<compile_context>
chip_gen: v6e
topology: v6e:2x2x1
jax: 0.10.0
libtpu: 0.0.40
codegen_flags: <defaults>
</compile_context>

<pallas_src>
import jax
import jax.numpy as jnp
from jax.experimental import pallas as pl
from jax.experimental.pallas import tpu as pltpu


def _round_up_channels(c):
    return max(128, ((c + 127) // 128) * 128)


# ---------------------------------------------------------------------------
# Fused  [DAR-BN apply + ReLU] -> 3x3 conv (+bias) [+ residual] -> stats kernel
# ---------------------------------------------------------------------------
def _make_conv3x3_kernel(H, W, apply_bn, add_residual):
    Hp, Wp = H + 2, W + 2

    def body(x_ref, scale_ref, shift_ref, w_ref, b_ref, r_ref,
             y_ref, s_ref, q_ref, xn_ref):
        C = x_ref.shape[-1]
        CO = w_ref.shape[-1]

        # Stage the (optionally normalized) sample into a zero-padded VMEM
        # scratch: spatial padding happens on-chip, no HBM im2col tensor.
        xn_ref[...] = jnp.zeros((Hp, Wp, C), jnp.float32)
        xin = x_ref[0]
        if apply_bn:
            xin = jnp.maximum(xin * scale_ref[0] + shift_ref[0], 0.0)
        xn_ref[1:1 + H, 1:1 + W, :] = xin

        # 9 shifted-window matmuls: bf16 MXU inputs, f32 accumulation.
        acc = jnp.zeros((H * W, CO), jnp.float32)
        for kh in range(3):
            for kw in range(3):
                win = xn_ref[kh:kh + H, kw:kw + W, :]
                a = win.reshape(H * W, C).astype(jnp.bfloat16)
                acc = acc + jnp.dot(a, w_ref[kh * 3 + kw],
                                    preferred_element_type=jnp.float32)
        acc = acc + b_ref[...]
        if add_residual:
            acc = acc + r_ref[0].reshape(H * W, CO)

        y_ref[0] = acc.reshape(H, W, CO)
        # Per-sample channel statistics for the next DAR-BN (tiny outputs).
        s_ref[0] = jnp.sum(acc, axis=0, keepdims=True)
        q_ref[0] = jnp.sum(acc * acc, axis=0, keepdims=True)

    if apply_bn and add_residual:
        def kernel(x_ref, scale_ref, shift_ref, w_ref, b_ref, r_ref,
                   y_ref, s_ref, q_ref, xn_ref):
            body(x_ref, scale_ref, shift_ref, w_ref, b_ref, r_ref,
                 y_ref, s_ref, q_ref, xn_ref)
    elif apply_bn:
        def kernel(x_ref, scale_ref, shift_ref, w_ref, b_ref,
                   y_ref, s_ref, q_ref, xn_ref):
            body(x_ref, scale_ref, shift_ref, w_ref, b_ref, None,
                 y_ref, s_ref, q_ref, xn_ref)
    elif add_residual:
        def kernel(x_ref, w_ref, b_ref, r_ref, y_ref, s_ref, q_ref, xn_ref):
            body(x_ref, None, None, w_ref, b_ref, r_ref,
                 y_ref, s_ref, q_ref, xn_ref)
    else:
        def kernel(x_ref, w_ref, b_ref, y_ref, s_ref, q_ref, xn_ref):
            body(x_ref, None, None, w_ref, b_ref, None,
                 y_ref, s_ref, q_ref, xn_ref)
    return kernel


def fused_conv3x3(x, w9, bias, scale=None, shift=None, residual=None):
    """Fused [BN apply + ReLU] -> 3x3 stride-1 conv (+bias) [+ residual].

    x:        (N, H, W, C)  f32  (C already lane-padded to 128 multiple)
    w9:       (9, C, CO)    bf16 (tap-major weights, zero-padded channels)
    bias:     (1, CO)       f32
    scale/shift: (N, C) f32 per-sample DAR-BN scale/shift, or None
    residual: (N, H, W, CO) f32 or None
    returns:  y (N, H, W, CO) f32, sums (N, CO) f32, sumsq (N, CO) f32
    """
    N, H, W, C = x.shape
    CO = w9.shape[-1]
    apply_bn = scale is not None
    add_res = residual is not None
    kernel = _make_conv3x3_kernel(H, W, apply_bn, add_res)

    inputs = [x]
    in_specs = [pl.BlockSpec((1, H, W, C), lambda n: (n, 0, 0, 0))]
    if apply_bn:
        inputs += [scale.reshape(N, 1, C).astype(jnp.float32),
                   shift.reshape(N, 1, C).astype(jnp.float32)]
        in_specs += [pl.BlockSpec((1, 1, C), lambda n: (n, 0, 0)),
                     pl.BlockSpec((1, 1, C), lambda n: (n, 0, 0))]
    inputs += [w9, bias]
    in_specs += [pl.BlockSpec((9, C, CO), lambda n: (0, 0, 0)),
                 pl.BlockSpec((1, CO), lambda n: (0, 0))]
    if add_res:
        inputs += [residual]
        in_specs += [pl.BlockSpec((1, H, W, CO), lambda n: (n, 0, 0, 0))]

    out_shape = (jax.ShapeDtypeStruct((N, H, W, CO), jnp.float32),
                 jax.ShapeDtypeStruct((N, 1, CO), jnp.float32),
                 jax.ShapeDtypeStruct((N, 1, CO), jnp.float32))
    out_specs = (pl.BlockSpec((1, H, W, CO), lambda n: (n, 0, 0, 0)),
                 pl.BlockSpec((1, 1, CO), lambda n: (n, 0, 0)),
                 pl.BlockSpec((1, 1, CO), lambda n: (n, 0, 0)))

    y, s, q = pl.pallas_call(
        kernel,
        grid=(N,),
        in_specs=in_specs,
        out_specs=out_specs,
        out_shape=out_shape,
        scratch_shapes=[pltpu.VMEM((H + 2, W + 2, C), jnp.float32)],
        compiler_params=pltpu.CompilerParams(
            dimension_semantics=("parallel",),
            vmem_limit_bytes=32 * 1024 * 1024),
    )(*inputs)
    return y, s.reshape(N, CO), q.reshape(N, CO)


# ---------------------------------------------------------------------------
# 1x1 shortcut conv: lane-dense Pallas matmul, large M tiles
# ---------------------------------------------------------------------------
def _conv1x1_kernel(a_ref, w_ref, b_ref, o_ref):
    o_ref[...] = (jnp.dot(a_ref[...].astype(jnp.bfloat16), w_ref[...],
                          preferred_element_type=jnp.float32) + b_ref[...])


def conv1x1(x, w, bias, stride=1):
    """x: (N,H,W,C) f32, w: (C,CO) bf16, bias: (1,CO) f32."""
    xs = x[:, ::stride, ::stride, :]
    N, Ho, Wo, C = xs.shape
    CO = w.shape[-1]
    M = N * Ho * Wo
    a = xs.reshape(M, C)
    tm = M
    for cand in (512, 256, 128, 64, 32, 16, 8):
        if M % cand == 0:
            tm = cand
            break
    out = pl.pallas_call(
        _conv1x1_kernel,
        grid=(M // tm,),
        in_specs=[pl.BlockSpec((tm, C), lambda i: (i, 0)),
                  pl.BlockSpec((C, CO), lambda i: (0, 0)),
                  pl.BlockSpec((1, CO), lambda i: (0, 0))],
        out_specs=pl.BlockSpec((tm, CO), lambda i: (i, 0)),
        out_shape=jax.ShapeDtypeStruct((M, CO), jnp.float32),
        compiler_params=pltpu.CompilerParams(
            dimension_semantics=("parallel",),
            vmem_limit_bytes=32 * 1024 * 1024),
    )(a, w, bias)
    return out.reshape(N, Ho, Wo, CO)


# ---------------------------------------------------------------------------
# DAR-BN group statistics -> per-sample scale / shift (tiny (N, C) glue)
# ---------------------------------------------------------------------------
def darbn_scale_shift(sums, sumsq, noise_mask, gamma, beta, hw, eps=1e-5):
    nat = jnp.logical_not(noise_mask).astype(jnp.float32)
    noi = noise_mask.astype(jnp.float32)
    cnt_nat = jnp.maximum(jnp.sum(nat) * hw, 1.0)   # guard empty group
    cnt_noi = jnp.maximum(jnp.sum(noi) * hw, 1.0)
    s_nat, s_noi = nat @ sums, noi @ sums
    q_nat, q_noi = nat @ sumsq, noi @ sumsq
    mean_nat, mean_noi = s_nat / cnt_nat, s_noi / cnt_noi
    var_nat = jnp.maximum(q_nat / cnt_nat - mean_nat * mean_nat, 0.0)  # biased
    var_noi = jnp.maximum(q_noi / cnt_noi - mean_noi * mean_noi, 0.0)
    sc_nat = gamma / jnp.sqrt(var_nat + eps)
    sc_noi = gamma / jnp.sqrt(var_noi + eps)
    sh_nat = beta - mean_nat * sc_nat
    sh_noi = beta - mean_noi * sc_noi
    m = noise_mask[:, None]
    scale = jnp.where(m, sc_noi[None, :], sc_nat[None, :])   # (N, C)
    shift = jnp.where(m, sh_noi[None, :], sh_nat[None, :])
    return scale, shift


# ---------------------------------------------------------------------------
# Model
# ---------------------------------------------------------------------------
class KeyGen:
    def __init__(self, key):
        self.key = key
        self.i = 0

    def __call__(self):
        self.i += 1
        return jax.random.fold_in(self.key, self.i)


def init_params(key, depth=10, widen_factor=1, num_classes=10):
    assert (depth - 4) % 6 == 0, "Wide-resnet depth should be 6n+4"
    n = (depth - 4) // 6
    k = widen_factor
    nStages = [16, 16 * k, 32 * k, 64 * k]
    kg = KeyGen(key)

    def conv3_p(cin, cout):
        cip, cop = _round_up_channels(cin), _round_up_channels(cout)
        w = 0.1 * jax.random.normal(kg(), (3, 3, cin, cout), jnp.float32)
        b = 0.05 * jax.random.normal(kg(), (cout,), jnp.float32)
        w9 = jnp.pad(w.reshape(9, cin, cout),
                     ((0, 0), (0, cip - cin), (0, cop - cout)))
        return w9.astype(jnp.bfloat16), jnp.pad(b, (0, cop - cout)).reshape(1, cop)

    def conv1_p(cin, cout):
        cip, cop = _round_up_channels(cin), _round_up_channels(cout)
        w = 0.1 * jax.random.normal(kg(), (cin, cout), jnp.float32)
        b = 0.05 * jax.random.normal(kg(), (cout,), jnp.float32)
        return (jnp.pad(w, ((0, cip - cin), (0, cop - cout))).astype(jnp.bfloat16),
                jnp.pad(b, (0, cop - cout)).reshape(1, cop))

    def bn_p(c):
        cp = _round_up_channels(c)
        g = 1.0 + 0.05 * jax.random.normal(kg(), (c,), jnp.float32)
        b = 0.05 * jax.random.normal(kg(), (c,), jnp.float32)
        return jnp.pad(g, (0, cp - c)), jnp.pad(b, (0, cp - c))

    params = {}
    params['conv1_w'], params['conv1_b'] = conv3_p(3, nStages[0])

    in_planes = nStages[0]
    layers = []
    for planes, stride0 in zip(nStages[1:], [1, 2, 2]):
        strides = [stride0] + [1] * (n - 1)
        blocks = []
        for s in strides:
            blk = {'stride': s}
            blk['bn1_g'], blk['bn1_b'] = bn_p(in_planes)
            blk['conv1_w'], blk['conv1_b'] = conv3_p(in_planes, planes)
            blk['bn2_g'], blk['bn2_b'] = bn_p(planes)
            blk['conv2_w'], blk['conv2_b'] = conv3_p(planes, planes)
            if s != 1 or in_planes != planes:
                blk['short_w'], blk['short_b'] = conv1_p(in_planes, planes)
            in_planes = planes
            blocks.append(blk)
        layers.append(blocks)
    params['layers'] = layers

    params['bn1_g'], params['bn1_b'] = bn_p(nStages[3])
    cp_last = _round_up_channels(nStages[3])
    lw = 0.1 * jax.random.normal(kg(), (nStages[3], num_classes), jnp.float32)
    params['lin_w'] = jnp.pad(lw, ((0, cp_last - nStages[3]), (0, 0)))
    params['lin_b'] = 0.05 * jax.random.normal(kg(), (num_classes,), jnp.float32)
    return params


def wide_basic_forward(x, s_x, q_x, blk, noise_mask):
    hw = x.shape[1] * x.shape[2]
    scale1, shift1 = darbn_scale_shift(s_x, q_x, noise_mask,
                                       blk['bn1_g'], blk['bn1_b'], hw)
    # nn.Dropout is identity in the inference forward pass.
    y, s_y, q_y = fused_conv3x3(x, blk['conv1_w'], blk['conv1_b'],
                                scale1, shift1)
    scale2, shift2 = darbn_scale_shift(s_y, q_y, noise_mask,
                                       blk['bn2_g'], blk['bn2_b'], hw)
    stride = blk['stride']
    has_sc = 'short_w' in blk
    if stride == 1 and not has_sc:
        # fully fused: BN2 + ReLU + conv2 + identity residual + stats
        out, s_o, q_o = fused_conv3x3(y, blk['conv2_w'], blk['conv2_b'],
                                      scale2, shift2, residual=x)
    elif stride == 1:
        sc = conv1x1(x, blk['short_w'], blk['short_b'], 1)
        out, s_o, q_o = fused_conv3x3(y, blk['conv2_w'], blk['conv2_b'],
                                      scale2, shift2, residual=sc)
    else:
        # stride-2 transition block: fused BN2+ReLU+conv2 at full resolution,
        # then decimate + shortcut + stats on the (small) downsampled tensor.
        y2_full, _, _ = fused_conv3x3(y, blk['conv2_w'], blk['conv2_b'],
                                      scale2, shift2)
        y2 = y2_full[:, ::stride, ::stride, :]
        sc = conv1x1(x, blk['short_w'], blk['short_b'], stride)
        out = y2 + sc
        s_o = jnp.sum(out, axis=(1, 2))
        q_o = jnp.sum(out * out, axis=(1, 2))
    return out, s_o, q_o


def wide_resnet_darbn_forward(params, x_nchw, noise_mask):
    x = jnp.transpose(x_nchw, (0, 2, 3, 1)).astype(jnp.float32)   # NCHW -> NHWC
    cin_pad = params['conv1_w'].shape[1]
    x = jnp.pad(x, ((0, 0), (0, 0), (0, 0), (0, cin_pad - x.shape[-1])))

    out, s, q = fused_conv3x3(x, params['conv1_w'], params['conv1_b'])
    for blocks in params['layers']:
        for blk in blocks:
            out, s, q = wide_basic_forward(out, s, q, blk, noise_mask)

    # Final DAR-BN + ReLU + avg_pool2d(8) + linear: tiny tail, plain JAX/XLA
    # per the perf review (padding M=4 to a Pallas tile would be pure waste).
    N, H, W, C = out.shape
    assert H == 8 and W == 8, "expected 8x8 feature map before avg_pool2d(8)"
    scale, shift = darbn_scale_shift(s, q, noise_mask,
                                     params['bn1_g'], params['bn1_b'], H * W)
    y = jnp.maximum(out * scale[:, None, None, :] + shift[:, None, None, :], 0.0)
    pooled = jnp.mean(y, axis=(1, 2))            # global mean == avg_pool2d(8)
    return pooled @ params['lin_w'] + params['lin_b']


# ---------------------------------------------------------------------------
if __name__ == "__main__":
    key = jax.random.PRNGKey(0)
    k_params, k_x = jax.random.split(key)

    # Small config: depth=10 (one block per stage), widen_factor=1, 10 classes.
    params = init_params(k_params, depth=10, widen_factor=1, num_classes=10)

    # CIFAR-sized input so avg_pool2d(8) reduces the final 8x8 map to 1x1.
    x = jax.random.normal(k_x, (4, 3, 32, 32), dtype=jnp.float32)
    noise_mask = jnp.array([False, False, True, True])  # mix natural / noise

    out = wide_resnet_darbn_forward(params, x, noise_mask)
    out = jax.block_until_ready(out)
    assert out.shape == (4, 10)
    assert bool(jnp.all(jnp.isfinite(out)))
    print("KERNEL_OK")
</pallas_src>

<mosaic_0001>
module attributes {stable_mosaic.version = 11 : i64} {
  func.func @kernel(%arg0: i32, %arg1: memref<1x32x32x128xf32, #tpu.memory_space<vmem>>, %arg2: memref<9x128x128xbf16, #tpu.memory_space<vmem>>, %arg3: memref<1x128xf32, #tpu.memory_space<vmem>>, %arg4: memref<1x32x32x128xf32, #tpu.memory_space<vmem>>, %arg5: memref<1x1x128xf32, #tpu.memory_space<vmem>>, %arg6: memref<1x1x128xf32, #tpu.memory_space<vmem>>, %arg7: memref<34x34x128xf32, #tpu.memory_space<vmem>>) attributes {dimension_semantics = [#tpu.dimension_semantics<parallel>], iteration_bounds = array<i64: 4>, scalar_prefetch = 0 : i64, scratch_operands = 1 : i64, tpu.core_type = #tpu.core_type<tc>, window_params = [{transform_indices = @transform_0, window_bounds = array<i64: 1, 32, 32, 128>}, {pipeline_mode = #tpu.pipeline_mode<synchronous>, transform_indices = @transform_1, window_bounds = array<i64: 9, 128, 128>}, {pipeline_mode = #tpu.pipeline_mode<synchronous>, transform_indices = @transform_2, window_bounds = array<i64: 1, 128>}, {transform_indices = @transform_3, window_bounds = array<i64: 1, 32, 32, 128>}, {transform_indices = @transform_4, window_bounds = array<i64: 1, 1, 128>}, {transform_indices = @transform_5, window_bounds = array<i64: 1, 1, 128>}]} {
    %cst = arith.constant 0.000000e+00 : f32
    %0 = vector.broadcast %cst : f32 to vector<34x34x128xf32>
    %c0 = arith.constant 0 : index
    %c0_0 = arith.constant 0 : index
    %c0_1 = arith.constant 0 : index
    %1 = vector.load %arg7[%c0, %c0_0, %c0_1] : memref<34x34x128xf32, #tpu.memory_space<vmem>>, vector<34x34x128xf32>
    tpu.vector_store %arg7[%c0, %c0_0, %c0_1], %0 {strides = array<i32>} : memref<34x34x128xf32, #tpu.memory_space<vmem>>, vector<34x34x128xf32>,
    %c0_2 = arith.constant 0 : index
    %c0_3 = arith.constant 0 : index
    %c0_4 = arith.constant 0 : index
    %c0_5 = arith.constant 0 : index
    %2 = vector.load %arg1[%c0_2, %c0_3, %c0_4, %c0_5] : memref<1x32x32x128xf32, #tpu.memory_space<vmem>>, vector<1x32x32x128xf32>
    %3 = vector.shape_cast %2 : vector<1x32x32x128xf32> to vector<32x32x128xf32>
    %c1 = arith.constant 1 : index
    %c1_6 = arith.constant 1 : index
    %c0_7 = arith.constant 0 : index
    %4 = vector.load %arg7[%c1, %c1_6, %c0_7] : memref<34x34x128xf32, #tpu.memory_space<vmem>>, vector<32x32x128xf32>
    tpu.vector_store %arg7[%c1, %c1_6, %c0_7], %3 {strides = array<i32>} : memref<34x34x128xf32, #tpu.memory_space<vmem>>, vector<32x32x128xf32>,
    %cst_8 = arith.constant 0.000000e+00 : f32
    %5 = vector.broadcast %cst_8 : f32 to vector<1024x128xf32>
    %c0_9 = arith.constant 0 : index
    %c0_10 = arith.constant 0 : index
    %c0_11 = arith.constant 0 : index
    %6 = vector.load %arg7[%c0_9, %c0_10, %c0_11] : memref<34x34x128xf32, #tpu.memory_space<vmem>>, vector<32x32x128xf32>
    %7 = vector.shape_cast %6 : vector<32x32x128xf32> to vector<1024x128xf32>
    %8 = arith.truncf %7 : vector<1024x128xf32> to vector<1024x128xbf16>
    %c0_12 = arith.constant 0 : index
    %c0_13 = arith.constant 0 : index
    %c0_14 = arith.constant 0 : index
    %9 = vector.load %arg2[%c0_12, %c0_13, %c0_14] : memref<9x128x128xbf16, #tpu.memory_space<vmem>>, vector<1x128x128xbf16>
    %10 = vector.shape_cast %9 : vector<1x128x128xbf16> to vector<128x128xbf16>
    %cst_15 = arith.constant dense<0.000000e+00> : vector<1024x128xf32>
    %11 = tpu.matmul %8, %10, %cst_15 {dimension_numbers = #tpu.dot_dimension_numbers<[1], [0], [0], [1], [0, 0, 1, 1], [], []>} : vector<1024x128xbf16>, vector<128x128xbf16>, vector<1024x128xf32> -> vector<1024x128xf32>
    %12 = arith.addf %5, %11 : vector<1024x128xf32>
    %c0_16 = arith.constant 0 : index
    %c1_17 = arith.constant 1 : index
    %c0_18 = arith.constant 0 : index
    %13 = vector.load %arg7[%c0_16, %c1_17, %c0_18] : memref<34x34x128xf32, #tpu.memory_space<vmem>>, vector<32x32x128xf32>
    %14 = vector.shape_cast %13 : vector<32x32x128xf32> to vector<1024x128xf32>
    %15 = arith.truncf %14 : vector<1024x128xf32> to vector<1024x128xbf16>
    %c1_19 = arith.constant 1 : index
    %c0_20 = arith.constant 0 : index
    %c0_21 = arith.constant 0 : index
    %16 = vector.load %arg2[%c1_19, %c0_20, %c0_21] : memref<9x128x128xbf16, #tpu.memory_space<vmem>>, vector<1x128x128xbf16>
    %17 = vector.shape_cast %16 : vector<1x128x128xbf16> to vector<128x128xbf16>
    %cst_22 = arith.constant dense<0.000000e+00> : vector<1024x128xf32>
    %18 = tpu.matmul %15, %17, %cst_22 {dimension_numbers = #tpu.dot_dimension_numbers<[1], [0], [0], [1], [0, 0, 1, 1], [], []>} : vector<1024x128xbf16>, vector<128x128xbf16>, vector<1024x128xf32> -> vector<1024x128xf32>
    %19 = arith.addf %12, %18 : vector<1024x128xf32>
    %c0_23 = arith.constant 0 : index
    %c2 = arith.constant 2 : index
    %c0_24 = arith.constant 0 : index
    %20 = vector.load %arg7[%c0_23, %c2, %c0_24] : memref<34x34x128xf32, #tpu.memory_space<vmem>>, vector<32x32x128xf32>
    %21 = vector.shape_cast %20 : vector<32x32x128xf32> to vector<1024x128xf32>
    %22 = arith.truncf %21 : vector<1024x128xf32> to vector<1024x128xbf16>
    %c2_25 = arith.constant 2 : index
    %c0_26 = arith.constant 0 : index
    %c0_27 = arith.constant 0 : index
    %23 = vector.load %arg2[%c2_25, %c0_26, %c0_27] : memref<9x128x128xbf16, #tpu.memory_space<vmem>>, vector<1x128x128xbf16>
    %24 = vector.shape_cast %23 : vector<1x128x128xbf16> to vector<128x128xbf16>
    %cst_28 = arith.constant dense<0.000000e+00> : vector<1024x128xf32>
    %25 = tpu.matmul %22, %24, %cst_28 {dimension_numbers = #tpu.dot_dimension_numbers<[1], [0], [0], [1], [0, 0, 1, 1], [], []>} : vector<1024x128xbf16>, vector<128x128xbf16>, vector<1024x128xf32> -> vector<1024x128xf32>
    %26 = arith.addf %19, %25 : vector<1024x128xf32>
    %c1_29 = arith.constant 1 : index
    %c0_30 = arith.constant 0 : index
    %c0_31 = arith.constant 0 : index
    %27 = vector.load %arg7[%c1_29, %c0_30, %c0_31] : memref<34x34x128xf32, #tpu.memory_space<vmem>>, vector<32x32x128xf32>
    %28 = vector.shape_cast %27 : vector<32x32x128xf32> to vector<1024x128xf32>
    %29 = arith.truncf %28 : vector<1024x128xf32> to vector<1024x128xbf16>
    %c3 = arith.constant 3 : index
    %c0_32 = arith.constant 0 : index
    %c0_33 = arith.constant 0 : index
    %30 = vector.load %arg2[%c3, %c0_32, %c0_33] : memref<9x128x128xbf16, #tpu.memory_space<vmem>>, vector<1x128x128xbf16>
    %31 = vector.shape_cast %30 : vector<1x128x128xbf16> to vector<128x128xbf16>
    %cst_34 = arith.constant dense<0.000000e+00> : vector<1024x128xf32>
    %32 = tpu.matmul %29, %31, %cst_34 {dimension_numbers = #tpu.dot_dimension_numbers<[1], [0], [0], [1], [0, 0, 1, 1], [], []>} : vector<1024x128xbf16>, vector<128x128xbf16>, vector<1024x128xf32> -> vector<1024x128xf32>
    %33 = arith.addf %26, %32 : vector<1024x128xf32>
    %c1_35 = arith.constant 1 : index
    %c1_36 = arith.constant 1 : index
    %c0_37 = arith.constant 0 : index
    %34 = vector.load %arg7[%c1_35, %c1_36, %c0_37] : memref<34x34x128xf32, #tpu.memory_space<vmem>>, vector<32x32x128xf32>
    %35 = vector.shape_cast %34 : vector<32x32x128xf32> to vector<1024x128xf32>
    %36 = arith.truncf %35 : vector<1024x128xf32> to vector<1024x128xbf16>
    %c4 = arith.constant 4 : index
    %c0_38 = arith.constant 0 : index
    %c0_39 = arith.constant 0 : index
    %37 = vector.load %arg2[%c4, %c0_38, %c0_39] : memref<9x128x128xbf16, #tpu.memory_space<vmem>>, vector<1x128x128xbf16>
    %38 = vector.shape_cast %37 : vector<1x128x128xbf16> to vector<128x128xbf16>
    %cst_40 = arith.constant dense<0.000000e+00> : vector<1024x128xf32>
    %39 = tpu.matmul %36, %38, %cst_40 {dimension_numbers = #tpu.dot_dimension_numbers<[1], [0], [0], [1], [0, 0, 1, 1], [], []>} : vector<1024x128xbf16>, vector<128x128xbf16>, vector<1024x128xf32> -> vector<1024x128xf32>
    %40 = arith.addf %33, %39 : vector<1024x128xf32>
    %c1_41 = arith.constant 1 : index
    %c2_42 = arith.constant 2 : index
    %c0_43 = arith.constant 0 : index
    %41 = vector.load %arg7[%c1_41, %c2_42, %c0_43] : memref<34x34x128xf32, #tpu.memory_space<vmem>>, vector<32x32x128xf32>
    %42 = vector.shape_cast %41 : vector<32x32x128xf32> to vector<1024x128xf32>
    %43 = arith.truncf %42 : vector<1024x128xf32> to vector<1024x128xbf16>
    %c5 = arith.constant 5 : index
    %c0_44 = arith.constant 0 : index
    %c0_45 = arith.constant 0 : index
    %44 = vector.load %arg2[%c5, %c0_44, %c0_45] : memref<9x128x128xbf16, #tpu.memory_space<vmem>>, vector<1x128x128xbf16>
    %45 = vector.shape_cast %44 : vector<1x128x128xbf16> to vector<128x128xbf16>
    %cst_46 = arith.constant dense<0.000000e+00> : vector<1024x128xf32>
    %46 = tpu.matmul %43, %45, %cst_46 {dimension_numbers = #tpu.dot_dimension_numbers<[1], [0], [0], [1], [0, 0, 1, 1], [], []>} : vector<1024x128xbf16>, vector<128x128xbf16>, vector<1024x128xf32> -> vector<1024x128xf32>
    %47 = arith.addf %40, %46 : vector<1024x128xf32>
    %c2_47 = arith.constant 2 : index
    %c0_48 = arith.constant 0 : index
    %c0_49 = arith.constant 0 : index
    %48 = vector.load %arg7[%c2_47, %c0_48, %c0_49] : memref<34x34x128xf32, #tpu.memory_space<vmem>>, vector<32x32x128xf32>
    %49 = vector.shape_cast %48 : vector<32x32x128xf32> to vector<1024x128xf32>
    %50 = arith.truncf %49 : vector<1024x128xf32> to vector<1024x128xbf16>
    %c6 = arith.constant 6 : index
    %c0_50 = arith.constant 0 : index
    %c0_51 = arith.constant 0 : index
    %51 = vector.load %arg2[%c6, %c0_50, %c0_51] : memref<9x128x128xbf16, #tpu.memory_space<vmem>>, vector<1x128x128xbf16>
    %52 = vector.shape_cast %51 : vector<1x128x128xbf16> to vector<128x128xbf16>
    %cst_52 = arith.constant dense<0.000000e+00> : vector<1024x128xf32>
    %53 = tpu.matmul %50, %52, %cst_52 {dimension_numbers = #tpu.dot_dimension_numbers<[1], [0], [0], [1], [0, 0, 1, 1], [], []>} : vector<1024x128xbf16>, vector<128x128xbf16>, vector<1024x128xf32> -> vector<1024x128xf32>
    %54 = arith.addf %47, %53 : vector<1024x128xf32>
    %c2_53 = arith.constant 2 : index
    %c1_54 = arith.constant 1 : index
    %c0_55 = arith.constant 0 : index
    %55 = vector.load %arg7[%c2_53, %c1_54, %c0_55] : memref<34x34x128xf32, #tpu.memory_space<vmem>>, vector<32x32x128xf32>
    %56 = vector.shape_cast %55 : vector<32x32x128xf32> to vector<1024x128xf32>
    %57 = arith.truncf %56 : vector<1024x128xf32> to vector<1024x128xbf16>
    %c7 = arith.constant 7 : index
    %c0_56 = arith.constant 0 : index
    %c0_57 = arith.constant 0 : index
    %58 = vector.load %arg2[%c7, %c0_56, %c0_57] : memref<9x128x128xbf16, #tpu.memory_space<vmem>>, vector<1x128x128xbf16>
    %59 = vector.shape_cast %58 : vector<1x128x128xbf16> to vector<128x128xbf16>
    %cst_58 = arith.constant dense<0.000000e+00> : vector<1024x128xf32>
    %60 = tpu.matmul %57, %59, %cst_58 {dimension_numbers = #tpu.dot_dimension_numbers<[1], [0], [0], [1], [0, 0, 1, 1], [], []>} : vector<1024x128xbf16>, vector<128x128xbf16>, vector<1024x128xf32> -> vector<1024x128xf32>
    %61 = arith.addf %54, %60 : vector<1024x128xf32>
    %c2_59 = arith.constant 2 : index
    %c2_60 = arith.constant 2 : index
    %c0_61 = arith.constant 0 : index
    %62 = vector.load %arg7[%c2_59, %c2_60, %c0_61] : memref<34x34x128xf32, #tpu.memory_space<vmem>>, vector<32x32x128xf32>
    %63 = vector.shape_cast %62 : vector<32x32x128xf32> to vector<1024x128xf32>
    %64 = arith.truncf %63 : vector<1024x128xf32> to vector<1024x128xbf16>
    %c8 = arith.constant 8 : index
    %c0_62 = arith.constant 0 : index
    %c0_63 = arith.constant 0 : index
    %65 = vector.load %arg2[%c8, %c0_62, %c0_63] : memref<9x128x128xbf16, #tpu.memory_space<vmem>>, vector<1x128x128xbf16>
    %66 = vector.shape_cast %65 : vector<1x128x128xbf16> to vector<128x128xbf16>
    %cst_64 = arith.constant dense<0.000000e+00> : vector<1024x128xf32>
    %67 = tpu.matmul %64, %66, %cst_64 {dimension_numbers = #tpu.dot_dimension_numbers<[1], [0], [0], [1], [0, 0, 1, 1], [], []>} : vector<1024x128xbf16>, vector<128x128xbf16>, vector<1024x128xf32> -> vector<1024x128xf32>
    %68 = arith.addf %61, %67 : vector<1024x128xf32>
    %c0_65 = arith.constant 0 : index
    %c0_66 = arith.constant 0 : index
    %69 = vector.load %arg3[%c0_65, %c0_66] : memref<1x128xf32, #tpu.memory_space<vmem>>, vector<1x128xf32>
    %70 = vector.broadcast %69 : vector<1x128xf32> to vector<1024x128xf32>
    %71 = arith.addf %68, %70 : vector<1024x128xf32>
    %72 = vector.shape_cast %71 : vector<1024x128xf32> to vector<32x32x128xf32>
    %c0_67 = arith.constant 0 : index
    %c0_68 = arith.constant 0 : index
    %c0_69 = arith.constant 0 : index
    %c0_70 = arith.constant 0 : index
    %73 = vector.load %arg4[%c0_67, %c0_68, %c0_69, %c0_70] : memref<1x32x32x128xf32, #tpu.memory_space<vmem>>, vector<1x32x32x128xf32>
    %74 = vector.shape_cast %73 : vector<1x32x32x128xf32> to vector<32x32x128xf32>
    %75 = vector.shape_cast %72 : vector<32x32x128xf32> to vector<1x32x32x128xf32>
    tpu.vector_store %arg4[%c0_67, %c0_68, %c0_69, %c0_70], %75 {strides = array<i32>} : memref<1x32x32x128xf32, #tpu.memory_space<vmem>>, vector<1x32x32x128xf32>,
    %cst_71 = arith.constant dense<0.000000e+00> : vector<128xf32>
    %76 = vector.multi_reduction <add>, %71, %cst_71 [0] : vector<1024x128xf32> to vector<128xf32>
    %77 = vector.shape_cast %76 : vector<128xf32> to vector<1x128xf32>
    %c0_72 = arith.constant 0 : index
    %c0_73 = arith.constant 0 : index
    %c0_74 = arith.constant 0 : index
    %78 = vector.load %arg5[%c0_72, %c0_73, %c0_74] : memref<1x1x128xf32, #tpu.memory_space<vmem>>, vector<1x1x128xf32>
    %79 = vector.shape_cast %78 : vector<1x1x128xf32> to vector<1x128xf32>
    %80 = vector.shape_cast %77 : vector<1x128xf32> to vector<1x1x128xf32>
    tpu.vector_store %arg5[%c0_72, %c0_73, %c0_74], %80 {strides = array<i32>} : memref<1x1x128xf32, #tpu.memory_space<vmem>>, vector<1x1x128xf32>,
    %81 = arith.mulf %71, %71 : vector<1024x128xf32>
    %cst_75 = arith.constant dense<0.000000e+00> : vector<128xf32>
    %82 = vector.multi_reduction <add>, %81, %cst_75 [0] : vector<1024x128xf32> to vector<128xf32>
    %83 = vector.shape_cast %82 : vector<128xf32> to vector<1x128xf32>
    %c0_76 = arith.constant 0 : index
    %c0_77 = arith.constant 0 : index
    %c0_78 = arith.constant 0 : index
    %84 = vector.load %arg6[%c0_76, %c0_77, %c0_78] : memref<1x1x128xf32, #tpu.memory_space<vmem>>, vector<1x1x128xf32>
    %85 = vector.shape_cast %84 : vector<1x1x128xf32> to vector<1x128xf32>
    %86 = vector.shape_cast %83 : vector<1x128xf32> to vector<1x1x128xf32>
    tpu.vector_store %arg6[%c0_76, %c0_77, %c0_78], %86 {strides = array<i32>} : memref<1x1x128xf32, #tpu.memory_space<vmem>>, vector<1x1x128xf32>,
    return
  }
  func.func @transform_0(%arg0: i32) -> (i32, i32, i32, i32) {
    %c0_i32 = arith.constant 0 : i32
    %c0_i32_0 = arith.constant 0 : i32
    %c0_i32_1 = arith.constant 0 : i32
    %c0_i32_2 = arith.constant 0 : i32
    return %arg0, %c0_i32, %c0_i32_0, %c0_i32_1 : i32, i32, i32, i32
  }
  func.func @transform_1(%arg0: i32) -> (i32, i32, i32) {
    %c0_i32 = arith.constant 0 : i32
    %c0_i32_0 = arith.constant 0 : i32
    %c0_i32_1 = arith.constant 0 : i32
    %c0_i32_2 = arith.constant 0 : i32
    return %c0_i32, %c0_i32_0, %c0_i32_1 : i32, i32, i32
  }
  func.func @transform_2(%arg0: i32) -> (i32, i32) {
    %c0_i32 = arith.constant 0 : i32
    %c0_i32_0 = arith.constant 0 : i32
    %c0_i32_1 = arith.constant 0 : i32
    return %c0_i32, %c0_i32_0 : i32, i32
  }
  func.func @transform_3(%arg0: i32) -> (i32, i32, i32, i32) {
    %c0_i32 = arith.constant 0 : i32
    %c0_i32_0 = arith.constant 0 : i32
    %c0_i32_1 = arith.constant 0 : i32
    %c0_i32_2 = arith.constant 0 : i32
    return %arg0, %c0_i32, %c0_i32_0, %c0_i32_1 : i32, i32, i32, i32
  }
  func.func @transform_4(%arg0: i32) -> (i32, i32, i32) {
    %c0_i32 = arith.constant 0 : i32
    %c0_i32_0 = arith.constant 0 : i32
    %c0_i32_1 = arith.constant 0 : i32
    return %arg0, %c0_i32, %c0_i32_0 : i32, i32, i32
  }
  func.func @transform_5(%arg0: i32) -> (i32, i32, i32) {
    %c0_i32 = arith.constant 0 : i32
    %c0_i32_0 = arith.constant 0 : i32
    %c0_i32_1 = arith.constant 0 : i32
    return %arg0, %c0_i32, %c0_i32_0 : i32, i32, i32
  }
}

</mosaic_0001>

<bundles_post_ra>
// kernel: tpu_custom_call.1
= control target key start
LH: loop header
LB: loop body
LE: loop exit
PB: predicated region body
PF: predicated region fallthrough
CT: control target
= control target key end

     0   :  { %11 = vsyncpa [#allocation4], 0  ;;  %s15139_s0 = inlined_call_operand.hbm [shape: f32[4,32,32,128], index: 0, kind: input, shape index: {}]   ;;  %s15140_s1 = inlined_call_operand.hbm [shape: bf16[9,128,128], index: 1, kind: input, shape index: {}]   ;;  %s15141_s2 = inlined_call_operand.hbm [shape: f32[1,128], index: 2, kind: input, shape index: {}]   ;;  %s15142_s3 = inlined_call_operand.hbm [shape: f32[4,32,32,128], index: 3, kind: output, shape index: {0}]   ;;  %s15143_s4 = inlined_call_operand.hbm [shape: f32[4,1,128], index: 4, kind: output, shape index: {1}]   ;;  %s15144_s5 = inlined_call_operand.hbm [shape: f32[4,1,128], index: 5, kind: output, shape index: {2}]  }
   0x1   :  { %13 = vsyncpa [#allocation4 + $0x1], 0 }
   0x2   :  { %14 = vsyncpa [#allocation7], 0 }
   0x3   :  { %15 = vsyncpa [#allocation5], 0 }
   0x4   :  { %17 = vsyncpa [#allocation5 + $0x1], 0 }
   0x5   :  { %18 = vsyncpa [#allocation11], 0 }
   0x6   :  { %20 = vsyncpa [#allocation11 + $0x1], 0  ;;  %s12144_s18 = smov 0   ;;  %s12146_s19 = smov 0  }
   0x7   :  { %s12148_s20 = smov 0   ;;  %s12150_s21 = smov 0  }
   0x8 LB: > { %s12165_s22 = sadd.s32 4294967295, %s12099_s21   ;;  %s9680_s23 = sadd.s32 4294967294, %s12099_s21   ;;  %s12099_s21 = sphi %s12150_s21, %s16004_s21   ;;  %s12095_s20 = sphi %s12148_s20, %s16003_s20   ;;  %s12091_s19 = sphi %s12146_s19, %s16002_s19   ;;  %s12087_s18 = sphi %s12144_s18, %s16001_s18  }
   0x9   : > { %p46_p0 = scmp.ne.s32.totalorder %s12091_s19, %s12087_s18  ;;  %p15145_p1 = scmp.eq.s32.totalorder %s12165_s22, 0 }
   0xa   : > { %p118_p3 = scmp.eq.s32.totalorder %s9680_s23, 3  ;;  %p9681_p5 = scmp.ge.s32.totalorder %s12099_s21, 1 }
   0xb   : > { %p12176_p4 = por %p15145_p1, %p46_p0  ;;  %p177_p7 = scmp.lt.s32.totalorder %s12099_s21, 5 }
   0xc   : > { %p12181_p6 = por %p118_p3, %p46_p0  ;;  %s12101_s27 = smov [#allocation6]  }
   0xd   : > { %s15179_s24 = scalar_select %p12176_p4, 1, 0 }
   0xe   : > { %s15180_s25 = scalar_select %p12181_p6, 1, 0 }
   0xf   : > { %p12186_p8 = pnand %p9681_p5, %p177_p7  ;;  %s189_s28 = sshll.u32 %s12101_s27, 4  ;;  %s190_s28 = int_to_ptr.vmem [resolvable:$true] %s189_s28 }
  0x10   : > { %s12102_s30 = smov [#allocation8]   ;;  %s11906_s7 = scalar_lea.vmem %s190_s28, 9216 }
  0x11   : > { %s15181_s26 = scalar_select %p12186_p8, 1, 0 }
  0x12   : > { %p11751_p9 = pneg %p12186_p8  ;;  %s203_s6 = sshll.u32 %s12102_s30, 4  ;;  %s204_s6 = int_to_ptr.vmem [resolvable:$true] %s203_s6 }
  0x13   : > { %p11907_p12 = scmp.ne.s32.totalorder %s190_s28, %s11906_s7  ;;  %p11914_p3 = scmp.lt.s32.totalorder %s190_s28, %s190_s28 }
  0x14   : > { %p12194_p10 = pnand %p11751_p9, %p15145_p1  ;;  %p11915_p5 = scmp.lt.s32.totalorder %s11906_s7, %s11906_s7 }
  0x16   : > { %p11897_p11 = pneg %p12194_p10  ;;  %p11916_p7 = por %p11915_p5, %p11914_p3 }
  0x18   : > { %p11909_p13 = pnand %p11907_p12, %p11897_p11 }
  0x1a   : > { %p11910_p0 = pneg %p11909_p13 }
  0x1c   : > { %p11917_p9 = pnand %p11916_p7, %p11910_p0 }
  0x1e   : > { %11920 = shalt.err (!%p11917_p9)
}
  0x1f   : > { %s12103_s8 = smov 64   ;;  %s12104_s9 = smov 4  }
  0x20   : > { %11754 = dma.hbm_to_vmem [thread:$0]  (!%p12194_p10), %s15140_s1, 9216, %s190_s28, [#allocation7], %s12103_s8, %s12103_s8, %s12104_s9  }
  0x21   : > { %s11932_s12 = scalar_lea.vmem %s204_s6, 16  ;;  %s11939_s13 = scalar_lea.vmem %s204_s6, 32 }
  0x22   : > { %p11933_p1 = scmp.ne.s32.totalorder %s204_s6, %s11932_s12  ;;  %p11940_p2 = scmp.lt.s32.totalorder %s204_s6, %s204_s6 }
  0x23   : > { %p11941_p3 = scmp.lt.s32.totalorder %s11939_s13, %s11932_s12 }
  0x24   : > { %p11935_p12 = pnand %p11933_p1, %p11897_p11 }
  0x25   : > { %p11942_p0 = por %p11941_p3, %p11940_p2 }
  0x26   : > { %p11936_p13 = pneg %p11935_p12 }
  0x28   : > { %p11943_p5 = pnand %p11942_p0, %p11936_p13 }
  0x2a   : > { %11946 = shalt.err (!%p11943_p5)
}
  0x2b   : > { %11757 = dma.hbm_to_vmem [thread:$0]  (!%p12194_p10), %s15141_s2, 16, %s204_s6, [#allocation7]  }
  0x2c   : > { %s12217_s16 = sadd.s32 1, %s12099_s21   ;;  %s33_s17 = sadd.s32 1, %s12095_s20 }
  0x2d   : > { %s30_s27 = ssub.s32 %s12099_s21, %s12217_s16  ;;  %p40_p1 = scmp.ne.s32.totalorder %s12095_s20, %s12091_s19 }
  0x2e   : > { %p31_p2 = scmp.eq.s32.totalorder %s30_s27, 0  ;;  %p41_p11 = scmp.eq.s32.totalorder %s12099_s21, 0 }
  0x2f   : > { %p15183_p7 = scmp.eq.s32.totalorder %s12165_s22, 3  ;;  %p11774_p12 = scmp.lt.s32.totalorder %s12099_s21, 4 }
  0x30   : > { %s12233_s29 = scalar_select %p31_p2, %s12095_s20, %s33_s17  }
  0x31   : > { %p12227_p9 = por %p15183_p7, %p40_p1  ;;  %p42_p13 = por %p41_p11, %p40_p1 }
  0x32   : > { %s214_s30 = sand.u32 1, %s12095_s20   ;;  %s9773_s6 = sshll.u32 %s12099_s21, 14 }
  0x33   : > { %s15184_s28 = scalar_select %p12227_p9, 1, 0 }
  0x34   : > { %s9685_s7 = sshll.u32 %s214_s30, 10  ;;  %s12240_s10 = scalar_lea.hbm %s15139_s0, %s9773_s6 }
  0x35   : > { %s218_s11 = scalar_lea.vmem [#allocation3], %s9685_s7  ;;  %p12244_p10 = pnand %p11774_p12, %p42_p13 }
  0x36   : > { %s225_s12 = sshll.u32 %s218_s11, 4  ;;  %s12248_s14 = scalar_lea.sflag [#allocation4], %s214_s30  ;;  %s12242_s12 = int_to_ptr.vmem [resolvable:$true] %s225_s12 }
  0x37   : > { %s11947_s15 = scalar_lea.hbm %s12240_s10, 16384  ;;  %p11949_p0 = pneg %p12244_p10 }
  0x38   : > { %p11948_p3 = scmp.ne.s32.totalorder %s12240_s10, %s11947_s15  ;;  %s11952_s7 = scalar_lea.hbm %s15139_s0, 65536 }
  0x39   : > { %p11953_p2 = scmp.lt.s32.totalorder %s12240_s10, %s15139_s0  ;;  %p11954_p11 = scmp.lt.s32.totalorder %s11952_s7, %s11947_s15 }
  0x3a   : > { %p11950_p5 = pnand %p11949_p0, %p11948_p3 }
  0x3b   : > { %p11955_p7 = por %p11954_p11, %p11953_p2 }
  0x3c   : > { %p11951_p1 = pneg %p11950_p5 }
  0x3e   : > { %p11956_p12 = pnand %p11955_p7, %p11951_p1 }
  0x40   : > { %11959 = shalt.err (!%p11956_p12)
}
  0x41   : > { %s11960_s30 = scalar_lea.vmem %s12242_s12, 16384  ;;  %s12105_s9 = smov [#allocation3]  }
  0x42   : > { %p11961_p13 = scmp.ne.s32.totalorder %s12242_s12, %s11960_s30  ;;  %s11965_s11 = sshll.u32 %s12105_s9, 4  ;;  %s11966_s11 = int_to_ptr.vmem [resolvable:$false] %s11965_s11 }
  0x43   : > { %s11967_s17 = scalar_lea.vmem %s11966_s11, 32768  ;;  %p11968_p5 = scmp.lt.s32.totalorder %s12242_s12, %s11966_s11 }
  0x44   : > { %p11963_p6 = pnand %p11961_p13, %p11949_p0  ;;  %p11969_p9 = scmp.lt.s32.totalorder %s11967_s17, %s11960_s30 }
  0x46   : > { %p11964_p3 = pneg %p11963_p6  ;;  %p11970_p4 = por %p11969_p9, %p11968_p5 }
  0x48   : > { %p11971_p8 = pnand %p11970_p4, %p11964_p3 }
  0x4a   : > { %11974 = shalt.err (!%p11971_p8)
}
  0x4b   : > { %s12106_s15 = smov 128   ;;  %s12107_s27 = smov 8  }
  0x4c   : > { %11761 = dma.hbm_to_vmem [thread:$0]  (!%p12244_p10), %s12240_s10, 16384, %s12242_s12, %s12248_s14, %s12106_s15, %s12106_s15, %s12107_s27  }
  0x4d   : > { %p15186_p0 = scmp.ne.s32.totalorder %s15181_s26, 0 }
  0x4f   : > { %237 = sbr.rel (%p15186_p0) target bundleno = 1625 (0x659), region = 32 }
  0x54   : > { %s12272_s7 = sand.u32 1, %s12091_s19   ;;  %p15187_p4 = scmp.ne.s32.totalorder %s15179_s24, 0 }
  0x55   : > { %s9689_s6 = sshll.u32 %s12272_s7, 10  ;;  %s240_s8 = scalar_lea.sflag [#allocation4], %s12272_s7 }
  0x56   : > { %s12278_s30 = scalar_lea.vmem [#allocation3], %s9689_s6 }
  0x57   : > { %12070 = dma.done.wait (%p15187_p4), %s240_s8, 16384  }
  0x58   : > { %12072 = vsyncadd (%p15187_p4), %s240_s8, 4294950912  ;;  %p15188_p6 = scmp.eq.s32.totalorder %s12165_s22, 0 }
  0x5a   : > { %12074 = dma.done.wait (%p15188_p6), [#allocation7], 9232   ;;  %p15189_p8 = pmov %p15188_p6 }
  0x5b   : > { %v12108_v0 = vmov 0.0   ;;  %v11819_v1 = vld [vmem:[#allocation6 + $0x78] sm:$0xff]   ;;  %v11820_v2 = vld [vmem:[#allocation6 + $0x70] sm:$0xff]   ;;  %v11821_v3 = vld [vmem:[#allocation6 + $0x68] sm:$0xff]   ;;  %s14612_s24 = scalar_lea.vmem [#allocation9], %s9689_s6  ;;  %s9774_s26 = sshll.u32 %s12165_s22, 14 }
  0x5c   : > { %12076 = vsyncadd (%p15189_p8), [#allocation7], 4294958064  ;;  %287 = vst [vmem:[#allocation2] sm:$0xff] %v12108_v0  ;;  %10423 = vmatprep.subr.bf16.mxu0 %v11819_v1  ;;  %11719 = vmatprep.subr.bf16.mxu1 %v11819_v1  ;;  %v11822_v4 = vld [vmem:[#allocation6 + $0x60] sm:$0xff]   ;;  %v518_v9 = vld [vmem:[%s12278_s30 + $0x1e8] sm:$0xff]  ;;  %s9509_s10 = sshll.u32 %s14612_s24, 4  ;;  %s15024_s14 = scalar_lea.hbm %s15142_s3, %s9774_s26  ;;  %s15026_s10 = int_to_ptr.vmem [resolvable:$true] %s9509_s10 }
  0x5d   : > { %288 = vst [vmem:[#allocation2 + $0x8] sm:$0xff] %v12108_v0  ;;  %289 = vst [vmem:[#allocation2 + $0x10] sm:$0xff] %v12108_v0  ;;  %10424 = vmatpush3.bf16.msra.mxu0 %v11819_v1  ;;  %11727 = vmatpush3.bf16.msra.mxu1 %v11819_v1  ;;  %v517_v7 = vld [vmem:[%s12278_s30 + $0x1e0] sm:$0xff]  ;;  %v12461_v11 = vld [vmem:[%s12278_s30 + $0x1f0] sm:$0xff]  ;;  %s9488_s9 = scalar_lea.sflag [#allocation5], %s12272_s7  ;;  %s11975_s11 = scalar_lea.vmem %s15026_s10, 16384 }
  0x5e   : > { %290 = vst [vmem:[#allocation2 + $0x18] sm:$0xff] %v12108_v0  ;;  %291 = vst [vmem:[#allocation2 + $0x20] sm:$0x3] %v12108_v0  ;;  %10425 = vmatprep.subr.bf16.mxu0 %v11820_v2  ;;  %11720 = vmatprep.subr.bf16.mxu1 %v11820_v2  ;;  %v1082_v10 = vpack.c.bf16 %v518_v9, %v517_v7  ;;  %v12464_v12 = vld [vmem:[%s12278_s30 + $0x1f8] sm:$0xff]  ;;  %v12469_v14 = vld [vmem:[%s12278_s30] sm:$0xff]  ;;  %p11976_p9 = scmp.ne.s32.totalorder %s15026_s10, %s11975_s11  ;;  %p15999_p10 = scmp.ne.s32.totalorder %s15184_s28, 0 }
  0x5f   : > { %292 = vst [vmem:[#allocation2 + $0x28] sm:$0xff] %v12108_v0  ;;  %293 = vst [vmem:[#allocation2 + $0x30] sm:$0xff] %v12108_v0  ;;  %v11823_v13 = vld [vmem:[#allocation6 + $0x58] sm:$0xff]   ;;  %v12472_v15 = vld [vmem:[%s12278_s30 + $0x8] sm:$0xff]  ;;  %v1083_v62 = vpack.c.bf16 %v12464_v12, %v12461_v11  ;;  %s12109_s17 = smov [#allocation9]  }
  0x60   : > { %294 = vst [vmem:[#allocation2 + $0x38] sm:$0xff] %v12108_v0  ;;  %295 = vst [vmem:[#allocation2 + $0x40] sm:$0xff] %v12108_v0  ;;  %10503 = vmatprep.mubr.bf16.mxu1 %v1082_v10  ;;  %v12476_v16 = vld [vmem:[%s12278_s30 + $0x200] sm:$0xff]  ;;  %v12479_v17 = vld [vmem:[%s12278_s30 + $0x208] sm:$0xff]  ;;  %p11977_p1 = pnand %p11976_p9, %p15999_p10  ;;  %s11979_s15 = sshll.u32 %s12109_s17, 4  ;;  %s11980_s15 = int_to_ptr.vmem [resolvable:$false] %s11979_s15 }
  0x61   : > { %296 = vst [vmem:[#allocation2 + $0x48] sm:$0x3] %v12108_v0  ;;  %297 = vst [vmem:[#allocation2 + $0x50] sm:$0xff] %v12108_v0  ;;  %10426 = vmatpush3.bf16.msra.mxu0 %v11820_v2  ;;  %11728 = vmatpush3.bf16.msra.mxu1 %v11820_v2  ;;  %v11824_v18 = vld [vmem:[#allocation6 + $0x50] sm:$0xff]   ;;  %v12488_v20 = vld [vmem:[%s12278_s30 + $0x18] sm:$0xff]  ;;  %s11981_s27 = scalar_lea.vmem %s11980_s15, 32768  ;;  %p11982_p11 = scmp.lt.s32.totalorder %s15026_s10, %s11980_s15 }
  0x62   : > { %298 = vst [vmem:[#allocation2 + $0x58] sm:$0xff] %v12108_v0  ;;  %299 = vst [vmem:[#allocation2 + $0x60] sm:$0xff] %v12108_v0  ;;  %10427 = vmatprep.subr.bf16.mxu0 %v11821_v3  ;;  %11721 = vmatprep.subr.bf16.mxu1 %v11821_v3  ;;  %v12485_v19 = vld [vmem:[%s12278_s30 + $0x10] sm:$0xff]  ;;  %v12496_v22 = vld [vmem:[%s12278_s30 + $0x218] sm:$0xff]  ;;  %p11978_p2 = pneg %p11977_p1  ;;  %p11983_p7 = scmp.lt.s32.totalorder %s11981_s27, %s11975_s11 }
  0x63   : > { %300 = vst [vmem:[#allocation2 + $0x68] sm:$0xff] %v12108_v0  ;;  %301 = vst [vmem:[#allocation2 + $0x70] sm:$0x3] %v12108_v0  ;;  %v12491_v21 = vld [vmem:[%s12278_s30 + $0x210] sm:$0xff]  ;;  %v12500_v23 = vld [vmem:[%s12278_s30 + $0x20] sm:$0xff] }
  0x64   : > { %302 = vst [vmem:[#allocation2 + $0x78] sm:$0xff] %v12108_v0  ;;  %303 = vst [vmem:[#allocation2 + $0x80] sm:$0xff] %v12108_v0  ;;  %v922_v5 = vld [vmem:[#allocation2 + $0x1] sm:$0xff]  ;;  %v923_v6 = vld [vmem:[#allocation2 + $0x9] sm:$0xff]  ;;  %p11984_p12 = por %p11983_p7, %p11982_p11 }
  0x65   : > { %304 = vst [vmem:[#allocation2 + $0x88] sm:$0xff] %v12108_v0  ;;  %305 = vst [vmem:[#allocation2 + $0x90] sm:$0xff] %v12108_v0  ;;  %v1050_v8 = vpack.c.bf16 %v923_v6, %v922_v5  ;;  %10428 = vmatpush3.bf16.msra.mxu0 %v11821_v3  ;;  %11729 = vmatpush3.bf16.msra.mxu1 %v11821_v3  ;;  %v12503_v24 = vld [vmem:[%s12278_s30 + $0x28] sm:$0xff]  ;;  %v12509_v25 = vld [vmem:[%s12278_s30 + $0x220] sm:$0xff]  ;;  %v1052_v6 = vpack.c.bf16 %v12472_v15, %v12469_v14 }
  0x66   : > { %306 = vst [vmem:[#allocation2 + $0x98] sm:$0x3] %v12108_v0  ;;  %307 = vst [vmem:[#allocation2 + $0xa0] sm:$0xff] %v12108_v0  ;;  %10429 = vmatprep.subr.bf16.mxu0 %v11822_v4  ;;  %11722 = vmatprep.subr.bf16.mxu1 %v11822_v4  ;;  %v12512_v26 = vld [vmem:[%s12278_s30 + $0x228] sm:$0xff]  ;;  %v12515_v27 = vld [vmem:[%s12278_s30 + $0x30] sm:$0xff]  ;;  %p11985_p13 = pnand %p11984_p12, %p11978_p2 }
  0x67   : > { %308 = vst [vmem:[#allocation2 + $0xa8] sm:$0xff] %v12108_v0  ;;  %309 = vst [vmem:[#allocation2 + $0xb0] sm:$0xff] %v12108_v0  ;;  %10439 = vmatprep.mubr.bf16.mxu0 %v1050_v8  ;;  %v12520_v28 = vld [vmem:[%s12278_s30 + $0x38] sm:$0xff]  ;;  %v12524_v29 = vld [vmem:[%s12278_s30 + $0x230] sm:$0xff] }
  0x68   : > { %310 = vst [vmem:[#allocation2 + $0xb8] sm:$0xff] %v12108_v0  ;;  %311 = vst [vmem:[#allocation2 + $0xc0] sm:$0x3] %v12108_v0  ;;  %v12527_v30 = vld [vmem:[%s12278_s30 + $0x238] sm:$0xff]  ;;  %v11825_v31 = vld [vmem:[#allocation6 + $0x48] sm:$0xff]  }
  0x69   : > { %312 = vst [vmem:[#allocation2 + $0xc8] sm:$0xff] %v12108_v0  ;;  %313 = vst [vmem:[#allocation2 + $0xd0] sm:$0xff] %v12108_v0  ;;  %10430 = vmatpush3.bf16.msra.mxu0 %v11822_v4  ;;  %11730 = vmatpush3.bf16.msra.mxu1 %v11822_v4  ;;  %v12533_v32 = vld [vmem:[%s12278_s30 + $0x40] sm:$0xff]  ;;  %v12536_v33 = vld [vmem:[%s12278_s30 + $0x48] sm:$0xff] }
  0x6a   : > { %314 = vst [vmem:[#allocation2 + $0xd8] sm:$0xff] %v12108_v0  ;;  %315 = vst [vmem:[#allocation2 + $0xe0] sm:$0xff] %v12108_v0  ;;  %10431 = vmatprep.subr.bf16.mxu0 %v11823_v13  ;;  %11723 = vmatprep.subr.bf16.mxu1 %v11823_v13  ;;  %v12539_v34 = vld [vmem:[%s12278_s30 + $0x240] sm:$0xff]  ;;  %v12544_v35 = vld [vmem:[%s12278_s30 + $0x248] sm:$0xff] }
  0x6b   : > { %316 = vst [vmem:[#allocation2 + $0xe8] sm:$0x3] %v12108_v0  ;;  %317 = vst [vmem:[#allocation2 + $0xf0] sm:$0xff] %v12108_v0  ;;  %v12548_v36 = vld [vmem:[%s12278_s30 + $0x50] sm:$0xff]  ;;  %v12551_v37 = vld [vmem:[%s12278_s30 + $0x58] sm:$0xff] }
  0x6c   : > { %318 = vst [vmem:[#allocation2 + $0xf8] sm:$0xff] %v12108_v0  ;;  %319 = vst [vmem:[#allocation2 + $0x100] sm:$0xff] %v12108_v0  ;;  %v11826_v38 = vld [vmem:[#allocation6 + $0x40] sm:$0xff]   ;;  %v12557_v39 = vld [vmem:[%s12278_s30 + $0x250] sm:$0xff] }
  0x6d   : > { %320 = vst [vmem:[#allocation2 + $0x108] sm:$0xff] %v12108_v0  ;;  %321 = vst [vmem:[#allocation2 + $0x110] sm:$0x3] %v12108_v0  ;;  %10432 = vmatpush3.bf16.msra.mxu0 %v11823_v13  ;;  %11731 = vmatpush3.bf16.msra.mxu1 %v11823_v13  ;;  %v12560_v40 = vld [vmem:[%s12278_s30 + $0x258] sm:$0xff]  ;;  %v12563_v41 = vld [vmem:[%s12278_s30 + $0x60] sm:$0xff] }
  0x6e   : > { %322 = vst [vmem:[#allocation2 + $0x118] sm:$0xff] %v12108_v0  ;;  %323 = vst [vmem:[#allocation2 + $0x120] sm:$0xff] %v12108_v0  ;;  %10433 = vmatprep.subr.bf16.mxu0 %v11824_v18  ;;  %11724 = vmatprep.subr.bf16.mxu1 %v11824_v18  ;;  %v12568_v42 = vld [vmem:[%s12278_s30 + $0x68] sm:$0xff]  ;;  %v12572_v43 = vld [vmem:[%s12278_s30 + $0x260] sm:$0xff] }
  0x6f   : > { %324 = vst [vmem:[#allocation2 + $0x128] sm:$0xff] %v12108_v0  ;;  %325 = vst [vmem:[#allocation2 + $0x130] sm:$0xff] %v12108_v0  ;;  %v12575_v44 = vld [vmem:[%s12278_s30 + $0x268] sm:$0xff]  ;;  %v12581_v45 = vld [vmem:[%s12278_s30 + $0x70] sm:$0xff] }
  0x70   : > { %326 = vst [vmem:[#allocation2 + $0x138] sm:$0x3] %v12108_v0  ;;  %327 = vst [vmem:[#allocation2 + $0x140] sm:$0xff] %v12108_v0  ;;  %v12584_v46 = vld [vmem:[%s12278_s30 + $0x78] sm:$0xff]  ;;  %v12587_v47 = vld [vmem:[%s12278_s30 + $0x270] sm:$0xff] }
  0x71   : > { %328 = vst [vmem:[#allocation2 + $0x148] sm:$0xff] %v12108_v0  ;;  %329 = vst [vmem:[#allocation2 + $0x150] sm:$0xff] %v12108_v0  ;;  %10434 = vmatpush3.bf16.msra.mxu0 %v11824_v18  ;;  %11732 = vmatpush3.bf16.msra.mxu1 %v11824_v18  ;;  %v924_v48 = vld [vmem:[#allocation2 + $0x11] sm:$0xff]  ;;  %v925_v49 = vld [vmem:[#allocation2 + $0x19] sm:$0xff] }
  0x72   : > { %330 = vst [vmem:[#allocation2 + $0x158] sm:$0xff] %v12108_v0  ;;  %331 = vst [vmem:[#allocation2 + $0x160] sm:$0x3] %v12108_v0  ;;  %10435 = vmatprep.subr.bf16.mxu0 %v11825_v31  ;;  %11725 = vmatprep.subr.bf16.mxu1 %v11825_v31  ;;  %v12592_v50 = vld [vmem:[%s12278_s30 + $0x278] sm:$0xff]  ;;  %v12597_v53 = vld [vmem:[%s12278_s30 + $0x80] sm:$0xff]  ;;  %v1051_v61 = vpack.c.bf16 %v925_v49, %v924_v48 }
  0x73   : > { %332 = vst [vmem:[#allocation2 + $0x168] sm:$0xff] %v12108_v0  ;;  %333 = vst [vmem:[#allocation2 + $0x170] sm:$0xff] %v12108_v0  ;;  %v11827_v51 = vld [vmem:[#allocation6 + $0x38] sm:$0xff]   ;;  %v12600_v54 = vld [vmem:[%s12278_s30 + $0x88] sm:$0xff] }
  0x74   : > { %334 = vst [vmem:[#allocation2 + $0x178] sm:$0xff] %v12108_v0  ;;  %335 = vst [vmem:[#allocation2 + $0x180] sm:$0xff] %v12108_v0  ;;  %v11828_v52 = vld [vmem:[#allocation6 + $0xb8] sm:$0xff]   ;;  %v12605_v55 = vld [vmem:[%s12278_s30 + $0x280] sm:$0xff] }
  0x75   : > { %336 = vst [vmem:[#allocation2 + $0x188] sm:$0x3] %v12108_v0  ;;  %337 = vst [vmem:[#allocation2 + $0x190] sm:$0xff] %v12108_v0  ;;  %10436 = vmatpush3.bf16.msra.mxu0 %v11825_v31  ;;  %11733 = vmatpush3.bf16.msra.mxu1 %v11825_v31  ;;  %v12608_v56 = vld [vmem:[%s12278_s30 + $0x288] sm:$0xff]  ;;  %v12611_v57 = vld [vmem:[%s12278_s30 + $0x90] sm:$0xff] }
  0x76   : > { %338 = vst [vmem:[#allocation2 + $0x198] sm:$0xff] %v12108_v0  ;;  %339 = vst [vmem:[#allocation2 + $0x1a0] sm:$0xff] %v12108_v0  ;;  %10437 = vmatprep.subr.bf16.mxu0 %v11826_v38  ;;  %11726 = vmatprep.subr.bf16.mxu1 %v11826_v38  ;;  %v12616_v58 = vld [vmem:[%s12278_s30 + $0x98] sm:$0xff]  ;;  %v12620_v59 = vld [vmem:[%s12278_s30 + $0x290] sm:$0xff] }
  0x77   : > { %340 = vst [vmem:[#allocation2 + $0x1a8] sm:$0xff] %v12108_v0  ;;  %341 = vst [vmem:[#allocation2 + $0x1b0] sm:$0x3] %v12108_v0  ;;  %v12623_v60 = vld [vmem:[%s12278_s30 + $0x298] sm:$0xff]  ;;  %v12631_v63 = vld [vmem:[%s12278_s30 + $0xa0] sm:$0xff] }
  0x78   : > { %342 = vst [vmem:[#allocation2 + $0x1b8] sm:$0xff] %v12108_v0  ;;  %343 = vst [vmem:[#allocation2 + $0x1c0] sm:$0xff] %v12108_v0  ;;  %v12637_v1 = vld [vmem:[%s12278_s30 + $0x2a0] sm:$0xff]  ;;  %v11829_v2 = vld [vmem:[#allocation6 + $0x30] sm:$0xff]  }
  0x79   : > { %344 = vst [vmem:[#allocation2 + $0x1c8] sm:$0xff] %v12108_v0  ;;  %345 = vst [vmem:[#allocation2 + $0x1d0] sm:$0xff] %v12108_v0  ;;  %10438 = vmatpush3.bf16.msra.mxu0 %v11826_v38  ;;  %11734 = vmatpush3.bf16.msra.mxu1 %v11826_v38  ;;  %v12642_v3 = vld [vmem:[%s12278_s30 + $0x2a8] sm:$0xff]  ;;  %v12646_v4 = vld [vmem:[%s12278_s30 + $0xb0] sm:$0xff] }
  0x7a   : > { %346 = vst [vmem:[#allocation2 + $0x1d8] sm:$0x3] %v12108_v0  ;;  %347 = vst [vmem:[#allocation2 + $0x1e0] sm:$0xff] %v12108_v0  ;;  %v12649_v5 = vld [vmem:[%s12278_s30 + $0xb8] sm:$0xff]  ;;  %10567 = vmatprep.subr.bf16.mxu1 %v11827_v51  ;;  %10711 = vmatprep.subr.bf16.mxu0 %v11828_v52  ;;  %v12659_v8 = vld [vmem:[%s12278_s30 + $0x2b0] sm:$0xff] }
  0x7b   : > { %348 = vst [vmem:[#allocation2 + $0x1e8] sm:$0xff] %v12108_v0  ;;  %349 = vst [vmem:[#allocation2 + $0x1f0] sm:$0xff] %v12108_v0  ;;  %v11830_v10 = vld [vmem:[#allocation6 + $0xb0] sm:$0xff]   ;;  %v12671_v13 = vld [vmem:[%s12278_s30 + $0xc0] sm:$0xff] }
  0x7c   : > { %350 = vst [vmem:[#allocation2 + $0x1f8] sm:$0xff] %v12108_v0  ;;  %351 = vst [vmem:[#allocation2 + $0x200] sm:$0x3] %v12108_v0  ;;  %10440 = vmatmul.mubr.bf16.vlgmr.msra.gmra.mxu0 %v1051_v61  ;;  %10504 = vmatmul.mubr.bf16.vlgmr.msra.gmra.mxu1 %v1083_v62  ;;  %v12690_v18 = vld [vmem:[%s12278_s30 + $0xd8] sm:$0xff]  ;;  %v12693_v31 = vld [vmem:[%s12278_s30 + $0x2d0] sm:$0xff] }
  0x7d   : > { %352 = vst [vmem:[#allocation2 + $0x208] sm:$0xff] %v12108_v0  ;;  %353 = vst [vmem:[#allocation2 + $0x210] sm:$0xff] %v12108_v0  ;;  %10568 = vmatpush3.bf16.msra.mxu1 %v11827_v51  ;;  %10712 = vmatpush3.bf16.msra.mxu0 %v11828_v52  ;;  %v12698_v38 = vld [vmem:[%s12278_s30 + $0x2d8] sm:$0xff]  ;;  %v12702_v48 = vld [vmem:[%s12278_s30 + $0xe0] sm:$0xff]  ;;  %v1053_v51 = vpack.c.bf16 %v12488_v20, %v12485_v19  ;;  %v1085_v52 = vpack.c.bf16 %v12496_v22, %v12491_v21 }
  0x7e   : > { %354 = vst [vmem:[#allocation2 + $0x218] sm:$0xff] %v12108_v0  ;;  %355 = vst [vmem:[#allocation2 + $0x220] sm:$0xff] %v12108_v0  ;;  %10443 = vmatprep.mubr.bf16.mxu0 %v1052_v6  ;;  %10569 = vmatprep.subr.bf16.mxu1 %v11829_v2  ;;  %v12705_v49 = vld [vmem:[%s12278_s30 + $0xe8] sm:$0xff]  ;;  %v12715_v61 = vld [vmem:[%s12278_s30 + $0x2e0] sm:$0xff] }
  0x7f   : > { %356 = vst [vmem:[#allocation2 + $0x228] sm:$0x3] %v12108_v0  ;;  %357 = vst [vmem:[#allocation2 + $0x230] sm:$0xff] %v12108_v0  ;;  %10713 = vmatprep.subr.bf16.mxu0 %v11830_v10  ;;  %v12718_v62 = vld [vmem:[%s12278_s30 + $0x2e8] sm:$0xff]  ;;  %v12721_v6 = vld [vmem:[%s12278_s30 + $0xf0] sm:$0xff] }
  0x80   : > { %358 = vst [vmem:[#allocation2 + $0x238] sm:$0xff] %v12108_v0  ;;  %359 = vst [vmem:[#allocation2 + $0x240] sm:$0xff] %v12108_v0 }
  0x81   : > { %360 = vst [vmem:[#allocation2 + $0x248] sm:$0xff] %v12108_v0  ;;  %361 = vst [vmem:[#allocation2 + $0x250] sm:$0x3] %v12108_v0  ;;  %10570 = vmatpush3.bf16.msra.mxu1 %v11829_v2  ;;  %10714 = vmatpush3.bf16.msra.mxu0 %v11830_v10  ;;  %v12751_v2 = vld [vmem:[%s12278_s30 + $0x300] sm:$0xff]  ;;  %v12753_v10 = vld [vmem:[#allocation6 + $0x18] sm:$0xff]  }
  0x82   : > { %362 = vst [vmem:[#allocation2 + $0x258] sm:$0xff] %v12108_v0  ;;  %363 = vst [vmem:[#allocation2 + $0x260] sm:$0xff] %v12108_v0 }
  0x83   : > { %364 = vst [vmem:[#allocation2 + $0x268] sm:$0xff] %v12108_v0  ;;  %365 = vst [vmem:[#allocation2 + $0x270] sm:$0xff] %v12108_v0 }
  0x84   : > { %366 = vst [vmem:[#allocation2 + $0x278] sm:$0x3] %v12108_v0  ;;  %367 = vst [vmem:[#allocation2 + $0x280] sm:$0xff] %v12108_v0  ;;  %10444 = vmatmul.mubr.bf16.gmra.mxu0 %v1053_v51  ;;  %v12760_v51 = vld [vmem:[%s12278_s30 + $0x308] sm:$0xff] }
  0x85   : > { %368 = vst [vmem:[#allocation2 + $0x288] sm:$0xff] %v12108_v0  ;;  %369 = vst [vmem:[#allocation2 + $0x290] sm:$0xff] %v12108_v0 }
  0x86   : > { %370 = vst [vmem:[#allocation2 + $0x298] sm:$0xff] %v12108_v0  ;;  %371 = vst [vmem:[#allocation2 + $0x2a0] sm:$0x3] %v12108_v0 }
  0x87   : > { %372 = vst [vmem:[#allocation2 + $0x2a8] sm:$0xff] %v12108_v0  ;;  %373 = vst [vmem:[#allocation2 + $0x2b0] sm:$0xff] %v12108_v0 }
  0x88   : > { %374 = vst [vmem:[#allocation2 + $0x2b8] sm:$0xff] %v12108_v0  ;;  %375 = vst [vmem:[#allocation2 + $0x2c0] sm:$0xff] %v12108_v0 }
  0x89   : > { %376 = vst [vmem:[#allocation2 + $0x2c8] sm:$0x3] %v12108_v0  ;;  %377 = vst [vmem:[#allocation2 + $0x2d0] sm:$0xff] %v12108_v0 }
  0x8a   : > { %378 = vst [vmem:[#allocation2 + $0x2d8] sm:$0xff] %v12108_v0  ;;  %379 = vst [vmem:[#allocation2 + $0x2e0] sm:$0xff] %v12108_v0 }
  0x8b   : > { %380 = vst [vmem:[#allocation2 + $0x2e8] sm:$0xff] %v12108_v0  ;;  %381 = vst [vmem:[#allocation2 + $0x2f0] sm:$0x3] %v12108_v0 }
  0x8c   : > { %382 = vst [vmem:[#allocation2 + $0x2f8] sm:$0xff] %v12108_v0  ;;  %383 = vst [vmem:[#allocation2 + $0x300] sm:$0xff] %v12108_v0 }
  0x8d   : > { %384 = vst [vmem:[#allocation2 + $0x308] sm:$0xff] %v12108_v0  ;;  %385 = vst [vmem:[#allocation2 + $0x310] sm:$0xff] %v12108_v0 }
  0x8e   : > { %386 = vst [vmem:[#allocation2 + $0x318] sm:$0x3] %v12108_v0  ;;  %387 = vst [vmem:[#allocation2 + $0x320] sm:$0xff] %v12108_v0 }
  0x8f   : > { %388 = vst [vmem:[#allocation2 + $0x328] sm:$0xff] %v12108_v0  ;;  %389 = vst [vmem:[#allocation2 + $0x330] sm:$0xff] %v12108_v0 }
  0x90   : > { %390 = vst [vmem:[#allocation2 + $0x338] sm:$0xff] %v12108_v0  ;;  %391 = vst [vmem:[#allocation2 + $0x340] sm:$0x3] %v12108_v0 }
  0x91   : > { %392 = vst [vmem:[#allocation2 + $0x348] sm:$0xff] %v12108_v0  ;;  %393 = vst [vmem:[#allocation2 + $0x350] sm:$0xff] %v12108_v0 }
  0x92   : > { %394 = vst [vmem:[#allocation2 + $0x358] sm:$0xff] %v12108_v0  ;;  %395 = vst [vmem:[#allocation2 + $0x360] sm:$0xff] %v12108_v0 }
  0x93   : > { %396 = vst [vmem:[#allocation2 + $0x368] sm:$0x3] %v12108_v0  ;;  %397 = vst [vmem:[#allocation2 + $0x370] sm:$0xff] %v12108_v0 }
  0x94   : > { %398 = vst [vmem:[#allocation2 + $0x378] sm:$0xff] %v12108_v0  ;;  %399 = vst [vmem:[#allocation2 + $0x380] sm:$0xff] %v12108_v0 }
  0x95   : > { %400 = vst [vmem:[#allocation2 + $0x388] sm:$0xff] %v12108_v0  ;;  %401 = vst [vmem:[#allocation2 + $0x390] sm:$0x3] %v12108_v0 }
  0x96   : > { %402 = vst [vmem:[#allocation2 + $0x398] sm:$0xff] %v12108_v0  ;;  %403 = vst [vmem:[#allocation2 + $0x3a0] sm:$0xff] %v12108_v0 }
  0x97   : > { %404 = vst [vmem:[#allocation2 + $0x3a8] sm:$0xff] %v12108_v0  ;;  %405 = vst [vmem:[#allocation2 + $0x3b0] sm:$0xff] %v12108_v0 }
  0x98   : > { %406 = vst [vmem:[#allocation2 + $0x3b8] sm:$0x3] %v12108_v0  ;;  %407 = vst [vmem:[#allocation2 + $0x3c0] sm:$0xff] %v12108_v0 }
  0x99   : > { %408 = vst [vmem:[#allocation2 + $0x3c8] sm:$0xff] %v12108_v0  ;;  %409 = vst [vmem:[#allocation2 + $0x3d0] sm:$0xff] %v12108_v0 }
  0x9a   : > { %410 = vst [vmem:[#allocation2 + $0x3d8] sm:$0xff] %v12108_v0  ;;  %411 = vst [vmem:[#allocation2 + $0x3e0] sm:$0x3] %v12108_v0 }
  0x9b   : > { %412 = vst [vmem:[#allocation2 + $0x3e8] sm:$0xff] %v12108_v0  ;;  %413 = vst [vmem:[#allocation2 + $0x3f0] sm:$0xff] %v12108_v0 }
  0x9c   : > { %414 = vst [vmem:[#allocation2 + $0x3f8] sm:$0xff] %v12108_v0  ;;  %415 = vst [vmem:[#allocation2 + $0x400] sm:$0xff] %v12108_v0 }
  0x9d   : > { %416 = vst [vmem:[#allocation2 + $0x408] sm:$0x3] %v12108_v0  ;;  %417 = vst [vmem:[#allocation2 + $0x410] sm:$0xff] %v12108_v0 }
  0x9e   : > { %418 = vst [vmem:[#allocation2 + $0x418] sm:$0xff] %v12108_v0  ;;  %419 = vst [vmem:[#allocation2 + $0x420] sm:$0xff] %v12108_v0 }
  0x9f   : > { %420 = vst [vmem:[#allocation2 + $0x428] sm:$0xff] %v12108_v0  ;;  %421 = vst [vmem:[#allocation2 + $0x430] sm:$0x3] %v12108_v0 }
  0xa0   : > { %422 = vst [vmem:[#allocation2 + $0x438] sm:$0xff] %v12108_v0  ;;  %423 = vst [vmem:[#allocation2 + $0x440] sm:$0xff] %v12108_v0 }
  0xa1   : > { %424 = vst [vmem:[#allocation2 + $0x448] sm:$0xff] %v12108_v0  ;;  %425 = vst [vmem:[#allocation2 + $0x450] sm:$0xff] %v12108_v0 }
  0xa2   : > { %426 = vst [vmem:[#allocation2 + $0x458] sm:$0x3] %v12108_v0  ;;  %427 = vst [vmem:[#allocation2 + $0x460] sm:$0xff] %v12108_v0 }
  0xa3   : > { %428 = vst [vmem:[#allocation2 + $0x468] sm:$0xff] %v12108_v0  ;;  %429 = vst [vmem:[#allocation2 + $0x470] sm:$0xff] %v12108_v0 }
  0xa4   : > { %430 = vst [vmem:[#allocation2 + $0x478] sm:$0xff] %v12108_v0  ;;  %431 = vst [vmem:[#allocation2 + $0x480] sm:$0x3] %v12108_v0 }
  0xa5   : > { %432 = vst [vmem:[#allocation2 + $0x488] sm:$0xff] %v12108_v0  ;;  %433 = vst [vmem:[#allocation2 + $0x490] sm:$0xff] %v12108_v0 }
  0xa6   : > { %434 = vst [vmem:[#allocation2 + $0x498] sm:$0xff] %v12108_v0  ;;  %435 = vst [vmem:[#allocation2 + $0x4a0] sm:$0xff] %v12108_v0 }
  0xa7   : > { %436 = vst [vmem:[#allocation2 + $0x4a8] sm:$0x3] %v12108_v0  ;;  %437 = vst [vmem:[#allocation2 + $0x4b0] sm:$0xff] %v12108_v0 }
  0xa8   : > { %438 = vst [vmem:[#allocation2 + $0x4b8] sm:$0xff] %v12108_v0  ;;  %439 = vst [vmem:[#allocation2 + $0x4c0] sm:$0xff] %v12108_v0 }
  0xa9   : > { %440 = vst [vmem:[#allocation2 + $0x4c8] sm:$0xff] %v12108_v0  ;;  %441 = vst [vmem:[#allocation2 + $0x4d0] sm:$0x3] %v12108_v0 }
  0xaa   : > { %442 = vst [vmem:[#allocation2 + $0x4d8] sm:$0xff] %v12108_v0  ;;  %443 = vst [vmem:[#allocation2 + $0x4e0] sm:$0xff] %v12108_v0 }
  0xab   : > { %444 = vst [vmem:[#allocation2 + $0x4e8] sm:$0xff] %v12108_v0  ;;  %445 = vst [vmem:[#allocation2 + $0x4f0] sm:$0xff] %v12108_v0 }
  0xac   : > { %446 = vst [vmem:[#allocation2 + $0x4f8] sm:$0x3] %v12108_v0  ;;  %447 = vst [vmem:[#allocation2 + $0x500] sm:$0xff] %v12108_v0 }
  0xad   : > { %448 = vst [vmem:[#allocation2 + $0x508] sm:$0xff] %v12108_v0  ;;  %449 = vst [vmem:[#allocation2 + $0x510] sm:$0xff] %v12108_v0 }
  0xae   : > { %450 = vst [vmem:[#allocation2 + $0x518] sm:$0xff] %v12108_v0  ;;  %451 = vst [vmem:[#allocation2 + $0x520] sm:$0x3] %v12108_v0 }
  0xaf   : > { %452 = vst [vmem:[#allocation2 + $0x528] sm:$0xff] %v12108_v0  ;;  %453 = vst [vmem:[#allocation2 + $0x530] sm:$0xff] %v12108_v0 }
  0xb0   : > { %454 = vst [vmem:[#allocation2 + $0x538] sm:$0xff] %v12108_v0  ;;  %455 = vst [vmem:[#allocation2 + $0x540] sm:$0xff] %v12108_v0 }
  0xb1   : > { %456 = vst [vmem:[#allocation2 + $0x548] sm:$0x3] %v12108_v0  ;;  %646 = vst [vmem:[#allocation2 + $0x281] sm:$0xff] %v517_v7  ;;  %v12634_v0 = vld [vmem:[%s12278_s30 + $0xa8] sm:$0xff]  ;;  %v1084_v7 = vpack.c.bf16 %v12479_v17, %v12476_v16 }
  0xb2   : > { %647 = vst [vmem:[#allocation2 + $0x289] sm:$0xff] %v518_v9  ;;  %648 = vst [vmem:[#allocation2 + $0x291] sm:$0xff] %v12461_v11  ;;  %v12662_v9 = vld [vmem:[%s12278_s30 + $0x2b8] sm:$0xff]  ;;  %v12666_v11 = vld [vmem:[#allocation6 + $0x28] sm:$0xff]  }
  0xb3   : > { %649 = vst [vmem:[#allocation2 + $0x299] sm:$0xff] %v12464_v12  ;;  %586 = vst [vmem:[#allocation2 + $0x29] sm:$0xff] %v12469_v14  ;;  %v12668_v12 = vld [vmem:[#allocation6 + $0xa8] sm:$0xff]   ;;  %10507 = vmatprep.mubr.bf16.mxu1 %v1084_v7  ;;  %v12737_v7 = vld [vmem:[%s12278_s30 + $0x2f8] sm:$0xff]  ;;  %10571 = vmatprep.subr.bf16.mxu1 %v12666_v11 }
  0xb4   : > { %587 = vst [vmem:[#allocation2 + $0x31] sm:$0xff] %v12472_v15  ;;  %650 = vst [vmem:[#allocation2 + $0x2a9] sm:$0xff] %v12476_v16  ;;  %v12674_v14 = vld [vmem:[%s12278_s30 + $0xc8] sm:$0xff]  ;;  %v12678_v15 = vld [vmem:[%s12278_s30 + $0x2c0] sm:$0xff]  ;;  %10715 = vmatprep.subr.bf16.mxu0 %v12668_v12  ;;  %10508 = vmatmul.mubr.bf16.gmra.mxu1 %v1085_v52 }
  0xb5   : > { %651 = vst [vmem:[#allocation2 + $0x2b1] sm:$0xff] %v12479_v17  ;;  %588 = vst [vmem:[#allocation2 + $0x39] sm:$0xff] %v12485_v19  ;;  %v12681_v16 = vld [vmem:[%s12278_s30 + $0x2c8] sm:$0xff]  ;;  %v12687_v17 = vld [vmem:[%s12278_s30 + $0xd0] sm:$0xff]  ;;  %v1054_v19 = vpack.c.bf16 %v12503_v24, %v12500_v23  ;;  %10572 = vmatpush3.bf16.msra.mxu1 %v12666_v11  ;;  %10716 = vmatpush3.bf16.msra.mxu0 %v12668_v12 }
  0xb6   : > { %589 = vst [vmem:[#allocation2 + $0x41] sm:$0xff] %v12488_v20  ;;  %652 = vst [vmem:[#allocation2 + $0x2b9] sm:$0xff] %v12491_v21  ;;  %v1086_v20 = vpack.c.bf16 %v12512_v26, %v12509_v25  ;;  %v12730_v21 = vld [vmem:[%s12278_s30 + $0xf8] sm:$0xff]  ;;  %v12764_v52 = vld [vmem:[%s12278_s30 + $0x110] sm:$0xff] }
  0xb7   : > { %653 = vst [vmem:[#allocation2 + $0x2c1] sm:$0xff] %v12496_v22  ;;  %590 = vst [vmem:[#allocation2 + $0x51] sm:$0xff] %v12500_v23  ;;  %v12734_v22 = vld [vmem:[%s12278_s30 + $0x2f0] sm:$0xff]  ;;  %v11833_v23 = vld [vmem:[#allocation6 + $0x20] sm:$0xff]   ;;  %10447 = vmatprep.mubr.bf16.mxu0 %v1054_v19 }
  0xb8   : > { %591 = vst [vmem:[#allocation2 + $0x59] sm:$0xff] %v12503_v24  ;;  %654 = vst [vmem:[#allocation2 + $0x2d1] sm:$0xff] %v12509_v25  ;;  %v11834_v24 = vld [vmem:[#allocation6 + $0xa0] sm:$0xff]   ;;  %10511 = vmatprep.mubr.bf16.mxu1 %v1086_v20  ;;  %v12767_v19 = vld [vmem:[%s12278_s30 + $0x118] sm:$0xff]  ;;  %10573 = vmatprep.subr.bf16.mxu1 %v11833_v23 }
  0xb9   : > { %655 = vst [vmem:[#allocation2 + $0x2d9] sm:$0xff] %v12512_v26  ;;  %592 = vst [vmem:[#allocation2 + $0x61] sm:$0xff] %v12515_v27  ;;  %v12745_v25 = vld [vmem:[%s12278_s30 + $0x100] sm:$0xff]  ;;  %v12748_v26 = vld [vmem:[%s12278_s30 + $0x108] sm:$0xff]  ;;  %10717 = vmatprep.subr.bf16.mxu0 %v11834_v24  ;;  %10574 = vmatpush3.bf16.msra.mxu1 %v11833_v23 }
  0xba   : > { %593 = vst [vmem:[#allocation2 + $0x69] sm:$0xff] %v12520_v28  ;;  %656 = vst [vmem:[#allocation2 + $0x2e1] sm:$0xff] %v12524_v29  ;;  %v12775_v20 = vld [vmem:[%s12278_s30 + $0x310] sm:$0xff]  ;;  %v12786_v11 = vld [vmem:[%s12278_s30 + $0x128] sm:$0xff]  ;;  %10718 = vmatpush3.bf16.msra.mxu0 %v11834_v24  ;;  %10575 = vmatprep.subr.bf16.mxu1 %v12753_v10 }
  0xbb   : > { %657 = vst [vmem:[#allocation2 + $0x2e9] sm:$0xff] %v12527_v30  ;;  %594 = vst [vmem:[#allocation2 + $0x79] sm:$0xff] %v12533_v32  ;;  %v12790_v12 = vld [vmem:[%s12278_s30 + $0x320] sm:$0xff]  ;;  %v12840_v24 = vld [vmem:[%s12278_s30 + $0x348] sm:$0xff] }
  0xbc   : > { %595 = vst [vmem:[#allocation2 + $0x81] sm:$0xff] %v12536_v33  ;;  %658 = vst [vmem:[#allocation2 + $0x2f9] sm:$0xff] %v12539_v34  ;;  %v12837_v23 = vld [vmem:[%s12278_s30 + $0x340] sm:$0xff] }
  0xbd   : > { %659 = vst [vmem:[#allocation2 + $0x301] sm:$0xff] %v12544_v35  ;;  %596 = vst [vmem:[#allocation2 + $0x89] sm:$0xff] %v12548_v36  ;;  %10576 = vmatpush3.bf16.msra.mxu1 %v12753_v10  ;;  %v12873_v10 = vld [vmem:[%s12278_s30 + $0x360] sm:$0xff] }
  0xbe   : > { %597 = vst [vmem:[#allocation2 + $0x91] sm:$0xff] %v12551_v37  ;;  %660 = vst [vmem:[#allocation2 + $0x309] sm:$0xff] %v12557_v39 }
  0xbf   : > { %661 = vst [vmem:[#allocation2 + $0x311] sm:$0xff] %v12560_v40  ;;  %598 = vst [vmem:[#allocation2 + $0xa1] sm:$0xff] %v12563_v41 }
  0xc0   : > { %599 = vst [vmem:[#allocation2 + $0xa9] sm:$0xff] %v12568_v42  ;;  %662 = vst [vmem:[#allocation2 + $0x321] sm:$0xff] %v12572_v43 }
  0xc1   : > { %663 = vst [vmem:[#allocation2 + $0x329] sm:$0xff] %v12575_v44  ;;  %600 = vst [vmem:[#allocation2 + $0xb1] sm:$0xff] %v12581_v45 }
  0xc2   : > { %601 = vst [vmem:[#allocation2 + $0xb9] sm:$0xff] %v12584_v46  ;;  %664 = vst [vmem:[#allocation2 + $0x331] sm:$0xff] %v12587_v47 }
  0xc3   : > { %665 = vst [vmem:[#allocation2 + $0x339] sm:$0xff] %v12592_v50  ;;  %602 = vst [vmem:[#allocation2 + $0xc9] sm:$0xff] %v12597_v53 }
  0xc4   : > { %603 = vst [vmem:[#allocation2 + $0xd1] sm:$0xff] %v12600_v54  ;;  %666 = vst [vmem:[#allocation2 + $0x349] sm:$0xff] %v12605_v55 }
  0xc5   : > { %667 = vst [vmem:[#allocation2 + $0x351] sm:$0xff] %v12608_v56  ;;  %604 = vst [vmem:[#allocation2 + $0xd9] sm:$0xff] %v12611_v57 }
  0xc6   : > { %605 = vst [vmem:[#allocation2 + $0xe1] sm:$0xff] %v12616_v58  ;;  %668 = vst [vmem:[#allocation2 + $0x359] sm:$0xff] %v12620_v59 }
  0xc7   : > { %669 = vst [vmem:[#allocation2 + $0x361] sm:$0xff] %v12623_v60  ;;  %606 = vst [vmem:[#allocation2 + $0xf1] sm:$0xff] %v12631_v63 }
  0xc8   : > { %607 = vst [vmem:[#allocation2 + $0xf9] sm:$0xff] %v12634_v0  ;;  %670 = vst [vmem:[#allocation2 + $0x371] sm:$0xff] %v12637_v1 }
  0xc9   : > { %671 = vst [vmem:[#allocation2 + $0x379] sm:$0xff] %v12642_v3  ;;  %608 = vst [vmem:[#allocation2 + $0x101] sm:$0xff] %v12646_v4 }
  0xca   : > { %609 = vst [vmem:[#allocation2 + $0x109] sm:$0xff] %v12649_v5  ;;  %672 = vst [vmem:[#allocation2 + $0x381] sm:$0xff] %v12659_v8 }
  0xcb   : > { %673 = vst [vmem:[#allocation2 + $0x389] sm:$0xff] %v12662_v9  ;;  %610 = vst [vmem:[#allocation2 + $0x119] sm:$0xff] %v12671_v13 }
  0xcc   : > { %611 = vst [vmem:[#allocation2 + $0x121] sm:$0xff] %v12674_v14  ;;  %674 = vst [vmem:[#allocation2 + $0x399] sm:$0xff] %v12678_v15 }
  0xcd   : > { %675 = vst [vmem:[#allocation2 + $0x3a1] sm:$0xff] %v12681_v16  ;;  %612 = vst [vmem:[#allocation2 + $0x129] sm:$0xff] %v12687_v17 }
  0xce   : > { %613 = vst [vmem:[#allocation2 + $0x131] sm:$0xff] %v12690_v18  ;;  %676 = vst [vmem:[#allocation2 + $0x3a9] sm:$0xff] %v12693_v31 }
  0xcf   : > { %677 = vst [vmem:[#allocation2 + $0x3b1] sm:$0xff] %v12698_v38  ;;  %614 = vst [vmem:[#allocation2 + $0x141] sm:$0xff] %v12702_v48 }
  0xd0   : > { %615 = vst [vmem:[#allocation2 + $0x149] sm:$0xff] %v12705_v49  ;;  %678 = vst [vmem:[#allocation2 + $0x3c1] sm:$0xff] %v12715_v61 }
  0xd1   : > { %679 = vst [vmem:[#allocation2 + $0x3c9] sm:$0xff] %v12718_v62  ;;  %616 = vst [vmem:[#allocation2 + $0x151] sm:$0xff] %v12721_v6 }
  0xd2   : > { %15190 = vst [vmem:[#allocation17_spill] sm:$0xff] %v12734_v22  ;;  %617 = vst [vmem:[#allocation2 + $0x159] sm:$0xff] %v12730_v21 }
  0xd3   : > { %680 = vst [vmem:[#allocation2 + $0x3d1] sm:$0xff] %v12734_v22  ;;  %681 = vst [vmem:[#allocation2 + $0x3d9] sm:$0xff] %v12737_v7  ;;  %v12755_v22 = vld [vmem:[#allocation6 + $0x98] sm:$0xff]  }
  0xd4   : > { %15191 = vst [vmem:[#allocation18_spill] sm:$0xff] %v12745_v25  ;;  %15192 = vst [vmem:[#allocation19_spill] sm:$0xff] %v12748_v26  ;;  %10719 = vmatprep.subr.bf16.mxu0 %v12755_v22 }
  0xd5   : > { %15193 = vst [vmem:[#allocation20_spill] sm:$0xff] %v12751_v2  ;;  %618 = vst [vmem:[#allocation2 + $0x169] sm:$0xff] %v12745_v25  ;;  %v1056_v25 = vpack.c.bf16 %v12536_v33, %v12533_v32  ;;  %v11837_v32 = vld [vmem:[#allocation6 + $0x10] sm:$0xff]   ;;  %10720 = vmatpush3.bf16.msra.mxu0 %v12755_v22  ;;  %v11840_v22 = vld [vmem:[#allocation6 + $0x88] sm:$0xff]  }
  0xd6   : > { %619 = vst [vmem:[#allocation2 + $0x171] sm:$0xff] %v12748_v26  ;;  %15194 = vst [vmem:[#allocation21_spill] sm:$0xff] %v12760_v51  ;;  %v12781_v26 = vld [vmem:[%s12278_s30 + $0x120] sm:$0xff]  ;;  %v11838_v33 = vld [vmem:[#allocation6 + $0x90] sm:$0xff]   ;;  %10577 = vmatprep.subr.bf16.mxu1 %v11837_v32 }
  0xd7   : > { %682 = vst [vmem:[#allocation2 + $0x3e9] sm:$0xff] %v12751_v2  ;;  %15195 = vst [vmem:[#allocation22_spill] sm:$0xff] %v12764_v52  ;;  %v12778_v2 = vld [vmem:[%s12278_s30 + $0x318] sm:$0xff]  ;;  %10721 = vmatprep.subr.bf16.mxu0 %v11838_v33  ;;  %10578 = vmatpush3.bf16.msra.mxu1 %v11837_v32  ;;  %v12952_v32 = vld [vmem:[%s12278_s30 + $0x1a0] sm:$0xff] }
  0xd8   : > { %15196 = vst [vmem:[#allocation23_spill] sm:$0xff] %v12767_v19  ;;  %683 = vst [vmem:[#allocation2 + $0x3f1] sm:$0xff] %v12760_v51  ;;  %v1087_v51 = vpack.c.bf16 %v12527_v30, %v12524_v29  ;;  %v12820_v29 = vld [vmem:[%s12278_s30 + $0x338] sm:$0xff]  ;;  %v12843_v30 = vld [vmem:[%s12278_s30 + $0x150] sm:$0xff] }
  0xd9   : > { %620 = vst [vmem:[#allocation2 + $0x179] sm:$0xff] %v12764_v52  ;;  %621 = vst [vmem:[#allocation2 + $0x181] sm:$0xff] %v12767_v19  ;;  %v12793_v19 = vld [vmem:[%s12278_s30 + $0x328] sm:$0xff]  ;;  %v1055_v52 = vpack.c.bf16 %v12520_v28, %v12515_v27  ;;  %v1088_v27 = vpack.c.bf16 %v12544_v35, %v12539_v34  ;;  %v12829_v34 = vld [vmem:[%s12278_s30 + $0x140] sm:$0xff]  ;;  %10722 = vmatpush3.bf16.msra.mxu0 %v11838_v33 }
  0xda   : > { %15197 = vst [vmem:[#allocation24_spill] sm:$0xff] %v12775_v20  ;;  %15198 = vst [vmem:[#allocation25_spill] sm:$0xff] %v12778_v2  ;;  %v12832_v35 = vld [vmem:[%s12278_s30 + $0x148] sm:$0xff]  ;;  %10512 = vmatmul.mubr.bf16.gmra.mxu1 %v1087_v51  ;;  %v12848_v51 = vld [vmem:[%s12278_s30 + $0x158] sm:$0xff]  ;;  %10723 = vmatprep.subr.bf16.mxu0 %v11840_v22 }
  0xdb   : > { %15199 = vst [vmem:[#allocation26_spill] sm:$0xff] %v12781_v26  ;;  %684 = vst [vmem:[#allocation2 + $0x3f9] sm:$0xff] %v12775_v20  ;;  %v12809_v20 = vld [vmem:[%s12278_s30 + $0x330] sm:$0xff]  ;;  %10448 = vmatmul.mubr.bf16.gmra.mxu0 %v1055_v52  ;;  %10515 = vmatprep.mubr.bf16.mxu1 %v1088_v27  ;;  %v12855_v28 = vld [vmem:[%s12278_s30 + $0x358] sm:$0xff] }
  0xdc   : > { %685 = vst [vmem:[#allocation2 + $0x401] sm:$0xff] %v12778_v2  ;;  %622 = vst [vmem:[#allocation2 + $0x191] sm:$0xff] %v12781_v26  ;;  %v12803_v2 = vld [vmem:[%s12278_s30 + $0x130] sm:$0xff]  ;;  %v12806_v26 = vld [vmem:[%s12278_s30 + $0x138] sm:$0xff]  ;;  %10451 = vmatprep.mubr.bf16.mxu0 %v1056_v25 }
  0xdd   : > { %623 = vst [vmem:[#allocation2 + $0x199] sm:$0xff] %v12786_v11  ;;  %686 = vst [vmem:[#allocation2 + $0x411] sm:$0xff] %v12790_v12  ;;  %v12852_v52 = vld [vmem:[%s12278_s30 + $0x350] sm:$0xff]  ;;  %v12880_v25 = vld [vmem:[%s12278_s30 + $0x368] sm:$0xff]  ;;  %10724 = vmatpush3.bf16.msra.mxu0 %v11840_v22  ;;  %v1059_v22 = vpack.c.bf16 %v12584_v46, %v12581_v45  ;;  %v1060_v45 = vpack.c.bf16 %v12600_v54, %v12597_v53  ;;  %v1092_v46 = vpack.c.bf16 %v12608_v56, %v12605_v55 }
  0xde   : > { %687 = vst [vmem:[#allocation2 + $0x419] sm:$0xff] %v12793_v19  ;;  %15200 = vst [vmem:[#allocation27_spill] sm:$0xff] %v12809_v20  ;;  %v12884_v27 = vld [vmem:[%s12278_s30 + $0x170] sm:$0xff]  ;;  %v13016_v54 = vld [vmem:[%s12278_s30 + $0x3c8] sm:$0xff]  ;;  %v1061_v53 = vpack.c.bf16 %v12616_v58, %v12611_v57  ;;  %v1063_v57 = vpack.c.bf16 %v12649_v5, %v12646_v4  ;;  %v1095_v58 = vpack.c.bf16 %v12662_v9, %v12659_v8 }
  0xdf   : > { %624 = vst [vmem:[#allocation2 + $0x1a1] sm:$0xff] %v12803_v2  ;;  %625 = vst [vmem:[#allocation2 + $0x1a9] sm:$0xff] %v12806_v26  ;;  %v12935_v33 = vld [vmem:[%s12278_s30 + $0x190] sm:$0xff]  ;;  %v13023_v56 = vld [vmem:[%s12278_s30 + $0x1d8] sm:$0xff]  ;;  %v1067_v4 = vpack.c.bf16 %v12730_v21, %v12721_v6  ;;  %v1102_v21 = vpack.c.bf16 %v12793_v19, %v12790_v12 }
  0xe0   : > { %15201 = vst [vmem:[#allocation28_spill] sm:$0xff] %v12820_v29  ;;  %688 = vst [vmem:[#allocation2 + $0x421] sm:$0xff] %v12809_v20  ;;  %v12867_v20 = vld [vmem:[%s12278_s30 + $0x160] sm:$0xff]  ;;  %v13020_v55 = vld [vmem:[%s12278_s30 + $0x1d0] sm:$0xff] }
  0xe1   : > { %689 = vst [vmem:[#allocation2 + $0x429] sm:$0xff] %v12820_v29  ;;  %626 = vst [vmem:[#allocation2 + $0x1b9] sm:$0xff] %v12829_v34  ;;  %v12870_v29 = vld [vmem:[%s12278_s30 + $0x168] sm:$0xff] }
  0xe2   : > { %627 = vst [vmem:[#allocation2 + $0x1c1] sm:$0xff] %v12832_v35  ;;  %15202 = vst [vmem:[#allocation29_spill] sm:$0xff] %v12843_v30  ;;  %v15218_v5 = vld [vmem:[#allocation17_spill] sm:$0xff]  ;;  %v15219_v9 = vld [vmem:[#allocation18_spill] sm:$0xff] }
  0xe3   : > { %690 = vst [vmem:[#allocation2 + $0x439] sm:$0xff] %v12837_v23  ;;  %691 = vst [vmem:[#allocation2 + $0x441] sm:$0xff] %v12840_v24  ;;  %v1099_v8 = vpack.c.bf16 %v12737_v7, %v15218_v5  ;;  %v1072_v7 = vpack.c.bf16 %v12832_v35, %v12829_v34 }
  0xe4   : > { %628 = vst [vmem:[#allocation2 + $0x1c9] sm:$0xff] %v12843_v30  ;;  %15203 = vst [vmem:[#allocation30_spill] sm:$0xff] %v12852_v52  ;;  %v1089_v30 = vpack.c.bf16 %v12560_v40, %v12557_v39  ;;  %v1090_v39 = vpack.c.bf16 %v12575_v44, %v12572_v43  ;;  %v12925_v43 = vld [vmem:[%s12278_s30 + $0x388] sm:$0xff]  ;;  %v12938_v40 = vld [vmem:[%s12278_s30 + $0x198] sm:$0xff] }
  0xe5   : > { %15204 = vst [vmem:[#allocation31_spill] sm:$0xff] %v12855_v28  ;;  %629 = vst [vmem:[#allocation2 + $0x1d1] sm:$0xff] %v12848_v51  ;;  %v12948_v44 = vld [vmem:[%s12278_s30 + $0x398] sm:$0xff] }
  0xe6   : > { %692 = vst [vmem:[#allocation2 + $0x449] sm:$0xff] %v12852_v52  ;;  %693 = vst [vmem:[#allocation2 + $0x451] sm:$0xff] %v12855_v28  ;;  %v12887_v52 = vld [vmem:[%s12278_s30 + $0x178] sm:$0xff]  ;;  %v1057_v28 = vpack.c.bf16 %v12551_v37, %v12548_v36  ;;  %v1058_v37 = vpack.c.bf16 %v12568_v42, %v12563_v41  ;;  %v12918_v41 = vld [vmem:[%s12278_s30 + $0x188] sm:$0xff]  ;;  %10516 = vmatmul.mubr.bf16.gmra.mxu1 %v1089_v30 }
  0xe7   : > { %15205 = vst [vmem:[#allocation32_spill] sm:$0xff] %v12867_v20  ;;  %15206 = vst [vmem:[#allocation33_spill] sm:$0xff] %v12870_v29  ;;  %v12904_v36 = vld [vmem:[%s12278_s30 + $0x378] sm:$0xff]  ;;  %v12922_v42 = vld [vmem:[%s12278_s30 + $0x380] sm:$0xff]  ;;  %10519 = vmatprep.mubr.bf16.mxu1 %v1090_v39 }
  0xe8   : > { %630 = vst [vmem:[#allocation2 + $0x1e1] sm:$0xff] %v12867_v20  ;;  %631 = vst [vmem:[#allocation2 + $0x1e9] sm:$0xff] %v12870_v29  ;;  %v12901_v29 = vld [vmem:[%s12278_s30 + $0x370] sm:$0xff]  ;;  %v11839_v20 = vld [vmem:[#allocation6 + $0x8] sm:$0xff]   ;;  %10452 = vmatmul.mubr.bf16.gmra.mxu0 %v1057_v28 }
  0xe9   : > { %694 = vst [vmem:[#allocation2 + $0x461] sm:$0xff] %v12873_v10  ;;  %15207 = vst [vmem:[#allocation34_spill] sm:$0xff] %v12884_v27  ;;  %10579 = vmatprep.subr.bf16.mxu1 %v11839_v20  ;;  %v12941_v28 = vld [vmem:[%s12278_s30 + $0x390] sm:$0xff]  ;;  %10455 = vmatprep.mubr.bf16.mxu0 %v1058_v37  ;;  %v12965_v30 = vld [vmem:[%s12278_s30 + $0x3a0] sm:$0xff] }
  0xea   : > { %695 = vst [vmem:[#allocation2 + $0x469] sm:$0xff] %v12880_v25  ;;  %632 = vst [vmem:[#allocation2 + $0x1f1] sm:$0xff] %v12884_v27  ;;  %v12915_v27 = vld [vmem:[%s12278_s30 + $0x180] sm:$0xff]  ;;  %10580 = vmatpush3.bf16.msra.mxu1 %v11839_v20  ;;  %v12971_v20 = vld [vmem:[%s12278_s30 + $0x1b0] sm:$0xff] }
  0xeb   : > { %633 = vst [vmem:[#allocation2 + $0x1f9] sm:$0xff] %v12887_v52  ;;  %696 = vst [vmem:[#allocation2 + $0x471] sm:$0xff] %v12901_v29  ;;  %v12982_v39 = vld [vmem:[%s12278_s30 + $0x3b0] sm:$0xff]  ;;  %v13006_v37 = vld [vmem:[%s12278_s30 + $0x1c8] sm:$0xff] }
  0xec   : > { %697 = vst [vmem:[#allocation2 + $0x479] sm:$0xff] %v12904_v36  ;;  %634 = vst [vmem:[#allocation2 + $0x209] sm:$0xff] %v12915_v27  ;;  %v15232_v19 = vld [vmem:[#allocation29_spill] sm:$0xff] }
  0xed   : > { %15208 = vst [vmem:[#allocation35_spill] sm:$0xff] %v12922_v42  ;;  %635 = vst [vmem:[#allocation2 + $0x211] sm:$0xff] %v12918_v41  ;;  %v15233_v12 = vpack.c.bf16 %v12848_v51, %v15232_v19  ;;  %v15243_v51 = vpack.c.bf16 %v12904_v36, %v12901_v29 }
  0xee   : > { %698 = vst [vmem:[#allocation2 + $0x489] sm:$0xff] %v12922_v42  ;;  %699 = vst [vmem:[#allocation2 + $0x491] sm:$0xff] %v12925_v43  ;;  %v12955_v42 = vld [vmem:[%s12278_s30 + $0x1a8] sm:$0xff] }
  0xef   : > { %15209 = vst [vmem:[#allocation36_spill] sm:$0xff] %v12935_v33  ;;  %15210 = vst [vmem:[#allocation37_spill] sm:$0xff] %v12941_v28  ;;  %v15237_v35 = vld [vmem:[#allocation33_spill] sm:$0xff] }
  0xf0   : > { %636 = vst [vmem:[#allocation2 + $0x219] sm:$0xff] %v12935_v33  ;;  %637 = vst [vmem:[#allocation2 + $0x221] sm:$0xff] %v12938_v40  ;;  %v12968_v33 = vld [vmem:[%s12278_s30 + $0x3a8] sm:$0xff]  ;;  %10456 = vmatmul.mubr.bf16.gmra.mxu0 %v1059_v22  ;;  %v13042_v22 = vld [vmem:[#allocation6 + $0xf8] sm:$0xff]  }
  0xf1   : > { %700 = vst [vmem:[#allocation2 + $0x499] sm:$0xff] %v12941_v28  ;;  %15211 = vst [vmem:[#allocation38_spill] sm:$0xff] %v12952_v32  ;;  %v12978_v28 = vld [vmem:[%s12278_s30 + $0x1b8] sm:$0xff]  ;;  %10459 = vmatprep.mubr.bf16.mxu0 %v1060_v45  ;;  %v1062_v45 = vpack.c.bf16 %v12634_v0, %v12631_v63  ;;  %v1065_v63 = vpack.c.bf16 %v12690_v18, %v12687_v17  ;;  %v1097_v0 = vpack.c.bf16 %v12698_v38, %v12693_v31  ;;  %v15223_v18 = vld [vmem:[#allocation22_spill] sm:$0xff] }
  0xf2   : > { %15212 = vst [vmem:[#allocation39_spill] sm:$0xff] %v12955_v42  ;;  %701 = vst [vmem:[#allocation2 + $0x4a1] sm:$0xff] %v12948_v44  ;;  %v15224_v31 = vld [vmem:[#allocation23_spill] sm:$0xff] }
  0xf3   : > { %638 = vst [vmem:[#allocation2 + $0x231] sm:$0xff] %v12952_v32  ;;  %639 = vst [vmem:[#allocation2 + $0x239] sm:$0xff] %v12955_v42  ;;  %v12985_v32 = vld [vmem:[%s12278_s30 + $0x3b8] sm:$0xff]  ;;  %v1091_v42 = vpack.c.bf16 %v12592_v50, %v12587_v47  ;;  %v11842_v47 = vld [vmem:[#allocation6 + $0x80] sm:$0xff]   ;;  %v1069_v38 = vpack.c.bf16 %v15224_v31, %v15223_v18 }
  0xf4   : > { %15213 = vst [vmem:[#allocation40_spill] sm:$0xff] %v12965_v30  ;;  %15214 = vst [vmem:[#allocation41_spill] sm:$0xff] %v12968_v33  ;;  %v13003_v50 = vld [vmem:[%s12278_s30 + $0x1c0] sm:$0xff]  ;;  %10725 = vmatprep.subr.bf16.mxu0 %v11842_v47 }
  0xf5   : > { %15215 = vst [vmem:[#allocation42_spill] sm:$0xff] %v12971_v20  ;;  %702 = vst [vmem:[#allocation2 + $0x4b1] sm:$0xff] %v12965_v30  ;;  %10520 = vmatmul.mubr.bf16.gmra.mxu1 %v1091_v42  ;;  %v13033_v30 = vld [vmem:[%s12278_s30 + $0x3d0] sm:$0xff]  ;;  %10726 = vmatpush3.bf16.msra.mxu0 %v11842_v47  ;;  %v1104_v47 = vpack.c.bf16 %v12840_v24, %v12837_v23  ;;  %v15238_v23 = vld [vmem:[#allocation32_spill] sm:$0xff] }
  0xf6   : > { %703 = vst [vmem:[#allocation2 + $0x4b9] sm:$0xff] %v12968_v33  ;;  %640 = vst [vmem:[#allocation2 + $0x241] sm:$0xff] %v12971_v20  ;;  %v11841_v33 = vld [vmem:[#allocation6] sm:$0xff]   ;;  %10523 = vmatprep.mubr.bf16.mxu1 %v1092_v46  ;;  %v1094_v46 = vpack.c.bf16 %v12642_v3, %v12637_v1  ;;  %v1066_v1 = vpack.c.bf16 %v12705_v49, %v12702_v48  ;;  %v1098_v3 = vpack.c.bf16 %v12718_v62, %v12715_v61  ;;  %v15227_v62 = vld [vmem:[#allocation26_spill] sm:$0xff] }
  0xf7   : > { %641 = vst [vmem:[#allocation2 + $0x249] sm:$0xff] %v12978_v28  ;;  %704 = vst [vmem:[#allocation2 + $0x4c1] sm:$0xff] %v12982_v39  ;;  %10581 = vmatprep.subr.bf16.mxu1 %v11841_v33  ;;  %v13009_v20 = vld [vmem:[%s12278_s30 + $0x3c0] sm:$0xff]  ;;  %v1070_v6 = vpack.c.bf16 %v12786_v11, %v15227_v62  ;;  %v15239_v24 = vpack.c.bf16 %v15237_v35, %v15238_v23  ;;  %v11846_v62 = vld [vmem:[#allocation6 + $0x130] sm:$0xff]  }
  0xf8   : > { %705 = vst [vmem:[#allocation2 + $0x4c9] sm:$0xff] %v12985_v32  ;;  %15216 = vst [vmem:[#allocation43_spill] sm:$0xff] %v13003_v50  ;;  %10582 = vmatpush3.bf16.msra.mxu1 %v11841_v33  ;;  %v13044_v33 = vld [vmem:[#allocation6 + $0x138] sm:$0xff]   ;;  %10460 = vmatmul.mubr.bf16.gmra.mxu0 %v1061_v53  ;;  %v15226_v49 = vld [vmem:[#allocation25_spill] sm:$0xff]  ;;  %v15228_v53 = vpack.c.bf16 %v12806_v26, %v12803_v2  ;;  %v15240_v26 = vpack.c.bf16 %v12880_v25, %v12873_v10 }
  0xf9   : > { %642 = vst [vmem:[#allocation2 + $0x259] sm:$0xff] %v13003_v50  ;;  %643 = vst [vmem:[#allocation2 + $0x261] sm:$0xff] %v13006_v37  ;;  %v13036_v50 = vld [vmem:[%s12278_s30 + $0x3d8] sm:$0xff]  ;;  %10855 = vmatprep.subr.bf16.mxu1 %v13042_v22  ;;  %10999 = vmatprep.subr.bf16.mxu0 %v13044_v33  ;;  %v15241_v2 = vld [vmem:[#allocation34_spill] sm:$0xff] }
  0xfa   : > { %706 = vst [vmem:[#allocation2 + $0x4d9] sm:$0xff] %v13009_v20  ;;  %15217 = vst [vmem:[#allocation44_spill] sm:$0xff] %v13020_v55  ;;  %v1113_v42 = vpack.c.bf16 %v13036_v50, %v13033_v30  ;;  %10463 = vmatprep.mubr.bf16.mxu0 %v1062_v45  ;;  %v15225_v48 = vld [vmem:[#allocation24_spill] sm:$0xff]  ;;  %v15230_v45 = vld [vmem:[#allocation27_spill] sm:$0xff] }
  0xfb   : > { %707 = vst [vmem:[#allocation2 + $0x4e1] sm:$0xff] %v13016_v54  ;;  %644 = vst [vmem:[#allocation2 + $0x269] sm:$0xff] %v13020_v55  ;;  %v1093_v55 = vpack.c.bf16 %v12623_v60, %v12620_v59  ;;  %v1064_v59 = vpack.c.bf16 %v12674_v14, %v12671_v13  ;;  %v1096_v60 = vpack.c.bf16 %v12681_v16, %v12678_v15  ;;  %v15220_v13 = vld [vmem:[#allocation19_spill] sm:$0xff]  ;;  %v15221_v15 = vld [vmem:[#allocation20_spill] sm:$0xff] }
  0xfc   : > { %645 = vst [vmem:[#allocation2 + $0x271] sm:$0xff] %v13023_v56  ;;  %708 = vst [vmem:[#allocation2 + $0x4e9] sm:$0xff] %v13033_v30  ;;  %v1068_v14 = vpack.c.bf16 %v15220_v13, %v15219_v9  ;;  %v15222_v16 = vld [vmem:[#allocation21_spill] sm:$0xff]  ;;  %v1101_v61 = vpack.c.bf16 %v15226_v49, %v15225_v48  ;;  %v2317_v9 = vld [vmem:[#allocation2 + $0x2] sm:$0xff] }
  0xfd   : > { %709 = vst [vmem:[#allocation2 + $0x4f1] sm:$0xff] %v13036_v50  ;;  %10524 = vmatmul.mubr.bf16.gmra.mxu1 %v1093_v55  ;;  %v1100_v17 = vpack.c.bf16 %v15222_v16, %v15221_v15  ;;  %v15229_v55 = vld [vmem:[#allocation28_spill] sm:$0xff]  ;;  %v15249_v10 = vld [vmem:[#allocation37_spill] sm:$0xff]  ;;  %v2324_v30 = vld [vmem:[#allocation2 + $0x42] sm:$0xff] }
  0xfe   : > { %10527 = vmatprep.mubr.bf16.mxu1 %v1094_v46  ;;  %v15231_v11 = vpack.c.bf16 %v15229_v55, %v15230_v45  ;;  %v15234_v46 = vld [vmem:[#allocation31_spill] sm:$0xff]  ;;  %v15254_v36 = vld [vmem:[#allocation41_spill] sm:$0xff] }
  0xff   : > { %v15260_v5 = vld [vmem:[#allocation43_spill] sm:$0xff]  ;;  %v2322_v18 = vld [vmem:[#allocation2 + $0x32] sm:$0xff] }
 0x100   : > { %10464 = vmatmul.mubr.bf16.gmra.mxu0 %v1063_v57  ;;  %v15235_v57 = vld [vmem:[#allocation30_spill] sm:$0xff]  ;;  %v2318_v13 = vld [vmem:[#allocation2 + $0xa] sm:$0xff] }
 0x101   : > { %10467 = vmatprep.mubr.bf16.mxu0 %v1064_v59  ;;  %v15236_v34 = vpack.c.bf16 %v15234_v46, %v15235_v57  ;;  %v15244_v59 = vpack.c.bf16 %v12918_v41, %v12915_v27  ;;  %v15257_v41 = vld [vmem:[#allocation42_spill] sm:$0xff]  ;;  %v2445_v16 = vpack.c.bf16 %v2318_v13, %v2317_v9  ;;  %v722_v50 = vld [vmem:[#allocation2 + $0x50] sm:$0xff]  ;;  %v725_v46 = vld [vmem:[#allocation2 + $0x68] sm:$0xff] }
 0x102   : > { %v720_v49 = vld [vmem:[#allocation2 + $0x38] sm:$0xff]  ;;  %v2327_v57 = vld [vmem:[#allocation2 + $0x62] sm:$0xff]  ;;  %v735_v13 = vld [vmem:[#allocation2 + $0xd0] sm:$0xff] }
 0x103   : > { %v726_v35 = vld [vmem:[#allocation2 + $0x78] sm:$0xff]  ;;  %v727_v23 = vld [vmem:[#allocation2 + $0x80] sm:$0xff]  ;;  %v734_v9 = vld [vmem:[#allocation2 + $0xc8] sm:$0xff] }
 0x105   : > { %10528 = vmatmul.mubr.bf16.gmra.mxu1 %v1095_v58  ;;  %v15242_v58 = vpack.c.bf16 %v12887_v52, %v15241_v2  ;;  %v15250_v52 = vpack.c.bf16 %v12948_v44, %v15249_v10  ;;  %v15261_v44 = vpack.c.bf16 %v13006_v37, %v15260_v5  ;;  %v2320_v37 = vld [vmem:[#allocation2 + $0x1a] sm:$0xff]  ;;  %v11851_v2 = vld [vmem:[#allocation6 + $0xd8] sm:$0xff]  }
 0x106   : > { %10531 = vmatprep.mubr.bf16.mxu1 %v1096_v60  ;;  %v15245_v60 = vld [vmem:[#allocation35_spill] sm:$0xff]  ;;  %v733_v5 = vld [vmem:[#allocation2 + $0xb8] sm:$0xff] }
 0x107   : > { %v2331_v10 = vld [vmem:[#allocation2 + $0x8a] sm:$0xff] }
 0x108   : > { %10468 = vmatmul.mubr.bf16.gmra.mxu0 %v1065_v63  ;;  %v15246_v63 = vpack.c.bf16 %v12925_v43, %v15245_v60  ;;  %v15258_v43 = vpack.c.bf16 %v12978_v28, %v15257_v41  ;;  %v15263_v28 = vld [vmem:[#allocation44_spill] sm:$0xff]  ;;  %v848_v60 = vpack.c.bf16 %v727_v23, %v726_v35  ;;  %v746_v35 = vld [vmem:[#allocation2 + $0x140] sm:$0xff] }
 0x109   : > { %10471 = vmatprep.mubr.bf16.mxu0 %v1066_v1  ;;  %v15251_v1 = vld [vmem:[#allocation39_spill] sm:$0xff] }
 0x10a   : > { %v747_v23 = vld [vmem:[#allocation2 + $0x148] sm:$0xff] }
 0x10d   : > { %10532 = vmatmul.mubr.bf16.gmra.mxu1 %v1097_v0  ;;  %v15247_v0 = vld [vmem:[#allocation36_spill] sm:$0xff] }
 0x10e   : > { %10535 = vmatprep.mubr.bf16.mxu1 %v1098_v3  ;;  %v15248_v25 = vpack.c.bf16 %v12938_v40, %v15247_v0  ;;  %v15252_v3 = vld [vmem:[#allocation38_spill] sm:$0xff]  ;;  %v15259_v40 = vpack.c.bf16 %v12985_v32, %v12982_v39  ;;  %v2319_v32 = vld [vmem:[#allocation2 + $0x12] sm:$0xff]  ;;  %v718_v39 = vld [vmem:[#allocation2 + $0x28] sm:$0xff] }
 0x10f   : > { %v15253_v29 = vpack.c.bf16 %v15251_v1, %v15252_v3  ;;  %v2446_v31 = vpack.c.bf16 %v2320_v37, %v2319_v32  ;;  %v728_v0 = vld [vmem:[#allocation2 + $0x88] sm:$0xff]  ;;  %v730_v1 = vld [vmem:[#allocation2 + $0xa0] sm:$0xff]  ;;  %v736_v37 = vld [vmem:[#allocation2 + $0xd8] sm:$0xff] }
 0x110   : > { %10472 = vmatmul.mubr.bf16.gmra.mxu0 %v1067_v4  ;;  %v15255_v4 = vld [vmem:[#allocation40_spill] sm:$0xff] }
 0x111   : > { %10475 = vmatprep.mubr.bf16.mxu0 %v1068_v14  ;;  %v15256_v27 = vpack.c.bf16 %v15254_v36, %v15255_v4  ;;  %v11891_v14 = vld [vmem:[#allocation2] sm:$0xff]  ;;  %v731_v3 = vld [vmem:[#allocation2 + $0xa8] sm:$0xff] }
 0x112   : > { %v842_v15 = vpack.c.bf16 %v11891_v14, %v11891_v14  ;;  %v2334_v36 = vld [vmem:[#allocation2 + $0xaa] sm:$0xff]  ;;  %v850_v41 = vpack.c.bf16 %v731_v3, %v730_v1  ;;  %v2354_v3 = vld [vmem:[#allocation2 + $0x172] sm:$0xff] }
 0x113   : > { %v2337_v14 = vld [vmem:[#allocation2 + $0xca] sm:$0xff] }
 0x114   : > { %v2353_v1 = vld [vmem:[#allocation2 + $0x16a] sm:$0xff] }
 0x115   : > { %10536 = vmatmul.mubr.bf16.gmra.mxu1 %v1099_v8  ;;  %v15262_v8 = vpack.c.bf16 %v13016_v54, %v13009_v20  ;;  %v719_v20 = vld [vmem:[#allocation2 + $0x30] sm:$0xff] }
 0x116   : > { %10539 = vmatprep.mubr.bf16.mxu1 %v1100_v17  ;;  %v15264_v17 = vpack.c.bf16 %v13023_v56, %v15263_v28  ;;  %v2321_v54 = vld [vmem:[#allocation2 + $0x2a] sm:$0xff]  ;;  %v721_v56 = vld [vmem:[#allocation2 + $0x40] sm:$0xff] }
 0x117   : > { %v2447_v48 = vpack.c.bf16 %v2322_v18, %v2321_v54  ;;  %v845_v55 = vpack.c.bf16 %v721_v56, %v720_v49  ;;  %v11853_v54 = vld [vmem:[#allocation6 + $0xd0] sm:$0xff]  }
 0x118   : > { %10476 = vmatmul.mubr.bf16.gmra.mxu0 %v1069_v38  ;;  %v844_v38 = vpack.c.bf16 %v719_v20, %v718_v39  ;;  %v737_v39 = vld [vmem:[#allocation2 + $0xe0] sm:$0xff] }
 0x119   : > { %10479 = vmatprep.mubr.bf16.mxu0 %v1070_v6  ;;  %v2323_v6 = vld [vmem:[#allocation2 + $0x3a] sm:$0xff]  ;;  %v2340_v18 = vld [vmem:[#allocation2 + $0xe2] sm:$0xff] }
 0x11a   : > { %v2448_v45 = vpack.c.bf16 %v2324_v30, %v2323_v6  ;;  %v2339_v20 = vld [vmem:[#allocation2 + $0xda] sm:$0xff] }
 0x11b   : > { %v2342_v49 = vld [vmem:[#allocation2 + $0xfa] sm:$0xff]  ;;  %v2456_v56 = vpack.c.bf16 %v2340_v18, %v2339_v20 }
 0x11d   : > { %10540 = vmatmul.mubr.bf16.gmra.mxu1 %v1101_v61  ;;  %v11845_v61 = vld [vmem:[#allocation6 + $0xf0] sm:$0xff]  }
 0x11e   : > { %10543 = vmatprep.mubr.bf16.mxu1 %v1102_v21  ;;  %v2325_v21 = vld [vmem:[#allocation2 + $0x52] sm:$0xff] }
 0x120   : > { %10480 = vmatmul.mubr.bf16.gmra.mxu0 %v15228_v53  ;;  %v11848_v53 = vld [vmem:[#allocation6 + $0x128] sm:$0xff]  }
 0x121   : > { %10483 = vmatprep.mubr.bf16.mxu0 %v1072_v7  ;;  %v2326_v7 = vld [vmem:[#allocation2 + $0x5a] sm:$0xff] }
 0x122   : > { %v2449_v19 = vpack.c.bf16 %v2326_v7, %v2325_v21  ;;  %v2343_v21 = vld [vmem:[#allocation2 + $0x102] sm:$0xff]  ;;  %v2344_v7 = vld [vmem:[#allocation2 + $0x10a] sm:$0xff] }
 0x125   : > { %10544 = vmatmul.mubr.bf16.gmra.mxu1 %v15231_v11 }
 0x126   : > { %10547 = vmatprep.mubr.bf16.mxu1 %v1104_v47  ;;  %v11847_v47 = vld [vmem:[#allocation6 + $0xe8] sm:$0xff]  }
 0x128   : > { %10484 = vmatmul.mubr.bf16.gmra.mxu0 %v15233_v12  ;;  %v724_v12 = vld [vmem:[#allocation2 + $0x60] sm:$0xff] }
 0x129   : > { %10487 = vmatprep.mubr.bf16.mxu0 %v15239_v24  ;;  %v2329_v24 = vld [vmem:[#allocation2 + $0x7a] sm:$0xff] }
 0x12d   : > { %10548 = vmatmul.mubr.bf16.gmra.mxu1 %v15236_v34  ;;  %v2328_v34 = vld [vmem:[#allocation2 + $0x6a] sm:$0xff] }
 0x12e   : > { %10551 = vmatprep.mubr.bf16.mxu1 %v15240_v26  ;;  %v2330_v26 = vld [vmem:[#allocation2 + $0x82] sm:$0xff] }
 0x130   : > { %10488 = vmatmul.mubr.bf16.gmra.mxu0 %v15242_v58  ;;  %v11852_v58 = vld [vmem:[#allocation6 + $0x118] sm:$0xff]  }
 0x131   : > { %10491 = vmatprep.mubr.bf16.mxu0 %v15244_v59  ;;  %v2450_v59 = vpack.c.bf16 %v2328_v34, %v2327_v57  ;;  %v2347_v57 = vld [vmem:[#allocation2 + $0x12a] sm:$0xff]  ;;  %v2348_v34 = vld [vmem:[#allocation2 + $0x132] sm:$0xff] }
 0x135   : > { %10552 = vmatmul.mubr.bf16.gmra.mxu1 %v15243_v51  ;;  %v847_v51 = vpack.c.bf16 %v725_v46, %v724_v12  ;;  %v744_v12 = vld [vmem:[#allocation2 + $0x128] sm:$0xff]  ;;  %v745_v46 = vld [vmem:[#allocation2 + $0x130] sm:$0xff] }
 0x136   : > { %10555 = vmatprep.mubr.bf16.mxu1 %v15246_v63  ;;  %v2451_v63 = vpack.c.bf16 %v2330_v26, %v2329_v24  ;;  %v2349_v24 = vld [vmem:[#allocation2 + $0x142] sm:$0xff]  ;;  %v2350_v26 = vld [vmem:[#allocation2 + $0x14a] sm:$0xff] }
 0x138   : > { %10492 = vmatmul.mubr.bf16.gmra.mxu0 %v15248_v25  ;;  %v729_v25 = vld [vmem:[#allocation2 + $0x90] sm:$0xff] }
 0x139   : > { %10495 = vmatprep.mubr.bf16.mxu0 %v15253_v29  ;;  %v2333_v29 = vld [vmem:[#allocation2 + $0xa2] sm:$0xff]  ;;  %v849_v4 = vpack.c.bf16 %v729_v25, %v728_v0  ;;  %v2351_v0 = vld [vmem:[#allocation2 + $0x152] sm:$0xff]  ;;  %v2352_v25 = vld [vmem:[#allocation2 + $0x15a] sm:$0xff] }
 0x13d   : > { %10556 = vmatmul.mubr.bf16.gmra.mxu1 %v15250_v52  ;;  %v2332_v52 = vld [vmem:[#allocation2 + $0x92] sm:$0xff] }
 0x13e   : > { %10559 = vmatprep.mubr.bf16.mxu1 %v15256_v27  ;;  %v2452_v27 = vpack.c.bf16 %v2332_v52, %v2331_v10  ;;  %v750_v10 = vld [vmem:[#allocation2 + $0x168] sm:$0xff]  ;;  %v751_v52 = vld [vmem:[#allocation2 + $0x170] sm:$0xff] }
 0x140   : > { %10496 = vmatmul.mubr.bf16.gmra.mxu0 %v15258_v43  ;;  %v2453_v43 = vpack.c.bf16 %v2334_v36, %v2333_v29  ;;  %v2462_v36 = vpack.c.bf16 %v2352_v25, %v2351_v0 }
 0x141   : > { %10499 = vmatprep.mubr.bf16.mxu0 %v15261_v44  ;;  %v2335_v44 = vld [vmem:[#allocation2 + $0xb2] sm:$0xff] }
 0x145   : > { %10560 = vmatmul.mubr.bf16.gmra.mxu1 %v15259_v40  ;;  %v732_v40 = vld [vmem:[#allocation2 + $0xb0] sm:$0xff] }
 0x146   : > { %10563 = vmatprep.mubr.bf16.mxu1 %v15262_v8  ;;  %v2336_v8 = vld [vmem:[#allocation2 + $0xba] sm:$0xff] }
 0x147   : > { %v2454_v28 = vpack.c.bf16 %v2336_v8, %v2335_v44  ;;  %v2355_v44 = vld [vmem:[#allocation2 + $0x17a] sm:$0xff]  ;;  %v2356_v8 = vld [vmem:[#allocation2 + $0x182] sm:$0xff] }
 0x148   : > { %10500 = vmatmul.mubr.bf16.gmra.mxu0 %v15264_v17  ;;  %v852_v17 = vpack.c.bf16 %v735_v13, %v734_v9  ;;  %v754_v9 = vld [vmem:[#allocation2 + $0x190] sm:$0xff]  ;;  %v2464_v20 = vpack.c.bf16 %v2356_v8, %v2355_v44  ;;  %v2368_v8 = vld [vmem:[#allocation2 + $0x1fa] sm:$0xff] }
 0x149   : > { %10727 = vmatprep.mubr.bf16.mxu0 %v2445_v16  ;;  %v851_v16 = vpack.c.bf16 %v733_v5, %v732_v40  ;;  %v752_v40 = vld [vmem:[#allocation2 + $0x178] sm:$0xff]  ;;  %v753_v5 = vld [vmem:[#allocation2 + $0x180] sm:$0xff] }
 0x14a   : > { %v2367_v44 = vld [vmem:[#allocation2 + $0x1f2] sm:$0xff] }
 0x14d   : > { %10564 = vmatmul.mubr.bf16.gmra.mxu1 %v1113_v42  ;;  %v723_v42 = vld [vmem:[#allocation2 + $0x58] sm:$0xff] }
 0x14e   : > { %10583 = vmatprep.mubr.bf16.mxu1 %v842_v15  ;;  %v846_v11 = vpack.c.bf16 %v723_v42, %v722_v50  ;;  %v740_v50 = vld [vmem:[#allocation2 + $0x100] sm:$0xff]  ;;  %v741_v42 = vld [vmem:[#allocation2 + $0x108] sm:$0xff] }
 0x150   : > { %10728 = vmatmul.mubr.bf16.vlgmr.msra.gmra.mxu0 %v2446_v31  ;;  %v738_v31 = vld [vmem:[#allocation2 + $0xf0] sm:$0xff] }
 0x151   : > { %11000 = vmatpush3.bf16.msra.mxu0 %v13044_v33  ;;  %10731 = vmatprep.mubr.bf16.mxu0 %v2447_v48  ;;  %v11850_v33 = vld [vmem:[#allocation6 + $0x120] sm:$0xff]  }
 0x152   : > { %11001 = vmatprep.subr.bf16.mxu0 %v11846_v62  ;;  %v2341_v48 = vld [vmem:[#allocation2 + $0xf2] sm:$0xff] }
 0x153   : > { %v2457_v30 = vpack.c.bf16 %v2342_v49, %v2341_v48 }
 0x155   : > { %10584 = vmatmul.mubr.bf16.vlgmr.msra.gmra.mxu1 %v842_v15  ;;  %11002 = vmatpush3.bf16.msra.mxu0 %v11846_v62  ;;  %v2338_v15 = vld [vmem:[#allocation2 + $0xd2] sm:$0xff]  ;;  %v853_v62 = vpack.c.bf16 %v737_v39, %v736_v37  ;;  %v861_v39 = vpack.c.bf16 %v753_v5, %v752_v40 }
 0x156   : > { %10856 = vmatpush3.bf16.msra.mxu1 %v13042_v22  ;;  %10587 = vmatprep.mubr.bf16.mxu1 %v844_v38  ;;  %v11849_v22 = vld [vmem:[#allocation6 + $0xe0] sm:$0xff]   ;;  %v2455_v32 = vpack.c.bf16 %v2338_v15, %v2337_v14  ;;  %v739_v38 = vld [vmem:[#allocation2 + $0xf8] sm:$0xff] }
 0x157   : > { %10857 = vmatprep.subr.bf16.mxu1 %v11845_v61  ;;  %11003 = vmatprep.subr.bf16.mxu0 %v11848_v53  ;;  %v854_v6 = vpack.c.bf16 %v739_v38, %v738_v31  ;;  %v755_v15 = vld [vmem:[#allocation2 + $0x198] sm:$0xff]  ;;  %v764_v40 = vld [vmem:[#allocation2 + $0x1f0] sm:$0xff] }
 0x158   : > { %10732 = vmatmul.mubr.bf16.gmra.mxu0 %v2448_v45  ;;  %v2346_v45 = vld [vmem:[#allocation2 + $0x122] sm:$0xff]  ;;  %v11856_v31 = vld [vmem:[#allocation6 + $0x108] sm:$0xff]  }
 0x159   : > { %10735 = vmatprep.mubr.bf16.mxu0 %v2449_v19  ;;  %11004 = vmatpush3.bf16.msra.mxu0 %v11848_v53  ;;  %v743_v53 = vld [vmem:[#allocation2 + $0x120] sm:$0xff]  ;;  %v2458_v19 = vpack.c.bf16 %v2344_v7, %v2343_v21  ;;  %v765_v5 = vld [vmem:[#allocation2 + $0x1f8] sm:$0xff] }
 0x15a   : > { %10858 = vmatpush3.bf16.msra.mxu1 %v11845_v61  ;;  %11005 = vmatprep.subr.bf16.mxu0 %v11850_v33  ;;  %v11854_v61 = vld [vmem:[#allocation6 + $0x110] sm:$0xff]  }
 0x15b   : > { %10859 = vmatprep.subr.bf16.mxu1 %v11847_v47  ;;  %v759_v7 = vld [vmem:[#allocation2 + $0x1c0] sm:$0xff] }
 0x15d   : > { %10588 = vmatmul.mubr.bf16.gmra.mxu1 %v845_v55  ;;  %11006 = vmatpush3.bf16.msra.mxu0 %v11850_v33  ;;  %v2345_v55 = vld [vmem:[#allocation2 + $0x11a] sm:$0xff] }
 0x15e   : > { %10591 = vmatprep.mubr.bf16.mxu1 %v846_v11  ;;  %10860 = vmatpush3.bf16.msra.mxu1 %v11847_v47  ;;  %v742_v47 = vld [vmem:[#allocation2 + $0x118] sm:$0xff]  ;;  %v855_v11 = vpack.c.bf16 %v741_v42, %v740_v50  ;;  %v2459_v33 = vpack.c.bf16 %v2346_v45, %v2345_v55 }
 0x15f   : > { %10861 = vmatprep.subr.bf16.mxu1 %v11849_v22  ;;  %11007 = vmatprep.subr.bf16.mxu0 %v11852_v58  ;;  %v758_v50 = vld [vmem:[#allocation2 + $0x1b8] sm:$0xff] }
 0x160   : > { %10736 = vmatmul.mubr.bf16.gmra.mxu0 %v2450_v59  ;;  %v2461_v59 = vpack.c.bf16 %v2350_v26, %v2349_v24  ;;  %v2363_v24 = vld [vmem:[#allocation2 + $0x1ca] sm:$0xff]  ;;  %v2364_v26 = vld [vmem:[#allocation2 + $0x1d2] sm:$0xff] }
 0x161   : > { %10739 = vmatprep.mubr.bf16.mxu0 %v2451_v63  ;;  %11008 = vmatpush3.bf16.msra.mxu0 %v11852_v58  ;;  %v2460_v58 = vpack.c.bf16 %v2348_v34, %v2347_v57  ;;  %v749_v63 = vld [vmem:[#allocation2 + $0x158] sm:$0xff] }
 0x162   : > { %10862 = vmatpush3.bf16.msra.mxu1 %v11849_v22  ;;  %11009 = vmatprep.subr.bf16.mxu0 %v11854_v61  ;;  %v856_v22 = vpack.c.bf16 %v743_v53, %v742_v47  ;;  %v2361_v47 = vld [vmem:[#allocation2 + $0x1ba] sm:$0xff]  ;;  %v2362_v53 = vld [vmem:[#allocation2 + $0x1c2] sm:$0xff] }
 0x163   : > { %10863 = vmatprep.subr.bf16.mxu1 %v11851_v2 }
 0x165   : > { %10592 = vmatmul.mubr.bf16.gmra.mxu1 %v847_v51  ;;  %11010 = vmatpush3.bf16.msra.mxu0 %v11854_v61  ;;  %v858_v51 = vpack.c.bf16 %v747_v23, %v746_v35  ;;  %v760_v35 = vld [vmem:[#allocation2 + $0x1c8] sm:$0xff]  ;;  %v761_v23 = vld [vmem:[#allocation2 + $0x1d0] sm:$0xff] }
 0x166   : > { %10595 = vmatprep.mubr.bf16.mxu1 %v848_v60  ;;  %10864 = vmatpush3.bf16.msra.mxu1 %v11851_v2  ;;  %v857_v2 = vpack.c.bf16 %v745_v46, %v744_v12  ;;  %v748_v60 = vld [vmem:[#allocation2 + $0x150] sm:$0xff] }
 0x167   : > { %10865 = vmatprep.subr.bf16.mxu1 %v11853_v54  ;;  %v859_v29 = vpack.c.bf16 %v749_v63, %v748_v60  ;;  %11011 = vmatprep.subr.bf16.mxu0 %v11856_v31  ;;  %v2365_v60 = vld [vmem:[#allocation2 + $0x1e2] sm:$0xff]  ;;  %v2366_v63 = vld [vmem:[#allocation2 + $0x1ea] sm:$0xff] }
 0x168   : > { %10740 = vmatmul.mubr.bf16.gmra.mxu0 %v2452_v27  ;;  %v2463_v27 = vpack.c.bf16 %v2354_v3, %v2353_v1  ;;  %v2469_v3 = vpack.c.bf16 %v2366_v63, %v2365_v60 }
 0x169   : > { %10743 = vmatprep.mubr.bf16.mxu0 %v2453_v43  ;;  %v13156_v43 = vpop.f32.mrf.mxu1  ;;  %11012 = vmatpush3.bf16.msra.mxu0 %v11856_v31  ;;  %v2470_v31 = vpack.c.bf16 %v2368_v8, %v2367_v44 }
 0x16a   : > { %10866 = vmatpush3.bf16.msra.mxu1 %v11853_v54  ;;  %15265 = vst [vmem:[#allocation17_spill] sm:$0xff] %v13156_v43  ;;  %v862_v54 = vpack.c.bf16 %v755_v15, %v754_v9  ;;  %v766_v9 = vld [vmem:[#allocation2 + $0x208] sm:$0xff]  ;;  %v797_v43 = vld [vmem:[#allocation2 + $0x338] sm:$0xff] }
 0x16b   : > { %v13160_v14 = vpop.f32.mrf.mxu1 }
 0x16c   : > { %15266 = vst [vmem:[#allocation18_spill] sm:$0xff] %v13160_v14 }
 0x16d   : > { %10596 = vmatmul.mubr.bf16.gmra.mxu1 %v849_v4  ;;  %v860_v4 = vpack.c.bf16 %v751_v52, %v750_v10  ;;  %v13164_v37 = vpop.f32.mrf.mxu1  ;;  %v865_v10 = vpack.c.bf16 %v761_v23, %v760_v35  ;;  %v2468_v52 = vpack.c.bf16 %v2364_v26, %v2363_v24  ;;  %v771_v23 = vld [vmem:[#allocation2 + $0x238] sm:$0xff] }
 0x16e   : > { %10599 = vmatprep.mubr.bf16.mxu1 %v850_v41  ;;  %v13154_v41 = vpop.f32.mrf.mxu0  ;;  %15267 = vst [vmem:[#allocation19_spill] sm:$0xff] %v13164_v37  ;;  %v2373_v24 = vld [vmem:[#allocation2 + $0x232] sm:$0xff]  ;;  %v2374_v26 = vld [vmem:[#allocation2 + $0x23a] sm:$0xff] }
 0x16f   : > { %v13168_v48 = vpop.f32.mrf.mxu1 }
 0x170   : > { %10744 = vmatmul.mubr.bf16.gmra.mxu0 %v2454_v28  ;;  %v13158_v13 = vpop.f32.mrf.mxu0  ;;  %v2358_v28 = vld [vmem:[#allocation2 + $0x19a] sm:$0xff]  ;;  %15268 = vst [vmem:[#allocation20_spill] sm:$0xff] %v13168_v48  ;;  %v2395_v48 = vld [vmem:[#allocation2 + $0x30a] sm:$0xff] }
 0x171   : > { %10747 = vmatprep.mubr.bf16.mxu0 %v2455_v32 }
 0x172   : > { %v13162_v32 = vpop.f32.mrf.mxu0 }
 0x174   : > { %v13166_v38 = vpop.f32.mrf.mxu0  ;;  %v13172_v61 = vpop.f32.mrf.mxu1 }
 0x175   : > { %10600 = vmatmul.mubr.bf16.gmra.mxu1 %v851_v16  ;;  %v2357_v16 = vld [vmem:[#allocation2 + $0x192] sm:$0xff]  ;;  %15269 = vst [vmem:[#allocation21_spill] sm:$0xff] %v13172_v61 }
 0x176   : > { %10603 = vmatprep.mubr.bf16.mxu1 %v852_v17  ;;  %v11855_v17 = vld [vmem:[#allocation6 + $0xc8] sm:$0xff]   ;;  %v2465_v18 = vpack.c.bf16 %v2358_v28, %v2357_v16  ;;  %v13170_v49 = vpop.f32.mrf.mxu0  ;;  %v13176_v21 = vpop.f32.mrf.mxu1  ;;  %v767_v28 = vld [vmem:[#allocation2 + $0x210] sm:$0xff] }
 0x177   : > { %10867 = vmatprep.subr.bf16.mxu1 %v11855_v17  ;;  %15270 = vst [vmem:[#allocation22_spill] sm:$0xff] %v13176_v21  ;;  %v793_v61 = vld [vmem:[#allocation2 + $0x310] sm:$0xff] }
 0x178   : > { %10748 = vmatmul.mubr.bf16.gmra.mxu0 %v2456_v56  ;;  %10868 = vmatpush3.bf16.msra.mxu1 %v11855_v17  ;;  %v757_v56 = vld [vmem:[#allocation2 + $0x1a8] sm:$0xff]  ;;  %v13174_v42 = vpop.f32.mrf.mxu0  ;;  %v13180_v45 = vpop.f32.mrf.mxu1 }
 0x179   : > { %10751 = vmatprep.mubr.bf16.mxu0 %v2457_v30  ;;  %v2360_v30 = vld [vmem:[#allocation2 + $0x1aa] sm:$0xff]  ;;  %15271 = vst [vmem:[#allocation23_spill] sm:$0xff] %v13180_v45 }
 0x17a   : > { %v13178_v55 = vpop.f32.mrf.mxu0  ;;  %v13184_v46 = vpop.f32.mrf.mxu1  ;;  %v2369_v17 = vld [vmem:[#allocation2 + $0x20a] sm:$0xff] }
 0x17b   : > { %15272 = vst [vmem:[#allocation24_spill] sm:$0xff] %v13184_v46 }
 0x17c   : > { %v13182_v12 = vpop.f32.mrf.mxu0 }
 0x17d   : > { %10604 = vmatmul.mubr.bf16.gmra.mxu1 %v853_v62  ;;  %v756_v62 = vld [vmem:[#allocation2 + $0x1a0] sm:$0xff] }
 0x17e   : > { %10607 = vmatprep.mubr.bf16.mxu1 %v854_v6  ;;  %v2359_v6 = vld [vmem:[#allocation2 + $0x1a2] sm:$0xff] }
 0x180   : > { %10752 = vmatmul.mubr.bf16.gmra.mxu0 %v2458_v19  ;;  %v2466_v19 = vpack.c.bf16 %v2360_v30, %v2359_v6 }
 0x181   : > { %10755 = vmatprep.mubr.bf16.mxu0 %v2459_v33  ;;  %v2467_v33 = vpack.c.bf16 %v2362_v53, %v2361_v47  ;;  %v768_v47 = vld [vmem:[#allocation2 + $0x218] sm:$0xff]  ;;  %v769_v53 = vld [vmem:[#allocation2 + $0x220] sm:$0xff] }
 0x182   : > { %v869_v63 = vpack.c.bf16 %v769_v53, %v768_v47  ;;  %v2377_v47 = vld [vmem:[#allocation2 + $0x25a] sm:$0xff]  ;;  %v2378_v53 = vld [vmem:[#allocation2 + $0x262] sm:$0xff] }
 0x185   : > { %10608 = vmatmul.mubr.bf16.gmra.mxu1 %v855_v11  ;;  %v863_v11 = vpack.c.bf16 %v757_v56, %v756_v62  ;;  %v868_v62 = vpack.c.bf16 %v767_v28, %v766_v9  ;;  %v772_v9 = vld [vmem:[#allocation2 + $0x240] sm:$0xff]  ;;  %v773_v28 = vld [vmem:[#allocation2 + $0x248] sm:$0xff] }
 0x186   : > { %10611 = vmatprep.mubr.bf16.mxu1 %v856_v22  ;;  %v864_v22 = vpack.c.bf16 %v759_v7, %v758_v50 }
 0x188   : > { %10756 = vmatmul.mubr.bf16.gmra.mxu0 %v2460_v58 }
 0x189   : > { %10759 = vmatprep.mubr.bf16.mxu0 %v2461_v59  ;;  %v763_v59 = vld [vmem:[#allocation2 + $0x1e8] sm:$0xff] }
 0x18d   : > { %10612 = vmatmul.mubr.bf16.gmra.mxu1 %v857_v2  ;;  %v762_v2 = vld [vmem:[#allocation2 + $0x1e0] sm:$0xff] }
 0x18e   : > { %10615 = vmatprep.mubr.bf16.mxu1 %v858_v51  ;;  %v866_v1 = vpack.c.bf16 %v763_v59, %v762_v2  ;;  %v11857_v2 = vld [vmem:[#allocation6 + $0xc0] sm:$0xff]  }
 0x18f   : > { %10869 = vmatprep.subr.bf16.mxu1 %v11857_v2 }
 0x190   : > { %10760 = vmatmul.mubr.bf16.gmra.mxu0 %v2462_v36  ;;  %10870 = vmatpush3.bf16.msra.mxu1 %v11857_v2 }
 0x191   : > { %10763 = vmatprep.mubr.bf16.mxu0 %v2463_v27 }
 0x195   : > { %10616 = vmatmul.mubr.bf16.gmra.mxu1 %v859_v29 }
 0x196   : > { %10619 = vmatprep.mubr.bf16.mxu1 %v860_v4 }
 0x198   : > { %10764 = vmatmul.mubr.bf16.gmra.mxu0 %v2464_v20 }
 0x199   : > { %10767 = vmatprep.mubr.bf16.mxu0 %v2465_v18  ;;  %v867_v18 = vpack.c.bf16 %v765_v5, %v764_v40 }
 0x19a   : > { %v13188_v34 = vpop.f32.mrf.mxu1 }
 0x19b   : > { %v13186_v57 = vpop.f32.mrf.mxu0  ;;  %15273 = vst [vmem:[#allocation25_spill] sm:$0xff] %v13188_v34 }
 0x19c   : > { %v13192_v51 = vpop.f32.mrf.mxu1 }
 0x19d   : > { %10620 = vmatmul.mubr.bf16.gmra.mxu1 %v861_v39  ;;  %v13190_v58 = vpop.f32.mrf.mxu0  ;;  %15274 = vst [vmem:[#allocation26_spill] sm:$0xff] %v13192_v51  ;;  %v2370_v39 = vld [vmem:[#allocation2 + $0x212] sm:$0xff] }
 0x19e   : > { %10623 = vmatprep.mubr.bf16.mxu1 %v862_v54  ;;  %v13196_v25 = vpop.f32.mrf.mxu1  ;;  %v2471_v56 = vpack.c.bf16 %v2370_v39, %v2369_v17  ;;  %v2375_v17 = vld [vmem:[#allocation2 + $0x242] sm:$0xff]  ;;  %v2376_v39 = vld [vmem:[#allocation2 + $0x24a] sm:$0xff] }
 0x19f   : > { %v13194_v0 = vpop.f32.mrf.mxu0  ;;  %15275 = vst [vmem:[#allocation28_spill] sm:$0xff] %v13196_v25 }
 0x1a0   : > { %10768 = vmatmul.mubr.bf16.gmra.mxu0 %v2466_v19  ;;  %v13200_v36 = vpop.f32.mrf.mxu1  ;;  %v2372_v19 = vld [vmem:[#allocation2 + $0x222] sm:$0xff] }
 0x1a1   : > { %10771 = vmatprep.mubr.bf16.mxu0 %v2467_v33  ;;  %v13198_v29 = vpop.f32.mrf.mxu0  ;;  %15276 = vst [vmem:[#allocation27_spill] sm:$0xff] %v13200_v36 }
 0x1a5   : > { %10624 = vmatmul.mubr.bf16.gmra.mxu1 %v863_v11  ;;  %v2371_v11 = vld [vmem:[#allocation2 + $0x21a] sm:$0xff] }
 0x1a6   : > { %10627 = vmatprep.mubr.bf16.mxu1 %v864_v22  ;;  %v13204_v27 = vpop.f32.mrf.mxu1  ;;  %v770_v22 = vld [vmem:[#allocation2 + $0x230] sm:$0xff] }
 0x1a7   : > { %15277 = vst [vmem:[#allocation29_spill] sm:$0xff] %v13204_v27 }
 0x1a8   : > { %v13202_v4 = vpop.f32.mrf.mxu0  ;;  %10772 = vmatmul.mubr.bf16.gmra.mxu0 %v2468_v52  ;;  %v13208_v16 = vpop.f32.mrf.mxu1  ;;  %v870_v52 = vpack.c.bf16 %v771_v23, %v770_v22  ;;  %v871_v22 = vpack.c.bf16 %v773_v28, %v772_v9  ;;  %v2474_v23 = vpack.c.bf16 %v2376_v39, %v2375_v17  ;;  %v778_v9 = vld [vmem:[#allocation2 + $0x280] sm:$0xff]  ;;  %v779_v39 = vld [vmem:[#allocation2 + $0x288] sm:$0xff] }
 0x1a9   : > { %10775 = vmatprep.mubr.bf16.mxu0 %v2469_v3  ;;  %15278 = vst [vmem:[#allocation31_spill] sm:$0xff] %v13208_v16  ;;  %v11858_v3 = vld [vmem:[#allocation6 + $0x100] sm:$0xff]   ;;  %v2387_v16 = vld [vmem:[#allocation2 + $0x2ba] sm:$0xff] }
 0x1aa   : > { %v13206_v15 = vpop.f32.mrf.mxu0  ;;  %v13212_v54 = vpop.f32.mrf.mxu1  ;;  %11013 = vmatprep.subr.bf16.mxu0 %v11858_v3 }
 0x1ab   : > { %15279 = vst [vmem:[#allocation30_spill] sm:$0xff] %v13212_v54  ;;  %11014 = vmatpush3.bf16.msra.mxu0 %v11858_v3  ;;  %v777_v3 = vld [vmem:[#allocation2 + $0x270] sm:$0xff]  ;;  %v785_v54 = vld [vmem:[#allocation2 + $0x2c0] sm:$0xff] }
 0x1ac   : > { %v13210_v20 = vpop.f32.mrf.mxu0  ;;  %v13216_v30 = vpop.f32.mrf.mxu1 }
 0x1ad   : > { %10628 = vmatmul.mubr.bf16.gmra.mxu1 %v865_v10  ;;  %15280 = vst [vmem:[#allocation33_spill] sm:$0xff] %v13216_v30  ;;  %v2472_v10 = vpack.c.bf16 %v2372_v19, %v2371_v11 }
 0x1ae   : > { %10631 = vmatprep.mubr.bf16.mxu1 %v866_v1  ;;  %v13214_v6 = vpop.f32.mrf.mxu0  ;;  %v2473_v1 = vpack.c.bf16 %v2374_v26, %v2373_v24  ;;  %v2475_v26 = vpack.c.bf16 %v2378_v53, %v2377_v47 }
 0x1b0   : > { %v13218_v50 = vpop.f32.mrf.mxu0  ;;  %10776 = vmatmul.mubr.bf16.gmra.mxu0 %v2470_v31 }
 0x1b1   : > { %10779 = vmatprep.mubr.bf16.mxu0 %v2471_v56  ;;  %v775_v56 = vld [vmem:[#allocation2 + $0x260] sm:$0xff] }
 0x1b2   : > { %v13222_v33 = vpop.f32.mrf.mxu0 }
 0x1b4   : > { %v13226_v59 = vpop.f32.mrf.mxu0 }
 0x1b5   : > { %v13220_v7 = vpop.f32.mrf.mxu1  ;;  %10632 = vmatmul.mubr.bf16.gmra.mxu1 %v867_v18  ;;  %v774_v18 = vld [vmem:[#allocation2 + $0x258] sm:$0xff] }
 0x1b6   : > { %15281 = vst [vmem:[#allocation32_spill] sm:$0xff] %v13220_v7  ;;  %10635 = vmatprep.mubr.bf16.mxu1 %v868_v62  ;;  %v13230_v40 = vpop.f32.mrf.mxu0  ;;  %v872_v24 = vpack.c.bf16 %v775_v56, %v774_v18  ;;  %v2381_v18 = vld [vmem:[#allocation2 + $0x282] sm:$0xff]  ;;  %v2382_v56 = vld [vmem:[#allocation2 + $0x28a] sm:$0xff] }
 0x1b7   : > { %v13224_v35 = vpop.f32.mrf.mxu1 }
 0x1b8   : > { %15282 = vst [vmem:[#allocation34_spill] sm:$0xff] %v13224_v35  ;;  %v13234_v44 = vpop.f32.mrf.mxu0  ;;  %10780 = vmatmul.mubr.bf16.gmra.mxu0 %v2472_v10  ;;  %v2383_v35 = vld [vmem:[#allocation2 + $0x292] sm:$0xff] }
 0x1b9   : > { %v13228_v60 = vpop.f32.mrf.mxu1  ;;  %10783 = vmatprep.mubr.bf16.mxu0 %v2473_v1  ;;  %v776_v1 = vld [vmem:[#allocation2 + $0x268] sm:$0xff] }
 0x1ba   : > { %15283 = vst [vmem:[#allocation35_spill] sm:$0xff] %v13228_v60  ;;  %v13238_v31 = vpop.f32.mrf.mxu0  ;;  %v781_v60 = vld [vmem:[#allocation2 + $0x298] sm:$0xff] }
 0x1bb   : > { %v13232_v5 = vpop.f32.mrf.mxu1 }
 0x1bc   : > { %15284 = vst [vmem:[#allocation36_spill] sm:$0xff] %v13232_v5  ;;  %v13242_v11 = vpop.f32.mrf.mxu0 }
 0x1bd   : > { %v13236_v8 = vpop.f32.mrf.mxu1  ;;  %10636 = vmatmul.mubr.bf16.gmra.mxu1 %v869_v63 }
 0x1be   : > { %15285 = vst [vmem:[#allocation37_spill] sm:$0xff] %v13236_v8  ;;  %10639 = vmatprep.mubr.bf16.mxu1 %v870_v52  ;;  %v13246_v2 = vpop.f32.mrf.mxu0 }
 0x1bf   : > { %v13240_v62 = vpop.f32.mrf.mxu1 }
 0x1c0   : > { %15286 = vst [vmem:[#allocation39_spill] sm:$0xff] %v13240_v62  ;;  %v13250_v10 = vpop.f32.mrf.mxu0  ;;  %10784 = vmatmul.mubr.bf16.gmra.mxu0 %v2474_v23  ;;  %v2379_v62 = vld [vmem:[#allocation2 + $0x26a] sm:$0xff] }
 0x1c1   : > { %v13244_v19 = vpop.f32.mrf.mxu1  ;;  %10787 = vmatprep.mubr.bf16.mxu0 %v2475_v26 }
 0x1c2   : > { %15287 = vst [vmem:[#allocation38_spill] sm:$0xff] %v13244_v19  ;;  %v2380_v19 = vld [vmem:[#allocation2 + $0x272] sm:$0xff]  ;;  %v13254_v28 = vpop.f32.mrf.mxu0 }
 0x1c3   : > { %v13248_v63 = vpop.f32.mrf.mxu1  ;;  %v2476_v23 = vpack.c.bf16 %v2380_v19, %v2379_v62 }
 0x1c4   : > { %15288 = vst [vmem:[#allocation41_spill] sm:$0xff] %v13248_v63  ;;  %v13258_v47 = vpop.f32.mrf.mxu0  ;;  %v2477_v63 = vpack.c.bf16 %v2382_v56, %v2381_v18 }
 0x1c5   : > { %v13252_v52 = vpop.f32.mrf.mxu1  ;;  %10640 = vmatmul.mubr.bf16.gmra.mxu1 %v871_v22  ;;  %v873_v22 = vpack.c.bf16 %v777_v3, %v776_v1  ;;  %v782_v1 = vld [vmem:[#allocation2 + $0x2a8] sm:$0xff]  ;;  %v783_v3 = vld [vmem:[#allocation2 + $0x2b0] sm:$0xff] }
 0x1c6   : > { %15289 = vst [vmem:[#allocation40_spill] sm:$0xff] %v13252_v52  ;;  %10643 = vmatprep.mubr.bf16.mxu1 %v872_v24  ;;  %v874_v52 = vpack.c.bf16 %v779_v39, %v778_v9  ;;  %v13262_v24 = vpop.f32.mrf.mxu0  ;;  %v2385_v9 = vld [vmem:[#allocation2 + $0x2aa] sm:$0xff]  ;;  %v2386_v39 = vld [vmem:[#allocation2 + $0x2b2] sm:$0xff] }
 0x1c7   : > { %v13256_v17 = vpop.f32.mrf.mxu1 }
 0x1c8   : > { %15290 = vst [vmem:[#allocation42_spill] sm:$0xff] %v13256_v17  ;;  %v13266_v8 = vpop.f32.mrf.mxu0  ;;  %10788 = vmatmul.mubr.bf16.gmra.mxu0 %v2476_v23  ;;  %v780_v17 = vld [vmem:[#allocation2 + $0x290] sm:$0xff] }
 0x1c9   : > { %v13260_v53 = vpop.f32.mrf.mxu1  ;;  %10791 = vmatprep.mubr.bf16.mxu0 %v2477_v63 }
 0x1ca   : > { %15291 = vst [vmem:[#allocation43_spill] sm:$0xff] %v13260_v53  ;;  %v2384_v53 = vld [vmem:[#allocation2 + $0x29a] sm:$0xff]  ;;  %v13270_v62 = vpop.f32.mrf.mxu0 }
 0x1cb   : > { %v13264_v26 = vpop.f32.mrf.mxu1  ;;  %v2478_v23 = vpack.c.bf16 %v2384_v53, %v2383_v35  ;;  %v787_v53 = vld [vmem:[#allocation2 + $0x2d8] sm:$0xff] }
 0x1cc   : > { %15292 = vst [vmem:[#allocation44_spill] sm:$0xff] %v13264_v26  ;;  %v13274_v18 = vpop.f32.mrf.mxu0  ;;  %v2479_v26 = vpack.c.bf16 %v2386_v39, %v2385_v9  ;;  %v13290_v9 = vld [vmem:[#allocation6 + $0x178] sm:$0xff]  }
 0x1cd   : > { %v13268_v5 = vpop.f32.mrf.mxu1  ;;  %10644 = vmatmul.mubr.bf16.gmra.mxu1 %v873_v22  ;;  %v875_v22 = vpack.c.bf16 %v781_v60, %v780_v17  ;;  %v786_v60 = vld [vmem:[#allocation2 + $0x2d0] sm:$0xff]  ;;  %11143 = vmatprep.subr.bf16.mxu1 %v13290_v9 }
 0x1ce   : > { %15293 = vst [vmem:[#allocation45_spill] sm:$0xff] %v13268_v5  ;;  %10647 = vmatprep.mubr.bf16.mxu1 %v874_v52  ;;  %v876_v5 = vpack.c.bf16 %v783_v3, %v782_v1  ;;  %v13278_v52 = vpop.f32.mrf.mxu0  ;;  %v2389_v1 = vld [vmem:[#allocation2 + $0x2d2] sm:$0xff]  ;;  %v2390_v3 = vld [vmem:[#allocation2 + $0x2da] sm:$0xff] }
 0x1cf   : > { %v13272_v19 = vpop.f32.mrf.mxu1 }
 0x1d0   : > { %15294 = vst [vmem:[#allocation46_spill] sm:$0xff] %v13272_v19  ;;  %v13282_v7 = vpop.f32.mrf.mxu0  ;;  %10792 = vmatmul.mubr.bf16.gmra.mxu0 %v2478_v23  ;;  %v784_v19 = vld [vmem:[#allocation2 + $0x2b8] sm:$0xff] }
 0x1d1   : > { %v13276_v56 = vpop.f32.mrf.mxu1  ;;  %10795 = vmatprep.mubr.bf16.mxu0 %v2479_v26  ;;  %v877_v23 = vpack.c.bf16 %v785_v54, %v784_v19  ;;  %v2481_v26 = vpack.c.bf16 %v2390_v3, %v2389_v1  ;;  %v788_v54 = vld [vmem:[#allocation2 + $0x2e0] sm:$0xff] }
 0x1d2   : > { %15295 = vst [vmem:[#allocation47_spill] sm:$0xff] %v13276_v56  ;;  %v2388_v56 = vld [vmem:[#allocation2 + $0x2c2] sm:$0xff]  ;;  %v13286_v35 = vpop.f32.mrf.mxu0 }
 0x1d3   : > { %v13280_v63 = vpop.f32.mrf.mxu1  ;;  %v2391_v19 = vld [vmem:[#allocation2 + $0x2e2] sm:$0xff] }
 0x1d4   : > { %15296 = vst [vmem:[#allocation48_spill] sm:$0xff] %v13280_v63  ;;  %v13292_v39 = vpop.f32.mrf.mxu0  ;;  %v13297_v63 = vld [vmem:[#allocation6 + $0x1b8] sm:$0xff]   ;;  %v791_v3 = vld [vmem:[#allocation2 + $0x300] sm:$0xff] }
 0x1d5   : > { %v13284_v30 = vpop.f32.mrf.mxu1  ;;  %10648 = vmatmul.mubr.bf16.gmra.mxu1 %v875_v22  ;;  %11287 = vmatprep.subr.bf16.mxu0 %v13297_v63 }
 0x1d6   : > { %15297 = vst [vmem:[#allocation49_spill] sm:$0xff] %v13284_v30  ;;  %10651 = vmatprep.mubr.bf16.mxu1 %v876_v5  ;;  %v2480_v30 = vpack.c.bf16 %v2388_v56, %v2387_v16  ;;  %v878_v5 = vpack.c.bf16 %v787_v53, %v786_v60  ;;  %v13299_v27 = vpop.f32.mrf.mxu0  ;;  %v789_v16 = vld [vmem:[#allocation2 + $0x2e8] sm:$0xff]  ;;  %v790_v60 = vld [vmem:[#allocation2 + $0x2f8] sm:$0xff] }
 0x1d7   : > { %v13288_v17 = vpop.f32.mrf.mxu1  ;;  %v2392_v56 = vld [vmem:[#allocation2 + $0x2ea] sm:$0xff] }
 0x1d8   : > { %15298 = vst [vmem:[#allocation50_spill] sm:$0xff] %v13288_v17  ;;  %v13304_v36 = vpop.f32.mrf.mxu0  ;;  %10796 = vmatmul.mubr.bf16.gmra.mxu0 %v2480_v30  ;;  %v2482_v30 = vpack.c.bf16 %v2392_v56, %v2391_v19  ;;  %v2397_v19 = vld [vmem:[#allocation2 + $0x322] sm:$0xff]  ;;  %v2398_v56 = vld [vmem:[#allocation2 + $0x32a] sm:$0xff] }
 0x1d9   : > { %v13294_v22 = vpop.f32.mrf.mxu1  ;;  %10799 = vmatprep.mubr.bf16.mxu0 %v2481_v26 }
 0x1da   : > { %15299 = vst [vmem:[#allocation51_spill] sm:$0xff] %v13294_v22  ;;  %v13308_v53 = vpop.f32.mrf.mxu0  ;;  %v2394_v22 = vld [vmem:[#allocation2 + $0x302] sm:$0xff] }
 0x1db   : > { %v13301_v17 = vpop.f32.mrf.mxu1  ;;  %15302 = vst [vmem:[#allocation54_spill] sm:$0xff] %v13308_v53 }
 0x1dc   : > { %15300 = vst [vmem:[#allocation52_spill] sm:$0xff] %v13301_v17  ;;  %v2393_v17 = vld [vmem:[#allocation2 + $0x2fa] sm:$0xff]  ;;  %v13312_v51 = vpop.f32.mrf.mxu0 }
 0x1dd   : > { %v13306_v25 = vpop.f32.mrf.mxu1  ;;  %10652 = vmatmul.mubr.bf16.gmra.mxu1 %v877_v23  ;;  %15304 = vst [vmem:[#allocation56_spill] sm:$0xff] %v13312_v51  ;;  %v879_v23 = vpack.c.bf16 %v789_v16, %v788_v54  ;;  %v2483_v46 = vpack.c.bf16 %v2394_v22, %v2393_v17  ;;  %v794_v54 = vld [vmem:[#allocation2 + $0x320] sm:$0xff]  ;;  %v795_v22 = vld [vmem:[#allocation2 + $0x328] sm:$0xff] }
 0x1de   : > { %15301 = vst [vmem:[#allocation53_spill] sm:$0xff] %v13306_v25  ;;  %10655 = vmatprep.mubr.bf16.mxu1 %v878_v5  ;;  %v880_v25 = vpack.c.bf16 %v791_v3, %v790_v60  ;;  %v13316_v5 = vpop.f32.mrf.mxu0 }
 0x1df   : > { %v13310_v1 = vpop.f32.mrf.mxu1  ;;  %15306 = vst [vmem:[#allocation58_spill] sm:$0xff] %v13316_v5 }
 0x1e0   : > { %15303 = vst [vmem:[#allocation55_spill] sm:$0xff] %v13310_v1  ;;  %v13320_v45 = vpop.f32.mrf.mxu0  ;;  %10800 = vmatmul.mubr.bf16.gmra.mxu0 %v2482_v30  ;;  %v792_v1 = vld [vmem:[#allocation2 + $0x308] sm:$0xff] }
 0x1e1   : > { %v13314_v34 = vpop.f32.mrf.mxu1  ;;  %15308 = vst [vmem:[#allocation60_spill] sm:$0xff] %v13320_v45  ;;  %10803 = vmatprep.mubr.bf16.mxu0 %v2483_v46 }
 0x1e2   : > { %15305 = vst [vmem:[#allocation57_spill] sm:$0xff] %v13314_v34  ;;  %v2396_v34 = vld [vmem:[#allocation2 + $0x312] sm:$0xff]  ;;  %v13324_v16 = vpop.f32.mrf.mxu0 }
 0x1e3   : > { %v13318_v26 = vpop.f32.mrf.mxu1  ;;  %15310 = vst [vmem:[#allocation62_spill] sm:$0xff] %v13324_v16  ;;  %v2484_v30 = vpack.c.bf16 %v2396_v34, %v2395_v48 }
 0x1e4   : > { %15307 = vst [vmem:[#allocation59_spill] sm:$0xff] %v13318_v26  ;;  %v13328_v60 = vpop.f32.mrf.mxu0  ;;  %v2485_v26 = vpack.c.bf16 %v2398_v56, %v2397_v19 }
 0x1e5   : > { %v13322_v21 = vpop.f32.mrf.mxu1  ;;  %10656 = vmatmul.mubr.bf16.gmra.mxu1 %v879_v23  ;;  %15312 = vst [vmem:[#allocation64_spill] sm:$0xff] %v13328_v60  ;;  %v881_v23 = vpack.c.bf16 %v793_v61, %v792_v1  ;;  %v2399_v60 = vld [vmem:[#allocation2 + $0x332] sm:$0xff]  ;;  %v798_v61 = vld [vmem:[#allocation2 + $0x348] sm:$0xff] }
 0x1e6   : > { %15309 = vst [vmem:[#allocation61_spill] sm:$0xff] %v13322_v21  ;;  %10659 = vmatprep.mubr.bf16.mxu1 %v880_v25  ;;  %v882_v21 = vpack.c.bf16 %v795_v22, %v794_v54  ;;  %v13332_v25 = vpop.f32.mrf.mxu0  ;;  %v799_v1 = vld [vmem:[#allocation2 + $0x350] sm:$0xff] }
 0x1e7   : > { %v13326_v17 = vpop.f32.mrf.mxu1  ;;  %15314 = vst [vmem:[#allocation66_spill] sm:$0xff] %v13332_v25  ;;  %v2401_v54 = vld [vmem:[#allocation2 + $0x34a] sm:$0xff]  ;;  %v2402_v22 = vld [vmem:[#allocation2 + $0x352] sm:$0xff]  ;;  %v801_v25 = vld [vmem:[#allocation2 + $0x360] sm:$0xff] }
 0x1e8   : > { %15311 = vst [vmem:[#allocation63_spill] sm:$0xff] %v13326_v17  ;;  %v13336_v37 = vpop.f32.mrf.mxu0  ;;  %10804 = vmatmul.mubr.bf16.gmra.mxu0 %v2484_v30  ;;  %v796_v17 = vld [vmem:[#allocation2 + $0x330] sm:$0xff] }
 0x1e9   : > { %v13330_v3 = vpop.f32.mrf.mxu1  ;;  %15316 = vst [vmem:[#allocation68_spill] sm:$0xff] %v13336_v37  ;;  %10807 = vmatprep.mubr.bf16.mxu0 %v2485_v26 }
 0x1ea   : > { %15313 = vst [vmem:[#allocation65_spill] sm:$0xff] %v13330_v3  ;;  %v2400_v3 = vld [vmem:[#allocation2 + $0x33a] sm:$0xff]  ;;  %v13340_v48 = vpop.f32.mrf.mxu0 }
 0x1eb   : > { %v13334_v46 = vpop.f32.mrf.mxu1  ;;  %15318 = vst [vmem:[#allocation70_spill] sm:$0xff] %v13340_v48  ;;  %v2486_v30 = vpack.c.bf16 %v2400_v3, %v2399_v60  ;;  %v803_v3 = vld [vmem:[#allocation2 + $0x378] sm:$0xff] }
 0x1ec   : > { %15315 = vst [vmem:[#allocation67_spill] sm:$0xff] %v13334_v46  ;;  %v13344_v19 = vpop.f32.mrf.mxu0  ;;  %v2487_v46 = vpack.c.bf16 %v2402_v22, %v2401_v54 }
 0x1ed   : > { %v13338_v14 = vpop.f32.mrf.mxu1  ;;  %10660 = vmatmul.mubr.bf16.gmra.mxu1 %v881_v23  ;;  %15320 = vst [vmem:[#allocation72_spill] sm:$0xff] %v13344_v19  ;;  %v883_v23 = vpack.c.bf16 %v797_v43, %v796_v17  ;;  %v2403_v19 = vld [vmem:[#allocation2 + $0x35a] sm:$0xff]  ;;  %v802_v43 = vld [vmem:[#allocation2 + $0x370] sm:$0xff] }
 0x1ee   : > { %15317 = vst [vmem:[#allocation69_spill] sm:$0xff] %v13338_v14  ;;  %10663 = vmatprep.mubr.bf16.mxu1 %v882_v21  ;;  %v884_v14 = vpack.c.bf16 %v799_v1, %v798_v61  ;;  %v13348_v21 = vpop.f32.mrf.mxu0  ;;  %v2405_v61 = vld [vmem:[#allocation2 + $0x372] sm:$0xff]  ;;  %v2406_v1 = vld [vmem:[#allocation2 + $0x37a] sm:$0xff] }
 0x1ef   : > { %v13342_v34 = vpop.f32.mrf.mxu1  ;;  %15322 = vst [vmem:[#allocation74_spill] sm:$0xff] %v13348_v21  ;;  %v805_v21 = vld [vmem:[#allocation2 + $0x388] sm:$0xff] }
 0x1f0   : > { %15319 = vst [vmem:[#allocation71_spill] sm:$0xff] %v13342_v34  ;;  %v13352_v37 = vpop.f32.mrf.mxu0  ;;  %10808 = vmatmul.mubr.bf16.gmra.mxu0 %v2486_v30  ;;  %v800_v34 = vld [vmem:[#allocation2 + $0x358] sm:$0xff] }
 0x1f1   : > { %v13346_v56 = vpop.f32.mrf.mxu1  ;;  %15324 = vst [vmem:[#allocation76_spill] sm:$0xff] %v13352_v37  ;;  %10811 = vmatprep.mubr.bf16.mxu0 %v2487_v46 }
 0x1f2   : > { %15321 = vst [vmem:[#allocation73_spill] sm:$0xff] %v13346_v56  ;;  %v2404_v56 = vld [vmem:[#allocation2 + $0x362] sm:$0xff]  ;;  %v13356_v17 = vpop.f32.mrf.mxu0 }
 0x1f3   : > { %v13350_v26 = vpop.f32.mrf.mxu1  ;;  %15326 = vst [vmem:[#allocation78_spill] sm:$0xff] %v13356_v17  ;;  %v2488_v30 = vpack.c.bf16 %v2404_v56, %v2403_v19  ;;  %v807_v56 = vld [vmem:[#allocation2 + $0x3a0] sm:$0xff] }
 0x1f4   : > { %15323 = vst [vmem:[#allocation75_spill] sm:$0xff] %v13350_v26  ;;  %v13360_v54 = vpop.f32.mrf.mxu0  ;;  %v2489_v26 = vpack.c.bf16 %v2406_v1, %v2405_v61 }
 0x1f5   : > { %v13354_v48 = vpop.f32.mrf.mxu1  ;;  %10664 = vmatmul.mubr.bf16.gmra.mxu1 %v883_v23  ;;  %15328 = vst [vmem:[#allocation80_spill] sm:$0xff] %v13360_v54  ;;  %v885_v23 = vpack.c.bf16 %v801_v25, %v800_v34  ;;  %v2407_v54 = vld [vmem:[#allocation2 + $0x382] sm:$0xff]  ;;  %v806_v25 = vld [vmem:[#allocation2 + $0x398] sm:$0xff] }
 0x1f6   : > { %15325 = vst [vmem:[#allocation77_spill] sm:$0xff] %v13354_v48  ;;  %10667 = vmatprep.mubr.bf16.mxu1 %v884_v14  ;;  %v886_v48 = vpack.c.bf16 %v803_v3, %v802_v43  ;;  %v13364_v14 = vpop.f32.mrf.mxu0  ;;  %v2409_v43 = vld [vmem:[#allocation2 + $0x39a] sm:$0xff]  ;;  %v2410_v3 = vld [vmem:[#allocation2 + $0x3a2] sm:$0xff] }
 0x1f7   : > { %v13358_v60 = vpop.f32.mrf.mxu1  ;;  %15330 = vst [vmem:[#allocation82_spill] sm:$0xff] %v13364_v14  ;;  %v809_v14 = vld [vmem:[#allocation2 + $0x3b0] sm:$0xff] }
 0x1f8   : > { %15327 = vst [vmem:[#allocation79_spill] sm:$0xff] %v13358_v60  ;;  %v13368_v37 = vpop.f32.mrf.mxu0  ;;  %10812 = vmatmul.mubr.bf16.gmra.mxu0 %v2488_v30  ;;  %v804_v60 = vld [vmem:[#allocation2 + $0x380] sm:$0xff] }
 0x1f9   : > { %v13362_v22 = vpop.f32.mrf.mxu1  ;;  %15332 = vst [vmem:[#allocation84_spill] sm:$0xff] %v13368_v37  ;;  %10815 = vmatprep.mubr.bf16.mxu0 %v2489_v26 }
 0x1fa   : > { %15329 = vst [vmem:[#allocation81_spill] sm:$0xff] %v13362_v22  ;;  %v2408_v22 = vld [vmem:[#allocation2 + $0x38a] sm:$0xff]  ;;  %v13372_v34 = vpop.f32.mrf.mxu0 }
 0x1fb   : > { %v13366_v46 = vpop.f32.mrf.mxu1  ;;  %15334 = vst [vmem:[#allocation86_spill] sm:$0xff] %v13372_v34  ;;  %v2490_v30 = vpack.c.bf16 %v2408_v22, %v2407_v54  ;;  %v811_v22 = vld [vmem:[#allocation2 + $0x3c8] sm:$0xff] }
 0x1fc   : > { %15331 = vst [vmem:[#allocation83_spill] sm:$0xff] %v13366_v46  ;;  %v13376_v61 = vpop.f32.mrf.mxu0  ;;  %v2491_v46 = vpack.c.bf16 %v2410_v3, %v2409_v43 }
 0x1fd   : > { %v13370_v17 = vpop.f32.mrf.mxu1  ;;  %10668 = vmatmul.mubr.bf16.gmra.mxu1 %v885_v23  ;;  %15336 = vst [vmem:[#allocation88_spill] sm:$0xff] %v13376_v61  ;;  %v887_v23 = vpack.c.bf16 %v805_v21, %v804_v60  ;;  %v2411_v61 = vld [vmem:[#allocation2 + $0x3aa] sm:$0xff]  ;;  %v810_v21 = vld [vmem:[#allocation2 + $0x3c0] sm:$0xff] }
 0x1fe   : > { %15333 = vst [vmem:[#allocation85_spill] sm:$0xff] %v13370_v17  ;;  %10671 = vmatprep.mubr.bf16.mxu1 %v886_v48  ;;  %v888_v17 = vpack.c.bf16 %v807_v56, %v806_v25  ;;  %v13380_v48 = vpop.f32.mrf.mxu0  ;;  %v2413_v25 = vld [vmem:[#allocation2 + $0x3c2] sm:$0xff]  ;;  %v2414_v56 = vld [vmem:[#allocation2 + $0x3ca] sm:$0xff] }
 0x1ff   : > { %v13374_v19 = vpop.f32.mrf.mxu1  ;;  %15338 = vst [vmem:[#allocation90_spill] sm:$0xff] %v13380_v48  ;;  %v813_v48 = vld [vmem:[#allocation2 + $0x3d8] sm:$0xff] }
 0x200   : > { %15335 = vst [vmem:[#allocation87_spill] sm:$0xff] %v13374_v19  ;;  %v13384_v37 = vpop.f32.mrf.mxu0  ;;  %10816 = vmatmul.mubr.bf16.gmra.mxu0 %v2490_v30  ;;  %v808_v19 = vld [vmem:[#allocation2 + $0x3a8] sm:$0xff] }
 0x201   : > { %v13378_v1 = vpop.f32.mrf.mxu1  ;;  %15340 = vst [vmem:[#allocation92_spill] sm:$0xff] %v13384_v37  ;;  %10819 = vmatprep.mubr.bf16.mxu0 %v2491_v46 }
 0x202   : > { %15337 = vst [vmem:[#allocation89_spill] sm:$0xff] %v13378_v1  ;;  %v2412_v1 = vld [vmem:[#allocation2 + $0x3b2] sm:$0xff]  ;;  %v13388_v60 = vpop.f32.mrf.mxu0 }
 0x203   : > { %v13382_v26 = vpop.f32.mrf.mxu1  ;;  %15342 = vst [vmem:[#allocation94_spill] sm:$0xff] %v13388_v60  ;;  %v2492_v30 = vpack.c.bf16 %v2412_v1, %v2411_v61  ;;  %v815_v1 = vld [vmem:[#allocation2 + $0x3f0] sm:$0xff] }
 0x204   : > { %15339 = vst [vmem:[#allocation91_spill] sm:$0xff] %v13382_v26  ;;  %v13392_v43 = vpop.f32.mrf.mxu0  ;;  %v2493_v26 = vpack.c.bf16 %v2414_v56, %v2413_v25 }
 0x205   : > { %v13386_v34 = vpop.f32.mrf.mxu1  ;;  %10672 = vmatmul.mubr.bf16.gmra.mxu1 %v887_v23  ;;  %15344 = vst [vmem:[#allocation96_spill] sm:$0xff] %v13392_v43  ;;  %v889_v23 = vpack.c.bf16 %v809_v14, %v808_v19  ;;  %v2415_v43 = vld [vmem:[#allocation2 + $0x3d2] sm:$0xff]  ;;  %v814_v14 = vld [vmem:[#allocation2 + $0x3e8] sm:$0xff] }
 0x206   : > { %15341 = vst [vmem:[#allocation93_spill] sm:$0xff] %v13386_v34  ;;  %10675 = vmatprep.mubr.bf16.mxu1 %v888_v17  ;;  %v890_v34 = vpack.c.bf16 %v811_v22, %v810_v21  ;;  %v13396_v17 = vpop.f32.mrf.mxu0  ;;  %v2417_v21 = vld [vmem:[#allocation2 + $0x3ea] sm:$0xff]  ;;  %v2418_v22 = vld [vmem:[#allocation2 + $0x3f2] sm:$0xff] }
 0x207   : > { %v13390_v54 = vpop.f32.mrf.mxu1  ;;  %15346 = vst [vmem:[#allocation98_spill] sm:$0xff] %v13396_v17  ;;  %v817_v17 = vld [vmem:[#allocation2 + $0x400] sm:$0xff] }
 0x208   : > { %15343 = vst [vmem:[#allocation95_spill] sm:$0xff] %v13390_v54  ;;  %v13400_v37 = vpop.f32.mrf.mxu0  ;;  %10820 = vmatmul.mubr.bf16.gmra.mxu0 %v2492_v30  ;;  %v812_v54 = vld [vmem:[#allocation2 + $0x3d0] sm:$0xff] }
 0x209   : > { %v13394_v3 = vpop.f32.mrf.mxu1  ;;  %15348 = vst [vmem:[#allocation100_spill] sm:$0xff] %v13400_v37  ;;  %10823 = vmatprep.mubr.bf16.mxu0 %v2493_v26 }
 0x20a   : > { %15345 = vst [vmem:[#allocation97_spill] sm:$0xff] %v13394_v3  ;;  %v2416_v3 = vld [vmem:[#allocation2 + $0x3da] sm:$0xff]  ;;  %v13404_v19 = vpop.f32.mrf.mxu0 }
 0x20b   : > { %v13398_v46 = vpop.f32.mrf.mxu1  ;;  %15350 = vst [vmem:[#allocation102_spill] sm:$0xff] %v13404_v19  ;;  %v2494_v30 = vpack.c.bf16 %v2416_v3, %v2415_v43  ;;  %v819_v3 = vld [vmem:[#allocation2 + $0x418] sm:$0xff] }
 0x20c   : > { %15347 = vst [vmem:[#allocation99_spill] sm:$0xff] %v13398_v46  ;;  %v13408_v25 = vpop.f32.mrf.mxu0  ;;  %v2495_v46 = vpack.c.bf16 %v2418_v22, %v2417_v21 }
 0x20d   : > { %v13402_v60 = vpop.f32.mrf.mxu1  ;;  %10676 = vmatmul.mubr.bf16.gmra.mxu1 %v889_v23  ;;  %15352 = vst [vmem:[#allocation104_spill] sm:$0xff] %v13408_v25  ;;  %v891_v23 = vpack.c.bf16 %v813_v48, %v812_v54  ;;  %v2419_v25 = vld [vmem:[#allocation2 + $0x3fa] sm:$0xff]  ;;  %v818_v48 = vld [vmem:[#allocation2 + $0x410] sm:$0xff] }
 0x20e   : > { %15349 = vst [vmem:[#allocation101_spill] sm:$0xff] %v13402_v60  ;;  %10679 = vmatprep.mubr.bf16.mxu1 %v890_v34  ;;  %v892_v60 = vpack.c.bf16 %v815_v1, %v814_v14  ;;  %v13412_v34 = vpop.f32.mrf.mxu0  ;;  %v2421_v14 = vld [vmem:[#allocation2 + $0x412] sm:$0xff]  ;;  %v2422_v1 = vld [vmem:[#allocation2 + $0x41a] sm:$0xff] }
 0x20f   : > { %v13406_v61 = vpop.f32.mrf.mxu1  ;;  %15354 = vst [vmem:[#allocation106_spill] sm:$0xff] %v13412_v34 }
 0x210   : > { %15351 = vst [vmem:[#allocation103_spill] sm:$0xff] %v13406_v61  ;;  %v10729_v19 = vpop.f32.mrf.mxu0  ;;  %10824 = vmatmul.mubr.bf16.gmra.mxu0 %v2494_v30  ;;  %v816_v61 = vld [vmem:[#allocation2 + $0x3f8] sm:$0xff] }
 0x211   : > { %v13410_v56 = vpop.f32.mrf.mxu1  ;;  %10827 = vmatprep.mubr.bf16.mxu0 %v2495_v46 }
 0x212   : > { %15353 = vst [vmem:[#allocation105_spill] sm:$0xff] %v13410_v56  ;;  %v2420_v56 = vld [vmem:[#allocation2 + $0x402] sm:$0xff]  ;;  %v2608_v43 = vpop.f32.mrf.mxu0 }
 0x213   : > { %v13414_v26 = vpop.f32.mrf.mxu1  ;;  %v2496_v34 = vpack.c.bf16 %v2420_v56, %v2419_v25  ;;  %v2424_v25 = vld [vmem:[#allocation2 + $0x42a] sm:$0xff]  ;;  %v822_v56 = vld [vmem:[#allocation2 + $0x438] sm:$0xff] }
 0x214   : > { %15355 = vst [vmem:[#allocation107_spill] sm:$0xff] %v13414_v26  ;;  %v10730_v30 = vpop.f32.mrf.mxu0  ;;  %v893_v26 = vpack.c.bf16 %v817_v17, %v816_v61 }
 0x215   : > { %v10585_v37 = vpop.f32.mrf.mxu1  ;;  %10680 = vmatmul.mubr.bf16.gmra.mxu1 %v891_v23 }
 0x216   : > { %v1815_v16 = vadd.f32 %v10585_v37, %v13154_v41  ;;  %10683 = vmatprep.mubr.bf16.mxu1 %v892_v60  ;;  %v894_v37 = vpack.c.bf16 %v819_v3, %v818_v48  ;;  %v2497_v60 = vpack.c.bf16 %v2422_v1, %v2421_v14  ;;  %v2611_v5 = vpop.f32.mrf.mxu0  ;;  %v823_v3 = vld [vmem:[#allocation2 + $0x440] sm:$0xff] }
 0x217   : > { %v1806_v54 = vpop.f32.mrf.mxu1  ;;  %v2425_v14 = vld [vmem:[#allocation2 + $0x43a] sm:$0xff] }
 0x218   : > { %v13417_v21 = vadd.f32 %v10729_v19, %v1815_v16  ;;  %v1807_v22 = vadd.f32 %v1806_v54, %v13158_v13  ;;  %v10733_v19 = vpop.f32.mrf.mxu0  ;;  %10828 = vmatmul.mubr.bf16.gmra.mxu0 %v2496_v34  ;;  %v820_v13 = vld [vmem:[#allocation2 + $0x420] sm:$0xff]  ;;  %v821_v54 = vld [vmem:[#allocation2 + $0x428] sm:$0xff] }
 0x219   : > { %v10586_v23 = vpop.f32.mrf.mxu1  ;;  %10831 = vmatprep.mubr.bf16.mxu0 %v2497_v60 }
 0x21a   : > { %v13420_v45 = vadd.f32 %v2608_v43, %v1807_v22  ;;  %v1818_v41 = vadd.f32 %v10586_v23, %v13162_v32  ;;  %v2423_v32 = vld [vmem:[#allocation2 + $0x422] sm:$0xff]  ;;  %v2624_v43 = vpop.f32.mrf.mxu0 }
 0x21b   : > { %v1809_v46 = vpop.f32.mrf.mxu1 }
 0x21c   : > { %v13423_v51 = vadd.f32 %v10730_v30, %v1818_v41  ;;  %v1810_v53 = vadd.f32 %v1809_v46, %v13166_v38  ;;  %v2426_v38 = vld [vmem:[#allocation2 + $0x442] sm:$0xff]  ;;  %v10734_v22 = vpop.f32.mrf.mxu0  ;;  %v896_v30 = vpack.c.bf16 %v823_v3, %v822_v56 }
 0x21d   : > { %v10589_v16 = vpop.f32.mrf.mxu1  ;;  %10684 = vmatmul.mubr.bf16.gmra.mxu1 %v893_v26  ;;  %v2499_v41 = vpack.c.bf16 %v2426_v38, %v2425_v14  ;;  %v827_v3 = vld [vmem:[#allocation2 + $0x468] sm:$0xff] }
 0x21e   : > { %v13426_v17 = vadd.f32 %v2611_v5, %v1810_v53  ;;  %v1831_v61 = vadd.f32 %v10589_v16, %v13170_v49  ;;  %10687 = vmatprep.mubr.bf16.mxu1 %v894_v37  ;;  %v895_v53 = vpack.c.bf16 %v821_v54, %v820_v13  ;;  %v2498_v5 = vpack.c.bf16 %v2424_v25, %v2423_v32  ;;  %v2627_v60 = vpop.f32.mrf.mxu0  ;;  %v2428_v32 = vld [vmem:[#allocation2 + $0x452] sm:$0xff]  ;;  %v826_v25 = vld [vmem:[#allocation2 + $0x460] sm:$0xff] }
 0x21f   : > { %v1822_v48 = vpop.f32.mrf.mxu1  ;;  %v2429_v14 = vld [vmem:[#allocation2 + $0x462] sm:$0xff] }
 0x220   : > { %v13429_v1 = vadd.f32 %v10733_v19, %v1831_v61  ;;  %v1823_v34 = vadd.f32 %v1822_v48, %v13174_v42  ;;  %v10737_v61 = vpop.f32.mrf.mxu0  ;;  %10832 = vmatmul.mubr.bf16.gmra.mxu0 %v2498_v5  ;;  %v824_v42 = vld [vmem:[#allocation2 + $0x448] sm:$0xff]  ;;  %v825_v48 = vld [vmem:[#allocation2 + $0x450] sm:$0xff] }
 0x221   : > { %v10590_v26 = vpop.f32.mrf.mxu1  ;;  %10835 = vmatprep.mubr.bf16.mxu0 %v2499_v41 }
 0x222   : > { %v13432_v23 = vadd.f32 %v2624_v43, %v1823_v34  ;;  %v1834_v49 = vadd.f32 %v10590_v26, %v13178_v55  ;;  %v2427_v55 = vld [vmem:[#allocation2 + $0x44a] sm:$0xff]  ;;  %v2640_v43 = vpop.f32.mrf.mxu0 }
 0x223   : > { %v1825_v37 = vpop.f32.mrf.mxu1  ;;  %v2500_v5 = vpack.c.bf16 %v2428_v32, %v2427_v55  ;;  %v2432_v55 = vld [vmem:[#allocation2 + $0x47a] sm:$0xff]  ;;  %v830_v32 = vld [vmem:[#allocation2 + $0x488] sm:$0xff] }
 0x224   : > { %v13435_v46 = vadd.f32 %v10734_v22, %v1834_v49  ;;  %v1826_v16 = vadd.f32 %v1825_v37, %v13182_v12  ;;  %v2430_v12 = vld [vmem:[#allocation2 + $0x46a] sm:$0xff]  ;;  %v10738_v22 = vpop.f32.mrf.mxu0 }
 0x225   : > { %v10593_v19 = vpop.f32.mrf.mxu1  ;;  %10688 = vmatmul.mubr.bf16.gmra.mxu1 %v895_v53  ;;  %v897_v53 = vpack.c.bf16 %v825_v48, %v824_v42  ;;  %v2501_v41 = vpack.c.bf16 %v2430_v12, %v2429_v14  ;;  %v2433_v14 = vld [vmem:[#allocation2 + $0x48a] sm:$0xff] }
 0x226   : > { %v13438_v13 = vadd.f32 %v2627_v60, %v1826_v16  ;;  %v1847_v54 = vadd.f32 %v10593_v19, %v13186_v57  ;;  %10691 = vmatprep.mubr.bf16.mxu1 %v896_v30  ;;  %v898_v30 = vpack.c.bf16 %v827_v3, %v826_v25  ;;  %v2643_v60 = vpop.f32.mrf.mxu0  ;;  %v831_v3 = vld [vmem:[#allocation2 + $0x490] sm:$0xff] }
 0x227   : > { %v1838_v56 = vpop.f32.mrf.mxu1 }
 0x228   : > { %v13441_v38 = vadd.f32 %v10737_v61, %v1847_v54  ;;  %v1839_v34 = vadd.f32 %v1838_v56, %v13190_v58  ;;  %v10741_v54 = vpop.f32.mrf.mxu0  ;;  %10836 = vmatmul.mubr.bf16.gmra.mxu0 %v2500_v5  ;;  %v828_v58 = vld [vmem:[#allocation2 + $0x470] sm:$0xff]  ;;  %v829_v56 = vld [vmem:[#allocation2 + $0x478] sm:$0xff] }
 0x229   : > { %v10594_v26 = vpop.f32.mrf.mxu1  ;;  %10839 = vmatprep.mubr.bf16.mxu0 %v2501_v41 }
 0x22a   : > { %v13444_v49 = vadd.f32 %v2640_v43, %v1839_v34  ;;  %v1850_v57 = vadd.f32 %v10594_v26, %v13194_v0  ;;  %v2431_v0 = vld [vmem:[#allocation2 + $0x472] sm:$0xff]  ;;  %v2656_v43 = vpop.f32.mrf.mxu0 }
 0x22b   : > { %v1841_v37 = vpop.f32.mrf.mxu1  ;;  %v2502_v5 = vpack.c.bf16 %v2432_v55, %v2431_v0  ;;  %v2436_v0 = vld [vmem:[#allocation2 + $0x4a2] sm:$0xff]  ;;  %v834_v55 = vld [vmem:[#allocation2 + $0x4b0] sm:$0xff] }
 0x22c   : > { %v13447_v16 = vadd.f32 %v10738_v22, %v1850_v57  ;;  %v1842_v19 = vadd.f32 %v1841_v37, %v13198_v29  ;;  %v2434_v29 = vld [vmem:[#allocation2 + $0x492] sm:$0xff]  ;;  %v10742_v22 = vpop.f32.mrf.mxu0 }
 0x22d   : > { %v10597_v61 = vpop.f32.mrf.mxu1  ;;  %10692 = vmatmul.mubr.bf16.gmra.mxu1 %v897_v53  ;;  %v899_v53 = vpack.c.bf16 %v829_v56, %v828_v58  ;;  %v2503_v41 = vpack.c.bf16 %v2434_v29, %v2433_v14  ;;  %v2437_v14 = vld [vmem:[#allocation2 + $0x4b2] sm:$0xff] }
 0x22e   : > { %v13450_v42 = vadd.f32 %v2643_v60, %v1842_v19  ;;  %v1863_v48 = vadd.f32 %v10597_v61, %v13202_v4  ;;  %10695 = vmatprep.mubr.bf16.mxu1 %v898_v30  ;;  %v900_v30 = vpack.c.bf16 %v831_v3, %v830_v32  ;;  %v2659_v60 = vpop.f32.mrf.mxu0  ;;  %v835_v3 = vld [vmem:[#allocation2 + $0x4b8] sm:$0xff] }
 0x22f   : > { %v1854_v25 = vpop.f32.mrf.mxu1 }
 0x230   : > { %v13453_v12 = vadd.f32 %v10741_v54, %v1863_v48  ;;  %v1855_v34 = vadd.f32 %v1854_v25, %v13206_v15  ;;  %v10745_v48 = vpop.f32.mrf.mxu0  ;;  %10840 = vmatmul.mubr.bf16.gmra.mxu0 %v2502_v5  ;;  %v832_v15 = vld [vmem:[#allocation2 + $0x498] sm:$0xff]  ;;  %v833_v25 = vld [vmem:[#allocation2 + $0x4a0] sm:$0xff] }
 0x231   : > { %v10598_v26 = vpop.f32.mrf.mxu1  ;;  %10843 = vmatprep.mubr.bf16.mxu0 %v2503_v41 }
 0x232   : > { %v13456_v57 = vadd.f32 %v2656_v43, %v1855_v34  ;;  %v1866_v4 = vadd.f32 %v10598_v26, %v13210_v20  ;;  %v2435_v20 = vld [vmem:[#allocation2 + $0x49a] sm:$0xff]  ;;  %v2672_v43 = vpop.f32.mrf.mxu0 }
 0x233   : > { %v1857_v37 = vpop.f32.mrf.mxu1  ;;  %v2504_v5 = vpack.c.bf16 %v2436_v0, %v2435_v20  ;;  %v2440_v20 = vld [vmem:[#allocation2 + $0x4ca] sm:$0xff]  ;;  %v838_v0 = vld [vmem:[#allocation2 + $0x4d8] sm:$0xff] }
 0x234   : > { %v13459_v19 = vadd.f32 %v10742_v22, %v1866_v4  ;;  %v1858_v61 = vadd.f32 %v1857_v37, %v13214_v6  ;;  %v2438_v6 = vld [vmem:[#allocation2 + $0x4ba] sm:$0xff]  ;;  %v10746_v22 = vpop.f32.mrf.mxu0 }
 0x235   : > { %v10601_v54 = vpop.f32.mrf.mxu1  ;;  %10696 = vmatmul.mubr.bf16.gmra.mxu1 %v899_v53  ;;  %v901_v53 = vpack.c.bf16 %v833_v25, %v832_v15  ;;  %v2505_v41 = vpack.c.bf16 %v2438_v6, %v2437_v14  ;;  %v2441_v14 = vld [vmem:[#allocation2 + $0x4da] sm:$0xff] }
 0x236   : > { %v13462_v58 = vadd.f32 %v2659_v60, %v1858_v61  ;;  %v1879_v56 = vadd.f32 %v10601_v54, %v13218_v50  ;;  %10699 = vmatprep.mubr.bf16.mxu1 %v900_v30  ;;  %v902_v30 = vpack.c.bf16 %v835_v3, %v834_v55  ;;  %v2675_v60 = vpop.f32.mrf.mxu0  ;;  %v839_v3 = vld [vmem:[#allocation2 + $0x4e0] sm:$0xff] }
 0x237   : > { %v1870_v32 = vpop.f32.mrf.mxu1 }
 0x238   : > { %v13465_v29 = vadd.f32 %v10745_v48, %v1879_v56  ;;  %v1871_v34 = vadd.f32 %v1870_v32, %v13222_v33  ;;  %v10749_v56 = vpop.f32.mrf.mxu0  ;;  %10844 = vmatmul.mubr.bf16.gmra.mxu0 %v2504_v5  ;;  %v836_v33 = vld [vmem:[#allocation2 + $0x4c0] sm:$0xff]  ;;  %v837_v32 = vld [vmem:[#allocation2 + $0x4c8] sm:$0xff] }
 0x239   : > { %v10602_v26 = vpop.f32.mrf.mxu1  ;;  %10847 = vmatprep.mubr.bf16.mxu0 %v2505_v41 }
 0x23a   : > { %v13468_v4 = vadd.f32 %v2672_v43, %v1871_v34  ;;  %v1882_v50 = vadd.f32 %v10602_v26, %v13226_v59  ;;  %v2439_v59 = vld [vmem:[#allocation2 + $0x4c2] sm:$0xff]  ;;  %v2688_v43 = vpop.f32.mrf.mxu0 }
 0x23b   : > { %v1873_v37 = vpop.f32.mrf.mxu1  ;;  %v2506_v5 = vpack.c.bf16 %v2440_v20, %v2439_v59  ;;  %v2444_v59 = vld [vmem:[#allocation2 + $0x4f2] sm:$0xff]  ;;  %v3247_v20 = vld [vmem:[#allocation2 + $0x28] sm:$0xff] }
 0x23c   : > { %v13471_v61 = vadd.f32 %v10746_v22, %v1882_v50  ;;  %v1874_v54 = vadd.f32 %v1873_v37, %v13230_v40  ;;  %v2442_v40 = vld [vmem:[#allocation2 + $0x4e2] sm:$0xff]  ;;  %v10750_v22 = vpop.f32.mrf.mxu0 }
 0x23d   : > { %v10605_v48 = vpop.f32.mrf.mxu1  ;;  %10700 = vmatmul.mubr.bf16.gmra.mxu1 %v901_v53  ;;  %v903_v53 = vpack.c.bf16 %v837_v32, %v836_v33  ;;  %v2507_v41 = vpack.c.bf16 %v2442_v40, %v2441_v14  ;;  %v4177_v14 = vld [vmem:[#allocation2 + $0x29] sm:$0xff] }
 0x23e   : > { %v13474_v15 = vadd.f32 %v2675_v60, %v1874_v54  ;;  %v1895_v25 = vadd.f32 %v10605_v48, %v13234_v44  ;;  %10703 = vmatprep.mubr.bf16.mxu1 %v902_v30  ;;  %v904_v30 = vpack.c.bf16 %v839_v3, %v838_v0  ;;  %v2691_v60 = vpop.f32.mrf.mxu0  ;;  %v3248_v3 = vld [vmem:[#allocation2 + $0x30] sm:$0xff] }
 0x23f   : > { %v1886_v55 = vpop.f32.mrf.mxu1 }
 0x240   : > { %v13477_v6 = vadd.f32 %v10749_v56, %v1895_v25  ;;  %v1887_v34 = vadd.f32 %v1886_v55, %v13238_v31  ;;  %v10753_v25 = vpop.f32.mrf.mxu0  ;;  %10848 = vmatmul.mubr.bf16.gmra.mxu0 %v2506_v5  ;;  %v840_v31 = vld [vmem:[#allocation2 + $0x4e8] sm:$0xff]  ;;  %v841_v55 = vld [vmem:[#allocation2 + $0x4f0] sm:$0xff] }
 0x241   : > { %v10606_v26 = vpop.f32.mrf.mxu1  ;;  %10851 = vmatprep.mubr.bf16.mxu0 %v2507_v41 }
 0x242   : > { %v13480_v50 = vadd.f32 %v2688_v43, %v1887_v34  ;;  %v1898_v44 = vadd.f32 %v10606_v26, %v13242_v11  ;;  %v2443_v11 = vld [vmem:[#allocation2 + $0x4ea] sm:$0xff]  ;;  %v2704_v43 = vpop.f32.mrf.mxu0 }
 0x243   : > { %v1889_v37 = vpop.f32.mrf.mxu1  ;;  %v2508_v5 = vpack.c.bf16 %v2444_v59, %v2443_v11  ;;  %v4180_v11 = vld [vmem:[#allocation2 + $0x41] sm:$0xff] }
 0x244   : > { %v13483_v54 = vadd.f32 %v10750_v22, %v1898_v44  ;;  %v1890_v48 = vadd.f32 %v1889_v37, %v13246_v2  ;;  %v4178_v2 = vld [vmem:[#allocation2 + $0x31] sm:$0xff]  ;;  %v10754_v22 = vpop.f32.mrf.mxu0 }
 0x245   : > { %v10609_v56 = vpop.f32.mrf.mxu1  ;;  %10704 = vmatmul.mubr.bf16.gmra.mxu1 %v903_v53  ;;  %v905_v53 = vpack.c.bf16 %v841_v55, %v840_v31  ;;  %v4305_v41 = vpack.c.bf16 %v4178_v2, %v4177_v14  ;;  %v4179_v55 = vld [vmem:[#allocation2 + $0x39] sm:$0xff]  ;;  %v4181_v2 = vld [vmem:[#allocation2 + $0x51] sm:$0xff] }
 0x246   : > { %v13486_v33 = vadd.f32 %v2691_v60, %v1890_v48  ;;  %v1911_v32 = vadd.f32 %v10609_v56, %v13250_v10  ;;  %10707 = vmatprep.mubr.bf16.mxu1 %v904_v30  ;;  %v3375_v30 = vpack.c.bf16 %v3248_v3, %v3247_v20  ;;  %v2707_v60 = vpop.f32.mrf.mxu0  ;;  %v3252_v14 = vld [vmem:[#allocation2 + $0x58] sm:$0xff] }
 0x247   : > { %v1902_v0 = vpop.f32.mrf.mxu1 }
 0x248   : > { %v13489_v40 = vadd.f32 %v10753_v25, %v1911_v32  ;;  %v1903_v34 = vadd.f32 %v1902_v0, %v13254_v28  ;;  %v10757_v32 = vpop.f32.mrf.mxu0  ;;  %10852 = vmatmul.mubr.bf16.gmra.mxu0 %v2508_v5  ;;  %v3249_v28 = vld [vmem:[#allocation2 + $0x38] sm:$0xff]  ;;  %v4306_v5 = vpack.c.bf16 %v4180_v11, %v4179_v55  ;;  %v4184_v55 = vld [vmem:[#allocation2 + $0x69] sm:$0xff] }
 0x249   : > { %v10610_v26 = vpop.f32.mrf.mxu1  ;;  %11015 = vmatprep.mubr.bf16.mxu0 %v4305_v41 }
 0x24a   : > { %v13492_v44 = vadd.f32 %v2704_v43, %v1903_v34  ;;  %v1914_v10 = vadd.f32 %v10610_v26, %v13258_v47  ;;  %v3250_v47 = vld [vmem:[#allocation2 + $0x40] sm:$0xff]  ;;  %v2720_v20 = vpop.f32.mrf.mxu0  ;;  %v3251_v43 = vld [vmem:[#allocation2 + $0x50] sm:$0xff] }
 0x24b   : > { %v1905_v37 = vpop.f32.mrf.mxu1  ;;  %v4182_v34 = vld [vmem:[#allocation2 + $0x59] sm:$0xff] }
 0x24c   : > { %v13495_v48 = vadd.f32 %v10754_v22, %v1914_v10  ;;  %v1906_v56 = vadd.f32 %v1905_v37, %v13262_v24  ;;  %v10758_v22 = vpop.f32.mrf.mxu0  ;;  %v3377_v37 = vpack.c.bf16 %v3252_v14, %v3251_v43  ;;  %v4185_v43 = vld [vmem:[#allocation2 + $0x79] sm:$0xff] }
 0x24d   : > { %v10613_v25 = vpop.f32.mrf.mxu1  ;;  %10708 = vmatmul.mubr.bf16.gmra.mxu1 %v905_v53  ;;  %v3376_v53 = vpack.c.bf16 %v3250_v47, %v3249_v28  ;;  %v3254_v28 = vld [vmem:[#allocation2 + $0x68] sm:$0xff] }
 0x24e   : > { %v13498_v0 = vadd.f32 %v2707_v60, %v1906_v56  ;;  %v1927_v31 = vadd.f32 %v10613_v25, %v13266_v8  ;;  %10871 = vmatprep.mubr.bf16.mxu1 %v3375_v30  ;;  %v2723_v41 = vpop.f32.mrf.mxu0  ;;  %v4307_v60 = vpack.c.bf16 %v4182_v34, %v4181_v2  ;;  %v4183_v47 = vld [vmem:[#allocation2 + $0x61] sm:$0xff]  ;;  %v11863_v34 = vld [vmem:[#allocation6 + $0x168] sm:$0xff]  }
 0x24f   : > { %v1918_v59 = vpop.f32.mrf.mxu1  ;;  %v4186_v2 = vld [vmem:[#allocation2 + $0x81] sm:$0xff] }
 0x250   : > { %v13501_v3 = vadd.f32 %v10757_v32, %v1927_v31  ;;  %v1919_v24 = vadd.f32 %v1918_v59, %v13270_v62  ;;  %v3253_v62 = vld [vmem:[#allocation2 + $0x60] sm:$0xff]  ;;  %11016 = vmatmul.mubr.bf16.vlgmr.msra.gmra.mxu0 %v4306_v5 }
 0x251   : > { %v10614_v26 = vpop.f32.mrf.mxu1  ;;  %v11861_v32 = vld [vmem:[#allocation6 + $0x170] sm:$0xff]   ;;  %11288 = vmatpush3.bf16.msra.mxu0 %v13297_v63  ;;  %11019 = vmatprep.mubr.bf16.mxu0 %v4307_v60  ;;  %v3378_v5 = vpack.c.bf16 %v3254_v28, %v3253_v62  ;;  %v4308_v63 = vpack.c.bf16 %v4184_v55, %v4183_v47  ;;  %v3257_v47 = vld [vmem:[#allocation2 + $0x88] sm:$0xff]  ;;  %v3258_v55 = vld [vmem:[#allocation2 + $0x90] sm:$0xff] }
 0x252   : > { %15356 = vst [vmem:[#allocation108_spill] sm:$0xff] %v13501_v3  ;;  %v13504_v8 = vadd.f32 %v2720_v20, %v1919_v24  ;;  %v1930_v10 = vadd.f32 %v10614_v26, %v13274_v18  ;;  %v11862_v31 = vld [vmem:[#allocation6 + $0x1b0] sm:$0xff]   ;;  %v10761_v3 = vpop.f32.mrf.mxu0  ;;  %v3255_v20 = vld [vmem:[#allocation2 + $0x78] sm:$0xff] }
 0x253   : > { %v1921_v30 = vpop.f32.mrf.mxu1  ;;  %v11864_v26 = vld [vmem:[#allocation6 + $0x1a8] sm:$0xff]   ;;  %11289 = vmatprep.subr.bf16.mxu0 %v11862_v31 }
 0x254   : > { %v13507_v56 = vadd.f32 %v10758_v22, %v1930_v10  ;;  %v1922_v25 = vadd.f32 %v1921_v30, %v13278_v52  ;;  %v3256_v52 = vld [vmem:[#allocation2 + $0x80] sm:$0xff]  ;;  %v2736_v14 = vpop.f32.mrf.mxu0 }
 0x255   : > { %v10617_v59 = vpop.f32.mrf.mxu1  ;;  %10872 = vmatmul.mubr.bf16.vlgmr.msra.gmra.mxu1 %v3376_v53  ;;  %v3379_v10 = vpack.c.bf16 %v3256_v52, %v3255_v20  ;;  %11290 = vmatpush3.bf16.msra.mxu0 %v11862_v31  ;;  %v4187_v31 = vld [vmem:[#allocation2 + $0x89] sm:$0xff]  ;;  %v4188_v20 = vld [vmem:[#allocation2 + $0x91] sm:$0xff]  ;;  %v3259_v52 = vld [vmem:[#allocation2 + $0xa0] sm:$0xff] }
 0x256   : > { %v13510_v11 = vadd.f32 %v2723_v41, %v1922_v25  ;;  %v1943_v18 = vadd.f32 %v10617_v59, %v13282_v7  ;;  %11144 = vmatpush3.bf16.msra.mxu1 %v13290_v9  ;;  %10875 = vmatprep.mubr.bf16.mxu1 %v3377_v37  ;;  %v10762_v9 = vpop.f32.mrf.mxu0  ;;  %v4309_v37 = vpack.c.bf16 %v4186_v2, %v4185_v43  ;;  %v11865_v59 = vld [vmem:[#allocation6 + $0x160] sm:$0xff]  }
 0x257   : > { %v1934_v24 = vpop.f32.mrf.mxu1  ;;  %11145 = vmatprep.subr.bf16.mxu1 %v11861_v32  ;;  %11291 = vmatprep.subr.bf16.mxu0 %v11864_v26  ;;  %v4190_v2 = vld [vmem:[#allocation2 + $0xa9] sm:$0xff] }
 0x258   : > { %v13515_v22 = vadd.f32 %v10761_v3, %v1943_v18  ;;  %v1935_v53 = vadd.f32 %v1934_v24, %v13286_v35  ;;  %v2739_v25 = vpop.f32.mrf.mxu0  ;;  %v11866_v18 = vld [vmem:[#allocation6 + $0x1a0] sm:$0xff]   ;;  %11020 = vmatmul.mubr.bf16.gmra.mxu0 %v4308_v63 }
 0x259   : > { %v10618_v7 = vpop.f32.mrf.mxu1  ;;  %11023 = vmatprep.mubr.bf16.mxu0 %v4309_v37  ;;  %11292 = vmatpush3.bf16.msra.mxu0 %v11864_v26  ;;  %v4310_v37 = vpack.c.bf16 %v4188_v20, %v4187_v31  ;;  %v15368_v20 = vld [vmem:[#allocation60_spill] sm:$0xff] }
 0x25a   : > { %15357 = vst [vmem:[#allocation109_spill] sm:$0xff] %v13515_v22  ;;  %v13518_v30 = vadd.f32 %v2736_v14, %v1935_v53  ;;  %v1946_v41 = vadd.f32 %v10618_v7, %v13292_v39  ;;  %11146 = vmatpush3.bf16.msra.mxu1 %v11861_v32  ;;  %v10765_v28 = vpop.f32.mrf.mxu0  ;;  %v4189_v14 = vld [vmem:[#allocation2 + $0xa1] sm:$0xff]  ;;  %11293 = vmatprep.subr.bf16.mxu0 %v11866_v18 }
 0x25b   : > { %v1937_v60 = vpop.f32.mrf.mxu1  ;;  %11147 = vmatprep.subr.bf16.mxu1 %v11863_v34  ;;  %v15362_v7 = vld [vmem:[#allocation54_spill] sm:$0xff] }
 0x25c   : > { %15358 = vst [vmem:[#allocation110_spill] sm:$0xff] %v13518_v30  ;;  %v13521_v3 = vadd.f32 %v10762_v9, %v1946_v41  ;;  %v1938_v35 = vadd.f32 %v1937_v60, %v13299_v27  ;;  %v2752_v24 = vpop.f32.mrf.mxu0  ;;  %v3260_v27 = vld [vmem:[#allocation2 + $0xa8] sm:$0xff]  ;;  %v3380_v41 = vpack.c.bf16 %v3258_v55, %v3257_v47  ;;  %v3261_v47 = vld [vmem:[#allocation2 + $0xb0] sm:$0xff]  ;;  %v3262_v55 = vld [vmem:[#allocation2 + $0xb8] sm:$0xff] }
 0x25d   : > { %v10621_v62 = vpop.f32.mrf.mxu1  ;;  %10876 = vmatmul.mubr.bf16.gmra.mxu1 %v3378_v5  ;;  %v11867_v5 = vld [vmem:[#allocation6 + $0x158] sm:$0xff]   ;;  %11294 = vmatpush3.bf16.msra.mxu0 %v11866_v18  ;;  %v4192_v18 = vld [vmem:[#allocation2 + $0xb9] sm:$0xff] }
 0x25e   : > { %15359 = vst [vmem:[#allocation111_spill] sm:$0xff] %v13521_v3  ;;  %v13524_v39 = vadd.f32 %v2739_v25, %v1938_v35  ;;  %v1959_v32 = vadd.f32 %v10621_v62, %v13304_v36  ;;  %10879 = vmatprep.mubr.bf16.mxu1 %v3379_v10  ;;  %11148 = vmatpush3.bf16.msra.mxu1 %v11863_v34  ;;  %v11868_v36 = vld [vmem:[#allocation6 + $0x198] sm:$0xff]   ;;  %v10766_v10 = vpop.f32.mrf.mxu0 }
 0x25f   : > { %v1950_v43 = vpop.f32.mrf.mxu1  ;;  %11149 = vmatprep.subr.bf16.mxu1 %v11865_v59  ;;  %v15364_v25 = vld [vmem:[#allocation56_spill] sm:$0xff]  ;;  %v3381_v62 = vpack.c.bf16 %v3260_v27, %v3259_v52  ;;  %11295 = vmatprep.subr.bf16.mxu0 %v11868_v36 }
 0x260   : > { %15360 = vst [vmem:[#allocation112_spill] sm:$0xff] %v13524_v39  ;;  %v13527_v53 = vadd.f32 %v10765_v28, %v1959_v32  ;;  %v1951_v9 = vadd.f32 %v1950_v43, %v15362_v7  ;;  %v4311_v39 = vpack.c.bf16 %v4190_v2, %v4189_v14  ;;  %v2755_v26 = vpop.f32.mrf.mxu0  ;;  %v15366_v32 = vld [vmem:[#allocation58_spill] sm:$0xff]  ;;  %11024 = vmatmul.mubr.bf16.gmra.mxu0 %v4310_v37  ;;  %v3264_v2 = vld [vmem:[#allocation2 + $0xd0] sm:$0xff] }
 0x261   : > { %v10622_v63 = vpop.f32.mrf.mxu1  ;;  %11296 = vmatpush3.bf16.msra.mxu0 %v11868_v36  ;;  %v15478_v30 = vld [vmem:[#allocation48_spill] sm:$0xff] }
 0x262   : > { %15361 = vst [vmem:[#allocation113_spill] sm:$0xff] %v13527_v53  ;;  %v13530_v60 = vadd.f32 %v2752_v24, %v1951_v9  ;;  %v1962_v35 = vadd.f32 %v10622_v63, %v15364_v25  ;;  %11150 = vmatpush3.bf16.msra.mxu1 %v11865_v59  ;;  %v10769_v53 = vpop.f32.mrf.mxu0  ;;  %11027 = vmatprep.mubr.bf16.mxu0 %v4311_v39  ;;  %v4191_v59 = vld [vmem:[#allocation2 + $0xb1] sm:$0xff]  ;;  %v3263_v24 = vld [vmem:[#allocation2 + $0xc8] sm:$0xff] }
 0x263   : > { %v1953_v34 = vpop.f32.mrf.mxu1  ;;  %11151 = vmatprep.subr.bf16.mxu1 %v11867_v5  ;;  %v4193_v9 = vld [vmem:[#allocation2 + $0xc9] sm:$0xff]  ;;  %v4194_v63 = vld [vmem:[#allocation2 + $0xd1] sm:$0xff] }
 0x264   : > { %15363 = vst [vmem:[#allocation54_spill] sm:$0xff] %v13530_v60  ;;  %v13533_v28 = vadd.f32 %v10766_v10, %v1962_v35  ;;  %v1954_v43 = vadd.f32 %v1953_v34, %v15366_v32  ;;  %v2768_v14 = vpop.f32.mrf.mxu0  ;;  %v3382_v34 = vpack.c.bf16 %v3262_v55, %v3261_v47  ;;  %v15372_v39 = vld [vmem:[#allocation64_spill] sm:$0xff] }
 0x265   : > { %v10625_v7 = vpop.f32.mrf.mxu1  ;;  %10880 = vmatmul.mubr.bf16.gmra.mxu1 %v3380_v41  ;;  %v15370_v41 = vld [vmem:[#allocation62_spill] sm:$0xff]  ;;  %v15376_v55 = vld [vmem:[#allocation68_spill] sm:$0xff] }
 0x266   : > { %15365 = vst [vmem:[#allocation56_spill] sm:$0xff] %v13533_v28  ;;  %v13536_v31 = vadd.f32 %v2755_v26, %v1954_v43  ;;  %v1975_v52 = vadd.f32 %v10625_v7, %v15368_v20  ;;  %10883 = vmatprep.mubr.bf16.mxu1 %v3381_v62  ;;  %11152 = vmatpush3.bf16.msra.mxu1 %v11867_v5  ;;  %v10770_v35 = vpop.f32.mrf.mxu0  ;;  %v15374_v5 = vld [vmem:[#allocation66_spill] sm:$0xff] }
 0x267   : > { %v1966_v27 = vpop.f32.mrf.mxu1  ;;  %v4312_v26 = vpack.c.bf16 %v4192_v18, %v4191_v59  ;;  %v3383_v43 = vpack.c.bf16 %v3264_v2, %v3263_v24  ;;  %v4313_v7 = vpack.c.bf16 %v4194_v63, %v4193_v9  ;;  %v4195_v18 = vld [vmem:[#allocation2 + $0xd9] sm:$0xff]  ;;  %v4196_v24 = vld [vmem:[#allocation2 + $0xe1] sm:$0xff] }
 0x268   : > { %15367 = vst [vmem:[#allocation58_spill] sm:$0xff] %v13536_v31  ;;  %v13539_v10 = vadd.f32 %v10769_v53, %v1975_v52  ;;  %v1967_v37 = vadd.f32 %v1966_v27, %v15370_v41  ;;  %v2771_v31 = vpop.f32.mrf.mxu0  ;;  %v3265_v27 = vld [vmem:[#allocation2 + $0xd8] sm:$0xff]  ;;  %v3266_v41 = vld [vmem:[#allocation2 + $0xe0] sm:$0xff] }
 0x269   : > { %v10626_v25 = vpop.f32.mrf.mxu1  ;;  %11028 = vmatmul.mubr.bf16.gmra.mxu0 %v4312_v26  ;;  %v3268_v63 = vld [vmem:[#allocation2 + $0xf8] sm:$0xff] }
 0x26a   : > { %15369 = vst [vmem:[#allocation60_spill] sm:$0xff] %v13539_v10  ;;  %v13542_v62 = vadd.f32 %v2768_v14, %v1967_v37  ;;  %v1978_v32 = vadd.f32 %v10626_v25, %v15372_v39  ;;  %v10773_v52 = vpop.f32.mrf.mxu0  ;;  %11031 = vmatprep.mubr.bf16.mxu0 %v4313_v7  ;;  %v3267_v14 = vld [vmem:[#allocation2 + $0xf0] sm:$0xff]  ;;  %v4198_v25 = vld [vmem:[#allocation2 + $0xf9] sm:$0xff] }
 0x26b   : > { %v1969_v20 = vpop.f32.mrf.mxu1  ;;  %v4197_v37 = vld [vmem:[#allocation2 + $0xf1] sm:$0xff] }
 0x26c   : > { %15371 = vst [vmem:[#allocation62_spill] sm:$0xff] %v13542_v62  ;;  %v13545_v28 = vadd.f32 %v10770_v35, %v1978_v32  ;;  %v1970_v36 = vadd.f32 %v1969_v20, %v15374_v5  ;;  %v2784_v9 = vpop.f32.mrf.mxu0  ;;  %v4314_v20 = vpack.c.bf16 %v4196_v24, %v4195_v18  ;;  %v15382_v62 = vld [vmem:[#allocation74_spill] sm:$0xff] }
 0x26d   : > { %v10629_v53 = vpop.f32.mrf.mxu1  ;;  %10884 = vmatmul.mubr.bf16.gmra.mxu1 %v3382_v34  ;;  %v15378_v34 = vld [vmem:[#allocation70_spill] sm:$0xff] }
 0x26e   : > { %15373 = vst [vmem:[#allocation64_spill] sm:$0xff] %v13545_v28  ;;  %v13548_v47 = vadd.f32 %v2771_v31, %v1970_v36  ;;  %v1991_v59 = vadd.f32 %v10629_v53, %v15376_v55  ;;  %10887 = vmatprep.mubr.bf16.mxu1 %v3383_v43  ;;  %v10774_v32 = vpop.f32.mrf.mxu0  ;;  %v3384_v31 = vpack.c.bf16 %v3266_v41, %v3265_v27  ;;  %v15380_v43 = vld [vmem:[#allocation72_spill] sm:$0xff]  ;;  %v4199_v24 = vld [vmem:[#allocation2 + $0x101] sm:$0xff] }
 0x26f   : > { %v1982_v2 = vpop.f32.mrf.mxu1  ;;  %v3385_v36 = vpack.c.bf16 %v3268_v63, %v3267_v14  ;;  %v4315_v53 = vpack.c.bf16 %v4198_v25, %v4197_v37  ;;  %v15384_v41 = vld [vmem:[#allocation76_spill] sm:$0xff]  ;;  %v3272_v25 = vld [vmem:[#allocation2 + $0x120] sm:$0xff] }
 0x270   : > { %15375 = vst [vmem:[#allocation66_spill] sm:$0xff] %v13548_v47  ;;  %v13551_v35 = vadd.f32 %v10773_v52, %v1991_v59  ;;  %v1983_v26 = vadd.f32 %v1982_v2, %v15378_v34  ;;  %v2787_v47 = vpop.f32.mrf.mxu0  ;;  %v3269_v2 = vld [vmem:[#allocation2 + $0x100] sm:$0xff]  ;;  %v3270_v34 = vld [vmem:[#allocation2 + $0x108] sm:$0xff] }
 0x271   : > { %v10630_v39 = vpop.f32.mrf.mxu1  ;;  %11032 = vmatmul.mubr.bf16.gmra.mxu0 %v4314_v20  ;;  %v4200_v14 = vld [vmem:[#allocation2 + $0x109] sm:$0xff]  ;;  %v11869_v20 = vld [vmem:[#allocation6 + $0x150] sm:$0xff]  }
 0x272   : > { %15377 = vst [vmem:[#allocation68_spill] sm:$0xff] %v13551_v35  ;;  %v13554_v5 = vadd.f32 %v2784_v9, %v1983_v26  ;;  %v1994_v7 = vadd.f32 %v10630_v39, %v15380_v43  ;;  %v10777_v59 = vpop.f32.mrf.mxu0  ;;  %11035 = vmatprep.mubr.bf16.mxu0 %v4315_v53  ;;  %v3271_v9 = vld [vmem:[#allocation2 + $0x118] sm:$0xff]  ;;  %11153 = vmatprep.subr.bf16.mxu1 %v11869_v20 }
 0x273   : > { %v1985_v55 = vpop.f32.mrf.mxu1  ;;  %v4201_v26 = vld [vmem:[#allocation2 + $0x119] sm:$0xff]  ;;  %11154 = vmatpush3.bf16.msra.mxu1 %v11869_v20  ;;  %v3276_v20 = vld [vmem:[#allocation2 + $0x148] sm:$0xff] }
 0x274   : > { %15379 = vst [vmem:[#allocation70_spill] sm:$0xff] %v13554_v5  ;;  %v13557_v28 = vadd.f32 %v10774_v32, %v1994_v7  ;;  %v1986_v10 = vadd.f32 %v1985_v55, %v15382_v62  ;;  %v2800_v37 = vpop.f32.mrf.mxu0  ;;  %v4202_v62 = vld [vmem:[#allocation2 + $0x121] sm:$0xff]  ;;  %v4316_v7 = vpack.c.bf16 %v4200_v14, %v4199_v24  ;;  %v15392_v14 = vld [vmem:[#allocation84_spill] sm:$0xff] }
 0x275   : > { %v10633_v52 = vpop.f32.mrf.mxu1  ;;  %10888 = vmatmul.mubr.bf16.gmra.mxu1 %v3384_v31  ;;  %v15386_v32 = vld [vmem:[#allocation78_spill] sm:$0xff] }
 0x276   : > { %15381 = vst [vmem:[#allocation72_spill] sm:$0xff] %v13557_v28  ;;  %v13560_v27 = vadd.f32 %v2787_v47, %v1986_v10  ;;  %v2007_v18 = vadd.f32 %v10633_v52, %v15384_v41  ;;  %10891 = vmatprep.mubr.bf16.mxu1 %v3385_v36  ;;  %v10778_v10 = vpop.f32.mrf.mxu0  ;;  %v3386_v47 = vpack.c.bf16 %v3270_v34, %v3269_v2  ;;  %v15388_v36 = vld [vmem:[#allocation80_spill] sm:$0xff]  ;;  %v15398_v35 = vld [vmem:[#allocation90_spill] sm:$0xff] }
 0x277   : > { %v1998_v63 = vpop.f32.mrf.mxu1  ;;  %v3387_v52 = vpack.c.bf16 %v3272_v25, %v3271_v9  ;;  %v4317_v41 = vpack.c.bf16 %v4202_v62, %v4201_v26  ;;  %v3273_v2 = vld [vmem:[#allocation2 + $0x128] sm:$0xff]  ;;  %v3274_v34 = vld [vmem:[#allocation2 + $0x130] sm:$0xff]  ;;  %v3275_v26 = vld [vmem:[#allocation2 + $0x140] sm:$0xff] }
 0x278   : > { %15383 = vst [vmem:[#allocation74_spill] sm:$0xff] %v13560_v27  ;;  %v13563_v39 = vadd.f32 %v10777_v59, %v2007_v18  ;;  %v1999_v31 = vadd.f32 %v1998_v63, %v15386_v32  ;;  %v11870_v27 = vld [vmem:[#allocation6 + $0x190] sm:$0xff]   ;;  %v2803_v5 = vpop.f32.mrf.mxu0  ;;  %v4204_v25 = vld [vmem:[#allocation2 + $0x131] sm:$0xff] }
 0x279   : > { %v10634_v43 = vpop.f32.mrf.mxu1  ;;  %v15390_v18 = vld [vmem:[#allocation82_spill] sm:$0xff]  ;;  %11297 = vmatprep.subr.bf16.mxu0 %v11870_v27  ;;  %11036 = vmatmul.mubr.bf16.gmra.mxu0 %v4316_v7 }
 0x27a   : > { %15385 = vst [vmem:[#allocation76_spill] sm:$0xff] %v13563_v39  ;;  %v13566_v55 = vadd.f32 %v2800_v37, %v1999_v31  ;;  %v2010_v53 = vadd.f32 %v10634_v43, %v15388_v36  ;;  %v10781_v39 = vpop.f32.mrf.mxu0  ;;  %11039 = vmatprep.mubr.bf16.mxu0 %v4317_v41  ;;  %v4203_v37 = vld [vmem:[#allocation2 + $0x129] sm:$0xff]  ;;  %11298 = vmatpush3.bf16.msra.mxu0 %v11870_v27 }
 0x27b   : > { %v2001_v28 = vpop.f32.mrf.mxu1  ;;  %v4206_v43 = vld [vmem:[#allocation2 + $0x149] sm:$0xff] }
 0x27c   : > { %15387 = vst [vmem:[#allocation78_spill] sm:$0xff] %v13566_v55  ;;  %v13569_v59 = vadd.f32 %v10778_v10, %v2010_v53  ;;  %v2002_v63 = vadd.f32 %v2001_v28, %v15390_v18  ;;  %v2816_v31 = vpop.f32.mrf.mxu0  ;;  %v4205_v28 = vld [vmem:[#allocation2 + $0x141] sm:$0xff]  ;;  %v3388_v53 = vpack.c.bf16 %v3274_v34, %v3273_v2  ;;  %v4318_v18 = vpack.c.bf16 %v4204_v25, %v4203_v37  ;;  %v15400_v34 = vld [vmem:[#allocation92_spill] sm:$0xff] }
 0x27d   : > { %v10637_v32 = vpop.f32.mrf.mxu1  ;;  %10892 = vmatmul.mubr.bf16.gmra.mxu1 %v3386_v47  ;;  %v15394_v47 = vld [vmem:[#allocation86_spill] sm:$0xff]  ;;  %v4207_v25 = vld [vmem:[#allocation2 + $0x151] sm:$0xff] }
 0x27e   : > { %15389 = vst [vmem:[#allocation80_spill] sm:$0xff] %v13569_v59  ;;  %v13572_v24 = vadd.f32 %v2803_v5, %v2002_v63  ;;  %v2023_v9 = vadd.f32 %v10637_v32, %v15392_v14  ;;  %10895 = vmatprep.mubr.bf16.mxu1 %v3387_v52  ;;  %v10782_v5 = vpop.f32.mrf.mxu0  ;;  %v15396_v52 = vld [vmem:[#allocation88_spill] sm:$0xff]  ;;  %v3389_v32 = vpack.c.bf16 %v3276_v20, %v3275_v26  ;;  %v4208_v26 = vld [vmem:[#allocation2 + $0x159] sm:$0xff] }
 0x27f   : > { %v2014_v62 = vpop.f32.mrf.mxu1  ;;  %v4319_v14 = vpack.c.bf16 %v4206_v43, %v4205_v28  ;;  %v3280_v43 = vld [vmem:[#allocation2 + $0x170] sm:$0xff] }
 0x280   : > { %15391 = vst [vmem:[#allocation82_spill] sm:$0xff] %v13572_v24  ;;  %v13575_v10 = vadd.f32 %v10781_v39, %v2023_v9  ;;  %v2015_v7 = vadd.f32 %v2014_v62, %v15394_v47  ;;  %v2819_v59 = vpop.f32.mrf.mxu0  ;;  %v3277_v62 = vld [vmem:[#allocation2 + $0x150] sm:$0xff]  ;;  %v3278_v47 = vld [vmem:[#allocation2 + $0x158] sm:$0xff] }
 0x281   : > { %v10638_v36 = vpop.f32.mrf.mxu1  ;;  %11040 = vmatmul.mubr.bf16.gmra.mxu0 %v4318_v18 }
 0x282   : > { %15393 = vst [vmem:[#allocation84_spill] sm:$0xff] %v13575_v10  ;;  %v13578_v63 = vadd.f32 %v2816_v31, %v2015_v7  ;;  %v2026_v41 = vadd.f32 %v10638_v36, %v15396_v52  ;;  %v10785_v9 = vpop.f32.mrf.mxu0  ;;  %11043 = vmatprep.mubr.bf16.mxu0 %v4319_v14  ;;  %v3279_v31 = vld [vmem:[#allocation2 + $0x168] sm:$0xff]  ;;  %v15402_v36 = vld [vmem:[#allocation94_spill] sm:$0xff]  ;;  %v4320_v52 = vpack.c.bf16 %v4208_v26, %v4207_v25 }
 0x283   : > { %v2017_v24 = vpop.f32.mrf.mxu1  ;;  %v4209_v7 = vld [vmem:[#allocation2 + $0x169] sm:$0xff]  ;;  %v4211_v26 = vld [vmem:[#allocation2 + $0x179] sm:$0xff] }
 0x284   : > { %15395 = vst [vmem:[#allocation86_spill] sm:$0xff] %v13578_v63  ;;  %v13581_v55 = vadd.f32 %v10782_v5, %v2026_v41  ;;  %v2018_v27 = vadd.f32 %v2017_v24, %v15398_v35  ;;  %v2832_v28 = vpop.f32.mrf.mxu0  ;;  %v4210_v35 = vld [vmem:[#allocation2 + $0x171] sm:$0xff]  ;;  %v15406_v63 = vld [vmem:[#allocation98_spill] sm:$0xff] }
 0x285   : > { %v10641_v39 = vpop.f32.mrf.mxu1  ;;  %10896 = vmatmul.mubr.bf16.gmra.mxu1 %v3388_v53 }
 0x286   : > { %15397 = vst [vmem:[#allocation88_spill] sm:$0xff] %v13581_v55  ;;  %v13584_v2 = vadd.f32 %v2819_v59, %v2018_v27  ;;  %v2039_v37 = vadd.f32 %v10641_v39, %v15400_v34  ;;  %10899 = vmatprep.mubr.bf16.mxu1 %v3389_v32  ;;  %v10786_v18 = vpop.f32.mrf.mxu0  ;;  %v3390_v59 = vpack.c.bf16 %v3278_v47, %v3277_v62  ;;  %v15404_v32 = vld [vmem:[#allocation96_spill] sm:$0xff] }
 0x287   : > { %v2030_v20 = vpop.f32.mrf.mxu1  ;;  %v3391_v27 = vpack.c.bf16 %v3280_v43, %v3279_v31  ;;  %v4321_v39 = vpack.c.bf16 %v4210_v35, %v4209_v7  ;;  %v15408_v47 = vld [vmem:[#allocation100_spill] sm:$0xff]  ;;  %v4212_v31 = vld [vmem:[#allocation2 + $0x181] sm:$0xff]  ;;  %v3284_v35 = vld [vmem:[#allocation2 + $0x198] sm:$0xff] }
 0x288   : > { %15399 = vst [vmem:[#allocation90_spill] sm:$0xff] %v13584_v2  ;;  %v13587_v24 = vadd.f32 %v10785_v9, %v2039_v37  ;;  %v2031_v5 = vadd.f32 %v2030_v20, %v15402_v36  ;;  %v2835_v2 = vpop.f32.mrf.mxu0  ;;  %v3281_v20 = vld [vmem:[#allocation2 + $0x178] sm:$0xff]  ;;  %v3282_v36 = vld [vmem:[#allocation2 + $0x180] sm:$0xff] }
 0x289   : > { %v10642_v53 = vpop.f32.mrf.mxu1  ;;  %11044 = vmatmul.mubr.bf16.gmra.mxu0 %v4320_v52 }
 0x28a   : > { %15401 = vst [vmem:[#allocation92_spill] sm:$0xff] %v13587_v24  ;;  %v13590_v41 = vadd.f32 %v2832_v28, %v2031_v5  ;;  %v2042_v14 = vadd.f32 %v10642_v53, %v15404_v32  ;;  %v10789_v37 = vpop.f32.mrf.mxu0  ;;  %11047 = vmatprep.mubr.bf16.mxu0 %v4321_v39  ;;  %v3283_v28 = vld [vmem:[#allocation2 + $0x190] sm:$0xff] }
 0x28b   : > { %v2033_v34 = vpop.f32.mrf.mxu1  ;;  %v4213_v5 = vld [vmem:[#allocation2 + $0x191] sm:$0xff] }
 0x28c   : > { %15403 = vst [vmem:[#allocation94_spill] sm:$0xff] %v13590_v41  ;;  %v13593_v55 = vadd.f32 %v10786_v18, %v2042_v14  ;;  %v2034_v10 = vadd.f32 %v2033_v34, %v15406_v63  ;;  %v2848_v7 = vpop.f32.mrf.mxu0  ;;  %v4214_v63 = vld [vmem:[#allocation2 + $0x199] sm:$0xff]  ;;  %v3393_v34 = vpack.c.bf16 %v3284_v35, %v3283_v28  ;;  %v4216_v28 = vld [vmem:[#allocation2 + $0x1a9] sm:$0xff] }
 0x28d   : > { %v10645_v9 = vpop.f32.mrf.mxu1  ;;  %10900 = vmatmul.mubr.bf16.gmra.mxu1 %v3390_v59  ;;  %v15410_v18 = vld [vmem:[#allocation102_spill] sm:$0xff] }
 0x28e   : > { %15405 = vst [vmem:[#allocation96_spill] sm:$0xff] %v13593_v55  ;;  %v13596_v62 = vadd.f32 %v2835_v2, %v2034_v10  ;;  %v2055_v25 = vadd.f32 %v10645_v9, %v15408_v47  ;;  %10903 = vmatprep.mubr.bf16.mxu1 %v3391_v27  ;;  %v10790_v32 = vpop.f32.mrf.mxu0  ;;  %v3392_v10 = vpack.c.bf16 %v3282_v36, %v3281_v20  ;;  %v15412_v27 = vld [vmem:[#allocation104_spill] sm:$0xff]  ;;  %v15414_v41 = vld [vmem:[#allocation106_spill] sm:$0xff]  ;;  %v15416_v36 = vld [vmem:[#allocation17_spill] sm:$0xff] }
 0x28f   : > { %v2046_v43 = vpop.f32.mrf.mxu1  ;;  %v4322_v2 = vpack.c.bf16 %v4212_v31, %v4211_v26  ;;  %v4323_v9 = vpack.c.bf16 %v4214_v63, %v4213_v5  ;;  %v4215_v31 = vld [vmem:[#allocation2 + $0x1a1] sm:$0xff] }
 0x290   : > { %15407 = vst [vmem:[#allocation98_spill] sm:$0xff] %v13596_v62  ;;  %v13599_v53 = vadd.f32 %v10789_v37, %v2055_v25  ;;  %v2047_v59 = vadd.f32 %v2046_v43, %v15410_v18  ;;  %v2851_v62 = vpop.f32.mrf.mxu0  ;;  %v3285_v43 = vld [vmem:[#allocation2 + $0x1a0] sm:$0xff]  ;;  %v3286_v18 = vld [vmem:[#allocation2 + $0x1a8] sm:$0xff] }
 0x291   : > { %v10646_v52 = vpop.f32.mrf.mxu1  ;;  %11048 = vmatmul.mubr.bf16.gmra.mxu0 %v4322_v2  ;;  %v3288_v63 = vld [vmem:[#allocation2 + $0x1c0] sm:$0xff]  ;;  %v11871_v2 = vld [vmem:[#allocation6 + $0x148] sm:$0xff]  }
 0x292   : > { %15409 = vst [vmem:[#allocation100_spill] sm:$0xff] %v13599_v53  ;;  %v13602_v14 = vadd.f32 %v2848_v7, %v2047_v59  ;;  %v2058_v39 = vadd.f32 %v10646_v52, %v15412_v27  ;;  %v10793_v25 = vpop.f32.mrf.mxu0  ;;  %11051 = vmatprep.mubr.bf16.mxu0 %v4323_v9  ;;  %v3287_v7 = vld [vmem:[#allocation2 + $0x1b8] sm:$0xff]  ;;  %11155 = vmatprep.subr.bf16.mxu1 %v11871_v2  ;;  %v15430_v53 = vld [vmem:[#allocation24_spill] sm:$0xff] }
 0x293   : > { %v2049_v47 = vpop.f32.mrf.mxu1  ;;  %v4217_v59 = vld [vmem:[#allocation2 + $0x1b9] sm:$0xff]  ;;  %11156 = vmatpush3.bf16.msra.mxu1 %v11871_v2  ;;  %v3292_v2 = vld [vmem:[#allocation2 + $0x1e8] sm:$0xff] }
 0x294   : > { %15411 = vst [vmem:[#allocation102_spill] sm:$0xff] %v13602_v14  ;;  %v13605_v55 = vadd.f32 %v10790_v32, %v2058_v39  ;;  %v2050_v24 = vadd.f32 %v2049_v47, %v15414_v41  ;;  %v2864_v5 = vpop.f32.mrf.mxu0  ;;  %v4218_v41 = vld [vmem:[#allocation2 + $0x1c1] sm:$0xff]  ;;  %v4324_v39 = vpack.c.bf16 %v4216_v28, %v4215_v31  ;;  %v15424_v28 = vld [vmem:[#allocation21_spill] sm:$0xff] }
 0x295   : > { %v10649_v37 = vpop.f32.mrf.mxu1  ;;  %10904 = vmatmul.mubr.bf16.gmra.mxu1 %v3392_v10  ;;  %v15418_v32 = vld [vmem:[#allocation18_spill] sm:$0xff] }
 0x296   : > { %15413 = vst [vmem:[#allocation104_spill] sm:$0xff] %v13605_v55  ;;  %v13608_v20 = vadd.f32 %v2851_v62, %v2050_v24  ;;  %v2071_v26 = vadd.f32 %v10649_v37, %v15416_v36  ;;  %10907 = vmatprep.mubr.bf16.mxu1 %v3393_v34  ;;  %v10794_v24 = vpop.f32.mrf.mxu0  ;;  %v3394_v62 = vpack.c.bf16 %v3286_v18, %v3285_v43  ;;  %v15420_v34 = vld [vmem:[#allocation19_spill] sm:$0xff]  ;;  %v3290_v18 = vld [vmem:[#allocation2 + $0x1d0] sm:$0xff] }
 0x297   : > { %v2062_v35 = vpop.f32.mrf.mxu1  ;;  %v3395_v37 = vpack.c.bf16 %v3288_v63, %v3287_v7  ;;  %v4325_v36 = vpack.c.bf16 %v4218_v41, %v4217_v59  ;;  %v3289_v43 = vld [vmem:[#allocation2 + $0x1c8] sm:$0xff]  ;;  %v4220_v63 = vld [vmem:[#allocation2 + $0x1d1] sm:$0xff]  ;;  %v3291_v59 = vld [vmem:[#allocation2 + $0x1e0] sm:$0xff] }
 0x298   : > { %15415 = vst [vmem:[#allocation106_spill] sm:$0xff] %v13608_v20  ;;  %v13611_v52 = vadd.f32 %v10793_v25, %v2071_v26  ;;  %v2063_v10 = vadd.f32 %v2062_v35, %v15418_v32  ;;  %v11872_v20 = vld [vmem:[#allocation6 + $0x188] sm:$0xff]   ;;  %v2867_v14 = vpop.f32.mrf.mxu0  ;;  %v15422_v26 = vld [vmem:[#allocation20_spill] sm:$0xff] }
 0x299   : > { %v10650_v27 = vpop.f32.mrf.mxu1  ;;  %11299 = vmatprep.subr.bf16.mxu0 %v11872_v20  ;;  %11052 = vmatmul.mubr.bf16.gmra.mxu0 %v4324_v39 }
 0x29a   : > { %15417 = vst [vmem:[#allocation17_spill] sm:$0xff] %v13611_v52  ;;  %v13614_v47 = vadd.f32 %v2864_v5, %v2063_v10  ;;  %v2074_v9 = vadd.f32 %v10650_v27, %v15420_v34  ;;  %v10797_v52 = vpop.f32.mrf.mxu0  ;;  %11055 = vmatprep.mubr.bf16.mxu0 %v4325_v36  ;;  %v4219_v5 = vld [vmem:[#allocation2 + $0x1c9] sm:$0xff]  ;;  %11300 = vmatpush3.bf16.msra.mxu0 %v11872_v20 }
 0x29b   : > { %v2065_v55 = vpop.f32.mrf.mxu1  ;;  %v4222_v27 = vld [vmem:[#allocation2 + $0x1e9] sm:$0xff] }
 0x29c   : > { %15419 = vst [vmem:[#allocation18_spill] sm:$0xff] %v13614_v47  ;;  %v13617_v25 = vadd.f32 %v10794_v24, %v2074_v9  ;;  %v2066_v35 = vadd.f32 %v2065_v55, %v15422_v26  ;;  %v2880_v10 = vpop.f32.mrf.mxu0  ;;  %v4221_v55 = vld [vmem:[#allocation2 + $0x1e1] sm:$0xff]  ;;  %v3396_v9 = vpack.c.bf16 %v3290_v18, %v3289_v43  ;;  %v4326_v26 = vpack.c.bf16 %v4220_v63, %v4219_v5  ;;  %v15432_v18 = vld [vmem:[#allocation25_spill] sm:$0xff] }
 0x29d   : > { %v10653_v32 = vpop.f32.mrf.mxu1  ;;  %10908 = vmatmul.mubr.bf16.gmra.mxu1 %v3394_v62  ;;  %v15426_v62 = vld [vmem:[#allocation22_spill] sm:$0xff]  ;;  %v4223_v63 = vld [vmem:[#allocation2 + $0x1f1] sm:$0xff] }
 0x29e   : > { %15421 = vst [vmem:[#allocation19_spill] sm:$0xff] %v13617_v25  ;;  %v13620_v31 = vadd.f32 %v2867_v14, %v2066_v35  ;;  %v2087_v7 = vadd.f32 %v10653_v32, %v15424_v28  ;;  %10911 = vmatprep.mubr.bf16.mxu1 %v3395_v37  ;;  %v10798_v14 = vpop.f32.mrf.mxu0  ;;  %v15428_v37 = vld [vmem:[#allocation23_spill] sm:$0xff]  ;;  %v3397_v32 = vpack.c.bf16 %v3292_v2, %v3291_v59  ;;  %v4224_v59 = vld [vmem:[#allocation2 + $0x1f9] sm:$0xff] }
 0x29f   : > { %v2078_v41 = vpop.f32.mrf.mxu1  ;;  %v4327_v28 = vpack.c.bf16 %v4222_v27, %v4221_v55  ;;  %v3296_v27 = vld [vmem:[#allocation2 + $0x210] sm:$0xff] }
 0x2a0   : > { %15423 = vst [vmem:[#allocation20_spill] sm:$0xff] %v13620_v31  ;;  %v13623_v24 = vadd.f32 %v10797_v52, %v2087_v7  ;;  %v2079_v39 = vadd.f32 %v2078_v41, %v15426_v62  ;;  %v2883_v25 = vpop.f32.mrf.mxu0  ;;  %v3293_v41 = vld [vmem:[#allocation2 + $0x1f0] sm:$0xff]  ;;  %v3294_v62 = vld [vmem:[#allocation2 + $0x1f8] sm:$0xff] }
 0x2a1   : > { %v10654_v34 = vpop.f32.mrf.mxu1  ;;  %11056 = vmatmul.mubr.bf16.gmra.mxu0 %v4326_v26 }
 0x2a2   : > { %15425 = vst [vmem:[#allocation21_spill] sm:$0xff] %v13623_v24  ;;  %v13626_v35 = vadd.f32 %v2880_v10, %v2079_v39  ;;  %v2090_v36 = vadd.f32 %v10654_v34, %v15428_v37  ;;  %v10801_v7 = vpop.f32.mrf.mxu0  ;;  %11059 = vmatprep.mubr.bf16.mxu0 %v4327_v28  ;;  %v3295_v10 = vld [vmem:[#allocation2 + $0x208] sm:$0xff]  ;;  %v15434_v34 = vld [vmem:[#allocation26_spill] sm:$0xff]  ;;  %v4328_v37 = vpack.c.bf16 %v4224_v59, %v4223_v63 }
 0x2a3   : > { %v2081_v31 = vpop.f32.mrf.mxu1  ;;  %v4225_v39 = vld [vmem:[#allocation2 + $0x209] sm:$0xff]  ;;  %v4227_v59 = vld [vmem:[#allocation2 + $0x219] sm:$0xff] }
 0x2a4   : > { %15427 = vst [vmem:[#allocation22_spill] sm:$0xff] %v13626_v35  ;;  %v13629_v47 = vadd.f32 %v10798_v14, %v2090_v36  ;;  %v2082_v20 = vadd.f32 %v2081_v31, %v15430_v53  ;;  %v2896_v55 = vpop.f32.mrf.mxu0  ;;  %v4226_v53 = vld [vmem:[#allocation2 + $0x211] sm:$0xff]  ;;  %v15438_v35 = vld [vmem:[#allocation27_spill] sm:$0xff] }
 0x2a5   : > { %v10657_v52 = vpop.f32.mrf.mxu1  ;;  %10912 = vmatmul.mubr.bf16.gmra.mxu1 %v3396_v9 }
 0x2a6   : > { %15429 = vst [vmem:[#allocation23_spill] sm:$0xff] %v13629_v47  ;;  %v13632_v43 = vadd.f32 %v2883_v25, %v2082_v20  ;;  %v2103_v5 = vadd.f32 %v10657_v52, %v15432_v18  ;;  %10915 = vmatprep.mubr.bf16.mxu1 %v3397_v32  ;;  %v10802_v26 = vpop.f32.mrf.mxu0  ;;  %v3398_v25 = vpack.c.bf16 %v3294_v62, %v3293_v41  ;;  %v15436_v32 = vld [vmem:[#allocation28_spill] sm:$0xff]  ;;  %v15440_v62 = vld [vmem:[#allocation29_spill] sm:$0xff] }
 0x2a7   : > { %v2094_v2 = vpop.f32.mrf.mxu1  ;;  %v3399_v20 = vpack.c.bf16 %v3296_v27, %v3295_v10  ;;  %v4329_v52 = vpack.c.bf16 %v4226_v53, %v4225_v39  ;;  %v4228_v10 = vld [vmem:[#allocation2 + $0x221] sm:$0xff]  ;;  %v3300_v53 = vld [vmem:[#allocation2 + $0x238] sm:$0xff] }
 0x2a8   : > { %15431 = vst [vmem:[#allocation24_spill] sm:$0xff] %v13632_v43  ;;  %v13635_v31 = vadd.f32 %v10801_v7, %v2103_v5  ;;  %v2095_v14 = vadd.f32 %v2094_v2, %v15434_v34  ;;  %v2899_v43 = vpop.f32.mrf.mxu0  ;;  %v3297_v2 = vld [vmem:[#allocation2 + $0x218] sm:$0xff]  ;;  %v3298_v34 = vld [vmem:[#allocation2 + $0x220] sm:$0xff] }
 0x2a9   : > { %v10658_v9 = vpop.f32.mrf.mxu1  ;;  %11060 = vmatmul.mubr.bf16.gmra.mxu0 %v4328_v37 }
 0x2aa   : > { %15433 = vst [vmem:[#allocation25_spill] sm:$0xff] %v13635_v31  ;;  %v13638_v36 = vadd.f32 %v2896_v55, %v2095_v14  ;;  %v2106_v28 = vadd.f32 %v10658_v9, %v15436_v32  ;;  %v10805_v5 = vpop.f32.mrf.mxu0  ;;  %11063 = vmatprep.mubr.bf16.mxu0 %v4329_v52  ;;  %v3299_v55 = vld [vmem:[#allocation2 + $0x230] sm:$0xff] }
 0x2ab   : > { %v2097_v18 = vpop.f32.mrf.mxu1  ;;  %v4229_v14 = vld [vmem:[#allocation2 + $0x231] sm:$0xff] }
 0x2ac   : > { %15435 = vst [vmem:[#allocation26_spill] sm:$0xff] %v13638_v36  ;;  %v13641_v47 = vadd.f32 %v10802_v26, %v2106_v28  ;;  %v2098_v24 = vadd.f32 %v2097_v18, %v15438_v35  ;;  %v2912_v39 = vpop.f32.mrf.mxu0  ;;  %v4230_v35 = vld [vmem:[#allocation2 + $0x239] sm:$0xff]  ;;  %v15442_v26 = vld [vmem:[#allocation31_spill] sm:$0xff]  ;;  %v3401_v18 = vpack.c.bf16 %v3300_v53, %v3299_v55 }
 0x2ad   : > { %v10661_v7 = vpop.f32.mrf.mxu1  ;;  %10916 = vmatmul.mubr.bf16.gmra.mxu1 %v3398_v25  ;;  %v15446_v36 = vld [vmem:[#allocation33_spill] sm:$0xff]  ;;  %v4232_v55 = vld [vmem:[#allocation2 + $0x249] sm:$0xff] }
 0x2ae   : > { %15437 = vst [vmem:[#allocation28_spill] sm:$0xff] %v13641_v47  ;;  %v13644_v41 = vadd.f32 %v2899_v43, %v2098_v24  ;;  %v2119_v63 = vadd.f32 %v10661_v7, %v15440_v62  ;;  %10919 = vmatprep.mubr.bf16.mxu1 %v3399_v20  ;;  %v10806_v32 = vpop.f32.mrf.mxu0  ;;  %v3400_v24 = vpack.c.bf16 %v3298_v34, %v3297_v2  ;;  %v15444_v20 = vld [vmem:[#allocation30_spill] sm:$0xff]  ;;  %v15448_v34 = vld [vmem:[#allocation32_spill] sm:$0xff] }
 0x2af   : > { %v2110_v27 = vpop.f32.mrf.mxu1  ;;  %v4330_v43 = vpack.c.bf16 %v4228_v10, %v4227_v59  ;;  %v4331_v7 = vpack.c.bf16 %v4230_v35, %v4229_v14  ;;  %v4231_v10 = vld [vmem:[#allocation2 + $0x241] sm:$0xff] }
 0x2b0   : > { %15439 = vst [vmem:[#allocation27_spill] sm:$0xff] %v13644_v41  ;;  %v13647_v9 = vadd.f32 %v10805_v5, %v2119_v63  ;;  %v2111_v25 = vadd.f32 %v2110_v27, %v15442_v26  ;;  %v2915_v41 = vpop.f32.mrf.mxu0  ;;  %v3301_v27 = vld [vmem:[#allocation2 + $0x240] sm:$0xff]  ;;  %v3302_v26 = vld [vmem:[#allocation2 + $0x248] sm:$0xff] }
 0x2b1   : > { %v10662_v37 = vpop.f32.mrf.mxu1  ;;  %11064 = vmatmul.mubr.bf16.gmra.mxu0 %v4330_v43  ;;  %v3304_v35 = vld [vmem:[#allocation2 + $0x260] sm:$0xff]  ;;  %v11873_v43 = vld [vmem:[#allocation6 + $0x140] sm:$0xff]  }
 0x2b2   : > { %15441 = vst [vmem:[#allocation29_spill] sm:$0xff] %v13647_v9  ;;  %v13650_v28 = vadd.f32 %v2912_v39, %v2111_v25  ;;  %v2122_v52 = vadd.f32 %v10662_v37, %v15444_v20  ;;  %v10809_v63 = vpop.f32.mrf.mxu0  ;;  %11067 = vmatprep.mubr.bf16.mxu0 %v4331_v7  ;;  %v3303_v39 = vld [vmem:[#allocation2 + $0x258] sm:$0xff]  ;;  %11157 = vmatprep.subr.bf16.mxu1 %v11873_v43 }
 0x2b3   : > { %v2113_v62 = vpop.f32.mrf.mxu1  ;;  %v4233_v25 = vld [vmem:[#allocation2 + $0x259] sm:$0xff]  ;;  %11158 = vmatpush3.bf16.msra.mxu1 %v11873_v43  ;;  %v3308_v43 = vld [vmem:[#allocation2 + $0x288] sm:$0xff] }
 0x2b4   : > { %15443 = vst [vmem:[#allocation31_spill] sm:$0xff] %v13650_v28  ;;  %v13653_v47 = vadd.f32 %v10806_v32, %v2122_v52  ;;  %v2114_v31 = vadd.f32 %v2113_v62, %v15446_v36  ;;  %v2928_v14 = vpop.f32.mrf.mxu0  ;;  %v4234_v36 = vld [vmem:[#allocation2 + $0x261] sm:$0xff]  ;;  %v4332_v52 = vpack.c.bf16 %v4232_v55, %v4231_v10  ;;  %v15456_v55 = vld [vmem:[#allocation37_spill] sm:$0xff] }
 0x2b5   : > { %v10665_v5 = vpop.f32.mrf.mxu1  ;;  %10920 = vmatmul.mubr.bf16.gmra.mxu1 %v3400_v24  ;;  %v15450_v32 = vld [vmem:[#allocation34_spill] sm:$0xff] }
 0x2b6   : > { %15445 = vst [vmem:[#allocation30_spill] sm:$0xff] %v13653_v47  ;;  %v13656_v2 = vadd.f32 %v2915_v41, %v2114_v31  ;;  %v2135_v59 = vadd.f32 %v10665_v5, %v15448_v34  ;;  %10923 = vmatprep.mubr.bf16.mxu1 %v3401_v18  ;;  %v10810_v31 = vpop.f32.mrf.mxu0  ;;  %v3402_v41 = vpack.c.bf16 %v3302_v26, %v3301_v27  ;;  %v15452_v18 = vld [vmem:[#allocation35_spill] sm:$0xff]  ;;  %v3306_v26 = vld [vmem:[#allocation2 + $0x270] sm:$0xff] }
 0x2b7   : > { %v2126_v53 = vpop.f32.mrf.mxu1  ;;  %v3403_v5 = vpack.c.bf16 %v3304_v35, %v3303_v39  ;;  %v4333_v34 = vpack.c.bf16 %v4234_v36, %v4233_v25  ;;  %v3305_v27 = vld [vmem:[#allocation2 + $0x268] sm:$0xff]  ;;  %v4236_v35 = vld [vmem:[#allocation2 + $0x271] sm:$0xff]  ;;  %v3307_v25 = vld [vmem:[#allocation2 + $0x280] sm:$0xff] }
 0x2b8   : > { %15447 = vst [vmem:[#allocation33_spill] sm:$0xff] %v13656_v2  ;;  %v13659_v37 = vadd.f32 %v10809_v63, %v2135_v59  ;;  %v2127_v24 = vadd.f32 %v2126_v53, %v15450_v32  ;;  %v11874_v2 = vld [vmem:[#allocation6 + $0x180] sm:$0xff]   ;;  %v2931_v28 = vpop.f32.mrf.mxu0 }
 0x2b9   : > { %v10666_v20 = vpop.f32.mrf.mxu1  ;;  %v15454_v59 = vld [vmem:[#allocation36_spill] sm:$0xff]  ;;  %11301 = vmatprep.subr.bf16.mxu0 %v11874_v2  ;;  %11068 = vmatmul.mubr.bf16.gmra.mxu0 %v4332_v52 }
 0x2ba   : > { %15449 = vst [vmem:[#allocation32_spill] sm:$0xff] %v13659_v37  ;;  %v13662_v62 = vadd.f32 %v2928_v14, %v2127_v24  ;;  %v2138_v7 = vadd.f32 %v10666_v20, %v15452_v18  ;;  %v10813_v37 = vpop.f32.mrf.mxu0  ;;  %11071 = vmatprep.mubr.bf16.mxu0 %v4333_v34  ;;  %v4235_v14 = vld [vmem:[#allocation2 + $0x269] sm:$0xff]  ;;  %11302 = vmatpush3.bf16.msra.mxu0 %v11874_v2 }
 0x2bb   : > { %v2129_v47 = vpop.f32.mrf.mxu1  ;;  %v4238_v20 = vld [vmem:[#allocation2 + $0x289] sm:$0xff] }
 0x2bc   : > { %15451 = vst [vmem:[#allocation34_spill] sm:$0xff] %v13662_v62  ;;  %v13665_v63 = vadd.f32 %v10810_v31, %v2138_v7  ;;  %v2130_v53 = vadd.f32 %v2129_v47, %v15454_v59  ;;  %v2944_v24 = vpop.f32.mrf.mxu0  ;;  %v4237_v47 = vld [vmem:[#allocation2 + $0x281] sm:$0xff]  ;;  %v3404_v7 = vpack.c.bf16 %v3306_v26, %v3305_v27  ;;  %v13678_v2 = vld [vmem:[%s12278_s30 + $0x3e0] sm:$0xff] }
 0x2bd   : > { %v10669_v32 = vpop.f32.mrf.mxu1  ;;  %10924 = vmatmul.mubr.bf16.gmra.mxu1 %v3402_v41  ;;  %v15458_v41 = vld [vmem:[#allocation39_spill] sm:$0xff]  ;;  %v15460_v59 = vld [vmem:[#allocation38_spill] sm:$0xff]  ;;  %710 = vst [vmem:[#allocation2 + $0x501] sm:$0xff] %v13678_v2 }
 0x2be   : > { %15453 = vst [vmem:[#allocation35_spill] sm:$0xff] %v13665_v63  ;;  %v13668_v10 = vadd.f32 %v2931_v28, %v2130_v53  ;;  %v2151_v39 = vadd.f32 %v10669_v32, %v15456_v55  ;;  %10927 = vmatprep.mubr.bf16.mxu1 %v3403_v5  ;;  %v10814_v18 = vpop.f32.mrf.mxu0  ;;  %v4334_v5 = vpack.c.bf16 %v4236_v35, %v4235_v14  ;;  %v13688_v27 = vld [vmem:[%s12278_s30 + $0x3f0] sm:$0xff]  ;;  %v13691_v26 = vld [vmem:[%s12278_s30 + $0x3f8] sm:$0xff] }
 0x2bf   : > { %v2142_v36 = vpop.f32.mrf.mxu1  ;;  %v3405_v32 = vpack.c.bf16 %v3308_v43, %v3307_v25  ;;  %v4335_v55 = vpack.c.bf16 %v4238_v20, %v4237_v47  ;;  %v3309_v25 = vld [vmem:[#allocation2 + $0x290] sm:$0xff]  ;;  %712 = vst [vmem:[#allocation2 + $0x511] sm:$0xff] %v13688_v27  ;;  %713 = vst [vmem:[#allocation2 + $0x519] sm:$0xff] %v13691_v26 }
 0x2c0   : > { %15455 = vst [vmem:[#allocation36_spill] sm:$0xff] %v13668_v10  ;;  %v13671_v31 = vadd.f32 %v10813_v37, %v2151_v39  ;;  %v2143_v28 = vadd.f32 %v2142_v36, %v15458_v41  ;;  %v2947_v63 = vpop.f32.mrf.mxu0  ;;  %v15462_v39 = vld [vmem:[#allocation41_spill] sm:$0xff]  ;;  %v15464_v47 = vld [vmem:[#allocation40_spill] sm:$0xff] }
 0x2c1   : > { %v10670_v52 = vpop.f32.mrf.mxu1  ;;  %v13684_v41 = vld [vmem:[%s12278_s30 + $0x3e8] sm:$0xff]  ;;  %11072 = vmatmul.mubr.bf16.gmra.mxu0 %v4334_v5 }
 0x2c2   : > { %15457 = vst [vmem:[#allocation37_spill] sm:$0xff] %v13671_v31  ;;  %v13674_v34 = vadd.f32 %v2944_v24, %v2143_v28  ;;  %v2154_v53 = vadd.f32 %v10670_v52, %v15460_v59  ;;  %v10817_v35 = vpop.f32.mrf.mxu0  ;;  %v3310_v24 = vld [vmem:[#allocation2 + $0x298] sm:$0xff]  ;;  %711 = vst [vmem:[#allocation2 + $0x509] sm:$0xff] %v13684_v41  ;;  %11075 = vmatprep.mubr.bf16.mxu0 %v4335_v55  ;;  %v3311_v52 = vld [vmem:[#allocation2 + $0x2a8] sm:$0xff] }
 0x2c3   : > { %v2145_v10 = vpop.f32.mrf.mxu1  ;;  %v4239_v43 = vld [vmem:[#allocation2 + $0x291] sm:$0xff]  ;;  %v4240_v28 = vld [vmem:[#allocation2 + $0x299] sm:$0xff]  ;;  %v4241_v59 = vld [vmem:[#allocation2 + $0x2a9] sm:$0xff]  ;;  %v3406_v9 = vpack.c.bf16 %v3310_v24, %v3309_v25 }
 0x2c4   : > { %15459 = vst [vmem:[#allocation39_spill] sm:$0xff] %v13674_v34  ;;  %v13680_v37 = vadd.f32 %v10814_v18, %v2154_v53  ;;  %v2146_v36 = vadd.f32 %v2145_v10, %v15462_v39  ;;  %v3312_v18 = vld [vmem:[#allocation2 + $0x2b0] sm:$0xff]  ;;  %v2960_v5 = vpop.f32.mrf.mxu0 }
 0x2c5   : > { %v10673_v14 = vpop.f32.mrf.mxu1  ;;  %10928 = vmatmul.mubr.bf16.gmra.mxu1 %v3404_v7  ;;  %v4242_v53 = vld [vmem:[#allocation2 + $0x2b1] sm:$0xff] }
 0x2c6   : > { %15461 = vst [vmem:[#allocation38_spill] sm:$0xff] %v13680_v37  ;;  %v13696_v10 = vadd.f32 %v2947_v63, %v2146_v36  ;;  %v2167_v20 = vadd.f32 %v10673_v14, %v15464_v47  ;;  %10931 = vmatprep.mubr.bf16.mxu1 %v3405_v32  ;;  %v15466_v37 = vld [vmem:[#allocation42_spill] sm:$0xff]  ;;  %v10818_v62 = vpop.f32.mrf.mxu0  ;;  %v4336_v63 = vpack.c.bf16 %v4240_v28, %v4239_v43  ;;  %v15468_v32 = vld [vmem:[#allocation43_spill] sm:$0xff]  ;;  %v15472_v28 = vld [vmem:[#allocation45_spill] sm:$0xff] }
 0x2c7   : > { %v2158_v7 = vpop.f32.mrf.mxu1  ;;  %v3407_v36 = vpack.c.bf16 %v3312_v18, %v3311_v52  ;;  %v4337_v14 = vpack.c.bf16 %v4242_v53, %v4241_v59  ;;  %v3314_v43 = vld [vmem:[#allocation2 + $0x2c0] sm:$0xff]  ;;  %v3315_v59 = vld [vmem:[#allocation2 + $0x2d0] sm:$0xff] }
 0x2c8   : > { %15463 = vst [vmem:[#allocation41_spill] sm:$0xff] %v13696_v10  ;;  %v13699_v39 = vadd.f32 %v10817_v35, %v2167_v20  ;;  %v2159_v34 = vadd.f32 %v2158_v7, %v15466_v37  ;;  %v2963_v3 = vpop.f32.mrf.mxu0  ;;  %v15470_v37 = vld [vmem:[#allocation44_spill] sm:$0xff]  ;;  %v4243_v18 = vld [vmem:[#allocation2 + $0x2b9] sm:$0xff] }
 0x2c9   : > { %v10674_v31 = vpop.f32.mrf.mxu1  ;;  %11076 = vmatmul.mubr.bf16.gmra.mxu0 %v4336_v63 }
 0x2ca   : > { %15465 = vst [vmem:[#allocation40_spill] sm:$0xff] %v13699_v39  ;;  %v13702_v10 = vadd.f32 %v2960_v5, %v2159_v34  ;;  %v2170_v55 = vadd.f32 %v10674_v31, %v15468_v32  ;;  %v10821_v24 = vpop.f32.mrf.mxu0  ;;  %v3313_v34 = vld [vmem:[#allocation2 + $0x2b8] sm:$0xff]  ;;  %11079 = vmatprep.mubr.bf16.mxu0 %v4337_v14  ;;  %v4244_v5 = vld [vmem:[#allocation2 + $0x2c1] sm:$0xff] }
 0x2cb   : > { %v2161_v60 = vpop.f32.mrf.mxu1  ;;  %v3316_v32 = vld [vmem:[#allocation2 + $0x2d8] sm:$0xff] }
 0x2cc   : > { %15467 = vst [vmem:[#allocation42_spill] sm:$0xff] %v13702_v10  ;;  %v13709_v20 = vadd.f32 %v10818_v62, %v2170_v55  ;;  %v2162_v7 = vadd.f32 %v2161_v60, %v15470_v37  ;;  %v2976_v62 = vpop.f32.mrf.mxu0  ;;  %v4245_v55 = vld [vmem:[#allocation2 + $0x2d1] sm:$0xff]  ;;  %v4246_v60 = vld [vmem:[#allocation2 + $0x2d9] sm:$0xff] }
 0x2cd   : > { %v10677_v25 = vpop.f32.mrf.mxu1  ;;  %10932 = vmatmul.mubr.bf16.gmra.mxu1 %v3406_v9  ;;  %v15474_v9 = vld [vmem:[#allocation46_spill] sm:$0xff] }
 0x2ce   : > { %15469 = vst [vmem:[#allocation43_spill] sm:$0xff] %v13709_v20  ;;  %v13712_v31 = vadd.f32 %v2963_v3, %v2162_v7  ;;  %v2183_v52 = vadd.f32 %v10677_v25, %v15472_v28  ;;  %10935 = vmatprep.mubr.bf16.mxu1 %v3407_v36  ;;  %v10822_v47 = vpop.f32.mrf.mxu0  ;;  %v3408_v3 = vpack.c.bf16 %v3314_v43, %v3313_v34  ;;  %v15476_v36 = vld [vmem:[#allocation47_spill] sm:$0xff]  ;;  %v15480_v43 = vld [vmem:[#allocation49_spill] sm:$0xff] }
 0x2cf   : > { %v2174_v53 = vpop.f32.mrf.mxu1  ;;  %v4338_v7 = vpack.c.bf16 %v4244_v5, %v4243_v18  ;;  %v3409_v25 = vpack.c.bf16 %v3316_v32, %v3315_v59  ;;  %v4339_v28 = vpack.c.bf16 %v4246_v60, %v4245_v55  ;;  %v4248_v5 = vld [vmem:[#allocation2 + $0x2e9] sm:$0xff]  ;;  %v3319_v59 = vld [vmem:[#allocation2 + $0x2f8] sm:$0xff]  ;;  %v3320_v32 = vld [vmem:[#allocation2 + $0x300] sm:$0xff] }
 0x2d0   : > { %15471 = vst [vmem:[#allocation44_spill] sm:$0xff] %v13712_v31  ;;  %v13715_v37 = vadd.f32 %v10821_v24, %v2183_v52  ;;  %v2175_v63 = vadd.f32 %v2174_v53, %v15474_v9  ;;  %v2979_v10 = vpop.f32.mrf.mxu0  ;;  %v3317_v53 = vld [vmem:[#allocation2 + $0x2e0] sm:$0xff]  ;;  %v3318_v9 = vld [vmem:[#allocation2 + $0x2e8] sm:$0xff] }
 0x2d1   : > { %v10678_v35 = vpop.f32.mrf.mxu1  ;;  %11080 = vmatmul.mubr.bf16.gmra.mxu0 %v4338_v7  ;;  %v4249_v55 = vld [vmem:[#allocation2 + $0x2f9] sm:$0xff]  ;;  %v3410_v7 = vpack.c.bf16 %v3318_v9, %v3317_v53 }
 0x2d2   : > { %15473 = vst [vmem:[#allocation45_spill] sm:$0xff] %v13715_v37  ;;  %v13718_v31 = vadd.f32 %v2976_v62, %v2175_v63  ;;  %v2186_v14 = vadd.f32 %v10678_v35, %v15476_v36  ;;  %v10825_v52 = vpop.f32.mrf.mxu0  ;;  %11083 = vmatprep.mubr.bf16.mxu0 %v4339_v28  ;;  %v4247_v35 = vld [vmem:[#allocation2 + $0x2e1] sm:$0xff] }
 0x2d3   : > { %v2177_v20 = vpop.f32.mrf.mxu1  ;;  %v15482_v60 = vld [vmem:[#allocation50_spill] sm:$0xff]  ;;  %v4340_v36 = vpack.c.bf16 %v4248_v5, %v4247_v35  ;;  %v3321_v35 = vld [vmem:[#allocation2 + $0x308] sm:$0xff]  ;;  %v3322_v5 = vld [vmem:[#allocation2 + $0x310] sm:$0xff] }
 0x2d4   : > { %15475 = vst [vmem:[#allocation46_spill] sm:$0xff] %v13718_v31  ;;  %v13721_v39 = vadd.f32 %v10822_v47, %v2186_v14  ;;  %v2178_v22 = vadd.f32 %v2177_v20, %v15478_v30  ;;  %v2992_v47 = vpop.f32.mrf.mxu0  ;;  %v4250_v30 = vld [vmem:[#allocation2 + $0x301] sm:$0xff] }
 0x2d5   : > { %v10681_v24 = vpop.f32.mrf.mxu1  ;;  %10936 = vmatmul.mubr.bf16.gmra.mxu1 %v3408_v3  ;;  %v13730_v3 = vld [vmem:[#allocation6 + $0x1f8] sm:$0xff]  }
 0x2d6   : > { %15477 = vst [vmem:[#allocation47_spill] sm:$0xff] %v13721_v39  ;;  %v13724_v34 = vadd.f32 %v2979_v10, %v2178_v22  ;;  %v2199_v18 = vadd.f32 %v10681_v24, %v15480_v43  ;;  %10939 = vmatprep.mubr.bf16.mxu1 %v3409_v25  ;;  %15483 = vst [vmem:[#allocation50_spill] sm:$0xff] %v13730_v3  ;;  %v10826_v10 = vpop.f32.mrf.mxu0  ;;  %v15485_v25 = vld [vmem:[#allocation51_spill] sm:$0xff]  ;;  %v3411_v24 = vpack.c.bf16 %v3320_v32, %v3319_v59 }
 0x2d7   : > { %v2190_v62 = vpop.f32.mrf.mxu1  ;;  %v4341_v43 = vpack.c.bf16 %v4250_v30, %v4249_v55  ;;  %11431 = vmatprep.subr.bf16.mxu1 %v13730_v3  ;;  %v4251_v55 = vld [vmem:[#allocation2 + $0x309] sm:$0xff]  ;;  %v4252_v30 = vld [vmem:[#allocation2 + $0x311] sm:$0xff] }
 0x2d8   : > { %15479 = vst [vmem:[#allocation48_spill] sm:$0xff] %v13724_v34  ;;  %v13727_v20 = vadd.f32 %v10825_v52, %v2199_v18  ;;  %v2191_v63 = vadd.f32 %v2190_v62, %v15482_v60  ;;  %v13736_v34 = vld [vmem:[#allocation6 + $0x238] sm:$0xff]   ;;  %v2995_v18 = vpop.f32.mrf.mxu0 }
 0x2d9   : > { %v10682_v22 = vpop.f32.mrf.mxu1  ;;  %15486 = vst [vmem:[#allocation51_spill] sm:$0xff] %v13736_v34  ;;  %v15488_v62 = vld [vmem:[#allocation52_spill] sm:$0xff]  ;;  %11575 = vmatprep.subr.bf16.mxu0 %v13736_v34  ;;  %11084 = vmatmul.mubr.bf16.gmra.mxu0 %v4340_v36  ;;  %v15496_v34 = vld [vmem:[#allocation59_spill] sm:$0xff] }
 0x2da   : > { %15481 = vst [vmem:[#allocation49_spill] sm:$0xff] %v13727_v20  ;;  %v13732_v14 = vadd.f32 %v2992_v47, %v2191_v63  ;;  %v2202_v28 = vadd.f32 %v10682_v22, %v15485_v25  ;;  %v10829_v9 = vpop.f32.mrf.mxu0  ;;  %v15490_v47 = vld [vmem:[#allocation53_spill] sm:$0xff]  ;;  %11087 = vmatprep.mubr.bf16.mxu0 %v4341_v43  ;;  %v3323_v63 = vld [vmem:[#allocation2 + $0x320] sm:$0xff]  ;;  %v3324_v25 = vld [vmem:[#allocation2 + $0x328] sm:$0xff] }
 0x2db   : > { %v2193_v52 = vpop.f32.mrf.mxu1 }
 0x2dc   : > { %15484 = vst [vmem:[#allocation114_spill] sm:$0xff] %v13732_v14  ;;  %v13738_v20 = vadd.f32 %v10826_v10, %v2202_v28  ;;  %v2194_v60 = vadd.f32 %v2193_v52, %v15488_v62  ;;  %v3008_v10 = vpop.f32.mrf.mxu0  ;;  %v4253_v28 = vld [vmem:[#allocation2 + $0x321] sm:$0xff]  ;;  %v4254_v52 = vld [vmem:[#allocation2 + $0x329] sm:$0xff] }
 0x2dd   : > { %v10685_v53 = vpop.f32.mrf.mxu1  ;;  %10940 = vmatmul.mubr.bf16.gmra.mxu1 %v3410_v7  ;;  %v15492_v7 = vld [vmem:[#allocation55_spill] sm:$0xff] }
 0x2de   : > { %15487 = vst [vmem:[#allocation115_spill] sm:$0xff] %v13738_v20  ;;  %v13742_v59 = vadd.f32 %v2995_v18, %v2194_v60  ;;  %v2215_v32 = vadd.f32 %v10685_v53, %v15490_v47  ;;  %10943 = vmatprep.mubr.bf16.mxu1 %v3411_v24  ;;  %v10830_v14 = vpop.f32.mrf.mxu0  ;;  %v3412_v18 = vpack.c.bf16 %v3322_v5, %v3321_v35  ;;  %v15494_v24 = vld [vmem:[#allocation57_spill] sm:$0xff] }
 0x2df   : > { %v2206_v22 = vpop.f32.mrf.mxu1  ;;  %v4342_v60 = vpack.c.bf16 %v4252_v30, %v4251_v55  ;;  %v3413_v53 = vpack.c.bf16 %v3324_v25, %v3323_v63  ;;  %v4343_v47 = vpack.c.bf16 %v4254_v52, %v4253_v28  ;;  %v15498_v5 = vld [vmem:[#allocation61_spill] sm:$0xff]  ;;  %v3327_v63 = vld [vmem:[#allocation2 + $0x348] sm:$0xff] }
 0x2e0   : > { %15489 = vst [vmem:[#allocation52_spill] sm:$0xff] %v13742_v59  ;;  %v13745_v62 = vadd.f32 %v10829_v9, %v2215_v32  ;;  %v2207_v36 = vadd.f32 %v2206_v22, %v15492_v7  ;;  %v3011_v31 = vpop.f32.mrf.mxu0  ;;  %v3325_v22 = vld [vmem:[#allocation2 + $0x330] sm:$0xff]  ;;  %v3326_v7 = vld [vmem:[#allocation2 + $0x338] sm:$0xff]  ;;  %v15500_v52 = vld [vmem:[#allocation63_spill] sm:$0xff] }
 0x2e1   : > { %v10686_v20 = vpop.f32.mrf.mxu1  ;;  %11088 = vmatmul.mubr.bf16.gmra.mxu0 %v4342_v60  ;;  %v4256_v30 = vld [vmem:[#allocation2 + $0x339] sm:$0xff]  ;;  %v3328_v25 = vld [vmem:[#allocation2 + $0x350] sm:$0xff] }
 0x2e2   : > { %15491 = vst [vmem:[#allocation53_spill] sm:$0xff] %v13745_v62  ;;  %v13748_v59 = vadd.f32 %v3008_v10, %v2207_v36  ;;  %v2218_v43 = vadd.f32 %v10686_v20, %v15494_v24  ;;  %v10833_v32 = vpop.f32.mrf.mxu0  ;;  %11091 = vmatprep.mubr.bf16.mxu0 %v4343_v47  ;;  %v4255_v20 = vld [vmem:[#allocation2 + $0x331] sm:$0xff]  ;;  %v4257_v28 = vld [vmem:[#allocation2 + $0x349] sm:$0xff]  ;;  %v3415_v47 = vpack.c.bf16 %v3328_v25, %v3327_v63  ;;  %v4260_v63 = vld [vmem:[#allocation2 + $0x361] sm:$0xff] }
 0x2e3   : > { %v2209_v39 = vpop.f32.mrf.mxu1 }
 0x2e4   : > { %15493 = vst [vmem:[#allocation55_spill] sm:$0xff] %v13748_v59  ;;  %v13751_v37 = vadd.f32 %v10830_v14, %v2218_v43  ;;  %v2210_v3 = vadd.f32 %v2209_v39, %v15496_v34  ;;  %v3024_v14 = vpop.f32.mrf.mxu0  ;;  %v4258_v39 = vld [vmem:[#allocation2 + $0x351] sm:$0xff]  ;;  %v15504_v59 = vld [vmem:[#allocation67_spill] sm:$0xff] }
 0x2e5   : > { %v10689_v9 = vpop.f32.mrf.mxu1  ;;  %10944 = vmatmul.mubr.bf16.gmra.mxu1 %v3412_v18  ;;  %v15502_v43 = vld [vmem:[#allocation65_spill] sm:$0xff] }
 0x2e6   : > { %15495 = vst [vmem:[#allocation57_spill] sm:$0xff] %v13751_v37  ;;  %v13754_v35 = vadd.f32 %v3011_v31, %v2210_v3  ;;  %v2231_v55 = vadd.f32 %v10689_v9, %v15498_v5  ;;  %10947 = vmatprep.mubr.bf16.mxu1 %v3413_v53  ;;  %v10834_v60 = vpop.f32.mrf.mxu0  ;;  %v3414_v31 = vpack.c.bf16 %v3326_v7, %v3325_v22  ;;  %v15506_v7 = vld [vmem:[#allocation69_spill] sm:$0xff] }
 0x2e7   : > { %v2222_v10 = vpop.f32.mrf.mxu1  ;;  %v4344_v3 = vpack.c.bf16 %v4256_v30, %v4255_v20  ;;  %v4345_v9 = vpack.c.bf16 %v4258_v39, %v4257_v28  ;;  %v4259_v30 = vld [vmem:[#allocation2 + $0x359] sm:$0xff] }
 0x2e8   : > { %15497 = vst [vmem:[#allocation59_spill] sm:$0xff] %v13754_v35  ;;  %v13757_v34 = vadd.f32 %v10833_v32, %v2231_v55  ;;  %v2223_v36 = vadd.f32 %v2222_v10, %v15500_v52  ;;  %v3027_v35 = vpop.f32.mrf.mxu0  ;;  %v3329_v10 = vld [vmem:[#allocation2 + $0x358] sm:$0xff]  ;;  %v3330_v52 = vld [vmem:[#allocation2 + $0x360] sm:$0xff] }
 0x2e9   : > { %v10690_v18 = vpop.f32.mrf.mxu1  ;;  %11092 = vmatmul.mubr.bf16.gmra.mxu0 %v4344_v3  ;;  %v3332_v39 = vld [vmem:[#allocation2 + $0x378] sm:$0xff] }
 0x2ea   : > { %15499 = vst [vmem:[#allocation61_spill] sm:$0xff] %v13757_v34  ;;  %v13760_v24 = vadd.f32 %v3024_v14, %v2223_v36  ;;  %v2234_v53 = vadd.f32 %v10690_v18, %v15502_v43  ;;  %v10837_v55 = vpop.f32.mrf.mxu0  ;;  %11095 = vmatprep.mubr.bf16.mxu0 %v4345_v9  ;;  %v3331_v14 = vld [vmem:[#allocation2 + $0x370] sm:$0xff] }
 0x2eb   : > { %v2225_v5 = vpop.f32.mrf.mxu1  ;;  %v4261_v36 = vld [vmem:[#allocation2 + $0x371] sm:$0xff] }
 0x2ec   : > { %15501 = vst [vmem:[#allocation63_spill] sm:$0xff] %v13760_v24  ;;  %v13763_v37 = vadd.f32 %v10834_v60, %v2234_v53  ;;  %v2226_v62 = vadd.f32 %v2225_v5, %v15504_v59  ;;  %v3040_v28 = vpop.f32.mrf.mxu0  ;;  %v4262_v59 = vld [vmem:[#allocation2 + $0x379] sm:$0xff]  ;;  %v15508_v60 = vld [vmem:[#allocation71_spill] sm:$0xff]  ;;  %v3417_v5 = vpack.c.bf16 %v3332_v39, %v3331_v14 }
 0x2ed   : > { %v10693_v32 = vpop.f32.mrf.mxu1  ;;  %10948 = vmatmul.mubr.bf16.gmra.mxu1 %v3414_v31  ;;  %v15512_v24 = vld [vmem:[#allocation75_spill] sm:$0xff] }
 0x2ee   : > { %15503 = vst [vmem:[#allocation65_spill] sm:$0xff] %v13763_v37  ;;  %v13766_v22 = vadd.f32 %v3027_v35, %v2226_v62  ;;  %v2247_v20 = vadd.f32 %v10693_v32, %v15506_v7  ;;  %10951 = vmatprep.mubr.bf16.mxu1 %v3415_v47  ;;  %v10838_v43 = vpop.f32.mrf.mxu0  ;;  %v3416_v62 = vpack.c.bf16 %v3330_v52, %v3329_v10  ;;  %v15510_v47 = vld [vmem:[#allocation73_spill] sm:$0xff]  ;;  %v4264_v14 = vld [vmem:[#allocation2 + $0x389] sm:$0xff] }
 0x2ef   : > { %v2238_v25 = vpop.f32.mrf.mxu1  ;;  %v4346_v35 = vpack.c.bf16 %v4260_v63, %v4259_v30  ;;  %v4347_v32 = vpack.c.bf16 %v4262_v59, %v4261_v36  ;;  %v15514_v52 = vld [vmem:[#allocation77_spill] sm:$0xff]  ;;  %v4263_v63 = vld [vmem:[#allocation2 + $0x381] sm:$0xff] }
 0x2f0   : > { %15505 = vst [vmem:[#allocation67_spill] sm:$0xff] %v13766_v22  ;;  %v13769_v18 = vadd.f32 %v10837_v55, %v2247_v20  ;;  %v2239_v31 = vadd.f32 %v2238_v25, %v15508_v60  ;;  %v3043_v22 = vpop.f32.mrf.mxu0  ;;  %v3333_v25 = vld [vmem:[#allocation2 + $0x380] sm:$0xff]  ;;  %v3334_v60 = vld [vmem:[#allocation2 + $0x388] sm:$0xff] }
 0x2f1   : > { %v10694_v3 = vpop.f32.mrf.mxu1  ;;  %11096 = vmatmul.mubr.bf16.gmra.mxu0 %v4346_v35  ;;  %v3336_v59 = vld [vmem:[#allocation2 + $0x3a0] sm:$0xff] }
 0x2f2   : > { %15507 = vst [vmem:[#allocation69_spill] sm:$0xff] %v13769_v18  ;;  %v13772_v53 = vadd.f32 %v3040_v28, %v2239_v31  ;;  %v2250_v9 = vadd.f32 %v10694_v3, %v15510_v47  ;;  %v10841_v20 = vpop.f32.mrf.mxu0  ;;  %11099 = vmatprep.mubr.bf16.mxu0 %v4347_v32  ;;  %v3335_v28 = vld [vmem:[#allocation2 + $0x398] sm:$0xff] }
 0x2f3   : > { %v2241_v7 = vpop.f32.mrf.mxu1  ;;  %v4265_v31 = vld [vmem:[#allocation2 + $0x399] sm:$0xff] }
 0x2f4   : > { %15509 = vst [vmem:[#allocation71_spill] sm:$0xff] %v13772_v53  ;;  %v13775_v37 = vadd.f32 %v10838_v43, %v2250_v9  ;;  %v2242_v34 = vadd.f32 %v2241_v7, %v15512_v24  ;;  %v3056_v36 = vpop.f32.mrf.mxu0  ;;  %v4266_v24 = vld [vmem:[#allocation2 + $0x3a1] sm:$0xff]  ;;  %v3419_v7 = vpack.c.bf16 %v3336_v59, %v3335_v28  ;;  %v4268_v28 = vld [vmem:[#allocation2 + $0x3b1] sm:$0xff] }
 0x2f5   : > { %v10697_v55 = vpop.f32.mrf.mxu1  ;;  %10952 = vmatmul.mubr.bf16.gmra.mxu1 %v3416_v62  ;;  %v15516_v43 = vld [vmem:[#allocation79_spill] sm:$0xff] }
 0x2f6   : > { %15511 = vst [vmem:[#allocation73_spill] sm:$0xff] %v13775_v37  ;;  %v13778_v10 = vadd.f32 %v3043_v22, %v2242_v34  ;;  %v2263_v30 = vadd.f32 %v10697_v55, %v15514_v52  ;;  %10955 = vmatprep.mubr.bf16.mxu1 %v3417_v5  ;;  %v10842_v47 = vpop.f32.mrf.mxu0  ;;  %v3418_v34 = vpack.c.bf16 %v3334_v60, %v3333_v25  ;;  %v15518_v5 = vld [vmem:[#allocation81_spill] sm:$0xff]  ;;  %v15520_v53 = vld [vmem:[#allocation83_spill] sm:$0xff] }
 0x2f7   : > { %v2254_v39 = vpop.f32.mrf.mxu1  ;;  %v4348_v22 = vpack.c.bf16 %v4264_v14, %v4263_v63  ;;  %v4349_v55 = vpack.c.bf16 %v4266_v24, %v4265_v31  ;;  %v15522_v60 = vld [vmem:[#allocation85_spill] sm:$0xff]  ;;  %v4267_v14 = vld [vmem:[#allocation2 + $0x3a9] sm:$0xff] }
 0x2f8   : > { %15513 = vst [vmem:[#allocation75_spill] sm:$0xff] %v13778_v10  ;;  %v13781_v3 = vadd.f32 %v10841_v20, %v2263_v30  ;;  %v2255_v62 = vadd.f32 %v2254_v39, %v15516_v43  ;;  %v3059_v10 = vpop.f32.mrf.mxu0  ;;  %v3337_v39 = vld [vmem:[#allocation2 + $0x3a8] sm:$0xff]  ;;  %v3338_v43 = vld [vmem:[#allocation2 + $0x3b0] sm:$0xff] }
 0x2f9   : > { %v10698_v35 = vpop.f32.mrf.mxu1  ;;  %11100 = vmatmul.mubr.bf16.gmra.mxu0 %v4348_v22  ;;  %v3340_v24 = vld [vmem:[#allocation2 + $0x3c8] sm:$0xff] }
 0x2fa   : > { %15515 = vst [vmem:[#allocation77_spill] sm:$0xff] %v13781_v3  ;;  %v13784_v9 = vadd.f32 %v3056_v36, %v2255_v62  ;;  %v2266_v32 = vadd.f32 %v10698_v35, %v15518_v5  ;;  %v10845_v30 = vpop.f32.mrf.mxu0  ;;  %11103 = vmatprep.mubr.bf16.mxu0 %v4349_v55  ;;  %v3339_v36 = vld [vmem:[#allocation2 + $0x3c0] sm:$0xff] }
 0x2fb   : > { %v2257_v52 = vpop.f32.mrf.mxu1  ;;  %v4269_v62 = vld [vmem:[#allocation2 + $0x3c1] sm:$0xff] }
 0x2fc   : > { %15517 = vst [vmem:[#allocation79_spill] sm:$0xff] %v13784_v9  ;;  %v13787_v37 = vadd.f32 %v10842_v47, %v2266_v32  ;;  %v2258_v18 = vadd.f32 %v2257_v52, %v15520_v53  ;;  %v3072_v31 = vpop.f32.mrf.mxu0  ;;  %v4270_v53 = vld [vmem:[#allocation2 + $0x3c9] sm:$0xff]  ;;  %v3421_v52 = vpack.c.bf16 %v3340_v24, %v3339_v36  ;;  %v4272_v36 = vld [vmem:[#allocation2 + $0x3d9] sm:$0xff] }
 0x2fd   : > { %v10701_v20 = vpop.f32.mrf.mxu1  ;;  %10956 = vmatmul.mubr.bf16.gmra.mxu1 %v3418_v34  ;;  %v15524_v47 = vld [vmem:[#allocation87_spill] sm:$0xff] }
 0x2fe   : > { %15519 = vst [vmem:[#allocation81_spill] sm:$0xff] %v13787_v37  ;;  %v13790_v25 = vadd.f32 %v3059_v10, %v2258_v18  ;;  %v2279_v63 = vadd.f32 %v10701_v20, %v15522_v60  ;;  %10959 = vmatprep.mubr.bf16.mxu1 %v3419_v7  ;;  %v10846_v5 = vpop.f32.mrf.mxu0  ;;  %v3420_v18 = vpack.c.bf16 %v3338_v43, %v3337_v39  ;;  %v15526_v7 = vld [vmem:[#allocation89_spill] sm:$0xff]  ;;  %v15528_v9 = vld [vmem:[#allocation91_spill] sm:$0xff] }
 0x2ff   : > { %v2270_v59 = vpop.f32.mrf.mxu1  ;;  %v4350_v10 = vpack.c.bf16 %v4268_v28, %v4267_v14  ;;  %v4351_v20 = vpack.c.bf16 %v4270_v53, %v4269_v62  ;;  %v15530_v43 = vld [vmem:[#allocation93_spill] sm:$0xff] }
 0x300   : > { %15521 = vst [vmem:[#allocation83_spill] sm:$0xff] %v13790_v25  ;;  %v13793_v35 = vadd.f32 %v10845_v30, %v2279_v63  ;;  %v2271_v34 = vadd.f32 %v2270_v59, %v15524_v47  ;;  %v3075_v25 = vpop.f32.mrf.mxu0  ;;  %v3341_v59 = vld [vmem:[#allocation2 + $0x3d0] sm:$0xff]  ;;  %v3342_v47 = vld [vmem:[#allocation2 + $0x3d8] sm:$0xff] }
 0x301   : > { %v10702_v22 = vpop.f32.mrf.mxu1  ;;  %11104 = vmatmul.mubr.bf16.gmra.mxu0 %v4350_v10  ;;  %v4271_v28 = vld [vmem:[#allocation2 + $0x3d1] sm:$0xff] }
 0x302   : > { %15523 = vst [vmem:[#allocation85_spill] sm:$0xff] %v13793_v35  ;;  %v13796_v32 = vadd.f32 %v3072_v31, %v2271_v34  ;;  %v2282_v55 = vadd.f32 %v10702_v22, %v15526_v7  ;;  %v10849_v63 = vpop.f32.mrf.mxu0  ;;  %11107 = vmatprep.mubr.bf16.mxu0 %v4351_v20  ;;  %v3343_v31 = vld [vmem:[#allocation2 + $0x3e8] sm:$0xff]  ;;  %v3344_v53 = vld [vmem:[#allocation2 + $0x3f0] sm:$0xff] }
 0x303   : > { %v2273_v60 = vpop.f32.mrf.mxu1  ;;  %v4273_v34 = vld [vmem:[#allocation2 + $0x3e9] sm:$0xff] }
 0x304   : > { %15525 = vst [vmem:[#allocation87_spill] sm:$0xff] %v13796_v32  ;;  %v13799_v37 = vadd.f32 %v10846_v5, %v2282_v55  ;;  %v2274_v3 = vadd.f32 %v2273_v60, %v15528_v9  ;;  %v3088_v62 = vpop.f32.mrf.mxu0  ;;  %v4274_v9 = vld [vmem:[#allocation2 + $0x3f1] sm:$0xff]  ;;  %v15532_v5 = vld [vmem:[#allocation95_spill] sm:$0xff]  ;;  %v3423_v60 = vpack.c.bf16 %v3344_v53, %v3343_v31 }
 0x305   : > { %v10705_v30 = vpop.f32.mrf.mxu1  ;;  %10960 = vmatmul.mubr.bf16.gmra.mxu1 %v3420_v18  ;;  %v15536_v32 = vld [vmem:[#allocation99_spill] sm:$0xff] }
 0x306   : > { %15527 = vst [vmem:[#allocation89_spill] sm:$0xff] %v13799_v37  ;;  %v13802_v39 = vadd.f32 %v3075_v25, %v2274_v3  ;;  %v2295_v14 = vadd.f32 %v10705_v30, %v15530_v43  ;;  %10963 = vmatprep.mubr.bf16.mxu1 %v3421_v52  ;;  %v10850_v7 = vpop.f32.mrf.mxu0  ;;  %v3422_v3 = vpack.c.bf16 %v3342_v47, %v3341_v59  ;;  %v15534_v52 = vld [vmem:[#allocation97_spill] sm:$0xff]  ;;  %v4276_v31 = vld [vmem:[#allocation2 + $0x401] sm:$0xff] }
 0x307   : > { %v2286_v24 = vpop.f32.mrf.mxu1  ;;  %v4352_v25 = vpack.c.bf16 %v4272_v36, %v4271_v28  ;;  %v4353_v30 = vpack.c.bf16 %v4274_v9, %v4273_v34  ;;  %v15538_v47 = vld [vmem:[#allocation101_spill] sm:$0xff] }
 0x308   : > { %15529 = vst [vmem:[#allocation91_spill] sm:$0xff] %v13802_v39  ;;  %v13805_v22 = vadd.f32 %v10849_v63, %v2295_v14  ;;  %v2287_v18 = vadd.f32 %v2286_v24, %v15532_v5  ;;  %v3091_v39 = vpop.f32.mrf.mxu0  ;;  %v3345_v24 = vld [vmem:[#allocation2 + $0x3f8] sm:$0xff]  ;;  %v3346_v5 = vld [vmem:[#allocation2 + $0x400] sm:$0xff] }
 0x309   : > { %v10706_v10 = vpop.f32.mrf.mxu1  ;;  %11108 = vmatmul.mubr.bf16.gmra.mxu0 %v4352_v25  ;;  %v4275_v36 = vld [vmem:[#allocation2 + $0x3f9] sm:$0xff] }
 0x30a   : > { %15531 = vst [vmem:[#allocation93_spill] sm:$0xff] %v13805_v22  ;;  %v13808_v55 = vadd.f32 %v3088_v62, %v2287_v18  ;;  %v2298_v20 = vadd.f32 %v10706_v10, %v15534_v52  ;;  %v10853_v14 = vpop.f32.mrf.mxu0  ;;  %11111 = vmatprep.mubr.bf16.mxu0 %v4353_v30  ;;  %v3347_v62 = vld [vmem:[#allocation2 + $0x410] sm:$0xff]  ;;  %v3348_v9 = vld [vmem:[#allocation2 + $0x418] sm:$0xff] }
 0x30b   : > { %v2289_v43 = vpop.f32.mrf.mxu1  ;;  %v4277_v18 = vld [vmem:[#allocation2 + $0x411] sm:$0xff] }
 0x30c   : > { %15533 = vst [vmem:[#allocation95_spill] sm:$0xff] %v13808_v55  ;;  %v13811_v37 = vadd.f32 %v10850_v7, %v2298_v20  ;;  %v2290_v35 = vadd.f32 %v2289_v43, %v15536_v32  ;;  %v3104_v34 = vpop.f32.mrf.mxu0  ;;  %v4278_v32 = vld [vmem:[#allocation2 + $0x419] sm:$0xff]  ;;  %v15539_v7 = vld [vmem:[#allocation103_spill] sm:$0xff]  ;;  %v3425_v43 = vpack.c.bf16 %v3348_v9, %v3347_v62 }
 0x30d   : > { %v10709_v63 = vpop.f32.mrf.mxu1  ;;  %10964 = vmatmul.mubr.bf16.gmra.mxu1 %v3422_v3  ;;  %v15541_v55 = vld [vmem:[#allocation107_spill] sm:$0xff]  ;;  %v3351_v62 = vld [vmem:[#allocation2 + $0x438] sm:$0xff] }
 0x30e   : > { %15535 = vst [vmem:[#allocation97_spill] sm:$0xff] %v13811_v37  ;;  %v13814_v59 = vadd.f32 %v3091_v39, %v2290_v35  ;;  %v2311_v28 = vadd.f32 %v10709_v63, %v15538_v47  ;;  %10967 = vmatprep.mubr.bf16.mxu1 %v3423_v60  ;;  %v10854_v52 = vpop.f32.mrf.mxu0  ;;  %v3424_v35 = vpack.c.bf16 %v3346_v5, %v3345_v24  ;;  %v15540_v60 = vld [vmem:[#allocation105_spill] sm:$0xff] }
 0x30f   : > { %v2302_v53 = vpop.f32.mrf.mxu1  ;;  %v4354_v39 = vpack.c.bf16 %v4276_v31, %v4275_v36  ;;  %v4355_v63 = vpack.c.bf16 %v4278_v32, %v4277_v18  ;;  %v4279_v36 = vld [vmem:[#allocation2 + $0x421] sm:$0xff]  ;;  %v4280_v31 = vld [vmem:[#allocation2 + $0x429] sm:$0xff]  ;;  %v4281_v32 = vld [vmem:[#allocation2 + $0x439] sm:$0xff] }
 0x310   : > { %15537 = vst [vmem:[#allocation99_spill] sm:$0xff] %v13814_v59  ;;  %v13817_v10 = vadd.f32 %v10853_v14, %v2311_v28  ;;  %v2303_v3 = vadd.f32 %v2302_v53, %v15539_v7  ;;  %v3107_v59 = vpop.f32.mrf.mxu0  ;;  %v3349_v53 = vld [vmem:[#allocation2 + $0x420] sm:$0xff]  ;;  %v3350_v7 = vld [vmem:[#allocation2 + $0x428] sm:$0xff] }
 0x311   : > { %v10710_v25 = vpop.f32.mrf.mxu1  ;;  %11112 = vmatmul.mubr.bf16.gmra.mxu0 %v4354_v39  ;;  %v3352_v18 = vld [vmem:[#allocation2 + $0x440] sm:$0xff] }
 0x312   : > { %v13820_v20 = vadd.f32 %v3104_v34, %v2303_v3  ;;  %v2314_v30 = vadd.f32 %v10710_v25, %v15540_v60  ;;  %v11017_v28 = vpop.f32.mrf.mxu0  ;;  %11115 = vmatprep.mubr.bf16.mxu0 %v4355_v63  ;;  %v3427_v60 = vpack.c.bf16 %v3352_v18, %v3351_v62  ;;  %v3356_v18 = vld [vmem:[#allocation2 + $0x468] sm:$0xff] }
 0x313   : > { %v2305_v47 = vpop.f32.mrf.mxu1 }
 0x314   : > { %v13823_v37 = vadd.f32 %v10854_v52, %v2314_v30  ;;  %v2306_v22 = vadd.f32 %v2305_v47, %v15541_v55  ;;  %v4468_v9 = vpop.f32.mrf.mxu0  ;;  %v4282_v55 = vld [vmem:[#allocation2 + $0x441] sm:$0xff] }
 0x315   : > { %v10873_v14 = vpop.f32.mrf.mxu1  ;;  %10968 = vmatmul.mubr.bf16.gmra.mxu1 %v3424_v35  ;;  %v4357_v30 = vpack.c.bf16 %v4282_v55, %v4281_v32  ;;  %v4285_v32 = vld [vmem:[#allocation2 + $0x461] sm:$0xff] }
 0x316   : > { %v13826_v24 = vadd.f32 %v3107_v59, %v2306_v22  ;;  %v4051_v5 = vadd.f32 %v10873_v14, %v13417_v21  ;;  %10971 = vmatprep.mubr.bf16.mxu1 %v3425_v43  ;;  %v11018_v35 = vpop.f32.mrf.mxu0  ;;  %v3426_v22 = vpack.c.bf16 %v3350_v7, %v3349_v53  ;;  %v4356_v59 = vpack.c.bf16 %v4280_v31, %v4279_v36  ;;  %v4284_v36 = vld [vmem:[#allocation2 + $0x451] sm:$0xff]  ;;  %v3355_v31 = vld [vmem:[#allocation2 + $0x460] sm:$0xff] }
 0x317   : > { %v3538_v34 = vpop.f32.mrf.mxu1 }
 0x318   : > { %v13829_v3 = vadd.f32 %v11017_v28, %v4051_v5  ;;  %v4049_v25 = vadd.f32 %v3538_v34, %v13420_v45  ;;  %v4471_v63 = vpop.f32.mrf.mxu0  ;;  %v3353_v45 = vld [vmem:[#allocation2 + $0x448] sm:$0xff]  ;;  %v3354_v34 = vld [vmem:[#allocation2 + $0x450] sm:$0xff] }
 0x319   : > { %v10874_v52 = vpop.f32.mrf.mxu1  ;;  %11116 = vmatmul.mubr.bf16.gmra.mxu0 %v4356_v59 }
 0x31a   : > { %v13832_v39 = vadd.f32 %v4468_v9, %v4049_v25  ;;  %v4052_v21 = vadd.f32 %v10874_v52, %v13423_v51  ;;  %v11021_v5 = vpop.f32.mrf.mxu0  ;;  %11119 = vmatprep.mubr.bf16.mxu0 %v4357_v30  ;;  %v4283_v51 = vld [vmem:[#allocation2 + $0x449] sm:$0xff] }
 0x31b   : > { %v3541_v43 = vpop.f32.mrf.mxu1  ;;  %v4358_v59 = vpack.c.bf16 %v4284_v36, %v4283_v51  ;;  %v4288_v51 = vld [vmem:[#allocation2 + $0x479] sm:$0xff]  ;;  %v3359_v36 = vld [vmem:[#allocation2 + $0x488] sm:$0xff] }
 0x31c   : > { %v13835_v47 = vadd.f32 %v11018_v35, %v4052_v21  ;;  %v4050_v14 = vadd.f32 %v3541_v43, %v13426_v17  ;;  %v4484_v9 = vpop.f32.mrf.mxu0  ;;  %v4286_v17 = vld [vmem:[#allocation2 + $0x469] sm:$0xff] }
 0x31d   : > { %v10877_v28 = vpop.f32.mrf.mxu1  ;;  %10972 = vmatmul.mubr.bf16.gmra.mxu1 %v3426_v22  ;;  %v3428_v22 = vpack.c.bf16 %v3354_v34, %v3353_v45  ;;  %v4359_v30 = vpack.c.bf16 %v4286_v17, %v4285_v32  ;;  %v4289_v32 = vld [vmem:[#allocation2 + $0x489] sm:$0xff] }
 0x31e   : > { %v13838_v53 = vadd.f32 %v4471_v63, %v4050_v14  ;;  %v4055_v7 = vadd.f32 %v10877_v28, %v13429_v1  ;;  %10975 = vmatprep.mubr.bf16.mxu1 %v3427_v60  ;;  %v11022_v35 = vpop.f32.mrf.mxu0  ;;  %v3429_v60 = vpack.c.bf16 %v3356_v18, %v3355_v31  ;;  %v3360_v18 = vld [vmem:[#allocation2 + $0x490] sm:$0xff] }
 0x31f   : > { %v3554_v62 = vpop.f32.mrf.mxu1 }
 0x320   : > { %v13841_v55 = vadd.f32 %v11021_v5, %v4055_v7  ;;  %v4053_v25 = vadd.f32 %v3554_v62, %v13432_v23  ;;  %v4487_v63 = vpop.f32.mrf.mxu0  ;;  %v3357_v23 = vld [vmem:[#allocation2 + $0x470] sm:$0xff]  ;;  %v3358_v62 = vld [vmem:[#allocation2 + $0x478] sm:$0xff] }
 0x321   : > { %v10878_v52 = vpop.f32.mrf.mxu1  ;;  %11120 = vmatmul.mubr.bf16.gmra.mxu0 %v4358_v59 }
 0x322   : > { %v13844_v21 = vadd.f32 %v4484_v9, %v4053_v25  ;;  %v4056_v1 = vadd.f32 %v10878_v52, %v13435_v46  ;;  %v11025_v7 = vpop.f32.mrf.mxu0  ;;  %11123 = vmatprep.mubr.bf16.mxu0 %v4359_v30  ;;  %v4287_v46 = vld [vmem:[#allocation2 + $0x471] sm:$0xff] }
 0x323   : > { %v3557_v43 = vpop.f32.mrf.mxu1  ;;  %v4360_v59 = vpack.c.bf16 %v4288_v51, %v4287_v46  ;;  %v4292_v46 = vld [vmem:[#allocation2 + $0x4a1] sm:$0xff]  ;;  %v3363_v51 = vld [vmem:[#allocation2 + $0x4b0] sm:$0xff] }
 0x324   : > { %v13847_v14 = vadd.f32 %v11022_v35, %v4056_v1  ;;  %v4054_v28 = vadd.f32 %v3557_v43, %v13438_v13  ;;  %v4500_v9 = vpop.f32.mrf.mxu0  ;;  %v4290_v13 = vld [vmem:[#allocation2 + $0x491] sm:$0xff] }
 0x325   : > { %v10881_v5 = vpop.f32.mrf.mxu1  ;;  %10976 = vmatmul.mubr.bf16.gmra.mxu1 %v3428_v22  ;;  %v3430_v22 = vpack.c.bf16 %v3358_v62, %v3357_v23  ;;  %v4361_v30 = vpack.c.bf16 %v4290_v13, %v4289_v32  ;;  %v4293_v32 = vld [vmem:[#allocation2 + $0x4b1] sm:$0xff] }
 0x326   : > { %v13850_v45 = vadd.f32 %v4487_v63, %v4054_v28  ;;  %v4059_v34 = vadd.f32 %v10881_v5, %v13441_v38  ;;  %10979 = vmatprep.mubr.bf16.mxu1 %v3429_v60  ;;  %v11026_v35 = vpop.f32.mrf.mxu0  ;;  %v3431_v60 = vpack.c.bf16 %v3360_v18, %v3359_v36  ;;  %v3364_v18 = vld [vmem:[#allocation2 + $0x4b8] sm:$0xff] }
 0x327   : > { %v3570_v31 = vpop.f32.mrf.mxu1 }
 0x328   : > { %v13853_v17 = vadd.f32 %v11025_v7, %v4059_v34  ;;  %v4057_v25 = vadd.f32 %v3570_v31, %v13444_v49  ;;  %v4503_v63 = vpop.f32.mrf.mxu0  ;;  %v3361_v49 = vld [vmem:[#allocation2 + $0x498] sm:$0xff]  ;;  %v3362_v31 = vld [vmem:[#allocation2 + $0x4a0] sm:$0xff] }
 0x329   : > { %v10882_v52 = vpop.f32.mrf.mxu1  ;;  %11124 = vmatmul.mubr.bf16.gmra.mxu0 %v4360_v59 }
 0x32a   : > { %v13856_v1 = vadd.f32 %v4500_v9, %v4057_v25  ;;  %v4060_v38 = vadd.f32 %v10882_v52, %v13447_v16  ;;  %v11029_v34 = vpop.f32.mrf.mxu0  ;;  %11127 = vmatprep.mubr.bf16.mxu0 %v4361_v30  ;;  %v4291_v16 = vld [vmem:[#allocation2 + $0x499] sm:$0xff] }
 0x32b   : > { %v3573_v43 = vpop.f32.mrf.mxu1  ;;  %v4362_v59 = vpack.c.bf16 %v4292_v46, %v4291_v16  ;;  %v4296_v16 = vld [vmem:[#allocation2 + $0x4c9] sm:$0xff]  ;;  %v3367_v46 = vld [vmem:[#allocation2 + $0x4d8] sm:$0xff] }
 0x32c   : > { %v13859_v28 = vadd.f32 %v11026_v35, %v4060_v38  ;;  %v4058_v5 = vadd.f32 %v3573_v43, %v13450_v42  ;;  %v4516_v9 = vpop.f32.mrf.mxu0  ;;  %v4294_v42 = vld [vmem:[#allocation2 + $0x4b9] sm:$0xff] }
 0x32d   : > { %v10885_v7 = vpop.f32.mrf.mxu1  ;;  %10980 = vmatmul.mubr.bf16.gmra.mxu1 %v3430_v22  ;;  %v3432_v22 = vpack.c.bf16 %v3362_v31, %v3361_v49  ;;  %v4363_v30 = vpack.c.bf16 %v4294_v42, %v4293_v32  ;;  %v4297_v32 = vld [vmem:[#allocation2 + $0x4d9] sm:$0xff] }
 0x32e   : > { %v13862_v23 = vadd.f32 %v4503_v63, %v4058_v5  ;;  %v4063_v62 = vadd.f32 %v10885_v7, %v13453_v12  ;;  %10983 = vmatprep.mubr.bf16.mxu1 %v3431_v60  ;;  %v11030_v35 = vpop.f32.mrf.mxu0  ;;  %v3433_v60 = vpack.c.bf16 %v3364_v18, %v3363_v51  ;;  %v3368_v18 = vld [vmem:[#allocation2 + $0x4e0] sm:$0xff] }
 0x32f   : > { %v3586_v36 = vpop.f32.mrf.mxu1 }
 0x330   : > { %v13865_v13 = vadd.f32 %v11029_v34, %v4063_v62  ;;  %v4061_v25 = vadd.f32 %v3586_v36, %v13456_v57  ;;  %v4519_v63 = vpop.f32.mrf.mxu0  ;;  %v3365_v57 = vld [vmem:[#allocation2 + $0x4c0] sm:$0xff]  ;;  %v3366_v36 = vld [vmem:[#allocation2 + $0x4c8] sm:$0xff] }
 0x331   : > { %v10886_v52 = vpop.f32.mrf.mxu1  ;;  %11128 = vmatmul.mubr.bf16.gmra.mxu0 %v4362_v59 }
 0x332   : > { %v13868_v38 = vadd.f32 %v4516_v9, %v4061_v25  ;;  %v4064_v12 = vadd.f32 %v10886_v52, %v13459_v19  ;;  %v11033_v62 = vpop.f32.mrf.mxu0  ;;  %11131 = vmatprep.mubr.bf16.mxu0 %v4363_v30  ;;  %v4295_v19 = vld [vmem:[#allocation2 + $0x4c1] sm:$0xff] }
 0x333   : > { %v3589_v43 = vpop.f32.mrf.mxu1  ;;  %v4364_v59 = vpack.c.bf16 %v4296_v16, %v4295_v19  ;;  %v4300_v19 = vld [vmem:[#allocation2 + $0x4f1] sm:$0xff] }
 0x334   : > { %v13871_v5 = vadd.f32 %v11030_v35, %v4064_v12  ;;  %v4062_v7 = vadd.f32 %v3589_v43, %v13462_v58  ;;  %v4532_v9 = vpop.f32.mrf.mxu0  ;;  %v4298_v58 = vld [vmem:[#allocation2 + $0x4e1] sm:$0xff] }
 0x335   : > { %v10889_v34 = vpop.f32.mrf.mxu1  ;;  %10984 = vmatmul.mubr.bf16.gmra.mxu1 %v3432_v22  ;;  %v3434_v22 = vpack.c.bf16 %v3366_v36, %v3365_v57  ;;  %v4365_v30 = vpack.c.bf16 %v4298_v58, %v4297_v32  ;;  %v4299_v36 = vld [vmem:[#allocation2 + $0x4e9] sm:$0xff] }
 0x336   : > { %v13874_v49 = vadd.f32 %v4519_v63, %v4062_v7  ;;  %v4067_v31 = vadd.f32 %v10889_v34, %v13465_v29  ;;  %10987 = vmatprep.mubr.bf16.mxu1 %v3433_v60  ;;  %v11034_v35 = vpop.f32.mrf.mxu0  ;;  %v3435_v60 = vpack.c.bf16 %v3368_v18, %v3367_v46  ;;  %v3372_v18 = vld [vmem:[#allocation2 + $0x508] sm:$0xff] }
 0x337   : > { %v3602_v51 = vpop.f32.mrf.mxu1 }
 0x338   : > { %v13877_v42 = vadd.f32 %v11033_v62, %v4067_v31  ;;  %v4065_v25 = vadd.f32 %v3602_v51, %v13468_v4  ;;  %v4535_v63 = vpop.f32.mrf.mxu0  ;;  %v3369_v4 = vld [vmem:[#allocation2 + $0x4e8] sm:$0xff] }
 0x339   : > { %v10890_v52 = vpop.f32.mrf.mxu1  ;;  %11132 = vmatmul.mubr.bf16.gmra.mxu0 %v4364_v59 }
 0x33a   : > { %v13880_v12 = vadd.f32 %v4532_v9, %v4065_v25  ;;  %v4068_v29 = vadd.f32 %v10890_v52, %v13471_v61  ;;  %v11037_v31 = vpop.f32.mrf.mxu0  ;;  %11135 = vmatprep.mubr.bf16.mxu0 %v4365_v30  ;;  %v3370_v61 = vld [vmem:[#allocation2 + $0x4f0] sm:$0xff]  ;;  %v3371_v9 = vld [vmem:[#allocation2 + $0x500] sm:$0xff] }
 0x33b   : > { %v3605_v43 = vpop.f32.mrf.mxu1  ;;  %v3436_v52 = vpack.c.bf16 %v3370_v61, %v3369_v4  ;;  %v3437_v59 = vpack.c.bf16 %v3372_v18, %v3371_v9  ;;  %v3374_v4 = vld [vmem:[#allocation2 + $0x518] sm:$0xff] }
 0x33c   : > { %v13883_v7 = vadd.f32 %v11034_v35, %v4068_v29  ;;  %v4066_v34 = vadd.f32 %v3605_v43, %v13474_v15  ;;  %v4548_v46 = vpop.f32.mrf.mxu0  ;;  %v4366_v35 = vpack.c.bf16 %v4300_v19, %v4299_v36  ;;  %v5108_v19 = vld [vmem:[#allocation2 + $0x32] sm:$0xff] }
 0x33d   : > { %v10893_v62 = vpop.f32.mrf.mxu1  ;;  %10988 = vmatmul.mubr.bf16.gmra.mxu1 %v3434_v22 }
 0x33e   : > { %v13886_v51 = vadd.f32 %v4535_v63, %v4066_v34  ;;  %v4071_v57 = vadd.f32 %v10893_v62, %v13477_v6  ;;  %10991 = vmatprep.mubr.bf16.mxu1 %v3435_v60  ;;  %v11038_v25 = vpop.f32.mrf.mxu0 }
 0x33f   : > { %v3618_v16 = vpop.f32.mrf.mxu1 }
 0x340   : > { %v13889_v32 = vadd.f32 %v11037_v31, %v4071_v57  ;;  %v4069_v15 = vadd.f32 %v3618_v16, %v13480_v50  ;;  %v4551_v60 = vpop.f32.mrf.mxu0  ;;  %v15542_v31 = vpack.c.bf16 %v13684_v41, %v13678_v2  ;;  %v5107_v57 = vld [vmem:[#allocation2 + $0x2a] sm:$0xff]  ;;  %v6039_v16 = vld [vmem:[#allocation2 + $0x58] sm:$0xff] }
 0x341   : > { %v10894_v58 = vpop.f32.mrf.mxu1  ;;  %11136 = vmatmul.mubr.bf16.gmra.mxu0 %v4366_v35  ;;  %v5235_v41 = vpack.c.bf16 %v5108_v19, %v5107_v57  ;;  %v5112_v19 = vld [vmem:[#allocation2 + $0x5a] sm:$0xff] }
 0x342   : > { %v13892_v22 = vadd.f32 %v4548_v46, %v4069_v15  ;;  %v4072_v6 = vadd.f32 %v10894_v58, %v13483_v54  ;;  %v11041_v34 = vpop.f32.mrf.mxu0  ;;  %11139 = vmatprep.mubr.bf16.mxu0 %v15542_v31  ;;  %v3373_v54 = vld [vmem:[#allocation2 + $0x510] sm:$0xff]  ;;  %v6040_v31 = vld [vmem:[#allocation2 + $0x60] sm:$0xff] }
 0x343   : > { %v3621_v29 = vpop.f32.mrf.mxu1 }
 0x344   : > { %v13895_v30 = vadd.f32 %v11038_v25, %v4072_v6  ;;  %v4070_v43 = vadd.f32 %v3621_v29, %v13486_v33  ;;  %v4564_v36 = vpop.f32.mrf.mxu0  ;;  %v6038_v33 = vld [vmem:[#allocation2 + $0x50] sm:$0xff] }
 0x345   : > { %v10897_v63 = vpop.f32.mrf.mxu1  ;;  %10992 = vmatmul.mubr.bf16.gmra.mxu1 %v3436_v52  ;;  %v6166_v25 = vpack.c.bf16 %v6039_v16, %v6038_v33 }
 0x346   : > { %v13898_v50 = vadd.f32 %v4551_v60, %v4070_v43  ;;  %v4075_v62 = vadd.f32 %v10897_v63, %v13489_v40  ;;  %10995 = vmatprep.mubr.bf16.mxu1 %v3437_v59  ;;  %v11042_v15 = vpop.f32.mrf.mxu0  ;;  %v3438_v40 = vpack.c.bf16 %v3374_v4, %v3373_v54  ;;  %v5109_v43 = vld [vmem:[#allocation2 + $0x3a] sm:$0xff]  ;;  %v6041_v54 = vld [vmem:[#allocation2 + $0x68] sm:$0xff] }
 0x347   : > { %v3634_v61 = vpop.f32.mrf.mxu1 }
 0x348   : > { %v13904_v46 = vadd.f32 %v11041_v34, %v4075_v62  ;;  %v4073_v9 = vadd.f32 %v3634_v61, %v13492_v44  ;;  %v4567_v35 = vpop.f32.mrf.mxu0  ;;  %v15543_v44 = vpack.c.bf16 %v13691_v26, %v13688_v27  ;;  %v15544_v34 = vld [vmem:[#allocation108_spill] sm:$0xff]  ;;  %v5110_v62 = vld [vmem:[#allocation2 + $0x42] sm:$0xff]  ;;  %v6042_v27 = vld [vmem:[#allocation2 + $0x78] sm:$0xff] }
 0x349   : > { %v10898_v18 = vpop.f32.mrf.mxu1  ;;  %v6043_v26 = vld [vmem:[#allocation2 + $0x80] sm:$0xff] }
 0x34a   : > { %v13907_v58 = vadd.f32 %v4564_v36, %v4073_v9  ;;  %v4076_v2 = vadd.f32 %v10898_v18, %v13495_v48  ;;  %v11045_v60 = vpop.f32.mrf.mxu0  ;;  %11140 = vmatmul.mubr.bf16.gmra.mxu0 %v15543_v44  ;;  %v5236_v9 = vpack.c.bf16 %v5110_v62, %v5109_v43  ;;  %v6167_v18 = vpack.c.bf16 %v6041_v54, %v6040_v31  ;;  %v5114_v43 = vld [vmem:[#allocation2 + $0x6a] sm:$0xff] }
 0x34b   : > { %v3637_v52 = vpop.f32.mrf.mxu1  ;;  %11303 = vmatprep.mubr.bf16.mxu0 %v6166_v25  ;;  %v6045_v62 = vld [vmem:[#allocation2 + $0x90] sm:$0xff] }
 0x34c   : > { %v13910_v6 = vadd.f32 %v11042_v15, %v4076_v2  ;;  %v4074_v59 = vadd.f32 %v3637_v52, %v13498_v0  ;;  %v4580_v57 = vpop.f32.mrf.mxu0  ;;  %v5111_v0 = vld [vmem:[#allocation2 + $0x52] sm:$0xff]  ;;  %v6168_v52 = vpack.c.bf16 %v6043_v26, %v6042_v27  ;;  %v6047_v26 = vld [vmem:[#allocation2 + $0xa8] sm:$0xff] }
 0x34d   : > { %v10901_v29 = vpop.f32.mrf.mxu1  ;;  %10996 = vmatmul.mubr.bf16.gmra.mxu1 %v3438_v40  ;;  %v5237_v25 = vpack.c.bf16 %v5112_v19, %v5111_v0  ;;  %v5115_v0 = vld [vmem:[#allocation2 + $0x7a] sm:$0xff] }
 0x34e   : > { %v13916_v63 = vadd.f32 %v4567_v35, %v4074_v59  ;;  %v4079_v48 = vadd.f32 %v10901_v29, %v15544_v34  ;;  %11159 = vmatprep.mubr.bf16.mxu1 %v5235_v41  ;;  %v11046_v16 = vpop.f32.mrf.mxu0  ;;  %v11877_v29 = vld [vmem:[#allocation6 + $0x1f0] sm:$0xff]  }
 0x34f   : > { %v3650_v4 = vpop.f32.mrf.mxu1 }
 0x350   : > { %v13919_v61 = vadd.f32 %v11045_v60, %v4079_v48  ;;  %v4077_v36 = vadd.f32 %v3650_v4, %v13504_v8  ;;  %v4583_v41 = vpop.f32.mrf.mxu0  ;;  %v5113_v8 = vld [vmem:[#allocation2 + $0x62] sm:$0xff] }
 0x351   : > { %v10902_v33 = vpop.f32.mrf.mxu1  ;;  %v11878_v60 = vld [vmem:[#allocation6 + $0x230] sm:$0xff]   ;;  %v6044_v48 = vld [vmem:[#allocation2 + $0x88] sm:$0xff] }
 0x352   : > { %v13922_v15 = vadd.f32 %v4580_v57, %v4077_v36  ;;  %v4080_v40 = vadd.f32 %v10902_v33, %v13507_v56  ;;  %v11049_v34 = vpop.f32.mrf.mxu0  ;;  %11304 = vmatmul.mubr.bf16.vlgmr.msra.gmra.mxu0 %v6167_v18  ;;  %v15547_v56 = vld [vmem:[#allocation109_spill] sm:$0xff]  ;;  %v15548_v4 = vld [vmem:[#allocation50_spill] sm:$0xff]  ;;  %v15549_v57 = vld [vmem:[#allocation51_spill] sm:$0xff] }
 0x353   : > { %v3653_v2 = vpop.f32.mrf.mxu1  ;;  %11576 = vmatpush3.bf16.msra.mxu0 %v15549_v57  ;;  %v6046_v36 = vld [vmem:[#allocation2 + $0xa0] sm:$0xff]  ;;  %11307 = vmatprep.mubr.bf16.mxu0 %v6168_v52  ;;  %v11879_v33 = vld [vmem:[#allocation6 + $0x1e8] sm:$0xff]  }
 0x354   : > { %v13925_v35 = vadd.f32 %v11046_v16, %v4080_v40  ;;  %v4078_v59 = vadd.f32 %v3653_v2, %v13510_v11  ;;  %v5116_v11 = vld [vmem:[#allocation2 + $0x82] sm:$0xff]  ;;  %v4596_v27 = vpop.f32.mrf.mxu0  ;;  %v11880_v16 = vld [vmem:[#allocation6 + $0x228] sm:$0xff]   ;;  %11577 = vmatprep.subr.bf16.mxu0 %v11878_v60 }
 0x355   : > { %v10905_v44 = vpop.f32.mrf.mxu1  ;;  %11160 = vmatmul.mubr.bf16.vlgmr.msra.gmra.mxu1 %v5236_v9  ;;  %v15551_v18 = vld [vmem:[#allocation110_spill] sm:$0xff]  ;;  %v15553_v57 = vld [vmem:[#allocation111_spill] sm:$0xff] }
 0x356   : > { %15545 = vst [vmem:[#allocation101_spill] sm:$0xff] %v13925_v35  ;;  %v13928_v31 = vadd.f32 %v4583_v41, %v4078_v59  ;;  %v4083_v54 = vadd.f32 %v10905_v44, %v15547_v56  ;;  %11432 = vmatpush3.bf16.msra.mxu1 %v15548_v4  ;;  %11163 = vmatprep.mubr.bf16.mxu1 %v5237_v25  ;;  %v11050_v41 = vpop.f32.mrf.mxu0 }
 0x357   : > { %v3666_v19 = vpop.f32.mrf.mxu1  ;;  %11433 = vmatprep.subr.bf16.mxu1 %v11877_v29  ;;  %v5238_v59 = vpack.c.bf16 %v5114_v43, %v5113_v8  ;;  %v6169_v44 = vpack.c.bf16 %v6045_v62, %v6044_v48  ;;  %v5239_v56 = vpack.c.bf16 %v5116_v11, %v5115_v0  ;;  %v6170_v25 = vpack.c.bf16 %v6047_v26, %v6046_v36  ;;  %v5117_v48 = vld [vmem:[#allocation2 + $0x8a] sm:$0xff]  ;;  %v5118_v62 = vld [vmem:[#allocation2 + $0x92] sm:$0xff] }
 0x358   : > { %15546 = vst [vmem:[#allocation103_spill] sm:$0xff] %v13928_v31  ;;  %v13933_v9 = vadd.f32 %v11049_v34, %v4083_v54  ;;  %v4081_v40 = vadd.f32 %v3666_v19, %v15551_v18  ;;  %11578 = vmatpush3.bf16.msra.mxu0 %v11878_v60  ;;  %v4599_v35 = vpop.f32.mrf.mxu0  ;;  %v15555_v54 = vld [vmem:[#allocation112_spill] sm:$0xff]  ;;  %v6049_v36 = vld [vmem:[#allocation2 + $0xb8] sm:$0xff] }
 0x359   : > { %v10906_v2 = vpop.f32.mrf.mxu1  ;;  %11579 = vmatprep.subr.bf16.mxu0 %v11880_v16  ;;  %v11881_v18 = vld [vmem:[#allocation6 + $0x1e0] sm:$0xff]  }
 0x35a   : > { %15550 = vst [vmem:[#allocation105_spill] sm:$0xff] %v13933_v9  ;;  %v13936_v4 = vadd.f32 %v4596_v27, %v4081_v40  ;;  %v4084_v31 = vadd.f32 %v10906_v2, %v15553_v57  ;;  %11434 = vmatpush3.bf16.msra.mxu1 %v11877_v29  ;;  %v11882_v9 = vld [vmem:[#allocation6 + $0x220] sm:$0xff]   ;;  %v11053_v43 = vpop.f32.mrf.mxu0  ;;  %11308 = vmatmul.mubr.bf16.gmra.mxu0 %v6169_v44  ;;  %v6050_v2 = vld [vmem:[#allocation2 + $0xc8] sm:$0xff]  ;;  %v15559_v44 = vld [vmem:[#allocation54_spill] sm:$0xff] }
 0x35b   : > { %v3669_v52 = vpop.f32.mrf.mxu1  ;;  %11435 = vmatprep.subr.bf16.mxu1 %v11879_v33  ;;  %v15557_v29 = vld [vmem:[#allocation113_spill] sm:$0xff]  ;;  %11311 = vmatprep.mubr.bf16.mxu0 %v6170_v25  ;;  %v5120_v40 = vld [vmem:[#allocation2 + $0xaa] sm:$0xff] }
 0x35c   : > { %15552 = vst [vmem:[#allocation107_spill] sm:$0xff] %v13936_v4  ;;  %v13939_v34 = vadd.f32 %v11050_v41, %v4084_v31  ;;  %v4082_v19 = vadd.f32 %v3669_v52, %v15555_v54  ;;  %v6048_v11 = vld [vmem:[#allocation2 + $0xb0] sm:$0xff]  ;;  %v5119_v31 = vld [vmem:[#allocation2 + $0xa2] sm:$0xff]  ;;  %v4612_v26 = vpop.f32.mrf.mxu0  ;;  %11580 = vmatpush3.bf16.msra.mxu0 %v11880_v16  ;;  %v5240_v54 = vpack.c.bf16 %v5118_v62, %v5117_v48  ;;  %v5122_v62 = vld [vmem:[#allocation2 + $0xba] sm:$0xff] }
 0x35d   : > { %v10909_v8 = vpop.f32.mrf.mxu1  ;;  %11164 = vmatmul.mubr.bf16.gmra.mxu1 %v5238_v59  ;;  %v6051_v41 = vld [vmem:[#allocation2 + $0xd0] sm:$0xff]  ;;  %11581 = vmatprep.subr.bf16.mxu0 %v11882_v9  ;;  %v11884_v52 = vld [vmem:[#allocation6 + $0x218] sm:$0xff]  }
 0x35e   : > { %15554 = vst [vmem:[#allocation108_spill] sm:$0xff] %v13939_v34  ;;  %v13942_v0 = vadd.f32 %v4599_v35, %v4082_v19  ;;  %v4087_v60 = vadd.f32 %v10909_v8, %v15557_v29  ;;  %11167 = vmatprep.mubr.bf16.mxu1 %v5239_v56  ;;  %11436 = vmatpush3.bf16.msra.mxu1 %v11879_v33  ;;  %v11883_v35 = vld [vmem:[#allocation6 + $0x1d8] sm:$0xff]   ;;  %v11054_v25 = vpop.f32.mrf.mxu0  ;;  %v5121_v48 = vld [vmem:[#allocation2 + $0xb2] sm:$0xff] }
 0x35f   : > { %v3682_v27 = vpop.f32.mrf.mxu1  ;;  %11437 = vmatprep.subr.bf16.mxu1 %v11881_v18  ;;  %v6171_v19 = vpack.c.bf16 %v6049_v36, %v6048_v11  ;;  %v15560_v29 = vld [vmem:[#allocation56_spill] sm:$0xff]  ;;  %v5241_v34 = vpack.c.bf16 %v5120_v40, %v5119_v31  ;;  %v6172_v4 = vpack.c.bf16 %v6051_v41, %v6050_v2 }
 0x360   : > { %15556 = vst [vmem:[#allocation109_spill] sm:$0xff] %v13942_v0  ;;  %v13945_v59 = vadd.f32 %v11053_v43, %v4087_v60  ;;  %v4085_v57 = vadd.f32 %v3682_v27, %v15559_v44  ;;  %v4615_v16 = vpop.f32.mrf.mxu0  ;;  %11582 = vmatpush3.bf16.msra.mxu0 %v11882_v9  ;;  %v15562_v60 = vld [vmem:[#allocation58_spill] sm:$0xff]  ;;  %v15564_v36 = vld [vmem:[#allocation60_spill] sm:$0xff] }
 0x361   : > { %v10910_v56 = vpop.f32.mrf.mxu1  ;;  %11583 = vmatprep.subr.bf16.mxu0 %v11884_v52  ;;  %v6053_v9 = vld [vmem:[#allocation2 + $0xe0] sm:$0xff]  ;;  %v5124_v2 = vld [vmem:[#allocation2 + $0xd2] sm:$0xff] }
 0x362   : > { %15558 = vst [vmem:[#allocation50_spill] sm:$0xff] %v13945_v59  ;;  %v13948_v8 = vadd.f32 %v4612_v26, %v4085_v57  ;;  %v4088_v0 = vadd.f32 %v10910_v56, %v15560_v29  ;;  %11438 = vmatpush3.bf16.msra.mxu1 %v11881_v18  ;;  %v11057_v59 = vpop.f32.mrf.mxu0  ;;  %11312 = vmatmul.mubr.bf16.gmra.mxu0 %v6171_v19  ;;  %v6052_v18 = vld [vmem:[#allocation2 + $0xd8] sm:$0xff]  ;;  %v6054_v41 = vld [vmem:[#allocation2 + $0xf0] sm:$0xff] }
 0x363   : > { %v3685_v33 = vpop.f32.mrf.mxu1  ;;  %11439 = vmatprep.subr.bf16.mxu1 %v11883_v35  ;;  %11315 = vmatprep.mubr.bf16.mxu0 %v6172_v4  ;;  %v6055_v57 = vld [vmem:[#allocation2 + $0xf8] sm:$0xff]  ;;  %v15568_v4 = vld [vmem:[#allocation64_spill] sm:$0xff] }
 0x364   : > { %v13951_v43 = vadd.f32 %v11054_v25, %v4088_v0  ;;  %v4086_v27 = vadd.f32 %v3685_v33, %v15562_v60  ;;  %v5123_v0 = vld [vmem:[#allocation2 + $0xca] sm:$0xff]  ;;  %v4628_v40 = vpop.f32.mrf.mxu0  ;;  %11584 = vmatpush3.bf16.msra.mxu0 %v11884_v52  ;;  %v15566_v25 = vld [vmem:[#allocation62_spill] sm:$0xff]  ;;  %v5242_v33 = vpack.c.bf16 %v5122_v62, %v5121_v48 }
 0x365   : > { %v10913_v44 = vpop.f32.mrf.mxu1  ;;  %11168 = vmatmul.mubr.bf16.gmra.mxu1 %v5240_v54  ;;  %v15572_v62 = vld [vmem:[#allocation68_spill] sm:$0xff] }
 0x366   : > { %15561 = vst [vmem:[#allocation51_spill] sm:$0xff] %v13951_v43  ;;  %v13954_v11 = vadd.f32 %v4615_v16, %v4086_v27  ;;  %v4091_v31 = vadd.f32 %v10913_v44, %v15564_v36  ;;  %11171 = vmatprep.mubr.bf16.mxu1 %v5241_v34  ;;  %11440 = vmatpush3.bf16.msra.mxu1 %v11883_v35  ;;  %v11058_v29 = vpop.f32.mrf.mxu0  ;;  %v15570_v35 = vld [vmem:[#allocation66_spill] sm:$0xff] }
 0x367   : > { %v3698_v26 = vpop.f32.mrf.mxu1  ;;  %v6173_v16 = vpack.c.bf16 %v6053_v9, %v6052_v18  ;;  %v5243_v27 = vpack.c.bf16 %v5124_v2, %v5123_v0  ;;  %v6174_v44 = vpack.c.bf16 %v6055_v57, %v6054_v41  ;;  %v6056_v9 = vld [vmem:[#allocation2 + $0x100] sm:$0xff]  ;;  %v6057_v0 = vld [vmem:[#allocation2 + $0x108] sm:$0xff] }
 0x368   : > { %15563 = vst [vmem:[#allocation110_spill] sm:$0xff] %v13954_v11  ;;  %v13957_v56 = vadd.f32 %v11057_v59, %v4091_v31  ;;  %v4089_v54 = vadd.f32 %v3698_v26, %v15566_v25  ;;  %v4631_v11 = vpop.f32.mrf.mxu0  ;;  %v5125_v26 = vld [vmem:[#allocation2 + $0xda] sm:$0xff]  ;;  %v5126_v25 = vld [vmem:[#allocation2 + $0xe2] sm:$0xff] }
 0x369   : > { %v10914_v19 = vpop.f32.mrf.mxu1  ;;  %v5128_v57 = vld [vmem:[#allocation2 + $0xfa] sm:$0xff] }
 0x36a   : > { %15565 = vst [vmem:[#allocation111_spill] sm:$0xff] %v13957_v56  ;;  %v13960_v34 = vadd.f32 %v4628_v40, %v4089_v54  ;;  %v4092_v60 = vadd.f32 %v10914_v19, %v15568_v4  ;;  %v11061_v31 = vpop.f32.mrf.mxu0  ;;  %11316 = vmatmul.mubr.bf16.gmra.mxu0 %v6173_v16  ;;  %v5127_v40 = vld [vmem:[#allocation2 + $0xf2] sm:$0xff]  ;;  %v6059_v19 = vld [vmem:[#allocation2 + $0x120] sm:$0xff] }
 0x36b   : > { %v3701_v36 = vpop.f32.mrf.mxu1  ;;  %11319 = vmatprep.mubr.bf16.mxu0 %v6174_v44  ;;  %v6058_v54 = vld [vmem:[#allocation2 + $0x118] sm:$0xff] }
 0x36c   : > { %15567 = vst [vmem:[#allocation112_spill] sm:$0xff] %v13960_v34  ;;  %v13963_v43 = vadd.f32 %v11058_v29, %v4092_v60  ;;  %v4090_v52 = vadd.f32 %v3701_v36, %v15570_v35  ;;  %v4644_v41 = vpop.f32.mrf.mxu0  ;;  %v6175_v36 = vpack.c.bf16 %v6057_v0, %v6056_v9  ;;  %v15578_v34 = vld [vmem:[#allocation74_spill] sm:$0xff]  ;;  %v6060_v0 = vld [vmem:[#allocation2 + $0x128] sm:$0xff] }
 0x36d   : > { %v10917_v59 = vpop.f32.mrf.mxu1  ;;  %11172 = vmatmul.mubr.bf16.gmra.mxu1 %v5242_v33  ;;  %v15574_v33 = vld [vmem:[#allocation70_spill] sm:$0xff] }
 0x36e   : > { %15569 = vst [vmem:[#allocation113_spill] sm:$0xff] %v13963_v43  ;;  %v13966_v48 = vadd.f32 %v4631_v11, %v4090_v52  ;;  %v4095_v18 = vadd.f32 %v10917_v59, %v15572_v62  ;;  %11175 = vmatprep.mubr.bf16.mxu1 %v5243_v27  ;;  %v11062_v60 = vpop.f32.mrf.mxu0  ;;  %v5244_v11 = vpack.c.bf16 %v5126_v25, %v5125_v26  ;;  %v15576_v27 = vld [vmem:[#allocation72_spill] sm:$0xff] }
 0x36f   : > { %v3714_v2 = vpop.f32.mrf.mxu1  ;;  %v5245_v52 = vpack.c.bf16 %v5128_v57, %v5127_v40  ;;  %v6176_v59 = vpack.c.bf16 %v6059_v19, %v6058_v54  ;;  %v15580_v25 = vld [vmem:[#allocation76_spill] sm:$0xff]  ;;  %v5132_v19 = vld [vmem:[#allocation2 + $0x122] sm:$0xff] }
 0x370   : > { %15571 = vst [vmem:[#allocation54_spill] sm:$0xff] %v13966_v48  ;;  %v13969_v29 = vadd.f32 %v11061_v31, %v4095_v18  ;;  %v4093_v16 = vadd.f32 %v3714_v2, %v15574_v33  ;;  %v4647_v48 = vpop.f32.mrf.mxu0  ;;  %v5129_v2 = vld [vmem:[#allocation2 + $0x102] sm:$0xff]  ;;  %v5130_v33 = vld [vmem:[#allocation2 + $0x10a] sm:$0xff] }
 0x371   : > { %v10918_v4 = vpop.f32.mrf.mxu1  ;;  %v6061_v40 = vld [vmem:[#allocation2 + $0x130] sm:$0xff] }
 0x372   : > { %15573 = vst [vmem:[#allocation56_spill] sm:$0xff] %v13969_v29  ;;  %v13972_v35 = vadd.f32 %v4644_v41, %v4093_v16  ;;  %v4096_v44 = vadd.f32 %v10918_v4, %v15576_v27  ;;  %v11065_v18 = vpop.f32.mrf.mxu0  ;;  %11320 = vmatmul.mubr.bf16.gmra.mxu0 %v6175_v36  ;;  %v5131_v41 = vld [vmem:[#allocation2 + $0x11a] sm:$0xff] }
 0x373   : > { %v3717_v62 = vpop.f32.mrf.mxu1  ;;  %11323 = vmatprep.mubr.bf16.mxu0 %v6176_v59  ;;  %v6062_v16 = vld [vmem:[#allocation2 + $0x140] sm:$0xff] }
 0x374   : > { %15575 = vst [vmem:[#allocation58_spill] sm:$0xff] %v13972_v35  ;;  %v13975_v43 = vadd.f32 %v11062_v60, %v4096_v44  ;;  %v4094_v56 = vadd.f32 %v3717_v62, %v15578_v34  ;;  %v4660_v54 = vpop.f32.mrf.mxu0  ;;  %v6063_v34 = vld [vmem:[#allocation2 + $0x148] sm:$0xff]  ;;  %v15582_v60 = vld [vmem:[#allocation78_spill] sm:$0xff]  ;;  %v6177_v44 = vpack.c.bf16 %v6061_v40, %v6060_v0 }
 0x375   : > { %v10921_v31 = vpop.f32.mrf.mxu1  ;;  %11176 = vmatmul.mubr.bf16.gmra.mxu1 %v5244_v11  ;;  %v11885_v36 = vld [vmem:[#allocation6 + $0x1d0] sm:$0xff]   ;;  %v15588_v40 = vld [vmem:[#allocation84_spill] sm:$0xff] }
 0x376   : > { %15577 = vst [vmem:[#allocation60_spill] sm:$0xff] %v13975_v43  ;;  %v13978_v26 = vadd.f32 %v4647_v48, %v4094_v56  ;;  %v4099_v9 = vadd.f32 %v10921_v31, %v15580_v25  ;;  %11179 = vmatprep.mubr.bf16.mxu1 %v5245_v52  ;;  %v11066_v56 = vpop.f32.mrf.mxu0  ;;  %v5246_v48 = vpack.c.bf16 %v5130_v33, %v5129_v2  ;;  %v15584_v52 = vld [vmem:[#allocation80_spill] sm:$0xff]  ;;  %v15594_v29 = vld [vmem:[#allocation90_spill] sm:$0xff] }
 0x377   : > { %v3730_v57 = vpop.f32.mrf.mxu1  ;;  %v5247_v31 = vpack.c.bf16 %v5132_v19, %v5131_v41  ;;  %v6178_v25 = vpack.c.bf16 %v6063_v34, %v6062_v16  ;;  %11441 = vmatprep.subr.bf16.mxu1 %v11885_v36  ;;  %v5133_v2 = vld [vmem:[#allocation2 + $0x12a] sm:$0xff]  ;;  %v5134_v33 = vld [vmem:[#allocation2 + $0x132] sm:$0xff]  ;;  %v5135_v16 = vld [vmem:[#allocation2 + $0x142] sm:$0xff] }
 0x378   : > { %15579 = vst [vmem:[#allocation62_spill] sm:$0xff] %v13978_v26  ;;  %v13981_v4 = vadd.f32 %v11065_v18, %v4099_v9  ;;  %v4097_v11 = vadd.f32 %v3730_v57, %v15582_v60  ;;  %v11886_v26 = vld [vmem:[#allocation6 + $0x210] sm:$0xff]   ;;  %v4663_v35 = vpop.f32.mrf.mxu0  ;;  %11442 = vmatpush3.bf16.msra.mxu1 %v11885_v36  ;;  %v6065_v19 = vld [vmem:[#allocation2 + $0x158] sm:$0xff]  ;;  %v5136_v36 = vld [vmem:[#allocation2 + $0x14a] sm:$0xff] }
 0x379   : > { %v10922_v27 = vpop.f32.mrf.mxu1  ;;  %v15586_v9 = vld [vmem:[#allocation82_spill] sm:$0xff]  ;;  %11585 = vmatprep.subr.bf16.mxu0 %v11886_v26 }
 0x37a   : > { %15581 = vst [vmem:[#allocation64_spill] sm:$0xff] %v13981_v4  ;;  %v13984_v62 = vadd.f32 %v4660_v54, %v4097_v11  ;;  %v4100_v59 = vadd.f32 %v10922_v27, %v15584_v52  ;;  %v11069_v4 = vpop.f32.mrf.mxu0  ;;  %11324 = vmatmul.mubr.bf16.gmra.mxu0 %v6177_v44  ;;  %v6064_v54 = vld [vmem:[#allocation2 + $0x150] sm:$0xff] }
 0x37b   : > { %v3733_v43 = vpop.f32.mrf.mxu1  ;;  %11327 = vmatprep.mubr.bf16.mxu0 %v6178_v25  ;;  %v6067_v27 = vld [vmem:[#allocation2 + $0x170] sm:$0xff]  ;;  %11586 = vmatpush3.bf16.msra.mxu0 %v11886_v26 }
 0x37c   : > { %15583 = vst [vmem:[#allocation66_spill] sm:$0xff] %v13984_v62  ;;  %v13987_v18 = vadd.f32 %v11066_v56, %v4100_v59  ;;  %v4098_v57 = vadd.f32 %v3733_v43, %v15586_v9  ;;  %v4676_v11 = vpop.f32.mrf.mxu0  ;;  %v6066_v43 = vld [vmem:[#allocation2 + $0x168] sm:$0xff]  ;;  %v5248_v59 = vpack.c.bf16 %v5134_v33, %v5133_v2  ;;  %v6179_v9 = vpack.c.bf16 %v6065_v19, %v6064_v54  ;;  %v6068_v19 = vld [vmem:[#allocation2 + $0x178] sm:$0xff] }
 0x37d   : > { %v10925_v60 = vpop.f32.mrf.mxu1  ;;  %11180 = vmatmul.mubr.bf16.gmra.mxu1 %v5246_v48  ;;  %v15590_v48 = vld [vmem:[#allocation86_spill] sm:$0xff]  ;;  %v15596_v33 = vld [vmem:[#allocation92_spill] sm:$0xff] }
 0x37e   : > { %15585 = vst [vmem:[#allocation68_spill] sm:$0xff] %v13987_v18  ;;  %v13990_v0 = vadd.f32 %v4663_v35, %v4098_v57  ;;  %v4103_v41 = vadd.f32 %v10925_v60, %v15588_v40  ;;  %11183 = vmatprep.mubr.bf16.mxu1 %v5247_v31  ;;  %v11070_v35 = vpop.f32.mrf.mxu0  ;;  %v15592_v31 = vld [vmem:[#allocation88_spill] sm:$0xff]  ;;  %v5249_v60 = vpack.c.bf16 %v5136_v36, %v5135_v16  ;;  %v6069_v16 = vld [vmem:[#allocation2 + $0x180] sm:$0xff] }
 0x37f   : > { %v3746_v34 = vpop.f32.mrf.mxu1  ;;  %v6180_v40 = vpack.c.bf16 %v6067_v27, %v6066_v43  ;;  %v5140_v27 = vld [vmem:[#allocation2 + $0x172] sm:$0xff] }
 0x380   : > { %15587 = vst [vmem:[#allocation70_spill] sm:$0xff] %v13990_v0  ;;  %v13993_v56 = vadd.f32 %v11069_v4, %v4103_v41  ;;  %v4101_v44 = vadd.f32 %v3746_v34, %v15590_v48  ;;  %v4679_v18 = vpop.f32.mrf.mxu0  ;;  %v5137_v34 = vld [vmem:[#allocation2 + $0x152] sm:$0xff]  ;;  %v5138_v48 = vld [vmem:[#allocation2 + $0x15a] sm:$0xff] }
 0x381   : > { %v10926_v52 = vpop.f32.mrf.mxu1 }
 0x382   : > { %15589 = vst [vmem:[#allocation72_spill] sm:$0xff] %v13993_v56  ;;  %v13996_v57 = vadd.f32 %v4676_v11, %v4101_v44  ;;  %v4104_v25 = vadd.f32 %v10926_v52, %v15592_v31  ;;  %v11073_v41 = vpop.f32.mrf.mxu0  ;;  %11328 = vmatmul.mubr.bf16.gmra.mxu0 %v6179_v9  ;;  %v5139_v11 = vld [vmem:[#allocation2 + $0x16a] sm:$0xff]  ;;  %v15598_v52 = vld [vmem:[#allocation94_spill] sm:$0xff]  ;;  %v6181_v31 = vpack.c.bf16 %v6069_v16, %v6068_v19 }
 0x383   : > { %v3749_v0 = vpop.f32.mrf.mxu1  ;;  %11331 = vmatprep.mubr.bf16.mxu0 %v6180_v40  ;;  %v6070_v44 = vld [vmem:[#allocation2 + $0x190] sm:$0xff]  ;;  %v6072_v16 = vld [vmem:[#allocation2 + $0x1a0] sm:$0xff] }
 0x384   : > { %15591 = vst [vmem:[#allocation74_spill] sm:$0xff] %v13996_v57  ;;  %v13999_v62 = vadd.f32 %v11070_v35, %v4104_v25  ;;  %v4102_v26 = vadd.f32 %v3749_v0, %v15594_v29  ;;  %v4692_v43 = vpop.f32.mrf.mxu0  ;;  %v6071_v29 = vld [vmem:[#allocation2 + $0x198] sm:$0xff] }
 0x385   : > { %v10929_v4 = vpop.f32.mrf.mxu1  ;;  %11184 = vmatmul.mubr.bf16.gmra.mxu1 %v5248_v59  ;;  %v15602_v57 = vld [vmem:[#allocation98_spill] sm:$0xff] }
 0x386   : > { %15593 = vst [vmem:[#allocation76_spill] sm:$0xff] %v13999_v62  ;;  %v14002_v2 = vadd.f32 %v4679_v18, %v4102_v26  ;;  %v4107_v54 = vadd.f32 %v10929_v4, %v15596_v33  ;;  %11187 = vmatprep.mubr.bf16.mxu1 %v5249_v60  ;;  %v11074_v9 = vpop.f32.mrf.mxu0  ;;  %v5250_v18 = vpack.c.bf16 %v5138_v48, %v5137_v34  ;;  %v15600_v60 = vld [vmem:[#allocation96_spill] sm:$0xff] }
 0x387   : > { %v3762_v36 = vpop.f32.mrf.mxu1  ;;  %v5251_v26 = vpack.c.bf16 %v5140_v27, %v5139_v11  ;;  %v6182_v4 = vpack.c.bf16 %v6071_v29, %v6070_v44  ;;  %v15604_v48 = vld [vmem:[#allocation100_spill] sm:$0xff]  ;;  %v5144_v29 = vld [vmem:[#allocation2 + $0x19a] sm:$0xff] }
 0x388   : > { %15595 = vst [vmem:[#allocation78_spill] sm:$0xff] %v14002_v2  ;;  %v14005_v0 = vadd.f32 %v11073_v41, %v4107_v54  ;;  %v4105_v35 = vadd.f32 %v3762_v36, %v15598_v52  ;;  %v4695_v2 = vpop.f32.mrf.mxu0  ;;  %v5141_v36 = vld [vmem:[#allocation2 + $0x17a] sm:$0xff]  ;;  %v5142_v52 = vld [vmem:[#allocation2 + $0x182] sm:$0xff] }
 0x389   : > { %v10930_v59 = vpop.f32.mrf.mxu1  ;;  %v6073_v11 = vld [vmem:[#allocation2 + $0x1a8] sm:$0xff] }
 0x38a   : > { %15597 = vst [vmem:[#allocation80_spill] sm:$0xff] %v14005_v0  ;;  %v14008_v25 = vadd.f32 %v4692_v43, %v4105_v35  ;;  %v4108_v40 = vadd.f32 %v10930_v59, %v15600_v60  ;;  %v11077_v54 = vpop.f32.mrf.mxu0  ;;  %11332 = vmatmul.mubr.bf16.gmra.mxu0 %v6181_v31  ;;  %v5143_v43 = vld [vmem:[#allocation2 + $0x192] sm:$0xff] }
 0x38b   : > { %v3765_v33 = vpop.f32.mrf.mxu1  ;;  %11335 = vmatprep.mubr.bf16.mxu0 %v6182_v4  ;;  %v6074_v35 = vld [vmem:[#allocation2 + $0x1b8] sm:$0xff] }
 0x38c   : > { %15599 = vst [vmem:[#allocation82_spill] sm:$0xff] %v14008_v25  ;;  %v14011_v62 = vadd.f32 %v11074_v9, %v4108_v40  ;;  %v4106_v56 = vadd.f32 %v3765_v33, %v15602_v57  ;;  %v4708_v44 = vpop.f32.mrf.mxu0  ;;  %v6075_v57 = vld [vmem:[#allocation2 + $0x1c0] sm:$0xff]  ;;  %v5253_v33 = vpack.c.bf16 %v5144_v29, %v5143_v43  ;;  %v6077_v43 = vld [vmem:[#allocation2 + $0x1d0] sm:$0xff] }
 0x38d   : > { %v10933_v41 = vpop.f32.mrf.mxu1  ;;  %11188 = vmatmul.mubr.bf16.gmra.mxu1 %v5250_v18  ;;  %v15606_v9 = vld [vmem:[#allocation102_spill] sm:$0xff] }
 0x38e   : > { %15601 = vst [vmem:[#allocation84_spill] sm:$0xff] %v14011_v62  ;;  %v14014_v34 = vadd.f32 %v4695_v2, %v4106_v56  ;;  %v4111_v19 = vadd.f32 %v10933_v41, %v15604_v48  ;;  %11191 = vmatprep.mubr.bf16.mxu1 %v5251_v26  ;;  %v11078_v60 = vpop.f32.mrf.mxu0  ;;  %v5252_v56 = vpack.c.bf16 %v5142_v52, %v5141_v36  ;;  %v15608_v26 = vld [vmem:[#allocation104_spill] sm:$0xff]  ;;  %v15610_v25 = vld [vmem:[#allocation106_spill] sm:$0xff]  ;;  %v15612_v52 = vld [vmem:[#allocation17_spill] sm:$0xff] }
 0x38f   : > { %v3778_v27 = vpop.f32.mrf.mxu1  ;;  %v6183_v2 = vpack.c.bf16 %v6073_v11, %v6072_v16  ;;  %v6184_v41 = vpack.c.bf16 %v6075_v57, %v6074_v35  ;;  %v6076_v11 = vld [vmem:[#allocation2 + $0x1c8] sm:$0xff] }
 0x390   : > { %15603 = vst [vmem:[#allocation86_spill] sm:$0xff] %v14014_v34  ;;  %v14017_v59 = vadd.f32 %v11077_v54, %v4111_v19  ;;  %v4109_v18 = vadd.f32 %v3778_v27, %v15606_v9  ;;  %v4711_v34 = vpop.f32.mrf.mxu0  ;;  %v5145_v27 = vld [vmem:[#allocation2 + $0x1a2] sm:$0xff]  ;;  %v5146_v9 = vld [vmem:[#allocation2 + $0x1aa] sm:$0xff] }
 0x391   : > { %v10934_v31 = vpop.f32.mrf.mxu1  ;;  %v5148_v57 = vld [vmem:[#allocation2 + $0x1c2] sm:$0xff] }
 0x392   : > { %15605 = vst [vmem:[#allocation88_spill] sm:$0xff] %v14017_v59  ;;  %v14020_v40 = vadd.f32 %v4708_v44, %v4109_v18  ;;  %v4112_v4 = vadd.f32 %v10934_v31, %v15608_v26  ;;  %v11081_v19 = vpop.f32.mrf.mxu0  ;;  %11336 = vmatmul.mubr.bf16.gmra.mxu0 %v6183_v2  ;;  %v5147_v44 = vld [vmem:[#allocation2 + $0x1ba] sm:$0xff]  ;;  %v15626_v59 = vld [vmem:[#allocation24_spill] sm:$0xff] }
 0x393   : > { %v3781_v48 = vpop.f32.mrf.mxu1  ;;  %11339 = vmatprep.mubr.bf16.mxu0 %v6184_v41  ;;  %v6078_v18 = vld [vmem:[#allocation2 + $0x1e0] sm:$0xff]  ;;  %v11887_v2 = vld [vmem:[#allocation6 + $0x1c8] sm:$0xff]  }
 0x394   : > { %15607 = vst [vmem:[#allocation90_spill] sm:$0xff] %v14020_v40  ;;  %v14023_v62 = vadd.f32 %v11078_v60, %v4112_v4  ;;  %v4110_v0 = vadd.f32 %v3781_v48, %v15610_v25  ;;  %v4724_v35 = vpop.f32.mrf.mxu0  ;;  %v6079_v25 = vld [vmem:[#allocation2 + $0x1e8] sm:$0xff]  ;;  %v15614_v60 = vld [vmem:[#allocation18_spill] sm:$0xff]  ;;  %v6185_v4 = vpack.c.bf16 %v6077_v43, %v6076_v11  ;;  %11443 = vmatprep.subr.bf16.mxu1 %v11887_v2  ;;  %v15620_v43 = vld [vmem:[#allocation21_spill] sm:$0xff] }
 0x395   : > { %v10937_v54 = vpop.f32.mrf.mxu1  ;;  %11192 = vmatmul.mubr.bf16.gmra.mxu1 %v5252_v56 }
 0x396   : > { %15609 = vst [vmem:[#allocation92_spill] sm:$0xff] %v14023_v62  ;;  %v14026_v36 = vadd.f32 %v4711_v34, %v4110_v0  ;;  %v4115_v16 = vadd.f32 %v10937_v54, %v15612_v52  ;;  %11195 = vmatprep.mubr.bf16.mxu1 %v5253_v33  ;;  %v11082_v0 = vpop.f32.mrf.mxu0  ;;  %v5254_v34 = vpack.c.bf16 %v5146_v9, %v5145_v27  ;;  %v15616_v33 = vld [vmem:[#allocation19_spill] sm:$0xff]  ;;  %v5150_v9 = vld [vmem:[#allocation2 + $0x1d2] sm:$0xff] }
 0x397   : > { %v3794_v29 = vpop.f32.mrf.mxu1  ;;  %v5255_v54 = vpack.c.bf16 %v5148_v57, %v5147_v44  ;;  %v6186_v52 = vpack.c.bf16 %v6079_v25, %v6078_v18  ;;  %11444 = vmatpush3.bf16.msra.mxu1 %v11887_v2  ;;  %v5149_v27 = vld [vmem:[#allocation2 + $0x1ca] sm:$0xff]  ;;  %v6081_v57 = vld [vmem:[#allocation2 + $0x1f8] sm:$0xff]  ;;  %v5151_v18 = vld [vmem:[#allocation2 + $0x1e2] sm:$0xff] }
 0x398   : > { %15611 = vst [vmem:[#allocation94_spill] sm:$0xff] %v14026_v36  ;;  %v14029_v31 = vadd.f32 %v11081_v19, %v4115_v16  ;;  %v4113_v56 = vadd.f32 %v3794_v29, %v15614_v60  ;;  %v11888_v36 = vld [vmem:[#allocation6 + $0x208] sm:$0xff]   ;;  %v4727_v40 = vpop.f32.mrf.mxu0  ;;  %v15618_v16 = vld [vmem:[#allocation20_spill] sm:$0xff] }
 0x399   : > { %v10938_v26 = vpop.f32.mrf.mxu1  ;;  %11587 = vmatprep.subr.bf16.mxu0 %v11888_v36  ;;  %v5152_v2 = vld [vmem:[#allocation2 + $0x1ea] sm:$0xff] }
 0x39a   : > { %15613 = vst [vmem:[#allocation96_spill] sm:$0xff] %v14029_v31  ;;  %v14032_v48 = vadd.f32 %v4724_v35, %v4113_v56  ;;  %v4116_v41 = vadd.f32 %v10938_v26, %v15616_v33  ;;  %v11085_v31 = vpop.f32.mrf.mxu0  ;;  %11340 = vmatmul.mubr.bf16.gmra.mxu0 %v6185_v4  ;;  %v6080_v35 = vld [vmem:[#allocation2 + $0x1f0] sm:$0xff] }
 0x39b   : > { %v3797_v62 = vpop.f32.mrf.mxu1  ;;  %11343 = vmatprep.mubr.bf16.mxu0 %v6186_v52  ;;  %v6083_v26 = vld [vmem:[#allocation2 + $0x210] sm:$0xff]  ;;  %11588 = vmatpush3.bf16.msra.mxu0 %v11888_v36 }
 0x39c   : > { %15615 = vst [vmem:[#allocation98_spill] sm:$0xff] %v14032_v48  ;;  %v14035_v19 = vadd.f32 %v11082_v0, %v4116_v41  ;;  %v4114_v29 = vadd.f32 %v3797_v62, %v15618_v16  ;;  %v4740_v56 = vpop.f32.mrf.mxu0  ;;  %v6082_v62 = vld [vmem:[#allocation2 + $0x208] sm:$0xff]  ;;  %v5256_v41 = vpack.c.bf16 %v5150_v9, %v5149_v27  ;;  %v6187_v16 = vpack.c.bf16 %v6081_v57, %v6080_v35  ;;  %v15628_v9 = vld [vmem:[#allocation25_spill] sm:$0xff] }
 0x39d   : > { %v10941_v60 = vpop.f32.mrf.mxu1  ;;  %11196 = vmatmul.mubr.bf16.gmra.mxu1 %v5254_v34  ;;  %v15622_v34 = vld [vmem:[#allocation22_spill] sm:$0xff] }
 0x39e   : > { %15617 = vst [vmem:[#allocation100_spill] sm:$0xff] %v14035_v19  ;;  %v14038_v11 = vadd.f32 %v4727_v40, %v4114_v29  ;;  %v4119_v44 = vadd.f32 %v10941_v60, %v15620_v43  ;;  %11199 = vmatprep.mubr.bf16.mxu1 %v5255_v54  ;;  %v11086_v40 = vpop.f32.mrf.mxu0  ;;  %v15624_v54 = vld [vmem:[#allocation23_spill] sm:$0xff]  ;;  %v5257_v60 = vpack.c.bf16 %v5152_v2, %v5151_v18  ;;  %v6084_v57 = vld [vmem:[#allocation2 + $0x218] sm:$0xff] }
 0x39f   : > { %v3810_v25 = vpop.f32.mrf.mxu1  ;;  %v6188_v43 = vpack.c.bf16 %v6083_v26, %v6082_v62  ;;  %v6085_v18 = vld [vmem:[#allocation2 + $0x220] sm:$0xff]  ;;  %v5156_v26 = vld [vmem:[#allocation2 + $0x212] sm:$0xff] }
 0x3a0   : > { %15619 = vst [vmem:[#allocation102_spill] sm:$0xff] %v14038_v11  ;;  %v14041_v0 = vadd.f32 %v11085_v31, %v4119_v44  ;;  %v4117_v4 = vadd.f32 %v3810_v25, %v15622_v34  ;;  %v4743_v19 = vpop.f32.mrf.mxu0  ;;  %v5153_v25 = vld [vmem:[#allocation2 + $0x1f2] sm:$0xff]  ;;  %v5154_v34 = vld [vmem:[#allocation2 + $0x1fa] sm:$0xff] }
 0x3a1   : > { %v10942_v33 = vpop.f32.mrf.mxu1 }
 0x3a2   : > { %15621 = vst [vmem:[#allocation104_spill] sm:$0xff] %v14041_v0  ;;  %v14044_v29 = vadd.f32 %v4740_v56, %v4117_v4  ;;  %v4120_v52 = vadd.f32 %v10942_v33, %v15624_v54  ;;  %v11089_v44 = vpop.f32.mrf.mxu0  ;;  %11344 = vmatmul.mubr.bf16.gmra.mxu0 %v6187_v16  ;;  %v5155_v56 = vld [vmem:[#allocation2 + $0x20a] sm:$0xff]  ;;  %v15630_v33 = vld [vmem:[#allocation26_spill] sm:$0xff]  ;;  %v6189_v54 = vpack.c.bf16 %v6085_v18, %v6084_v57 }
 0x3a3   : > { %v3813_v11 = vpop.f32.mrf.mxu1  ;;  %11347 = vmatprep.mubr.bf16.mxu0 %v6188_v43  ;;  %v6086_v4 = vld [vmem:[#allocation2 + $0x230] sm:$0xff]  ;;  %v6088_v18 = vld [vmem:[#allocation2 + $0x240] sm:$0xff] }
 0x3a4   : > { %15623 = vst [vmem:[#allocation106_spill] sm:$0xff] %v14044_v29  ;;  %v14047_v48 = vadd.f32 %v11086_v40, %v4120_v52  ;;  %v4118_v36 = vadd.f32 %v3813_v11, %v15626_v59  ;;  %v4756_v62 = vpop.f32.mrf.mxu0  ;;  %v6087_v59 = vld [vmem:[#allocation2 + $0x238] sm:$0xff]  ;;  %v15634_v29 = vld [vmem:[#allocation27_spill] sm:$0xff] }
 0x3a5   : > { %v10945_v31 = vpop.f32.mrf.mxu1  ;;  %11200 = vmatmul.mubr.bf16.gmra.mxu1 %v5256_v41 }
 0x3a6   : > { %15625 = vst [vmem:[#allocation17_spill] sm:$0xff] %v14047_v48  ;;  %v14050_v27 = vadd.f32 %v4743_v19, %v4118_v36  ;;  %v4123_v35 = vadd.f32 %v10945_v31, %v15628_v9  ;;  %11203 = vmatprep.mubr.bf16.mxu1 %v5257_v60  ;;  %v11090_v16 = vpop.f32.mrf.mxu0  ;;  %v5258_v19 = vpack.c.bf16 %v5154_v34, %v5153_v25  ;;  %v15632_v60 = vld [vmem:[#allocation28_spill] sm:$0xff]  ;;  %v15636_v34 = vld [vmem:[#allocation29_spill] sm:$0xff] }
 0x3a7   : > { %v3826_v2 = vpop.f32.mrf.mxu1  ;;  %v5259_v36 = vpack.c.bf16 %v5156_v26, %v5155_v56  ;;  %v6190_v31 = vpack.c.bf16 %v6087_v59, %v6086_v4  ;;  %v6089_v56 = vld [vmem:[#allocation2 + $0x248] sm:$0xff]  ;;  %v5160_v59 = vld [vmem:[#allocation2 + $0x23a] sm:$0xff] }
 0x3a8   : > { %15627 = vst [vmem:[#allocation18_spill] sm:$0xff] %v14050_v27  ;;  %v14053_v11 = vadd.f32 %v11089_v44, %v4123_v35  ;;  %v4121_v40 = vadd.f32 %v3826_v2, %v15630_v33  ;;  %v4759_v27 = vpop.f32.mrf.mxu0  ;;  %v5157_v2 = vld [vmem:[#allocation2 + $0x21a] sm:$0xff]  ;;  %v5158_v33 = vld [vmem:[#allocation2 + $0x222] sm:$0xff] }
 0x3a9   : > { %v10946_v41 = vpop.f32.mrf.mxu1 }
 0x3aa   : > { %15629 = vst [vmem:[#allocation19_spill] sm:$0xff] %v14053_v11  ;;  %v14056_v52 = vadd.f32 %v4756_v62, %v4121_v40  ;;  %v4124_v43 = vadd.f32 %v10946_v41, %v15632_v60  ;;  %v11093_v35 = vpop.f32.mrf.mxu0  ;;  %11348 = vmatmul.mubr.bf16.gmra.mxu0 %v6189_v54  ;;  %v5159_v62 = vld [vmem:[#allocation2 + $0x232] sm:$0xff] }
 0x3ab   : > { %v3829_v9 = vpop.f32.mrf.mxu1  ;;  %11351 = vmatprep.mubr.bf16.mxu0 %v6190_v31  ;;  %v6090_v40 = vld [vmem:[#allocation2 + $0x258] sm:$0xff] }
 0x3ac   : > { %15631 = vst [vmem:[#allocation20_spill] sm:$0xff] %v14056_v52  ;;  %v14059_v48 = vadd.f32 %v11090_v16, %v4124_v43  ;;  %v4122_v0 = vadd.f32 %v3829_v9, %v15634_v29  ;;  %v4772_v4 = vpop.f32.mrf.mxu0  ;;  %v6091_v29 = vld [vmem:[#allocation2 + $0x260] sm:$0xff]  ;;  %v5261_v9 = vpack.c.bf16 %v5160_v59, %v5159_v62  ;;  %v15642_v52 = vld [vmem:[#allocation33_spill] sm:$0xff] }
 0x3ad   : > { %v10949_v44 = vpop.f32.mrf.mxu1  ;;  %11204 = vmatmul.mubr.bf16.gmra.mxu1 %v5258_v19  ;;  %v15638_v16 = vld [vmem:[#allocation31_spill] sm:$0xff]  ;;  %v6093_v62 = vld [vmem:[#allocation2 + $0x270] sm:$0xff] }
 0x3ae   : > { %15633 = vst [vmem:[#allocation21_spill] sm:$0xff] %v14059_v48  ;;  %v14062_v25 = vadd.f32 %v4759_v27, %v4122_v0  ;;  %v4127_v57 = vadd.f32 %v10949_v44, %v15636_v34  ;;  %11207 = vmatprep.mubr.bf16.mxu1 %v5259_v36  ;;  %v11094_v60 = vpop.f32.mrf.mxu0  ;;  %v5260_v0 = vpack.c.bf16 %v5158_v33, %v5157_v2  ;;  %v15640_v36 = vld [vmem:[#allocation30_spill] sm:$0xff]  ;;  %v15644_v33 = vld [vmem:[#allocation32_spill] sm:$0xff] }
 0x3af   : > { %v3842_v26 = vpop.f32.mrf.mxu1  ;;  %v6191_v27 = vpack.c.bf16 %v6089_v56, %v6088_v18  ;;  %v6192_v44 = vpack.c.bf16 %v6091_v29, %v6090_v40  ;;  %v6092_v56 = vld [vmem:[#allocation2 + $0x268] sm:$0xff] }
 0x3b0   : > { %15635 = vst [vmem:[#allocation22_spill] sm:$0xff] %v14062_v25  ;;  %v14065_v41 = vadd.f32 %v11093_v35, %v4127_v57  ;;  %v4125_v19 = vadd.f32 %v3842_v26, %v15638_v16  ;;  %v4775_v25 = vpop.f32.mrf.mxu0  ;;  %v5161_v26 = vld [vmem:[#allocation2 + $0x242] sm:$0xff]  ;;  %v5162_v16 = vld [vmem:[#allocation2 + $0x24a] sm:$0xff] }
 0x3b1   : > { %v10950_v54 = vpop.f32.mrf.mxu1  ;;  %v5164_v29 = vld [vmem:[#allocation2 + $0x262] sm:$0xff] }
 0x3b2   : > { %15637 = vst [vmem:[#allocation23_spill] sm:$0xff] %v14065_v41  ;;  %v14068_v43 = vadd.f32 %v4772_v4, %v4125_v19  ;;  %v4128_v31 = vadd.f32 %v10950_v54, %v15640_v36  ;;  %v11097_v57 = vpop.f32.mrf.mxu0  ;;  %11352 = vmatmul.mubr.bf16.gmra.mxu0 %v6191_v27  ;;  %v5163_v4 = vld [vmem:[#allocation2 + $0x25a] sm:$0xff]  ;;  %v11889_v27 = vld [vmem:[#allocation6 + $0x1c0] sm:$0xff]  }
 0x3b3   : > { %v3845_v34 = vpop.f32.mrf.mxu1  ;;  %11355 = vmatprep.mubr.bf16.mxu0 %v6192_v44  ;;  %v6094_v19 = vld [vmem:[#allocation2 + $0x280] sm:$0xff]  ;;  %11445 = vmatprep.subr.bf16.mxu1 %v11889_v27  ;;  %v15658_v41 = vld [vmem:[#allocation41_spill] sm:$0xff] }
 0x3b4   : > { %15639 = vst [vmem:[#allocation24_spill] sm:$0xff] %v14068_v43  ;;  %v14071_v48 = vadd.f32 %v11094_v60, %v4128_v31  ;;  %v4126_v11 = vadd.f32 %v3845_v34, %v15642_v52  ;;  %v4788_v40 = vpop.f32.mrf.mxu0  ;;  %v6095_v52 = vld [vmem:[#allocation2 + $0x288] sm:$0xff]  ;;  %v15646_v60 = vld [vmem:[#allocation34_spill] sm:$0xff]  ;;  %v6193_v31 = vpack.c.bf16 %v6093_v62, %v6092_v56  ;;  %11446 = vmatpush3.bf16.msra.mxu1 %v11889_v27  ;;  %v15652_v62 = vld [vmem:[#allocation37_spill] sm:$0xff] }
 0x3b5   : > { %v10953_v35 = vpop.f32.mrf.mxu1  ;;  %11208 = vmatmul.mubr.bf16.gmra.mxu1 %v5260_v0  ;;  %v5168_v27 = vld [vmem:[#allocation2 + $0x28a] sm:$0xff] }
 0x3b6   : > { %15641 = vst [vmem:[#allocation25_spill] sm:$0xff] %v14071_v48  ;;  %v14074_v2 = vadd.f32 %v4775_v25, %v4126_v11  ;;  %v4131_v18 = vadd.f32 %v10953_v35, %v15644_v33  ;;  %11211 = vmatprep.mubr.bf16.mxu1 %v5261_v9  ;;  %v11098_v11 = vpop.f32.mrf.mxu0  ;;  %v5262_v25 = vpack.c.bf16 %v5162_v16, %v5161_v26  ;;  %v15648_v9 = vld [vmem:[#allocation35_spill] sm:$0xff]  ;;  %v5166_v16 = vld [vmem:[#allocation2 + $0x272] sm:$0xff] }
 0x3b7   : > { %v3858_v59 = vpop.f32.mrf.mxu1  ;;  %v5263_v35 = vpack.c.bf16 %v5164_v29, %v5163_v4  ;;  %v6194_v33 = vpack.c.bf16 %v6095_v52, %v6094_v19  ;;  %v5165_v26 = vld [vmem:[#allocation2 + $0x26a] sm:$0xff]  ;;  %v6097_v29 = vld [vmem:[#allocation2 + $0x298] sm:$0xff]  ;;  %v5167_v19 = vld [vmem:[#allocation2 + $0x282] sm:$0xff] }
 0x3b8   : > { %15643 = vst [vmem:[#allocation26_spill] sm:$0xff] %v14074_v2  ;;  %v14077_v54 = vadd.f32 %v11097_v57, %v4131_v18  ;;  %v4129_v0 = vadd.f32 %v3858_v59, %v15646_v60  ;;  %v11890_v2 = vld [vmem:[#allocation6 + $0x200] sm:$0xff]   ;;  %v4791_v43 = vpop.f32.mrf.mxu0 }
 0x3b9   : > { %v10954_v36 = vpop.f32.mrf.mxu1  ;;  %v15650_v18 = vld [vmem:[#allocation36_spill] sm:$0xff]  ;;  %11589 = vmatprep.subr.bf16.mxu0 %v11890_v2 }
 0x3ba   : > { %15645 = vst [vmem:[#allocation28_spill] sm:$0xff] %v14077_v54  ;;  %v14080_v34 = vadd.f32 %v4788_v40, %v4129_v0  ;;  %v4132_v44 = vadd.f32 %v10954_v36, %v15648_v9  ;;  %v11101_v54 = vpop.f32.mrf.mxu0  ;;  %11356 = vmatmul.mubr.bf16.gmra.mxu0 %v6193_v31  ;;  %v6096_v40 = vld [vmem:[#allocation2 + $0x290] sm:$0xff] }
 0x3bb   : > { %v3861_v48 = vpop.f32.mrf.mxu1  ;;  %11359 = vmatprep.mubr.bf16.mxu0 %v6194_v33  ;;  %v6099_v36 = vld [vmem:[#allocation2 + $0x2b0] sm:$0xff]  ;;  %11590 = vmatpush3.bf16.msra.mxu0 %v11890_v2 }
 0x3bc   : > { %15647 = vst [vmem:[#allocation27_spill] sm:$0xff] %v14080_v34  ;;  %v14083_v57 = vadd.f32 %v11098_v11, %v4132_v44  ;;  %v4130_v59 = vadd.f32 %v3861_v48, %v15650_v18  ;;  %v4804_v0 = vpop.f32.mrf.mxu0  ;;  %v6098_v48 = vld [vmem:[#allocation2 + $0x2a8] sm:$0xff]  ;;  %v5264_v44 = vpack.c.bf16 %v5166_v16, %v5165_v26  ;;  %v6195_v18 = vpack.c.bf16 %v6097_v29, %v6096_v40  ;;  %v6100_v29 = vld [vmem:[#allocation2 + $0x2b8] sm:$0xff] }
 0x3bd   : > { %v10957_v60 = vpop.f32.mrf.mxu1  ;;  %11212 = vmatmul.mubr.bf16.gmra.mxu1 %v5262_v25  ;;  %v15654_v25 = vld [vmem:[#allocation39_spill] sm:$0xff]  ;;  %v15660_v16 = vld [vmem:[#allocation40_spill] sm:$0xff] }
 0x3be   : > { %15649 = vst [vmem:[#allocation29_spill] sm:$0xff] %v14083_v57  ;;  %v14086_v56 = vadd.f32 %v4791_v43, %v4130_v59  ;;  %v4135_v4 = vadd.f32 %v10957_v60, %v15652_v62  ;;  %11215 = vmatprep.mubr.bf16.mxu1 %v5263_v35  ;;  %v11102_v43 = vpop.f32.mrf.mxu0  ;;  %v15656_v35 = vld [vmem:[#allocation38_spill] sm:$0xff]  ;;  %v5265_v60 = vpack.c.bf16 %v5168_v27, %v5167_v19 }
 0x3bf   : > { %v3874_v52 = vpop.f32.mrf.mxu1  ;;  %v6196_v62 = vpack.c.bf16 %v6099_v36, %v6098_v48  ;;  %v6101_v19 = vld [vmem:[#allocation2 + $0x2c0] sm:$0xff]  ;;  %v5172_v36 = vld [vmem:[#allocation2 + $0x2b2] sm:$0xff] }
 0x3c0   : > { %15651 = vst [vmem:[#allocation31_spill] sm:$0xff] %v14086_v56  ;;  %v14089_v11 = vadd.f32 %v11101_v54, %v4135_v4  ;;  %v4133_v31 = vadd.f32 %v3874_v52, %v15654_v25  ;;  %v4807_v57 = vpop.f32.mrf.mxu0  ;;  %v5169_v52 = vld [vmem:[#allocation2 + $0x292] sm:$0xff]  ;;  %v5170_v25 = vld [vmem:[#allocation2 + $0x29a] sm:$0xff] }
 0x3c1   : > { %v10958_v9 = vpop.f32.mrf.mxu1 }
 0x3c2   : > { %15653 = vst [vmem:[#allocation30_spill] sm:$0xff] %v14089_v11  ;;  %v14092_v59 = vadd.f32 %v4804_v0, %v4133_v31  ;;  %v4136_v33 = vadd.f32 %v10958_v9, %v15656_v35  ;;  %v11105_v4 = vpop.f32.mrf.mxu0  ;;  %11360 = vmatmul.mubr.bf16.gmra.mxu0 %v6195_v18  ;;  %v5171_v0 = vld [vmem:[#allocation2 + $0x2aa] sm:$0xff]  ;;  %v15662_v9 = vld [vmem:[#allocation42_spill] sm:$0xff]  ;;  %v6197_v35 = vpack.c.bf16 %v6101_v19, %v6100_v29 }
 0x3c3   : > { %v3877_v56 = vpop.f32.mrf.mxu1  ;;  %11363 = vmatprep.mubr.bf16.mxu0 %v6196_v62  ;;  %v6102_v31 = vld [vmem:[#allocation2 + $0x2d0] sm:$0xff]  ;;  %v6104_v19 = vld [vmem:[#allocation2 + $0x2e0] sm:$0xff] }
 0x3c4   : > { %15655 = vst [vmem:[#allocation33_spill] sm:$0xff] %v14092_v59  ;;  %v14095_v34 = vadd.f32 %v11102_v43, %v4136_v33  ;;  %v4134_v2 = vadd.f32 %v3877_v56, %v15658_v41  ;;  %v4820_v48 = vpop.f32.mrf.mxu0  ;;  %v6103_v41 = vld [vmem:[#allocation2 + $0x2d8] sm:$0xff]  ;;  %v15666_v59 = vld [vmem:[#allocation44_spill] sm:$0xff] }
 0x3c5   : > { %v10961_v54 = vpop.f32.mrf.mxu1  ;;  %11216 = vmatmul.mubr.bf16.gmra.mxu1 %v5264_v44 }
 0x3c6   : > { %15657 = vst [vmem:[#allocation32_spill] sm:$0xff] %v14095_v34  ;;  %v14098_v26 = vadd.f32 %v4807_v57, %v4134_v2  ;;  %v4139_v40 = vadd.f32 %v10961_v54, %v15660_v16  ;;  %11219 = vmatprep.mubr.bf16.mxu1 %v5265_v60  ;;  %v11106_v18 = vpop.f32.mrf.mxu0  ;;  %v5266_v57 = vpack.c.bf16 %v5170_v25, %v5169_v52  ;;  %v15664_v60 = vld [vmem:[#allocation43_spill] sm:$0xff]  ;;  %v15668_v25 = vld [vmem:[#allocation45_spill] sm:$0xff] }
 0x3c7   : > { %v3890_v27 = vpop.f32.mrf.mxu1  ;;  %v5267_v2 = vpack.c.bf16 %v5172_v36, %v5171_v0  ;;  %v6198_v54 = vpack.c.bf16 %v6103_v41, %v6102_v31  ;;  %v6105_v0 = vld [vmem:[#allocation2 + $0x2e8] sm:$0xff]  ;;  %v5176_v41 = vld [vmem:[#allocation2 + $0x2da] sm:$0xff] }
 0x3c8   : > { %15659 = vst [vmem:[#allocation34_spill] sm:$0xff] %v14098_v26  ;;  %v14101_v56 = vadd.f32 %v11105_v4, %v4139_v40  ;;  %v4137_v43 = vadd.f32 %v3890_v27, %v15662_v9  ;;  %v4823_v26 = vpop.f32.mrf.mxu0  ;;  %v5173_v27 = vld [vmem:[#allocation2 + $0x2ba] sm:$0xff]  ;;  %v5174_v9 = vld [vmem:[#allocation2 + $0x2c2] sm:$0xff] }
 0x3c9   : > { %v10962_v44 = vpop.f32.mrf.mxu1 }
 0x3ca   : > { %15661 = vst [vmem:[#allocation35_spill] sm:$0xff] %v14101_v56  ;;  %v14104_v33 = vadd.f32 %v4820_v48, %v4137_v43  ;;  %v4140_v62 = vadd.f32 %v10962_v44, %v15664_v60  ;;  %v11109_v40 = vpop.f32.mrf.mxu0  ;;  %11364 = vmatmul.mubr.bf16.gmra.mxu0 %v6197_v35  ;;  %v5175_v48 = vld [vmem:[#allocation2 + $0x2d2] sm:$0xff] }
 0x3cb   : > { %v3893_v16 = vpop.f32.mrf.mxu1  ;;  %11367 = vmatprep.mubr.bf16.mxu0 %v6198_v54  ;;  %v6106_v43 = vld [vmem:[#allocation2 + $0x2f8] sm:$0xff] }
 0x3cc   : > { %15663 = vst [vmem:[#allocation36_spill] sm:$0xff] %v14104_v33  ;;  %v14107_v34 = vadd.f32 %v11106_v18, %v4140_v62  ;;  %v4138_v11 = vadd.f32 %v3893_v16, %v15666_v59  ;;  %v4836_v31 = vpop.f32.mrf.mxu0  ;;  %v6107_v59 = vld [vmem:[#allocation2 + $0x300] sm:$0xff]  ;;  %v5269_v16 = vpack.c.bf16 %v5176_v41, %v5175_v48  ;;  %v15674_v33 = vld [vmem:[#allocation48_spill] sm:$0xff] }
 0x3cd   : > { %v10965_v4 = vpop.f32.mrf.mxu1  ;;  %11220 = vmatmul.mubr.bf16.gmra.mxu1 %v5266_v57  ;;  %v15670_v18 = vld [vmem:[#allocation46_spill] sm:$0xff]  ;;  %v6109_v48 = vld [vmem:[#allocation2 + $0x310] sm:$0xff] }
 0x3ce   : > { %15665 = vst [vmem:[#allocation37_spill] sm:$0xff] %v14107_v34  ;;  %v14110_v52 = vadd.f32 %v4823_v26, %v4138_v11  ;;  %v4143_v29 = vadd.f32 %v10965_v4, %v15668_v25  ;;  %11223 = vmatprep.mubr.bf16.mxu1 %v5267_v2  ;;  %v11110_v60 = vpop.f32.mrf.mxu0  ;;  %v5268_v11 = vpack.c.bf16 %v5174_v9, %v5173_v27  ;;  %v15672_v2 = vld [vmem:[#allocation47_spill] sm:$0xff]  ;;  %v15676_v9 = vld [vmem:[#allocation49_spill] sm:$0xff] }
 0x3cf   : > { %v3906_v36 = vpop.f32.mrf.mxu1  ;;  %v6199_v26 = vpack.c.bf16 %v6105_v0, %v6104_v19  ;;  %v6200_v4 = vpack.c.bf16 %v6107_v59, %v6106_v43  ;;  %v6108_v0 = vld [vmem:[#allocation2 + $0x308] sm:$0xff] }
 0x3d0   : > { %15667 = vst [vmem:[#allocation39_spill] sm:$0xff] %v14110_v52  ;;  %v14113_v44 = vadd.f32 %v11109_v40, %v4143_v29  ;;  %v4141_v57 = vadd.f32 %v3906_v36, %v15670_v18  ;;  %v4839_v52 = vpop.f32.mrf.mxu0  ;;  %v5177_v36 = vld [vmem:[#allocation2 + $0x2e2] sm:$0xff]  ;;  %v5178_v18 = vld [vmem:[#allocation2 + $0x2ea] sm:$0xff] }
 0x3d1   : > { %v10966_v35 = vpop.f32.mrf.mxu1  ;;  %v5180_v59 = vld [vmem:[#allocation2 + $0x302] sm:$0xff] }
 0x3d2   : > { %15669 = vst [vmem:[#allocation38_spill] sm:$0xff] %v14113_v44  ;;  %v14116_v62 = vadd.f32 %v4836_v31, %v4141_v57  ;;  %v4144_v54 = vadd.f32 %v10966_v35, %v15672_v2  ;;  %v11113_v29 = vpop.f32.mrf.mxu0  ;;  %11368 = vmatmul.mubr.bf16.gmra.mxu0 %v6199_v26  ;;  %v5179_v31 = vld [vmem:[#allocation2 + $0x2fa] sm:$0xff] }
 0x3d3   : > { %v3909_v25 = vpop.f32.mrf.mxu1  ;;  %11371 = vmatprep.mubr.bf16.mxu0 %v6200_v4  ;;  %v6110_v57 = vld [vmem:[#allocation2 + $0x320] sm:$0xff] }
 0x3d4   : > { %15671 = vst [vmem:[#allocation41_spill] sm:$0xff] %v14116_v62  ;;  %v14119_v34 = vadd.f32 %v11110_v60, %v4144_v54  ;;  %v4142_v56 = vadd.f32 %v3909_v25, %v15674_v33  ;;  %v4852_v43 = vpop.f32.mrf.mxu0  ;;  %v6111_v33 = vld [vmem:[#allocation2 + $0x328] sm:$0xff]  ;;  %v15678_v60 = vld [vmem:[#allocation114_spill] sm:$0xff]  ;;  %v5271_v25 = vpack.c.bf16 %v5180_v59, %v5179_v31 }
 0x3d5   : > { %v10969_v40 = vpop.f32.mrf.mxu1  ;;  %11224 = vmatmul.mubr.bf16.gmra.mxu1 %v5268_v11  ;;  %v15682_v62 = vld [vmem:[#allocation52_spill] sm:$0xff]  ;;  %v6113_v31 = vld [vmem:[#allocation2 + $0x338] sm:$0xff] }
 0x3d6   : > { %15673 = vst [vmem:[#allocation40_spill] sm:$0xff] %v14119_v34  ;;  %v14122_v27 = vadd.f32 %v4839_v52, %v4142_v56  ;;  %v4147_v19 = vadd.f32 %v10969_v40, %v15676_v9  ;;  %11227 = vmatprep.mubr.bf16.mxu1 %v5269_v16  ;;  %v11114_v2 = vpop.f32.mrf.mxu0  ;;  %v5270_v56 = vpack.c.bf16 %v5178_v18, %v5177_v36  ;;  %v15680_v16 = vld [vmem:[#allocation115_spill] sm:$0xff]  ;;  %v15684_v18 = vld [vmem:[#allocation53_spill] sm:$0xff] }
 0x3d7   : > { %v3922_v41 = vpop.f32.mrf.mxu1  ;;  %v6201_v52 = vpack.c.bf16 %v6109_v48, %v6108_v0  ;;  %v6202_v40 = vpack.c.bf16 %v6111_v33, %v6110_v57  ;;  %v6112_v48 = vld [vmem:[#allocation2 + $0x330] sm:$0xff] }
 0x3d8   : > { %15675 = vst [vmem:[#allocation42_spill] sm:$0xff] %v14122_v27  ;;  %v14125_v35 = vadd.f32 %v11113_v29, %v4147_v19  ;;  %v4145_v11 = vadd.f32 %v3922_v41, %v15678_v60  ;;  %v4855_v27 = vpop.f32.mrf.mxu0  ;;  %v5181_v41 = vld [vmem:[#allocation2 + $0x30a] sm:$0xff]  ;;  %v5182_v60 = vld [vmem:[#allocation2 + $0x312] sm:$0xff] }
 0x3d9   : > { %v10970_v26 = vpop.f32.mrf.mxu1  ;;  %v5184_v33 = vld [vmem:[#allocation2 + $0x32a] sm:$0xff] }
 0x3da   : > { %15677 = vst [vmem:[#allocation43_spill] sm:$0xff] %v14125_v35  ;;  %v14128_v54 = vadd.f32 %v4852_v43, %v4145_v11  ;;  %v4148_v4 = vadd.f32 %v10970_v26, %v15680_v16  ;;  %v11117_v19 = vpop.f32.mrf.mxu0  ;;  %11372 = vmatmul.mubr.bf16.gmra.mxu0 %v6201_v52  ;;  %v5183_v43 = vld [vmem:[#allocation2 + $0x322] sm:$0xff] }
 0x3db   : > { %v3925_v9 = vpop.f32.mrf.mxu1  ;;  %11375 = vmatprep.mubr.bf16.mxu0 %v6202_v40  ;;  %v6114_v11 = vld [vmem:[#allocation2 + $0x348] sm:$0xff] }
 0x3dc   : > { %15679 = vst [vmem:[#allocation44_spill] sm:$0xff] %v14128_v54  ;;  %v14131_v34 = vadd.f32 %v11114_v2, %v4148_v4  ;;  %v4146_v44 = vadd.f32 %v3925_v9, %v15682_v62  ;;  %v4868_v57 = vpop.f32.mrf.mxu0  ;;  %v6115_v62 = vld [vmem:[#allocation2 + $0x350] sm:$0xff]  ;;  %v15686_v2 = vld [vmem:[#allocation55_spill] sm:$0xff]  ;;  %v5273_v9 = vpack.c.bf16 %v5184_v33, %v5183_v43 }
 0x3dd   : > { %v10973_v29 = vpop.f32.mrf.mxu1  ;;  %11228 = vmatmul.mubr.bf16.gmra.mxu1 %v5270_v56  ;;  %v15690_v54 = vld [vmem:[#allocation59_spill] sm:$0xff] }
 0x3de   : > { %15681 = vst [vmem:[#allocation45_spill] sm:$0xff] %v14131_v34  ;;  %v14134_v36 = vadd.f32 %v4855_v27, %v4146_v44  ;;  %v4151_v0 = vadd.f32 %v10973_v29, %v15684_v18  ;;  %11231 = vmatprep.mubr.bf16.mxu1 %v5271_v25  ;;  %v11118_v16 = vpop.f32.mrf.mxu0  ;;  %v5272_v44 = vpack.c.bf16 %v5182_v60, %v5181_v41  ;;  %v15688_v25 = vld [vmem:[#allocation57_spill] sm:$0xff]  ;;  %v6117_v43 = vld [vmem:[#allocation2 + $0x360] sm:$0xff] }
 0x3df   : > { %v3938_v59 = vpop.f32.mrf.mxu1  ;;  %v6203_v27 = vpack.c.bf16 %v6113_v31, %v6112_v48  ;;  %v6204_v29 = vpack.c.bf16 %v6115_v62, %v6114_v11  ;;  %v15692_v60 = vld [vmem:[#allocation61_spill] sm:$0xff] }
 0x3e0   : > { %15683 = vst [vmem:[#allocation46_spill] sm:$0xff] %v14134_v36  ;;  %v14137_v26 = vadd.f32 %v11117_v19, %v4151_v0  ;;  %v4149_v56 = vadd.f32 %v3938_v59, %v15686_v2  ;;  %v4871_v36 = vpop.f32.mrf.mxu0  ;;  %v5185_v59 = vld [vmem:[#allocation2 + $0x332] sm:$0xff]  ;;  %v5186_v2 = vld [vmem:[#allocation2 + $0x33a] sm:$0xff] }
 0x3e1   : > { %v10974_v52 = vpop.f32.mrf.mxu1  ;;  %v6116_v31 = vld [vmem:[#allocation2 + $0x358] sm:$0xff] }
 0x3e2   : > { %15685 = vst [vmem:[#allocation47_spill] sm:$0xff] %v14137_v26  ;;  %v14140_v4 = vadd.f32 %v4868_v57, %v4149_v56  ;;  %v4152_v40 = vadd.f32 %v10974_v52, %v15688_v25  ;;  %v11121_v0 = vpop.f32.mrf.mxu0  ;;  %11376 = vmatmul.mubr.bf16.gmra.mxu0 %v6203_v27  ;;  %v5187_v57 = vld [vmem:[#allocation2 + $0x34a] sm:$0xff]  ;;  %v5188_v62 = vld [vmem:[#allocation2 + $0x352] sm:$0xff] }
 0x3e3   : > { %v3941_v18 = vpop.f32.mrf.mxu1  ;;  %11379 = vmatprep.mubr.bf16.mxu0 %v6204_v29  ;;  %v6118_v56 = vld [vmem:[#allocation2 + $0x370] sm:$0xff] }
 0x3e4   : > { %15687 = vst [vmem:[#allocation48_spill] sm:$0xff] %v14140_v4  ;;  %v14143_v34 = vadd.f32 %v11118_v16, %v4152_v40  ;;  %v4150_v35 = vadd.f32 %v3941_v18, %v15690_v54  ;;  %v4884_v11 = vpop.f32.mrf.mxu0  ;;  %v6119_v54 = vld [vmem:[#allocation2 + $0x378] sm:$0xff]  ;;  %v15694_v16 = vld [vmem:[#allocation63_spill] sm:$0xff]  ;;  %v5275_v18 = vpack.c.bf16 %v5188_v62, %v5187_v57 }
 0x3e5   : > { %v10977_v19 = vpop.f32.mrf.mxu1  ;;  %11232 = vmatmul.mubr.bf16.gmra.mxu1 %v5272_v44  ;;  %v15698_v4 = vld [vmem:[#allocation67_spill] sm:$0xff] }
 0x3e6   : > { %15689 = vst [vmem:[#allocation49_spill] sm:$0xff] %v14143_v34  ;;  %v14146_v41 = vadd.f32 %v4871_v36, %v4150_v35  ;;  %v4155_v48 = vadd.f32 %v10977_v19, %v15692_v60  ;;  %11235 = vmatprep.mubr.bf16.mxu1 %v5273_v9  ;;  %v11122_v25 = vpop.f32.mrf.mxu0  ;;  %v5274_v35 = vpack.c.bf16 %v5186_v2, %v5185_v59  ;;  %v15696_v9 = vld [vmem:[#allocation65_spill] sm:$0xff]  ;;  %v6121_v57 = vld [vmem:[#allocation2 + $0x388] sm:$0xff] }
 0x3e7   : > { %v3954_v33 = vpop.f32.mrf.mxu1  ;;  %v6205_v36 = vpack.c.bf16 %v6117_v43, %v6116_v31  ;;  %v6206_v19 = vpack.c.bf16 %v6119_v54, %v6118_v56  ;;  %v15700_v2 = vld [vmem:[#allocation69_spill] sm:$0xff]  ;;  %v6120_v43 = vld [vmem:[#allocation2 + $0x380] sm:$0xff] }
 0x3e8   : > { %15691 = vst [vmem:[#allocation114_spill] sm:$0xff] %v14146_v41  ;;  %v14149_v52 = vadd.f32 %v11121_v0, %v4155_v48  ;;  %v4153_v44 = vadd.f32 %v3954_v33, %v15694_v16  ;;  %v4887_v41 = vpop.f32.mrf.mxu0  ;;  %v5189_v33 = vld [vmem:[#allocation2 + $0x35a] sm:$0xff]  ;;  %v5190_v16 = vld [vmem:[#allocation2 + $0x362] sm:$0xff] }
 0x3e9   : > { %v10978_v27 = vpop.f32.mrf.mxu1  ;;  %v5192_v54 = vld [vmem:[#allocation2 + $0x37a] sm:$0xff] }
 0x3ea   : > { %15693 = vst [vmem:[#allocation115_spill] sm:$0xff] %v14149_v52  ;;  %v14152_v40 = vadd.f32 %v4884_v11, %v4153_v44  ;;  %v4156_v29 = vadd.f32 %v10978_v27, %v15696_v9  ;;  %v11125_v48 = vpop.f32.mrf.mxu0  ;;  %11380 = vmatmul.mubr.bf16.gmra.mxu0 %v6205_v36  ;;  %v5191_v11 = vld [vmem:[#allocation2 + $0x372] sm:$0xff] }
 0x3eb   : > { %v3957_v60 = vpop.f32.mrf.mxu1  ;;  %11383 = vmatprep.mubr.bf16.mxu0 %v6206_v19  ;;  %v6122_v44 = vld [vmem:[#allocation2 + $0x398] sm:$0xff] }
 0x3ec   : > { %15695 = vst [vmem:[#allocation52_spill] sm:$0xff] %v14152_v40  ;;  %v14155_v34 = vadd.f32 %v11122_v25, %v4156_v29  ;;  %v4154_v26 = vadd.f32 %v3957_v60, %v15698_v4  ;;  %v4900_v56 = vpop.f32.mrf.mxu0  ;;  %v6123_v4 = vld [vmem:[#allocation2 + $0x3a0] sm:$0xff]  ;;  %v5277_v60 = vpack.c.bf16 %v5192_v54, %v5191_v11  ;;  %v6125_v11 = vld [vmem:[#allocation2 + $0x3b0] sm:$0xff] }
 0x3ed   : > { %v10981_v0 = vpop.f32.mrf.mxu1  ;;  %11236 = vmatmul.mubr.bf16.gmra.mxu1 %v5274_v35  ;;  %v15702_v25 = vld [vmem:[#allocation71_spill] sm:$0xff] }
 0x3ee   : > { %15697 = vst [vmem:[#allocation53_spill] sm:$0xff] %v14155_v34  ;;  %v14158_v59 = vadd.f32 %v4887_v41, %v4154_v26  ;;  %v4159_v31 = vadd.f32 %v10981_v0, %v15700_v2  ;;  %11239 = vmatprep.mubr.bf16.mxu1 %v5275_v18  ;;  %v11126_v9 = vpop.f32.mrf.mxu0  ;;  %v5276_v26 = vpack.c.bf16 %v5190_v16, %v5189_v33  ;;  %v15704_v18 = vld [vmem:[#allocation73_spill] sm:$0xff]  ;;  %v15706_v40 = vld [vmem:[#allocation75_spill] sm:$0xff] }
 0x3ef   : > { %v3970_v62 = vpop.f32.mrf.mxu1  ;;  %v6207_v41 = vpack.c.bf16 %v6121_v57, %v6120_v43  ;;  %v6208_v0 = vpack.c.bf16 %v6123_v4, %v6122_v44  ;;  %v15708_v16 = vld [vmem:[#allocation77_spill] sm:$0xff]  ;;  %v6124_v57 = vld [vmem:[#allocation2 + $0x3a8] sm:$0xff] }
 0x3f0   : > { %15699 = vst [vmem:[#allocation55_spill] sm:$0xff] %v14158_v59  ;;  %v14161_v27 = vadd.f32 %v11125_v48, %v4159_v31  ;;  %v4157_v35 = vadd.f32 %v3970_v62, %v15702_v25  ;;  %v4903_v59 = vpop.f32.mrf.mxu0  ;;  %v5193_v62 = vld [vmem:[#allocation2 + $0x382] sm:$0xff]  ;;  %v5194_v25 = vld [vmem:[#allocation2 + $0x38a] sm:$0xff] }
 0x3f1   : > { %v10982_v36 = vpop.f32.mrf.mxu1  ;;  %v5196_v4 = vld [vmem:[#allocation2 + $0x3a2] sm:$0xff] }
 0x3f2   : > { %15701 = vst [vmem:[#allocation57_spill] sm:$0xff] %v14161_v27  ;;  %v14164_v29 = vadd.f32 %v4900_v56, %v4157_v35  ;;  %v4160_v19 = vadd.f32 %v10982_v36, %v15704_v18  ;;  %v11129_v31 = vpop.f32.mrf.mxu0  ;;  %11384 = vmatmul.mubr.bf16.gmra.mxu0 %v6207_v41  ;;  %v5195_v56 = vld [vmem:[#allocation2 + $0x39a] sm:$0xff] }
 0x3f3   : > { %v3973_v2 = vpop.f32.mrf.mxu1  ;;  %11387 = vmatprep.mubr.bf16.mxu0 %v6208_v0  ;;  %v6126_v35 = vld [vmem:[#allocation2 + $0x3c0] sm:$0xff] }
 0x3f4   : > { %15703 = vst [vmem:[#allocation59_spill] sm:$0xff] %v14164_v29  ;;  %v14167_v34 = vadd.f32 %v11126_v9, %v4160_v19  ;;  %v4158_v52 = vadd.f32 %v3973_v2, %v15706_v40  ;;  %v4916_v44 = vpop.f32.mrf.mxu0  ;;  %v6127_v40 = vld [vmem:[#allocation2 + $0x3c8] sm:$0xff]  ;;  %v5279_v2 = vpack.c.bf16 %v5196_v4, %v5195_v56  ;;  %v6129_v56 = vld [vmem:[#allocation2 + $0x3d8] sm:$0xff] }
 0x3f5   : > { %v10985_v48 = vpop.f32.mrf.mxu1  ;;  %11240 = vmatmul.mubr.bf16.gmra.mxu1 %v5276_v26  ;;  %v15710_v9 = vld [vmem:[#allocation79_spill] sm:$0xff] }
 0x3f6   : > { %15705 = vst [vmem:[#allocation61_spill] sm:$0xff] %v14167_v34  ;;  %v14170_v33 = vadd.f32 %v4903_v59, %v4158_v52  ;;  %v4163_v43 = vadd.f32 %v10985_v48, %v15708_v16  ;;  %11243 = vmatprep.mubr.bf16.mxu1 %v5277_v60  ;;  %v11130_v18 = vpop.f32.mrf.mxu0  ;;  %v5278_v52 = vpack.c.bf16 %v5194_v25, %v5193_v62  ;;  %v15712_v60 = vld [vmem:[#allocation81_spill] sm:$0xff]  ;;  %v15714_v29 = vld [vmem:[#allocation83_spill] sm:$0xff] }
 0x3f7   : > { %v3986_v54 = vpop.f32.mrf.mxu1  ;;  %v6209_v59 = vpack.c.bf16 %v6125_v11, %v6124_v57  ;;  %v6210_v48 = vpack.c.bf16 %v6127_v40, %v6126_v35  ;;  %v15716_v25 = vld [vmem:[#allocation85_spill] sm:$0xff]  ;;  %v5200_v40 = vld [vmem:[#allocation2 + $0x3ca] sm:$0xff] }
 0x3f8   : > { %15707 = vst [vmem:[#allocation63_spill] sm:$0xff] %v14170_v33  ;;  %v14173_v36 = vadd.f32 %v11129_v31, %v4163_v43  ;;  %v4161_v26 = vadd.f32 %v3986_v54, %v15710_v9  ;;  %v4919_v33 = vpop.f32.mrf.mxu0  ;;  %v5197_v54 = vld [vmem:[#allocation2 + $0x3aa] sm:$0xff]  ;;  %v5198_v9 = vld [vmem:[#allocation2 + $0x3b2] sm:$0xff] }
 0x3f9   : > { %v10986_v41 = vpop.f32.mrf.mxu1  ;;  %v6128_v11 = vld [vmem:[#allocation2 + $0x3d0] sm:$0xff] }
 0x3fa   : > { %15709 = vst [vmem:[#allocation65_spill] sm:$0xff] %v14173_v36  ;;  %v14176_v19 = vadd.f32 %v4916_v44, %v4161_v26  ;;  %v4164_v0 = vadd.f32 %v10986_v41, %v15712_v60  ;;  %v11133_v43 = vpop.f32.mrf.mxu0  ;;  %11388 = vmatmul.mubr.bf16.gmra.mxu0 %v6209_v59  ;;  %v5199_v44 = vld [vmem:[#allocation2 + $0x3c2] sm:$0xff] }
 0x3fb   : > { %v3989_v16 = vpop.f32.mrf.mxu1  ;;  %11391 = vmatprep.mubr.bf16.mxu0 %v6210_v48  ;;  %v6130_v26 = vld [vmem:[#allocation2 + $0x3e8] sm:$0xff] }
 0x3fc   : > { %15711 = vst [vmem:[#allocation67_spill] sm:$0xff] %v14176_v19  ;;  %v14179_v34 = vadd.f32 %v11130_v18, %v4164_v0  ;;  %v4162_v27 = vadd.f32 %v3989_v16, %v15714_v29  ;;  %v4932_v35 = vpop.f32.mrf.mxu0  ;;  %v6131_v29 = vld [vmem:[#allocation2 + $0x3f0] sm:$0xff]  ;;  %v15718_v18 = vld [vmem:[#allocation87_spill] sm:$0xff]  ;;  %v5281_v16 = vpack.c.bf16 %v5200_v40, %v5199_v44 }
 0x3fd   : > { %v10989_v31 = vpop.f32.mrf.mxu1  ;;  %11244 = vmatmul.mubr.bf16.gmra.mxu1 %v5278_v52  ;;  %v15722_v19 = vld [vmem:[#allocation91_spill] sm:$0xff] }
 0x3fe   : > { %15713 = vst [vmem:[#allocation69_spill] sm:$0xff] %v14179_v34  ;;  %v14182_v62 = vadd.f32 %v4919_v33, %v4162_v27  ;;  %v4167_v57 = vadd.f32 %v10989_v31, %v15716_v25  ;;  %11247 = vmatprep.mubr.bf16.mxu1 %v5279_v2  ;;  %v11134_v60 = vpop.f32.mrf.mxu0  ;;  %v5280_v27 = vpack.c.bf16 %v5198_v9, %v5197_v54  ;;  %v15720_v2 = vld [vmem:[#allocation89_spill] sm:$0xff]  ;;  %v6133_v44 = vld [vmem:[#allocation2 + $0x400] sm:$0xff] }
 0x3ff   : > { %v4002_v4 = vpop.f32.mrf.mxu1  ;;  %v6211_v33 = vpack.c.bf16 %v6129_v56, %v6128_v11  ;;  %v6212_v31 = vpack.c.bf16 %v6131_v29, %v6130_v26  ;;  %v15724_v9 = vld [vmem:[#allocation93_spill] sm:$0xff] }
 0x400   : > { %15715 = vst [vmem:[#allocation71_spill] sm:$0xff] %v14182_v62  ;;  %v14185_v41 = vadd.f32 %v11133_v43, %v4167_v57  ;;  %v4165_v52 = vadd.f32 %v4002_v4, %v15718_v18  ;;  %v4935_v62 = vpop.f32.mrf.mxu0  ;;  %v5201_v4 = vld [vmem:[#allocation2 + $0x3d2] sm:$0xff]  ;;  %v5202_v18 = vld [vmem:[#allocation2 + $0x3da] sm:$0xff] }
 0x401   : > { %v10990_v59 = vpop.f32.mrf.mxu1  ;;  %v6132_v56 = vld [vmem:[#allocation2 + $0x3f8] sm:$0xff] }
 0x402   : > { %15717 = vst [vmem:[#allocation73_spill] sm:$0xff] %v14185_v41  ;;  %v14188_v0 = vadd.f32 %v4932_v35, %v4165_v52  ;;  %v4168_v48 = vadd.f32 %v10990_v59, %v15720_v2  ;;  %v11137_v57 = vpop.f32.mrf.mxu0  ;;  %11392 = vmatmul.mubr.bf16.gmra.mxu0 %v6211_v33  ;;  %v5203_v35 = vld [vmem:[#allocation2 + $0x3ea] sm:$0xff]  ;;  %v5204_v29 = vld [vmem:[#allocation2 + $0x3f2] sm:$0xff] }
 0x403   : > { %v4005_v25 = vpop.f32.mrf.mxu1  ;;  %11395 = vmatprep.mubr.bf16.mxu0 %v6212_v31  ;;  %v6134_v52 = vld [vmem:[#allocation2 + $0x410] sm:$0xff] }
 0x404   : > { %15719 = vst [vmem:[#allocation75_spill] sm:$0xff] %v14188_v0  ;;  %v14191_v34 = vadd.f32 %v11134_v60, %v4168_v48  ;;  %v4166_v36 = vadd.f32 %v4005_v25, %v15722_v19  ;;  %v4948_v26 = vpop.f32.mrf.mxu0  ;;  %v6135_v19 = vld [vmem:[#allocation2 + $0x418] sm:$0xff]  ;;  %v15725_v60 = vld [vmem:[#allocation95_spill] sm:$0xff]  ;;  %v5283_v25 = vpack.c.bf16 %v5204_v29, %v5203_v35 }
 0x405   : > { %v10993_v43 = vpop.f32.mrf.mxu1  ;;  %11248 = vmatmul.mubr.bf16.gmra.mxu1 %v5280_v27  ;;  %v15727_v0 = vld [vmem:[#allocation99_spill] sm:$0xff]  ;;  %v5207_v35 = vld [vmem:[#allocation2 + $0x412] sm:$0xff] }
 0x406   : > { %15721 = vst [vmem:[#allocation77_spill] sm:$0xff] %v14191_v34  ;;  %v14194_v54 = vadd.f32 %v4935_v62, %v4166_v36  ;;  %v4171_v11 = vadd.f32 %v10993_v43, %v15724_v9  ;;  %11251 = vmatprep.mubr.bf16.mxu1 %v5281_v16  ;;  %v11138_v2 = vpop.f32.mrf.mxu0  ;;  %v5282_v36 = vpack.c.bf16 %v5202_v18, %v5201_v4  ;;  %v15726_v16 = vld [vmem:[#allocation97_spill] sm:$0xff] }
 0x407   : > { %v4018_v40 = vpop.f32.mrf.mxu1  ;;  %v6213_v62 = vpack.c.bf16 %v6133_v44, %v6132_v56  ;;  %v6214_v43 = vpack.c.bf16 %v6135_v19, %v6134_v52  ;;  %v6136_v56 = vld [vmem:[#allocation2 + $0x420] sm:$0xff]  ;;  %v6137_v44 = vld [vmem:[#allocation2 + $0x428] sm:$0xff]  ;;  %v6138_v19 = vld [vmem:[#allocation2 + $0x438] sm:$0xff] }
 0x408   : > { %15723 = vst [vmem:[#allocation79_spill] sm:$0xff] %v14194_v54  ;;  %v14197_v59 = vadd.f32 %v11137_v57, %v4171_v11  ;;  %v4169_v27 = vadd.f32 %v4018_v40, %v15725_v60  ;;  %v4951_v54 = vpop.f32.mrf.mxu0  ;;  %v5205_v40 = vld [vmem:[#allocation2 + $0x3fa] sm:$0xff]  ;;  %v5206_v60 = vld [vmem:[#allocation2 + $0x402] sm:$0xff] }
 0x409   : > { %v10994_v33 = vpop.f32.mrf.mxu1  ;;  %v5208_v52 = vld [vmem:[#allocation2 + $0x41a] sm:$0xff] }
 0x40a   : > { %v14200_v48 = vadd.f32 %v4948_v26, %v4169_v27  ;;  %v4172_v31 = vadd.f32 %v10994_v33, %v15726_v16  ;;  %v11141_v11 = vpop.f32.mrf.mxu0  ;;  %11396 = vmatmul.mubr.bf16.gmra.mxu0 %v6213_v62  ;;  %v5285_v16 = vpack.c.bf16 %v5208_v52, %v5207_v35  ;;  %v5212_v52 = vld [vmem:[#allocation2 + $0x442] sm:$0xff] }
 0x40b   : > { %v4021_v9 = vpop.f32.mrf.mxu1  ;;  %11399 = vmatprep.mubr.bf16.mxu0 %v6214_v43 }
 0x40c   : > { %v14203_v34 = vadd.f32 %v11138_v2, %v4172_v31  ;;  %v4170_v41 = vadd.f32 %v4021_v9, %v15727_v0  ;;  %v4964_v29 = vpop.f32.mrf.mxu0  ;;  %v6139_v0 = vld [vmem:[#allocation2 + $0x440] sm:$0xff] }
 0x40d   : > { %v10997_v57 = vpop.f32.mrf.mxu1  ;;  %11252 = vmatmul.mubr.bf16.gmra.mxu1 %v5282_v36  ;;  %v6216_v31 = vpack.c.bf16 %v6139_v0, %v6138_v19  ;;  %v6142_v19 = vld [vmem:[#allocation2 + $0x460] sm:$0xff] }
 0x40e   : > { %v14206_v4 = vadd.f32 %v4951_v54, %v4170_v41  ;;  %v4175_v18 = vadd.f32 %v10997_v57, %v13817_v10  ;;  %11255 = vmatprep.mubr.bf16.mxu1 %v5283_v25  ;;  %v11142_v36 = vpop.f32.mrf.mxu0  ;;  %v5284_v41 = vpack.c.bf16 %v5206_v60, %v5205_v40  ;;  %v6215_v54 = vpack.c.bf16 %v6137_v44, %v6136_v56  ;;  %v6141_v56 = vld [vmem:[#allocation2 + $0x450] sm:$0xff]  ;;  %v5211_v44 = vld [vmem:[#allocation2 + $0x43a] sm:$0xff] }
 0x40f   : > { %v4034_v26 = vpop.f32.mrf.mxu1 }
 0x410   : > { %v14209_v27 = vadd.f32 %v11141_v11, %v4175_v18  ;;  %v4173_v33 = vadd.f32 %v4034_v26, %v13820_v20  ;;  %v4967_v43 = vpop.f32.mrf.mxu0  ;;  %v5209_v20 = vld [vmem:[#allocation2 + $0x422] sm:$0xff]  ;;  %v5210_v26 = vld [vmem:[#allocation2 + $0x42a] sm:$0xff] }
 0x411   : > { %v10998_v2 = vpop.f32.mrf.mxu1 }
 0x412   : > { %v14212_v62 = vadd.f32 %v4964_v29, %v4173_v33  ;;  %v4176_v10 = vadd.f32 %v10998_v2, %v13823_v37  ;;  %v11305_v18 = vpop.f32.mrf.mxu0  ;;  %11400 = vmatmul.mubr.bf16.gmra.mxu0 %v6215_v54  ;;  %v6140_v37 = vld [vmem:[#allocation2 + $0x448] sm:$0xff] }
 0x413   : > { %v4037_v25 = vpop.f32.mrf.mxu1  ;;  %11403 = vmatprep.mubr.bf16.mxu0 %v6216_v31  ;;  %v6217_v54 = vpack.c.bf16 %v6141_v56, %v6140_v37  ;;  %v6145_v37 = vld [vmem:[#allocation2 + $0x478] sm:$0xff]  ;;  %v5215_v56 = vld [vmem:[#allocation2 + $0x462] sm:$0xff] }
 0x414   : > { %v14215_v9 = vadd.f32 %v11142_v36, %v4176_v10  ;;  %v4174_v57 = vadd.f32 %v4037_v25, %v13826_v24  ;;  %v6329_v29 = vpop.f32.mrf.mxu0  ;;  %v6143_v24 = vld [vmem:[#allocation2 + $0x468] sm:$0xff] }
 0x415   : > { %v11161_v11 = vpop.f32.mrf.mxu1  ;;  %11256 = vmatmul.mubr.bf16.gmra.mxu1 %v5284_v41  ;;  %v5286_v41 = vpack.c.bf16 %v5210_v26, %v5209_v20  ;;  %v6218_v31 = vpack.c.bf16 %v6143_v24, %v6142_v19  ;;  %v6146_v19 = vld [vmem:[#allocation2 + $0x488] sm:$0xff] }
 0x416   : > { %v14218_v40 = vadd.f32 %v4967_v43, %v4174_v57  ;;  %v5911_v60 = vadd.f32 %v11161_v11, %v13829_v3  ;;  %11259 = vmatprep.mubr.bf16.mxu1 %v5285_v16  ;;  %v11306_v36 = vpop.f32.mrf.mxu0  ;;  %v5287_v16 = vpack.c.bf16 %v5212_v52, %v5211_v44  ;;  %v5216_v52 = vld [vmem:[#allocation2 + $0x46a] sm:$0xff] }
 0x417   : > { %v5398_v35 = vpop.f32.mrf.mxu1 }
 0x418   : > { %v14221_v0 = vadd.f32 %v11305_v18, %v5911_v60  ;;  %v5909_v33 = vadd.f32 %v5398_v35, %v13832_v39  ;;  %v6332_v43 = vpop.f32.mrf.mxu0  ;;  %v5213_v39 = vld [vmem:[#allocation2 + $0x44a] sm:$0xff]  ;;  %v5214_v35 = vld [vmem:[#allocation2 + $0x452] sm:$0xff] }
 0x419   : > { %v11162_v2 = vpop.f32.mrf.mxu1 }
 0x41a   : > { %v14224_v10 = vadd.f32 %v6329_v29, %v5909_v33  ;;  %v5912_v3 = vadd.f32 %v11162_v2, %v13835_v47  ;;  %v11309_v60 = vpop.f32.mrf.mxu0  ;;  %11404 = vmatmul.mubr.bf16.gmra.mxu0 %v6217_v54  ;;  %v6144_v47 = vld [vmem:[#allocation2 + $0x470] sm:$0xff] }
 0x41b   : > { %v5401_v25 = vpop.f32.mrf.mxu1  ;;  %11407 = vmatprep.mubr.bf16.mxu0 %v6218_v31  ;;  %v6219_v54 = vpack.c.bf16 %v6145_v37, %v6144_v47  ;;  %v6149_v47 = vld [vmem:[#allocation2 + $0x4a0] sm:$0xff]  ;;  %v5219_v37 = vld [vmem:[#allocation2 + $0x48a] sm:$0xff] }
 0x41c   : > { %v14227_v57 = vadd.f32 %v11306_v36, %v5912_v3  ;;  %v5910_v11 = vadd.f32 %v5401_v25, %v13838_v53  ;;  %v6345_v29 = vpop.f32.mrf.mxu0  ;;  %v6147_v53 = vld [vmem:[#allocation2 + $0x490] sm:$0xff] }
 0x41d   : > { %v11165_v18 = vpop.f32.mrf.mxu1  ;;  %11260 = vmatmul.mubr.bf16.gmra.mxu1 %v5286_v41  ;;  %v5288_v41 = vpack.c.bf16 %v5214_v35, %v5213_v39  ;;  %v6220_v31 = vpack.c.bf16 %v6147_v53, %v6146_v19  ;;  %v6150_v19 = vld [vmem:[#allocation2 + $0x4b0] sm:$0xff] }
 0x41e   : > { %v14230_v20 = vadd.f32 %v6332_v43, %v5910_v11  ;;  %v5915_v26 = vadd.f32 %v11165_v18, %v13841_v55  ;;  %11263 = vmatprep.mubr.bf16.mxu1 %v5287_v16  ;;  %v11310_v36 = vpop.f32.mrf.mxu0  ;;  %v5289_v16 = vpack.c.bf16 %v5216_v52, %v5215_v56  ;;  %v5220_v52 = vld [vmem:[#allocation2 + $0x492] sm:$0xff] }
 0x41f   : > { %v5414_v44 = vpop.f32.mrf.mxu1 }
 0x420   : > { %v14233_v24 = vadd.f32 %v11309_v60, %v5915_v26  ;;  %v5913_v33 = vadd.f32 %v5414_v44, %v13844_v21  ;;  %v6348_v43 = vpop.f32.mrf.mxu0  ;;  %v5217_v21 = vld [vmem:[#allocation2 + $0x472] sm:$0xff]  ;;  %v5218_v44 = vld [vmem:[#allocation2 + $0x47a] sm:$0xff] }
 0x421   : > { %v11166_v2 = vpop.f32.mrf.mxu1 }
 0x422   : > { %v14236_v3 = vadd.f32 %v6345_v29, %v5913_v33  ;;  %v5916_v55 = vadd.f32 %v11166_v2, %v13847_v14  ;;  %v11313_v26 = vpop.f32.mrf.mxu0  ;;  %11408 = vmatmul.mubr.bf16.gmra.mxu0 %v6219_v54  ;;  %v6148_v14 = vld [vmem:[#allocation2 + $0x498] sm:$0xff] }
 0x423   : > { %v5417_v25 = vpop.f32.mrf.mxu1  ;;  %11411 = vmatprep.mubr.bf16.mxu0 %v6220_v31  ;;  %v6221_v54 = vpack.c.bf16 %v6149_v47, %v6148_v14  ;;  %v6153_v14 = vld [vmem:[#allocation2 + $0x4c8] sm:$0xff]  ;;  %v5223_v47 = vld [vmem:[#allocation2 + $0x4b2] sm:$0xff] }
 0x424   : > { %v14239_v11 = vadd.f32 %v11310_v36, %v5916_v55  ;;  %v5914_v18 = vadd.f32 %v5417_v25, %v13850_v45  ;;  %v6361_v29 = vpop.f32.mrf.mxu0  ;;  %v6151_v45 = vld [vmem:[#allocation2 + $0x4b8] sm:$0xff] }
 0x425   : > { %v11169_v60 = vpop.f32.mrf.mxu1  ;;  %11264 = vmatmul.mubr.bf16.gmra.mxu1 %v5288_v41  ;;  %v5290_v41 = vpack.c.bf16 %v5218_v44, %v5217_v21  ;;  %v6222_v31 = vpack.c.bf16 %v6151_v45, %v6150_v19  ;;  %v6154_v19 = vld [vmem:[#allocation2 + $0x4d8] sm:$0xff] }
 0x426   : > { %v14242_v39 = vadd.f32 %v6348_v43, %v5914_v18  ;;  %v5919_v35 = vadd.f32 %v11169_v60, %v13853_v17  ;;  %11267 = vmatprep.mubr.bf16.mxu1 %v5289_v16  ;;  %v11314_v36 = vpop.f32.mrf.mxu0  ;;  %v5291_v16 = vpack.c.bf16 %v5220_v52, %v5219_v37  ;;  %v5224_v52 = vld [vmem:[#allocation2 + $0x4ba] sm:$0xff] }
 0x427   : > { %v5430_v56 = vpop.f32.mrf.mxu1 }
 0x428   : > { %v14245_v53 = vadd.f32 %v11313_v26, %v5919_v35  ;;  %v5917_v33 = vadd.f32 %v5430_v56, %v13856_v1  ;;  %v6364_v43 = vpop.f32.mrf.mxu0  ;;  %v5221_v1 = vld [vmem:[#allocation2 + $0x49a] sm:$0xff]  ;;  %v5222_v56 = vld [vmem:[#allocation2 + $0x4a2] sm:$0xff] }
 0x429   : > { %v11170_v2 = vpop.f32.mrf.mxu1 }
 0x42a   : > { %v14248_v55 = vadd.f32 %v6361_v29, %v5917_v33  ;;  %v5920_v17 = vadd.f32 %v11170_v2, %v13859_v28  ;;  %v11317_v35 = vpop.f32.mrf.mxu0  ;;  %11412 = vmatmul.mubr.bf16.gmra.mxu0 %v6221_v54  ;;  %v6152_v28 = vld [vmem:[#allocation2 + $0x4c0] sm:$0xff] }
 0x42b   : > { %v5433_v25 = vpop.f32.mrf.mxu1  ;;  %11415 = vmatprep.mubr.bf16.mxu0 %v6222_v31  ;;  %v6223_v54 = vpack.c.bf16 %v6153_v14, %v6152_v28  ;;  %v6157_v28 = vld [vmem:[#allocation2 + $0x4f0] sm:$0xff]  ;;  %v5227_v14 = vld [vmem:[#allocation2 + $0x4da] sm:$0xff] }
 0x42c   : > { %v14251_v18 = vadd.f32 %v11314_v36, %v5920_v17  ;;  %v5918_v60 = vadd.f32 %v5433_v25, %v13862_v23  ;;  %v6377_v29 = vpop.f32.mrf.mxu0  ;;  %v6155_v23 = vld [vmem:[#allocation2 + $0x4e0] sm:$0xff] }
 0x42d   : > { %v11173_v26 = vpop.f32.mrf.mxu1  ;;  %11268 = vmatmul.mubr.bf16.gmra.mxu1 %v5290_v41  ;;  %v5292_v41 = vpack.c.bf16 %v5222_v56, %v5221_v1  ;;  %v6224_v31 = vpack.c.bf16 %v6155_v23, %v6154_v19  ;;  %v6158_v19 = vld [vmem:[#allocation2 + $0x500] sm:$0xff] }
 0x42e   : > { %v14254_v21 = vadd.f32 %v6364_v43, %v5918_v60  ;;  %v5923_v44 = vadd.f32 %v11173_v26, %v13865_v13  ;;  %11271 = vmatprep.mubr.bf16.mxu1 %v5291_v16  ;;  %v11318_v36 = vpop.f32.mrf.mxu0  ;;  %v5293_v16 = vpack.c.bf16 %v5224_v52, %v5223_v47  ;;  %v5228_v52 = vld [vmem:[#allocation2 + $0x4e2] sm:$0xff] }
 0x42f   : > { %v5446_v37 = vpop.f32.mrf.mxu1 }
 0x430   : > { %v14257_v45 = vadd.f32 %v11317_v35, %v5923_v44  ;;  %v5921_v33 = vadd.f32 %v5446_v37, %v13868_v38  ;;  %v6380_v43 = vpop.f32.mrf.mxu0  ;;  %v5225_v38 = vld [vmem:[#allocation2 + $0x4c2] sm:$0xff]  ;;  %v5226_v37 = vld [vmem:[#allocation2 + $0x4ca] sm:$0xff] }
 0x431   : > { %v11174_v2 = vpop.f32.mrf.mxu1 }
 0x432   : > { %v14260_v17 = vadd.f32 %v6377_v29, %v5921_v33  ;;  %v5924_v13 = vadd.f32 %v11174_v2, %v13871_v5  ;;  %v11321_v44 = vpop.f32.mrf.mxu0  ;;  %11416 = vmatmul.mubr.bf16.gmra.mxu0 %v6223_v54  ;;  %v6156_v5 = vld [vmem:[#allocation2 + $0x4e8] sm:$0xff] }
 0x433   : > { %v5449_v25 = vpop.f32.mrf.mxu1  ;;  %11419 = vmatprep.mubr.bf16.mxu0 %v6224_v31  ;;  %v6225_v54 = vpack.c.bf16 %v6157_v28, %v6156_v5  ;;  %v6161_v5 = vld [vmem:[#allocation2 + $0x518] sm:$0xff] }
 0x434   : > { %v14263_v60 = vadd.f32 %v11318_v36, %v5924_v13  ;;  %v5922_v26 = vadd.f32 %v5449_v25, %v13874_v49  ;;  %v6393_v29 = vpop.f32.mrf.mxu0  ;;  %v6159_v49 = vld [vmem:[#allocation2 + $0x508] sm:$0xff] }
 0x435   : > { %v11177_v35 = vpop.f32.mrf.mxu1  ;;  %11272 = vmatmul.mubr.bf16.gmra.mxu1 %v5292_v41  ;;  %v5294_v41 = vpack.c.bf16 %v5226_v37, %v5225_v38  ;;  %v6226_v31 = vpack.c.bf16 %v6159_v49, %v6158_v19  ;;  %v6160_v37 = vld [vmem:[#allocation2 + $0x510] sm:$0xff] }
 0x436   : > { %v14266_v1 = vadd.f32 %v6380_v43, %v5922_v26  ;;  %v5927_v56 = vadd.f32 %v11177_v35, %v13877_v42  ;;  %11275 = vmatprep.mubr.bf16.mxu1 %v5293_v16  ;;  %v11322_v36 = vpop.f32.mrf.mxu0  ;;  %v5295_v16 = vpack.c.bf16 %v5228_v52, %v5227_v14  ;;  %v5232_v52 = vld [vmem:[#allocation2 + $0x50a] sm:$0xff] }
 0x437   : > { %v5462_v47 = vpop.f32.mrf.mxu1 }
 0x438   : > { %v14269_v23 = vadd.f32 %v11321_v44, %v5927_v56  ;;  %v5925_v33 = vadd.f32 %v5462_v47, %v13880_v12  ;;  %v6396_v43 = vpop.f32.mrf.mxu0  ;;  %v5229_v12 = vld [vmem:[#allocation2 + $0x4ea] sm:$0xff] }
 0x439   : > { %v11178_v2 = vpop.f32.mrf.mxu1 }
 0x43a   : > { %v14272_v13 = vadd.f32 %v6393_v29, %v5925_v33  ;;  %v5928_v42 = vadd.f32 %v11178_v2, %v13883_v7  ;;  %v11325_v56 = vpop.f32.mrf.mxu0  ;;  %11420 = vmatmul.mubr.bf16.gmra.mxu0 %v6225_v54  ;;  %v5230_v7 = vld [vmem:[#allocation2 + $0x4f2] sm:$0xff]  ;;  %v5231_v29 = vld [vmem:[#allocation2 + $0x502] sm:$0xff] }
 0x43b   : > { %v5465_v25 = vpop.f32.mrf.mxu1  ;;  %11423 = vmatprep.mubr.bf16.mxu0 %v6226_v31  ;;  %v5296_v2 = vpack.c.bf16 %v5230_v7, %v5229_v12  ;;  %v5297_v54 = vpack.c.bf16 %v5232_v52, %v5231_v29  ;;  %v6968_v7 = vld [vmem:[#allocation2 + $0x51] sm:$0xff]  ;;  %v7899_v29 = vld [vmem:[#allocation2 + $0x5a] sm:$0xff] }
 0x43c   : > { %v14275_v26 = vadd.f32 %v11322_v36, %v5928_v42  ;;  %v5926_v35 = vadd.f32 %v5465_v25, %v13886_v51  ;;  %v6409_v14 = vpop.f32.mrf.mxu0  ;;  %v6227_v36 = vpack.c.bf16 %v6161_v5, %v6160_v37  ;;  %v11892_v42 = vld [vmem:[#allocation2] sm:$0xff] }
 0x43d   : > { %v11181_v44 = vpop.f32.mrf.mxu1  ;;  %11276 = vmatmul.mubr.bf16.gmra.mxu1 %v5294_v41 }
 0x43e   : > { %v14278_v47 = vadd.f32 %v6396_v43, %v5926_v35  ;;  %v5931_v38 = vadd.f32 %v11181_v44, %v13889_v32  ;;  %11279 = vmatprep.mubr.bf16.mxu1 %v5295_v16  ;;  %v11326_v33 = vpop.f32.mrf.mxu0  ;;  %v6228_v16 = vpack.c.bf16 %v11892_v42, %v11892_v42 }
 0x43f   : > { %v5478_v28 = vpop.f32.mrf.mxu1 }
 0x440   : > { %v14281_v19 = vadd.f32 %v11325_v56, %v5931_v38  ;;  %v5929_v51 = vadd.f32 %v5478_v28, %v13892_v22  ;;  %v6412_v25 = vpop.f32.mrf.mxu0  ;;  %v5234_v38 = vld [vmem:[#allocation2 + $0x51a] sm:$0xff] }
 0x441   : > { %v11182_v49 = vpop.f32.mrf.mxu1  ;;  %v6969_v28 = vld [vmem:[#allocation2 + $0x59] sm:$0xff] }
 0x442   : > { %v14284_v41 = vadd.f32 %v6409_v14, %v5929_v51  ;;  %v5932_v32 = vadd.f32 %v11182_v49, %v13895_v30  ;;  %v11329_v22 = vpop.f32.mrf.mxu0  ;;  %11424 = vmatmul.mubr.bf16.gmra.mxu0 %v6227_v36  ;;  %v5233_v30 = vld [vmem:[#allocation2 + $0x512] sm:$0xff]  ;;  %v7096_v36 = vpack.c.bf16 %v6969_v28, %v6968_v7  ;;  %v6973_v28 = vld [vmem:[#allocation2 + $0x81] sm:$0xff] }
 0x443   : > { %v5481_v31 = vpop.f32.mrf.mxu1  ;;  %11427 = vmatprep.mubr.bf16.mxu0 %v6228_v16  ;;  %v7898_v14 = vld [vmem:[#allocation2 + $0x52] sm:$0xff] }
 0x444   : > { %v14287_v43 = vadd.f32 %v11326_v33, %v5932_v32  ;;  %v5930_v35 = vadd.f32 %v5481_v31, %v13898_v50  ;;  %v6425_v5 = vpop.f32.mrf.mxu0  ;;  %v5298_v33 = vpack.c.bf16 %v5234_v38, %v5233_v30  ;;  %v8026_v32 = vpack.c.bf16 %v7899_v29, %v7898_v14  ;;  %v7901_v38 = vld [vmem:[#allocation2 + $0x6a] sm:$0xff]  ;;  %v6972_v7 = vld [vmem:[#allocation2 + $0x79] sm:$0xff] }
 0x445   : > { %v11185_v44 = vpop.f32.mrf.mxu1  ;;  %11280 = vmatmul.mubr.bf16.gmra.mxu1 %v5296_v2  ;;  %v7902_v14 = vld [vmem:[#allocation2 + $0x7a] sm:$0xff] }
 0x446   : > { %v14290_v56 = vadd.f32 %v6412_v25, %v5930_v35  ;;  %v5935_v12 = vadd.f32 %v11185_v44, %v13904_v46  ;;  %11283 = vmatprep.mubr.bf16.mxu1 %v5297_v54  ;;  %v11330_v49 = vpop.f32.mrf.mxu0 }
 0x447   : > { %v5494_v37 = vpop.f32.mrf.mxu1 }
 0x448   : > { %v14293_v52 = vadd.f32 %v11329_v22, %v5935_v12  ;;  %v5933_v50 = vadd.f32 %v5494_v37, %v13907_v58  ;;  %v6428_v42 = vpop.f32.mrf.mxu0  ;;  %v6970_v58 = vld [vmem:[#allocation2 + $0x61] sm:$0xff]  ;;  %v6971_v22 = vld [vmem:[#allocation2 + $0x69] sm:$0xff] }
 0x449   : > { %v11186_v51 = vpop.f32.mrf.mxu1 }
 0x44a   : > { %v14296_v2 = vadd.f32 %v6425_v5, %v5933_v50  ;;  %v5936_v46 = vadd.f32 %v11186_v51, %v13910_v6  ;;  %v11333_v44 = vpop.f32.mrf.mxu0  ;;  %11428 = vmatmul.mubr.bf16.gmra.mxu0 %v6228_v16  ;;  %v7900_v6 = vld [vmem:[#allocation2 + $0x62] sm:$0xff] }
 0x44b   : > { %v5497_v54 = vpop.f32.mrf.mxu1  ;;  %11591 = vmatprep.mubr.bf16.mxu0 %v8026_v32  ;;  %v7098_v32 = vpack.c.bf16 %v6973_v28, %v6972_v7  ;;  %v7905_v7 = vld [vmem:[#allocation2 + $0x92] sm:$0xff] }
 0x44c   : > { %v14299_v31 = vadd.f32 %v11330_v49, %v5936_v46  ;;  %v5934_v25 = vadd.f32 %v5497_v54, %v13916_v63  ;;  %v6441_v5 = vpop.f32.mrf.mxu0  ;;  %v7903_v63 = vld [vmem:[#allocation2 + $0x82] sm:$0xff]  ;;  %v7097_v49 = vpack.c.bf16 %v6971_v22, %v6970_v58  ;;  %v15736_v22 = vld [vmem:[#allocation105_spill] sm:$0xff] }
 0x44d   : > { %v11189_v35 = vpop.f32.mrf.mxu1  ;;  %11284 = vmatmul.mubr.bf16.gmra.mxu1 %v5298_v33  ;;  %v8027_v33 = vpack.c.bf16 %v7901_v38, %v7900_v6  ;;  %v8028_v54 = vpack.c.bf16 %v7903_v63, %v7902_v14  ;;  %v7904_v38 = vld [vmem:[#allocation2 + $0x8a] sm:$0xff] }
 0x44e   : > { %15728 = vst [vmem:[#allocation81_spill] sm:$0xff] %v14299_v31  ;;  %v14302_v12 = vadd.f32 %v6428_v42, %v5934_v25  ;;  %v5939_v30 = vadd.f32 %v11189_v35, %v13919_v61  ;;  %11447 = vmatprep.mubr.bf16.mxu1 %v7096_v36  ;;  %v11334_v51 = vpop.f32.mrf.mxu0  ;;  %v15732_v61 = vld [vmem:[#allocation101_spill] sm:$0xff]  ;;  %v6977_v63 = vld [vmem:[#allocation2 + $0xa9] sm:$0xff] }
 0x44f   : > { %v5510_v37 = vpop.f32.mrf.mxu1 }
 0x450   : > { %15729 = vst [vmem:[#allocation83_spill] sm:$0xff] %v14302_v12  ;;  %v14305_v29 = vadd.f32 %v11333_v44, %v5939_v30  ;;  %v5937_v16 = vadd.f32 %v5510_v37, %v13922_v15  ;;  %v6444_v25 = vpop.f32.mrf.mxu0  ;;  %v15734_v12 = vld [vmem:[#allocation103_spill] sm:$0xff]  ;;  %v6975_v37 = vld [vmem:[#allocation2 + $0x91] sm:$0xff] }
 0x451   : > { %v11190_v50 = vpop.f32.mrf.mxu1  ;;  %v6974_v15 = vld [vmem:[#allocation2 + $0x89] sm:$0xff] }
 0x452   : > { %15730 = vst [vmem:[#allocation85_spill] sm:$0xff] %v14305_v29  ;;  %v14308_v46 = vadd.f32 %v6441_v5, %v5937_v16  ;;  %v5940_v36 = vadd.f32 %v11190_v50, %v15732_v61  ;;  %v11337_v30 = vpop.f32.mrf.mxu0  ;;  %11592 = vmatmul.mubr.bf16.vlgmr.msra.gmra.mxu0 %v8027_v33  ;;  %v6976_v5 = vld [vmem:[#allocation2 + $0xa1] sm:$0xff] }
 0x453   : > { %v5513_v42 = vpop.f32.mrf.mxu1  ;;  %11595 = vmatprep.mubr.bf16.mxu0 %v8028_v54  ;;  %v7906_v16 = vld [vmem:[#allocation2 + $0xa2] sm:$0xff] }
 0x454   : > { %15731 = vst [vmem:[#allocation87_spill] sm:$0xff] %v14308_v46  ;;  %v14311_v35 = vadd.f32 %v11334_v51, %v5940_v36  ;;  %v5938_v31 = vadd.f32 %v5513_v42, %v15734_v12  ;;  %v6457_v14 = vpop.f32.mrf.mxu0  ;;  %v7907_v12 = vld [vmem:[#allocation2 + $0xaa] sm:$0xff]  ;;  %v8029_v36 = vpack.c.bf16 %v7905_v7, %v7904_v38  ;;  %v15741_v46 = vld [vmem:[#allocation109_spill] sm:$0xff] }
 0x455   : > { %v11193_v44 = vpop.f32.mrf.mxu1  ;;  %11448 = vmatmul.mubr.bf16.vlgmr.msra.gmra.mxu1 %v7097_v49  ;;  %v15737_v51 = vld [vmem:[#allocation107_spill] sm:$0xff]  ;;  %v7908_v7 = vld [vmem:[#allocation2 + $0xb2] sm:$0xff] }
 0x456   : > { %15733 = vst [vmem:[#allocation89_spill] sm:$0xff] %v14311_v35  ;;  %v14314_v58 = vadd.f32 %v6444_v25, %v5938_v31  ;;  %v5943_v6 = vadd.f32 %v11193_v44, %v15736_v22  ;;  %11451 = vmatprep.mubr.bf16.mxu1 %v7098_v32  ;;  %v11338_v61 = vpop.f32.mrf.mxu0  ;;  %v7099_v31 = vpack.c.bf16 %v6975_v37, %v6974_v15  ;;  %v15739_v32 = vld [vmem:[#allocation108_spill] sm:$0xff]  ;;  %v15743_v37 = vld [vmem:[#allocation50_spill] sm:$0xff] }
 0x457   : > { %v5526_v28 = vpop.f32.mrf.mxu1  ;;  %v7100_v25 = vpack.c.bf16 %v6977_v63, %v6976_v5  ;;  %v8030_v44 = vpack.c.bf16 %v7907_v12, %v7906_v16  ;;  %v7909_v5 = vld [vmem:[#allocation2 + $0xba] sm:$0xff]  ;;  %v6981_v12 = vld [vmem:[#allocation2 + $0xd1] sm:$0xff] }
 0x458   : > { %15735 = vst [vmem:[#allocation91_spill] sm:$0xff] %v14314_v58  ;;  %v14317_v50 = vadd.f32 %v11337_v30, %v5943_v6  ;;  %v5941_v49 = vadd.f32 %v5526_v28, %v15737_v51  ;;  %v6460_v58 = vpop.f32.mrf.mxu0  ;;  %v6978_v28 = vld [vmem:[#allocation2 + $0xb1] sm:$0xff]  ;;  %v6979_v51 = vld [vmem:[#allocation2 + $0xb9] sm:$0xff] }
 0x459   : > { %v11194_v33 = vpop.f32.mrf.mxu1 }
 0x45a   : > { %v14320_v42 = vadd.f32 %v6457_v14, %v5941_v49  ;;  %v5944_v54 = vadd.f32 %v11194_v33, %v15739_v32  ;;  %v11341_v6 = vpop.f32.mrf.mxu0  ;;  %11596 = vmatmul.mubr.bf16.gmra.mxu0 %v8029_v36  ;;  %v6980_v14 = vld [vmem:[#allocation2 + $0xc9] sm:$0xff] }
 0x45b   : > { %v5529_v22 = vpop.f32.mrf.mxu1  ;;  %11599 = vmatprep.mubr.bf16.mxu0 %v8030_v44  ;;  %v7910_v49 = vld [vmem:[#allocation2 + $0xca] sm:$0xff]  ;;  %v7102_v44 = vpack.c.bf16 %v6981_v12, %v6980_v14  ;;  %v7913_v14 = vld [vmem:[#allocation2 + $0xe2] sm:$0xff] }
 0x45c   : > { %15738 = vst [vmem:[#allocation93_spill] sm:$0xff] %v14320_v42  ;;  %v14323_v35 = vadd.f32 %v11338_v61, %v5944_v54  ;;  %v5942_v29 = vadd.f32 %v5529_v22, %v15741_v46  ;;  %v6473_v16 = vpop.f32.mrf.mxu0  ;;  %v7911_v46 = vld [vmem:[#allocation2 + $0xd2] sm:$0xff]  ;;  %v15746_v54 = vld [vmem:[#allocation51_spill] sm:$0xff] }
 0x45d   : > { %v11197_v30 = vpop.f32.mrf.mxu1  ;;  %11452 = vmatmul.mubr.bf16.gmra.mxu1 %v7099_v31  ;;  %v8032_v22 = vpack.c.bf16 %v7911_v46, %v7910_v49  ;;  %v6985_v46 = vld [vmem:[#allocation2 + $0xf9] sm:$0xff] }
 0x45e   : > { %15740 = vst [vmem:[#allocation95_spill] sm:$0xff] %v14323_v35  ;;  %v14326_v15 = vadd.f32 %v6460_v58, %v5942_v29  ;;  %v5947_v38 = vadd.f32 %v11197_v30, %v15743_v37  ;;  %11455 = vmatprep.mubr.bf16.mxu1 %v7100_v25  ;;  %v11342_v36 = vpop.f32.mrf.mxu0  ;;  %v7101_v29 = vpack.c.bf16 %v6979_v51, %v6978_v28  ;;  %v15748_v35 = vld [vmem:[#allocation110_spill] sm:$0xff]  ;;  %v15750_v51 = vld [vmem:[#allocation111_spill] sm:$0xff] }
 0x45f   : > { %v5542_v63 = vpop.f32.mrf.mxu1  ;;  %v8031_v58 = vpack.c.bf16 %v7909_v5, %v7908_v7  ;;  %v7912_v5 = vld [vmem:[#allocation2 + $0xda] sm:$0xff] }
 0x460   : > { %15742 = vst [vmem:[#allocation97_spill] sm:$0xff] %v14326_v15  ;;  %v14329_v33 = vadd.f32 %v11341_v6, %v5947_v38  ;;  %v5945_v61 = vadd.f32 %v5542_v63, %v13948_v8  ;;  %v6476_v37 = vpop.f32.mrf.mxu0  ;;  %v6982_v8 = vld [vmem:[#allocation2 + $0xd9] sm:$0xff]  ;;  %v6983_v63 = vld [vmem:[#allocation2 + $0xe1] sm:$0xff] }
 0x461   : > { %v11198_v31 = vpop.f32.mrf.mxu1 }
 0x462   : > { %15744 = vst [vmem:[#allocation99_spill] sm:$0xff] %v14329_v33  ;;  %v14332_v32 = vadd.f32 %v6473_v16, %v5945_v61  ;;  %v5948_v25 = vadd.f32 %v11198_v31, %v15746_v54  ;;  %v11345_v38 = vpop.f32.mrf.mxu0  ;;  %11600 = vmatmul.mubr.bf16.gmra.mxu0 %v8031_v58  ;;  %v6984_v16 = vld [vmem:[#allocation2 + $0xf1] sm:$0xff] }
 0x463   : > { %v5545_v30 = vpop.f32.mrf.mxu1  ;;  %11603 = vmatprep.mubr.bf16.mxu0 %v8032_v22  ;;  %v7914_v61 = vld [vmem:[#allocation2 + $0xf2] sm:$0xff] }
 0x464   : > { %15745 = vst [vmem:[#allocation101_spill] sm:$0xff] %v14332_v32  ;;  %v14335_v15 = vadd.f32 %v11342_v36, %v5948_v25  ;;  %v5946_v42 = vadd.f32 %v5545_v30, %v15748_v35  ;;  %v6489_v49 = vpop.f32.mrf.mxu0  ;;  %v7915_v35 = vld [vmem:[#allocation2 + $0xfa] sm:$0xff]  ;;  %v15752_v36 = vld [vmem:[#allocation112_spill] sm:$0xff]  ;;  %v8033_v25 = vpack.c.bf16 %v7913_v14, %v7912_v5  ;;  %v7916_v14 = vld [vmem:[#allocation2 + $0x102] sm:$0xff] }
 0x465   : > { %v11201_v6 = vpop.f32.mrf.mxu1  ;;  %11456 = vmatmul.mubr.bf16.gmra.mxu1 %v7101_v29  ;;  %v15756_v32 = vld [vmem:[#allocation54_spill] sm:$0xff] }
 0x466   : > { %15747 = vst [vmem:[#allocation103_spill] sm:$0xff] %v14335_v15  ;;  %v14338_v28 = vadd.f32 %v6476_v37, %v5946_v42  ;;  %v5951_v7 = vadd.f32 %v11201_v6, %v15750_v51  ;;  %11459 = vmatprep.mubr.bf16.mxu1 %v7102_v44  ;;  %v11346_v54 = vpop.f32.mrf.mxu0  ;;  %v7103_v42 = vpack.c.bf16 %v6983_v63, %v6982_v8  ;;  %v15754_v44 = vld [vmem:[#allocation113_spill] sm:$0xff]  ;;  %v15758_v63 = vld [vmem:[#allocation56_spill] sm:$0xff] }
 0x467   : > { %v5558_v12 = vpop.f32.mrf.mxu1  ;;  %v7104_v37 = vpack.c.bf16 %v6985_v46, %v6984_v16  ;;  %v8034_v6 = vpack.c.bf16 %v7915_v35, %v7914_v61  ;;  %v7917_v16 = vld [vmem:[#allocation2 + $0x10a] sm:$0xff]  ;;  %v6989_v35 = vld [vmem:[#allocation2 + $0x121] sm:$0xff] }
 0x468   : > { %15749 = vst [vmem:[#allocation105_spill] sm:$0xff] %v14338_v28  ;;  %v14341_v31 = vadd.f32 %v11345_v38, %v5951_v7  ;;  %v5949_v29 = vadd.f32 %v5558_v12, %v15752_v36  ;;  %v6492_v28 = vpop.f32.mrf.mxu0  ;;  %v6986_v12 = vld [vmem:[#allocation2 + $0x101] sm:$0xff]  ;;  %v6987_v36 = vld [vmem:[#allocation2 + $0x109] sm:$0xff] }
 0x469   : > { %v11202_v58 = vpop.f32.mrf.mxu1 }
 0x46a   : > { %15751 = vst [vmem:[#allocation107_spill] sm:$0xff] %v14341_v31  ;;  %v14344_v30 = vadd.f32 %v6489_v49, %v5949_v29  ;;  %v5952_v22 = vadd.f32 %v11202_v58, %v15754_v44  ;;  %v11349_v7 = vpop.f32.mrf.mxu0  ;;  %11604 = vmatmul.mubr.bf16.gmra.mxu0 %v8033_v25  ;;  %v6988_v49 = vld [vmem:[#allocation2 + $0x119] sm:$0xff] }
 0x46b   : > { %v5561_v51 = vpop.f32.mrf.mxu1  ;;  %11607 = vmatprep.mubr.bf16.mxu0 %v8034_v6  ;;  %v7918_v29 = vld [vmem:[#allocation2 + $0x11a] sm:$0xff] }
 0x46c   : > { %15753 = vst [vmem:[#allocation108_spill] sm:$0xff] %v14344_v30  ;;  %v14347_v15 = vadd.f32 %v11346_v54, %v5952_v22  ;;  %v5950_v33 = vadd.f32 %v5561_v51, %v15756_v32  ;;  %v6505_v61 = vpop.f32.mrf.mxu0  ;;  %v7919_v32 = vld [vmem:[#allocation2 + $0x122] sm:$0xff]  ;;  %v7106_v51 = vpack.c.bf16 %v6989_v35, %v6988_v49  ;;  %v7921_v49 = vld [vmem:[#allocation2 + $0x132] sm:$0xff] }
 0x46d   : > { %v11205_v38 = vpop.f32.mrf.mxu1  ;;  %11460 = vmatmul.mubr.bf16.gmra.mxu1 %v7103_v42  ;;  %v15760_v54 = vld [vmem:[#allocation58_spill] sm:$0xff] }
 0x46e   : > { %15755 = vst [vmem:[#allocation109_spill] sm:$0xff] %v14347_v15  ;;  %v14350_v8 = vadd.f32 %v6492_v28, %v5950_v33  ;;  %v5955_v5 = vadd.f32 %v11205_v38, %v15758_v63  ;;  %11463 = vmatprep.mubr.bf16.mxu1 %v7104_v37  ;;  %v11350_v44 = vpop.f32.mrf.mxu0  ;;  %v7105_v33 = vpack.c.bf16 %v6987_v36, %v6986_v12  ;;  %v15762_v37 = vld [vmem:[#allocation60_spill] sm:$0xff]  ;;  %v15764_v30 = vld [vmem:[#allocation62_spill] sm:$0xff] }
 0x46f   : > { %v5574_v46 = vpop.f32.mrf.mxu1  ;;  %v8035_v28 = vpack.c.bf16 %v7917_v16, %v7916_v14  ;;  %v8036_v38 = vpack.c.bf16 %v7919_v32, %v7918_v29  ;;  %v15766_v36 = vld [vmem:[#allocation64_spill] sm:$0xff] }
 0x470   : > { %15757 = vst [vmem:[#allocation50_spill] sm:$0xff] %v14350_v8  ;;  %v14353_v58 = vadd.f32 %v11349_v7, %v5955_v5  ;;  %v5953_v42 = vadd.f32 %v5574_v46, %v15760_v54  ;;  %v6508_v8 = vpop.f32.mrf.mxu0  ;;  %v6990_v46 = vld [vmem:[#allocation2 + $0x129] sm:$0xff]  ;;  %v6991_v54 = vld [vmem:[#allocation2 + $0x131] sm:$0xff] }
 0x471   : > { %v11206_v25 = vpop.f32.mrf.mxu1  ;;  %v7920_v16 = vld [vmem:[#allocation2 + $0x12a] sm:$0xff] }
 0x472   : > { %15759 = vst [vmem:[#allocation51_spill] sm:$0xff] %v14353_v58  ;;  %v14356_v22 = vadd.f32 %v6505_v61, %v5953_v42  ;;  %v5956_v6 = vadd.f32 %v11206_v25, %v15762_v37  ;;  %v11353_v5 = vpop.f32.mrf.mxu0  ;;  %11608 = vmatmul.mubr.bf16.gmra.mxu0 %v8035_v28  ;;  %v6992_v61 = vld [vmem:[#allocation2 + $0x141] sm:$0xff]  ;;  %v6993_v32 = vld [vmem:[#allocation2 + $0x149] sm:$0xff] }
 0x473   : > { %v5577_v63 = vpop.f32.mrf.mxu1  ;;  %11611 = vmatprep.mubr.bf16.mxu0 %v8036_v38  ;;  %v7922_v42 = vld [vmem:[#allocation2 + $0x142] sm:$0xff] }
 0x474   : > { %15761 = vst [vmem:[#allocation110_spill] sm:$0xff] %v14356_v22  ;;  %v14359_v15 = vadd.f32 %v11350_v44, %v5956_v6  ;;  %v5954_v31 = vadd.f32 %v5577_v63, %v15764_v30  ;;  %v6521_v29 = vpop.f32.mrf.mxu0  ;;  %v7923_v30 = vld [vmem:[#allocation2 + $0x14a] sm:$0xff]  ;;  %v15768_v44 = vld [vmem:[#allocation66_spill] sm:$0xff]  ;;  %v7108_v63 = vpack.c.bf16 %v6993_v32, %v6992_v61 }
 0x475   : > { %v11209_v7 = vpop.f32.mrf.mxu1  ;;  %11464 = vmatmul.mubr.bf16.gmra.mxu1 %v7105_v33  ;;  %v15772_v22 = vld [vmem:[#allocation70_spill] sm:$0xff] }
 0x476   : > { %15763 = vst [vmem:[#allocation111_spill] sm:$0xff] %v14359_v15  ;;  %v14362_v12 = vadd.f32 %v6508_v8, %v5954_v31  ;;  %v5959_v14 = vadd.f32 %v11209_v7, %v15766_v36  ;;  %11467 = vmatprep.mubr.bf16.mxu1 %v7106_v51  ;;  %v11354_v37 = vpop.f32.mrf.mxu0  ;;  %v7107_v31 = vpack.c.bf16 %v6991_v54, %v6990_v46  ;;  %v15770_v51 = vld [vmem:[#allocation68_spill] sm:$0xff]  ;;  %v7925_v61 = vld [vmem:[#allocation2 + $0x15a] sm:$0xff] }
 0x477   : > { %v5590_v35 = vpop.f32.mrf.mxu1  ;;  %v8037_v8 = vpack.c.bf16 %v7921_v49, %v7920_v16  ;;  %v8038_v7 = vpack.c.bf16 %v7923_v30, %v7922_v42  ;;  %v15774_v54 = vld [vmem:[#allocation72_spill] sm:$0xff] }
 0x478   : > { %15765 = vst [vmem:[#allocation112_spill] sm:$0xff] %v14362_v12  ;;  %v14365_v25 = vadd.f32 %v11353_v5, %v5959_v14  ;;  %v5957_v33 = vadd.f32 %v5590_v35, %v15768_v44  ;;  %v6524_v12 = vpop.f32.mrf.mxu0  ;;  %v6994_v35 = vld [vmem:[#allocation2 + $0x151] sm:$0xff]  ;;  %v6995_v44 = vld [vmem:[#allocation2 + $0x159] sm:$0xff] }
 0x479   : > { %v11210_v28 = vpop.f32.mrf.mxu1  ;;  %v7924_v49 = vld [vmem:[#allocation2 + $0x152] sm:$0xff] }
 0x47a   : > { %15767 = vst [vmem:[#allocation113_spill] sm:$0xff] %v14365_v25  ;;  %v14368_v6 = vadd.f32 %v6521_v29, %v5957_v33  ;;  %v5960_v38 = vadd.f32 %v11210_v28, %v15770_v51  ;;  %v11357_v14 = vpop.f32.mrf.mxu0  ;;  %11612 = vmatmul.mubr.bf16.gmra.mxu0 %v8037_v8  ;;  %v6996_v29 = vld [vmem:[#allocation2 + $0x169] sm:$0xff]  ;;  %v6997_v30 = vld [vmem:[#allocation2 + $0x171] sm:$0xff] }
 0x47b   : > { %v5593_v36 = vpop.f32.mrf.mxu1  ;;  %11615 = vmatprep.mubr.bf16.mxu0 %v8038_v7  ;;  %v7926_v33 = vld [vmem:[#allocation2 + $0x16a] sm:$0xff] }
 0x47c   : > { %15769 = vst [vmem:[#allocation54_spill] sm:$0xff] %v14368_v6  ;;  %v14371_v15 = vadd.f32 %v11354_v37, %v5960_v38  ;;  %v5958_v58 = vadd.f32 %v5593_v36, %v15772_v22  ;;  %v6537_v42 = vpop.f32.mrf.mxu0  ;;  %v7927_v22 = vld [vmem:[#allocation2 + $0x172] sm:$0xff]  ;;  %v15776_v37 = vld [vmem:[#allocation74_spill] sm:$0xff]  ;;  %v7110_v36 = vpack.c.bf16 %v6997_v30, %v6996_v29 }
 0x47d   : > { %v11213_v5 = vpop.f32.mrf.mxu1  ;;  %11468 = vmatmul.mubr.bf16.gmra.mxu1 %v7107_v31  ;;  %v15780_v6 = vld [vmem:[#allocation78_spill] sm:$0xff] }
 0x47e   : > { %15771 = vst [vmem:[#allocation56_spill] sm:$0xff] %v14371_v15  ;;  %v14374_v46 = vadd.f32 %v6524_v12, %v5958_v58  ;;  %v5963_v16 = vadd.f32 %v11213_v5, %v15774_v54  ;;  %11471 = vmatprep.mubr.bf16.mxu1 %v7108_v63  ;;  %v11358_v51 = vpop.f32.mrf.mxu0  ;;  %v7109_v58 = vpack.c.bf16 %v6995_v44, %v6994_v35  ;;  %v15778_v63 = vld [vmem:[#allocation76_spill] sm:$0xff]  ;;  %v7929_v29 = vld [vmem:[#allocation2 + $0x182] sm:$0xff] }
 0x47f   : > { %v5606_v32 = vpop.f32.mrf.mxu1  ;;  %v8039_v12 = vpack.c.bf16 %v7925_v61, %v7924_v49  ;;  %v8040_v5 = vpack.c.bf16 %v7927_v22, %v7926_v33  ;;  %v15782_v44 = vld [vmem:[#allocation80_spill] sm:$0xff]  ;;  %v7928_v61 = vld [vmem:[#allocation2 + $0x17a] sm:$0xff] }
 0x480   : > { %15773 = vst [vmem:[#allocation58_spill] sm:$0xff] %v14374_v46  ;;  %v14377_v28 = vadd.f32 %v11357_v14, %v5963_v16  ;;  %v5961_v31 = vadd.f32 %v5606_v32, %v15776_v37  ;;  %v6540_v46 = vpop.f32.mrf.mxu0  ;;  %v6998_v32 = vld [vmem:[#allocation2 + $0x179] sm:$0xff]  ;;  %v6999_v37 = vld [vmem:[#allocation2 + $0x181] sm:$0xff] }
 0x481   : > { %v11214_v8 = vpop.f32.mrf.mxu1  ;;  %v7001_v22 = vld [vmem:[#allocation2 + $0x199] sm:$0xff] }
 0x482   : > { %15775 = vst [vmem:[#allocation60_spill] sm:$0xff] %v14377_v28  ;;  %v14380_v38 = vadd.f32 %v6537_v42, %v5961_v31  ;;  %v5964_v7 = vadd.f32 %v11214_v8, %v15778_v63  ;;  %v11361_v16 = vpop.f32.mrf.mxu0  ;;  %11616 = vmatmul.mubr.bf16.gmra.mxu0 %v8039_v12  ;;  %v7000_v42 = vld [vmem:[#allocation2 + $0x191] sm:$0xff] }
 0x483   : > { %v5609_v54 = vpop.f32.mrf.mxu1  ;;  %11619 = vmatprep.mubr.bf16.mxu0 %v8040_v5  ;;  %v7930_v31 = vld [vmem:[#allocation2 + $0x192] sm:$0xff] }
 0x484   : > { %15777 = vst [vmem:[#allocation62_spill] sm:$0xff] %v14380_v38  ;;  %v14383_v15 = vadd.f32 %v11358_v51, %v5964_v7  ;;  %v5962_v25 = vadd.f32 %v5609_v54, %v15780_v6  ;;  %v6553_v33 = vpop.f32.mrf.mxu0  ;;  %v7931_v6 = vld [vmem:[#allocation2 + $0x19a] sm:$0xff]  ;;  %v7112_v54 = vpack.c.bf16 %v7001_v22, %v7000_v42  ;;  %v7933_v42 = vld [vmem:[#allocation2 + $0x1aa] sm:$0xff] }
 0x485   : > { %v11217_v14 = vpop.f32.mrf.mxu1  ;;  %11472 = vmatmul.mubr.bf16.gmra.mxu1 %v7109_v58  ;;  %v15784_v51 = vld [vmem:[#allocation82_spill] sm:$0xff] }
 0x486   : > { %15779 = vst [vmem:[#allocation64_spill] sm:$0xff] %v14383_v15  ;;  %v14386_v35 = vadd.f32 %v6540_v46, %v5962_v25  ;;  %v5967_v49 = vadd.f32 %v11217_v14, %v15782_v44  ;;  %11475 = vmatprep.mubr.bf16.mxu1 %v7110_v36  ;;  %v11362_v63 = vpop.f32.mrf.mxu0  ;;  %v7111_v25 = vpack.c.bf16 %v6999_v37, %v6998_v32  ;;  %v15786_v36 = vld [vmem:[#allocation84_spill] sm:$0xff]  ;;  %v15788_v38 = vld [vmem:[#allocation86_spill] sm:$0xff] }
 0x487   : > { %v5622_v30 = vpop.f32.mrf.mxu1  ;;  %v8041_v46 = vpack.c.bf16 %v7929_v29, %v7928_v61  ;;  %v8042_v14 = vpack.c.bf16 %v7931_v6, %v7930_v31  ;;  %v15790_v37 = vld [vmem:[#allocation88_spill] sm:$0xff]  ;;  %v7932_v29 = vld [vmem:[#allocation2 + $0x1a2] sm:$0xff] }
 0x488   : > { %15781 = vst [vmem:[#allocation66_spill] sm:$0xff] %v14386_v35  ;;  %v14389_v8 = vadd.f32 %v11361_v16, %v5967_v49  ;;  %v5965_v58 = vadd.f32 %v5622_v30, %v15784_v51  ;;  %v6556_v35 = vpop.f32.mrf.mxu0  ;;  %v7002_v30 = vld [vmem:[#allocation2 + $0x1a1] sm:$0xff]  ;;  %v7003_v51 = vld [vmem:[#allocation2 + $0x1a9] sm:$0xff] }
 0x489   : > { %v11218_v12 = vpop.f32.mrf.mxu1  ;;  %v7005_v6 = vld [vmem:[#allocation2 + $0x1c1] sm:$0xff] }
 0x48a   : > { %15783 = vst [vmem:[#allocation68_spill] sm:$0xff] %v14389_v8  ;;  %v14392_v7 = vadd.f32 %v6553_v33, %v5965_v58  ;;  %v5968_v5 = vadd.f32 %v11218_v12, %v15786_v36  ;;  %v11365_v49 = vpop.f32.mrf.mxu0  ;;  %11620 = vmatmul.mubr.bf16.gmra.mxu0 %v8041_v46  ;;  %v7004_v33 = vld [vmem:[#allocation2 + $0x1b9] sm:$0xff] }
 0x48b   : > { %v5625_v44 = vpop.f32.mrf.mxu1  ;;  %11623 = vmatprep.mubr.bf16.mxu0 %v8042_v14  ;;  %v7934_v58 = vld [vmem:[#allocation2 + $0x1ba] sm:$0xff] }
 0x48c   : > { %15785 = vst [vmem:[#allocation70_spill] sm:$0xff] %v14392_v7  ;;  %v14395_v15 = vadd.f32 %v11362_v63, %v5968_v5  ;;  %v5966_v28 = vadd.f32 %v5625_v44, %v15788_v38  ;;  %v6569_v31 = vpop.f32.mrf.mxu0  ;;  %v7935_v38 = vld [vmem:[#allocation2 + $0x1c2] sm:$0xff]  ;;  %v7114_v44 = vpack.c.bf16 %v7005_v6, %v7004_v33  ;;  %v7937_v33 = vld [vmem:[#allocation2 + $0x1d2] sm:$0xff] }
 0x48d   : > { %v11221_v16 = vpop.f32.mrf.mxu1  ;;  %11476 = vmatmul.mubr.bf16.gmra.mxu1 %v7111_v25  ;;  %v15792_v63 = vld [vmem:[#allocation90_spill] sm:$0xff] }
 0x48e   : > { %15787 = vst [vmem:[#allocation72_spill] sm:$0xff] %v14395_v15  ;;  %v14398_v32 = vadd.f32 %v6556_v35, %v5966_v28  ;;  %v5971_v61 = vadd.f32 %v11221_v16, %v15790_v37  ;;  %11479 = vmatprep.mubr.bf16.mxu1 %v7112_v54  ;;  %v11366_v36 = vpop.f32.mrf.mxu0  ;;  %v7113_v28 = vpack.c.bf16 %v7003_v51, %v7002_v30  ;;  %v15794_v54 = vld [vmem:[#allocation92_spill] sm:$0xff]  ;;  %v15796_v7 = vld [vmem:[#allocation94_spill] sm:$0xff] }
 0x48f   : > { %v5638_v22 = vpop.f32.mrf.mxu1  ;;  %v8043_v35 = vpack.c.bf16 %v7933_v42, %v7932_v29  ;;  %v8044_v16 = vpack.c.bf16 %v7935_v38, %v7934_v58  ;;  %v15798_v51 = vld [vmem:[#allocation96_spill] sm:$0xff] }
 0x490   : > { %15789 = vst [vmem:[#allocation74_spill] sm:$0xff] %v14398_v32  ;;  %v14401_v12 = vadd.f32 %v11365_v49, %v5971_v61  ;;  %v5969_v25 = vadd.f32 %v5638_v22, %v15792_v63  ;;  %v6572_v32 = vpop.f32.mrf.mxu0  ;;  %v7006_v22 = vld [vmem:[#allocation2 + $0x1c9] sm:$0xff]  ;;  %v7007_v63 = vld [vmem:[#allocation2 + $0x1d1] sm:$0xff] }
 0x491   : > { %v11222_v46 = vpop.f32.mrf.mxu1  ;;  %v7936_v42 = vld [vmem:[#allocation2 + $0x1ca] sm:$0xff] }
 0x492   : > { %15791 = vst [vmem:[#allocation76_spill] sm:$0xff] %v14401_v12  ;;  %v14404_v5 = vadd.f32 %v6569_v31, %v5969_v25  ;;  %v5972_v14 = vadd.f32 %v11222_v46, %v15794_v54  ;;  %v11369_v61 = vpop.f32.mrf.mxu0  ;;  %11624 = vmatmul.mubr.bf16.gmra.mxu0 %v8043_v35  ;;  %v7008_v31 = vld [vmem:[#allocation2 + $0x1e1] sm:$0xff]  ;;  %v7009_v38 = vld [vmem:[#allocation2 + $0x1e9] sm:$0xff] }
 0x493   : > { %v5641_v37 = vpop.f32.mrf.mxu1  ;;  %11627 = vmatprep.mubr.bf16.mxu0 %v8044_v16  ;;  %v7938_v25 = vld [vmem:[#allocation2 + $0x1e2] sm:$0xff] }
 0x494   : > { %15793 = vst [vmem:[#allocation78_spill] sm:$0xff] %v14404_v5  ;;  %v14407_v15 = vadd.f32 %v11366_v36, %v5972_v14  ;;  %v5970_v8 = vadd.f32 %v5641_v37, %v15796_v7  ;;  %v6585_v58 = vpop.f32.mrf.mxu0  ;;  %v7939_v7 = vld [vmem:[#allocation2 + $0x1ea] sm:$0xff]  ;;  %v15800_v36 = vld [vmem:[#allocation98_spill] sm:$0xff]  ;;  %v7116_v37 = vpack.c.bf16 %v7009_v38, %v7008_v31 }
 0x495   : > { %v11225_v49 = vpop.f32.mrf.mxu1  ;;  %11480 = vmatmul.mubr.bf16.gmra.mxu1 %v7113_v28  ;;  %v15804_v5 = vld [vmem:[#allocation102_spill] sm:$0xff] }
 0x496   : > { %15795 = vst [vmem:[#allocation80_spill] sm:$0xff] %v14407_v15  ;;  %v14410_v30 = vadd.f32 %v6572_v32, %v5970_v8  ;;  %v5975_v29 = vadd.f32 %v11225_v49, %v15798_v51  ;;  %11483 = vmatprep.mubr.bf16.mxu1 %v7114_v44  ;;  %v11370_v54 = vpop.f32.mrf.mxu0  ;;  %v7115_v8 = vpack.c.bf16 %v7007_v63, %v7006_v22  ;;  %v15802_v44 = vld [vmem:[#allocation100_spill] sm:$0xff]  ;;  %v7941_v31 = vld [vmem:[#allocation2 + $0x1fa] sm:$0xff] }
 0x497   : > { %v5654_v6 = vpop.f32.mrf.mxu1  ;;  %v8045_v32 = vpack.c.bf16 %v7937_v33, %v7936_v42  ;;  %v8046_v49 = vpack.c.bf16 %v7939_v7, %v7938_v25  ;;  %v15806_v63 = vld [vmem:[#allocation104_spill] sm:$0xff] }
 0x498   : > { %15797 = vst [vmem:[#allocation82_spill] sm:$0xff] %v14410_v30  ;;  %v14413_v46 = vadd.f32 %v11369_v61, %v5975_v29  ;;  %v5973_v28 = vadd.f32 %v5654_v6, %v15800_v36  ;;  %v6588_v30 = vpop.f32.mrf.mxu0  ;;  %v7010_v6 = vld [vmem:[#allocation2 + $0x1f1] sm:$0xff]  ;;  %v7011_v36 = vld [vmem:[#allocation2 + $0x1f9] sm:$0xff] }
 0x499   : > { %v11226_v35 = vpop.f32.mrf.mxu1  ;;  %v7940_v33 = vld [vmem:[#allocation2 + $0x1f2] sm:$0xff] }
 0x49a   : > { %15799 = vst [vmem:[#allocation84_spill] sm:$0xff] %v14413_v46  ;;  %v14416_v14 = vadd.f32 %v6585_v58, %v5973_v28  ;;  %v5976_v16 = vadd.f32 %v11226_v35, %v15802_v44  ;;  %v11373_v29 = vpop.f32.mrf.mxu0  ;;  %11628 = vmatmul.mubr.bf16.gmra.mxu0 %v8045_v32  ;;  %v7012_v58 = vld [vmem:[#allocation2 + $0x209] sm:$0xff]  ;;  %v7013_v7 = vld [vmem:[#allocation2 + $0x211] sm:$0xff] }
 0x49b   : > { %v5657_v51 = vpop.f32.mrf.mxu1  ;;  %11631 = vmatprep.mubr.bf16.mxu0 %v8046_v49  ;;  %v7942_v28 = vld [vmem:[#allocation2 + $0x20a] sm:$0xff] }
 0x49c   : > { %15801 = vst [vmem:[#allocation86_spill] sm:$0xff] %v14416_v14  ;;  %v14419_v15 = vadd.f32 %v11370_v54, %v5976_v16  ;;  %v5974_v12 = vadd.f32 %v5657_v51, %v15804_v5  ;;  %v6601_v25 = vpop.f32.mrf.mxu0  ;;  %v7943_v5 = vld [vmem:[#allocation2 + $0x212] sm:$0xff]  ;;  %v15808_v54 = vld [vmem:[#allocation106_spill] sm:$0xff]  ;;  %v7118_v51 = vpack.c.bf16 %v7013_v7, %v7012_v58 }
 0x49d   : > { %v11229_v61 = vpop.f32.mrf.mxu1  ;;  %11484 = vmatmul.mubr.bf16.gmra.mxu1 %v7115_v8  ;;  %v15812_v14 = vld [vmem:[#allocation18_spill] sm:$0xff] }
 0x49e   : > { %15803 = vst [vmem:[#allocation88_spill] sm:$0xff] %v14419_v15  ;;  %v14422_v22 = vadd.f32 %v6588_v30, %v5974_v12  ;;  %v5979_v42 = vadd.f32 %v11229_v61, %v15806_v63  ;;  %11487 = vmatprep.mubr.bf16.mxu1 %v7116_v37  ;;  %v11374_v44 = vpop.f32.mrf.mxu0  ;;  %v7117_v12 = vpack.c.bf16 %v7011_v36, %v7010_v6  ;;  %v15810_v37 = vld [vmem:[#allocation17_spill] sm:$0xff]  ;;  %v15814_v36 = vld [vmem:[#allocation19_spill] sm:$0xff] }
 0x49f   : > { %v5670_v38 = vpop.f32.mrf.mxu1  ;;  %v8047_v30 = vpack.c.bf16 %v7941_v31, %v7940_v33  ;;  %v8048_v61 = vpack.c.bf16 %v7943_v5, %v7942_v28  ;;  %v7944_v31 = vld [vmem:[#allocation2 + $0x21a] sm:$0xff]  ;;  %v7945_v58 = vld [vmem:[#allocation2 + $0x222] sm:$0xff] }
 0x4a0   : > { %15805 = vst [vmem:[#allocation90_spill] sm:$0xff] %v14422_v22  ;;  %v14425_v35 = vadd.f32 %v11373_v29, %v5979_v42  ;;  %v5977_v8 = vadd.f32 %v5670_v38, %v15808_v54  ;;  %v6604_v22 = vpop.f32.mrf.mxu0  ;;  %v7014_v38 = vld [vmem:[#allocation2 + $0x219] sm:$0xff]  ;;  %v7015_v54 = vld [vmem:[#allocation2 + $0x221] sm:$0xff] }
 0x4a1   : > { %v11230_v32 = vpop.f32.mrf.mxu1  ;;  %v7017_v5 = vld [vmem:[#allocation2 + $0x239] sm:$0xff] }
 0x4a2   : > { %15807 = vst [vmem:[#allocation92_spill] sm:$0xff] %v14425_v35  ;;  %v14428_v16 = vadd.f32 %v6601_v25, %v5977_v8  ;;  %v5980_v49 = vadd.f32 %v11230_v32, %v15810_v37  ;;  %v11377_v42 = vpop.f32.mrf.mxu0  ;;  %11632 = vmatmul.mubr.bf16.gmra.mxu0 %v8047_v30  ;;  %v7016_v25 = vld [vmem:[#allocation2 + $0x231] sm:$0xff] }
 0x4a3   : > { %v5673_v63 = vpop.f32.mrf.mxu1  ;;  %11635 = vmatprep.mubr.bf16.mxu0 %v8048_v61  ;;  %v7946_v8 = vld [vmem:[#allocation2 + $0x232] sm:$0xff] }
 0x4a4   : > { %15809 = vst [vmem:[#allocation94_spill] sm:$0xff] %v14428_v16  ;;  %v14431_v15 = vadd.f32 %v11374_v44, %v5980_v49  ;;  %v5978_v46 = vadd.f32 %v5673_v63, %v15812_v14  ;;  %v6617_v28 = vpop.f32.mrf.mxu0  ;;  %v7947_v14 = vld [vmem:[#allocation2 + $0x23a] sm:$0xff]  ;;  %v15816_v44 = vld [vmem:[#allocation20_spill] sm:$0xff]  ;;  %v7120_v63 = vpack.c.bf16 %v7017_v5, %v7016_v25 }
 0x4a5   : > { %v11233_v29 = vpop.f32.mrf.mxu1  ;;  %11488 = vmatmul.mubr.bf16.gmra.mxu1 %v7117_v12  ;;  %v15820_v16 = vld [vmem:[#allocation22_spill] sm:$0xff]  ;;  %v7949_v25 = vld [vmem:[#allocation2 + $0x24a] sm:$0xff] }
 0x4a6   : > { %15811 = vst [vmem:[#allocation96_spill] sm:$0xff] %v14431_v15  ;;  %v14434_v6 = vadd.f32 %v6604_v22, %v5978_v46  ;;  %v5983_v33 = vadd.f32 %v11233_v29, %v15814_v36  ;;  %11491 = vmatprep.mubr.bf16.mxu1 %v7118_v51  ;;  %v11378_v37 = vpop.f32.mrf.mxu0  ;;  %v7119_v46 = vpack.c.bf16 %v7015_v54, %v7014_v38  ;;  %v15818_v51 = vld [vmem:[#allocation21_spill] sm:$0xff]  ;;  %v15822_v54 = vld [vmem:[#allocation23_spill] sm:$0xff] }
 0x4a7   : > { %v5686_v7 = vpop.f32.mrf.mxu1  ;;  %v8049_v22 = vpack.c.bf16 %v7945_v58, %v7944_v31  ;;  %v8050_v29 = vpack.c.bf16 %v7947_v14, %v7946_v8  ;;  %v7948_v58 = vld [vmem:[#allocation2 + $0x242] sm:$0xff] }
 0x4a8   : > { %15813 = vst [vmem:[#allocation98_spill] sm:$0xff] %v14434_v6  ;;  %v14437_v32 = vadd.f32 %v11377_v42, %v5983_v33  ;;  %v5981_v12 = vadd.f32 %v5686_v7, %v15816_v44  ;;  %v6620_v6 = vpop.f32.mrf.mxu0  ;;  %v7018_v7 = vld [vmem:[#allocation2 + $0x241] sm:$0xff]  ;;  %v7019_v44 = vld [vmem:[#allocation2 + $0x249] sm:$0xff] }
 0x4a9   : > { %v11234_v30 = vpop.f32.mrf.mxu1  ;;  %v7021_v14 = vld [vmem:[#allocation2 + $0x261] sm:$0xff] }
 0x4aa   : > { %15815 = vst [vmem:[#allocation100_spill] sm:$0xff] %v14437_v32  ;;  %v14440_v49 = vadd.f32 %v6617_v28, %v5981_v12  ;;  %v5984_v61 = vadd.f32 %v11234_v30, %v15818_v51  ;;  %v11381_v33 = vpop.f32.mrf.mxu0  ;;  %11636 = vmatmul.mubr.bf16.gmra.mxu0 %v8049_v22  ;;  %v7020_v28 = vld [vmem:[#allocation2 + $0x259] sm:$0xff] }
 0x4ab   : > { %v5689_v36 = vpop.f32.mrf.mxu1  ;;  %11639 = vmatprep.mubr.bf16.mxu0 %v8050_v29  ;;  %v7950_v12 = vld [vmem:[#allocation2 + $0x25a] sm:$0xff] }
 0x4ac   : > { %15817 = vst [vmem:[#allocation102_spill] sm:$0xff] %v14440_v49  ;;  %v14443_v15 = vadd.f32 %v11378_v37, %v5984_v61  ;;  %v5982_v35 = vadd.f32 %v5689_v36, %v15820_v16  ;;  %v6633_v8 = vpop.f32.mrf.mxu0  ;;  %v7951_v16 = vld [vmem:[#allocation2 + $0x262] sm:$0xff]  ;;  %v15824_v37 = vld [vmem:[#allocation24_spill] sm:$0xff]  ;;  %v7122_v36 = vpack.c.bf16 %v7021_v14, %v7020_v28 }
 0x4ad   : > { %v11237_v42 = vpop.f32.mrf.mxu1  ;;  %11492 = vmatmul.mubr.bf16.gmra.mxu1 %v7119_v46  ;;  %v15828_v49 = vld [vmem:[#allocation26_spill] sm:$0xff]  ;;  %v7953_v28 = vld [vmem:[#allocation2 + $0x272] sm:$0xff] }
 0x4ae   : > { %15819 = vst [vmem:[#allocation104_spill] sm:$0xff] %v14443_v15  ;;  %v14446_v38 = vadd.f32 %v6620_v6, %v5982_v35  ;;  %v5987_v31 = vadd.f32 %v11237_v42, %v15822_v54  ;;  %11495 = vmatprep.mubr.bf16.mxu1 %v7120_v63  ;;  %v11382_v51 = vpop.f32.mrf.mxu0  ;;  %v7121_v35 = vpack.c.bf16 %v7019_v44, %v7018_v7  ;;  %v15826_v63 = vld [vmem:[#allocation25_spill] sm:$0xff]  ;;  %v15830_v44 = vld [vmem:[#allocation28_spill] sm:$0xff] }
 0x4af   : > { %v5702_v5 = vpop.f32.mrf.mxu1  ;;  %v8051_v6 = vpack.c.bf16 %v7949_v25, %v7948_v58  ;;  %v8052_v42 = vpack.c.bf16 %v7951_v16, %v7950_v12  ;;  %v7952_v25 = vld [vmem:[#allocation2 + $0x26a] sm:$0xff] }
 0x4b0   : > { %15821 = vst [vmem:[#allocation106_spill] sm:$0xff] %v14446_v38  ;;  %v14449_v30 = vadd.f32 %v11381_v33, %v5987_v31  ;;  %v5985_v46 = vadd.f32 %v5702_v5, %v15824_v37  ;;  %v6636_v38 = vpop.f32.mrf.mxu0  ;;  %v7022_v5 = vld [vmem:[#allocation2 + $0x269] sm:$0xff]  ;;  %v7023_v37 = vld [vmem:[#allocation2 + $0x271] sm:$0xff] }
 0x4b1   : > { %v11238_v22 = vpop.f32.mrf.mxu1  ;;  %v7025_v16 = vld [vmem:[#allocation2 + $0x289] sm:$0xff] }
 0x4b2   : > { %15823 = vst [vmem:[#allocation17_spill] sm:$0xff] %v14449_v30  ;;  %v14452_v61 = vadd.f32 %v6633_v8, %v5985_v46  ;;  %v5988_v29 = vadd.f32 %v11238_v22, %v15826_v63  ;;  %v11385_v31 = vpop.f32.mrf.mxu0  ;;  %11640 = vmatmul.mubr.bf16.gmra.mxu0 %v8051_v6  ;;  %v7024_v8 = vld [vmem:[#allocation2 + $0x281] sm:$0xff] }
 0x4b3   : > { %v5705_v54 = vpop.f32.mrf.mxu1  ;;  %11643 = vmatprep.mubr.bf16.mxu0 %v8052_v42  ;;  %v7954_v46 = vld [vmem:[#allocation2 + $0x282] sm:$0xff] }
 0x4b4   : > { %15825 = vst [vmem:[#allocation18_spill] sm:$0xff] %v14452_v61  ;;  %v14455_v15 = vadd.f32 %v11382_v51, %v5988_v29  ;;  %v5986_v32 = vadd.f32 %v5705_v54, %v15828_v49  ;;  %v6649_v12 = vpop.f32.mrf.mxu0  ;;  %v7955_v49 = vld [vmem:[#allocation2 + $0x28a] sm:$0xff]  ;;  %v7124_v54 = vpack.c.bf16 %v7025_v16, %v7024_v8  ;;  %v7957_v8 = vld [vmem:[#allocation2 + $0x29a] sm:$0xff] }
 0x4b5   : > { %v11241_v33 = vpop.f32.mrf.mxu1  ;;  %11496 = vmatmul.mubr.bf16.gmra.mxu1 %v7121_v35  ;;  %v15832_v51 = vld [vmem:[#allocation27_spill] sm:$0xff] }
 0x4b6   : > { %15827 = vst [vmem:[#allocation19_spill] sm:$0xff] %v14455_v15  ;;  %v14458_v7 = vadd.f32 %v6636_v38, %v5986_v32  ;;  %v5991_v58 = vadd.f32 %v11241_v33, %v15830_v44  ;;  %11499 = vmatprep.mubr.bf16.mxu1 %v7122_v36  ;;  %v11386_v63 = vpop.f32.mrf.mxu0  ;;  %v7123_v32 = vpack.c.bf16 %v7023_v37, %v7022_v5  ;;  %v15834_v36 = vld [vmem:[#allocation29_spill] sm:$0xff]  ;;  %v15836_v61 = vld [vmem:[#allocation31_spill] sm:$0xff]  ;;  %v15838_v37 = vld [vmem:[#allocation30_spill] sm:$0xff] }
 0x4b7   : > { %v5718_v14 = vpop.f32.mrf.mxu1  ;;  %v8053_v38 = vpack.c.bf16 %v7953_v28, %v7952_v25  ;;  %v8054_v33 = vpack.c.bf16 %v7955_v49, %v7954_v46  ;;  %v7956_v28 = vld [vmem:[#allocation2 + $0x292] sm:$0xff] }
 0x4b8   : > { %15829 = vst [vmem:[#allocation20_spill] sm:$0xff] %v14458_v7  ;;  %v14461_v22 = vadd.f32 %v11385_v31, %v5991_v58  ;;  %v5989_v35 = vadd.f32 %v5718_v14, %v15832_v51  ;;  %v6652_v7 = vpop.f32.mrf.mxu0  ;;  %v7026_v14 = vld [vmem:[#allocation2 + $0x291] sm:$0xff]  ;;  %v7027_v51 = vld [vmem:[#allocation2 + $0x299] sm:$0xff] }
 0x4b9   : > { %v11242_v6 = vpop.f32.mrf.mxu1  ;;  %v7029_v49 = vld [vmem:[#allocation2 + $0x2b1] sm:$0xff] }
 0x4ba   : > { %15831 = vst [vmem:[#allocation21_spill] sm:$0xff] %v14461_v22  ;;  %v14464_v29 = vadd.f32 %v6649_v12, %v5989_v35  ;;  %v5992_v42 = vadd.f32 %v11242_v6, %v15834_v36  ;;  %v11389_v58 = vpop.f32.mrf.mxu0  ;;  %11644 = vmatmul.mubr.bf16.gmra.mxu0 %v8053_v38  ;;  %v7028_v12 = vld [vmem:[#allocation2 + $0x2a9] sm:$0xff] }
 0x4bb   : > { %v5721_v44 = vpop.f32.mrf.mxu1  ;;  %11647 = vmatprep.mubr.bf16.mxu0 %v8054_v33  ;;  %v7958_v35 = vld [vmem:[#allocation2 + $0x2aa] sm:$0xff] }
 0x4bc   : > { %15833 = vst [vmem:[#allocation22_spill] sm:$0xff] %v14464_v29  ;;  %v14467_v15 = vadd.f32 %v11386_v63, %v5992_v42  ;;  %v5990_v30 = vadd.f32 %v5721_v44, %v15836_v61  ;;  %v6665_v46 = vpop.f32.mrf.mxu0  ;;  %v7959_v61 = vld [vmem:[#allocation2 + $0x2b2] sm:$0xff]  ;;  %v7126_v44 = vpack.c.bf16 %v7029_v49, %v7028_v12  ;;  %v15844_v29 = vld [vmem:[#allocation34_spill] sm:$0xff] }
 0x4bd   : > { %v11245_v31 = vpop.f32.mrf.mxu1  ;;  %11500 = vmatmul.mubr.bf16.gmra.mxu1 %v7123_v32  ;;  %v15840_v63 = vld [vmem:[#allocation33_spill] sm:$0xff]  ;;  %v7961_v12 = vld [vmem:[#allocation2 + $0x2c2] sm:$0xff] }
 0x4be   : > { %15835 = vst [vmem:[#allocation23_spill] sm:$0xff] %v14467_v15  ;;  %v14470_v5 = vadd.f32 %v6652_v7, %v5990_v30  ;;  %v5995_v25 = vadd.f32 %v11245_v31, %v15838_v37  ;;  %11503 = vmatprep.mubr.bf16.mxu1 %v7124_v54  ;;  %v11390_v36 = vpop.f32.mrf.mxu0  ;;  %v7125_v30 = vpack.c.bf16 %v7027_v51, %v7026_v14  ;;  %v15842_v54 = vld [vmem:[#allocation32_spill] sm:$0xff]  ;;  %v15846_v51 = vld [vmem:[#allocation35_spill] sm:$0xff] }
 0x4bf   : > { %v5734_v16 = vpop.f32.mrf.mxu1  ;;  %v8055_v7 = vpack.c.bf16 %v7957_v8, %v7956_v28  ;;  %v8056_v31 = vpack.c.bf16 %v7959_v61, %v7958_v35  ;;  %v7960_v8 = vld [vmem:[#allocation2 + $0x2ba] sm:$0xff] }
 0x4c0   : > { %15837 = vst [vmem:[#allocation24_spill] sm:$0xff] %v14470_v5  ;;  %v14473_v6 = vadd.f32 %v11389_v58, %v5995_v25  ;;  %v5993_v32 = vadd.f32 %v5734_v16, %v15840_v63  ;;  %v6668_v5 = vpop.f32.mrf.mxu0  ;;  %v7030_v16 = vld [vmem:[#allocation2 + $0x2b9] sm:$0xff]  ;;  %v7031_v63 = vld [vmem:[#allocation2 + $0x2c1] sm:$0xff] }
 0x4c1   : > { %v11246_v38 = vpop.f32.mrf.mxu1  ;;  %v7033_v61 = vld [vmem:[#allocation2 + $0x2d9] sm:$0xff] }
 0x4c2   : > { %15839 = vst [vmem:[#allocation25_spill] sm:$0xff] %v14473_v6  ;;  %v14476_v42 = vadd.f32 %v6665_v46, %v5993_v32  ;;  %v5996_v33 = vadd.f32 %v11246_v38, %v15842_v54  ;;  %v11393_v25 = vpop.f32.mrf.mxu0  ;;  %11648 = vmatmul.mubr.bf16.gmra.mxu0 %v8055_v7  ;;  %v7032_v46 = vld [vmem:[#allocation2 + $0x2d1] sm:$0xff] }
 0x4c3   : > { %v5737_v37 = vpop.f32.mrf.mxu1  ;;  %11651 = vmatprep.mubr.bf16.mxu0 %v8056_v31  ;;  %v7962_v32 = vld [vmem:[#allocation2 + $0x2d2] sm:$0xff] }
 0x4c4   : > { %15841 = vst [vmem:[#allocation26_spill] sm:$0xff] %v14476_v42  ;;  %v14479_v15 = vadd.f32 %v11390_v36, %v5996_v33  ;;  %v5994_v22 = vadd.f32 %v5737_v37, %v15844_v29  ;;  %v6681_v35 = vpop.f32.mrf.mxu0  ;;  %v7963_v29 = vld [vmem:[#allocation2 + $0x2da] sm:$0xff]  ;;  %v15848_v36 = vld [vmem:[#allocation36_spill] sm:$0xff]  ;;  %v7128_v37 = vpack.c.bf16 %v7033_v61, %v7032_v46  ;;  %v15852_v42 = vld [vmem:[#allocation39_spill] sm:$0xff] }
 0x4c5   : > { %v11249_v58 = vpop.f32.mrf.mxu1  ;;  %11504 = vmatmul.mubr.bf16.gmra.mxu1 %v7125_v30  ;;  %v7965_v46 = vld [vmem:[#allocation2 + $0x2ea] sm:$0xff] }
 0x4c6   : > { %15843 = vst [vmem:[#allocation28_spill] sm:$0xff] %v14479_v15  ;;  %v14482_v14 = vadd.f32 %v6668_v5, %v5994_v22  ;;  %v5999_v28 = vadd.f32 %v11249_v58, %v15846_v51  ;;  %11507 = vmatprep.mubr.bf16.mxu1 %v7126_v44  ;;  %v11394_v54 = vpop.f32.mrf.mxu0  ;;  %v7127_v22 = vpack.c.bf16 %v7031_v63, %v7030_v16  ;;  %v15850_v44 = vld [vmem:[#allocation37_spill] sm:$0xff]  ;;  %v15854_v63 = vld [vmem:[#allocation38_spill] sm:$0xff] }
 0x4c7   : > { %v5750_v49 = vpop.f32.mrf.mxu1  ;;  %v8057_v5 = vpack.c.bf16 %v7961_v12, %v7960_v8  ;;  %v8058_v58 = vpack.c.bf16 %v7963_v29, %v7962_v32  ;;  %v7964_v12 = vld [vmem:[#allocation2 + $0x2e2] sm:$0xff] }
 0x4c8   : > { %15845 = vst [vmem:[#allocation27_spill] sm:$0xff] %v14482_v14  ;;  %v14485_v38 = vadd.f32 %v11393_v25, %v5999_v28  ;;  %v5997_v30 = vadd.f32 %v5750_v49, %v15848_v36  ;;  %v6684_v14 = vpop.f32.mrf.mxu0  ;;  %v7034_v49 = vld [vmem:[#allocation2 + $0x2e1] sm:$0xff]  ;;  %v7035_v36 = vld [vmem:[#allocation2 + $0x2e9] sm:$0xff] }
 0x4c9   : > { %v11250_v7 = vpop.f32.mrf.mxu1  ;;  %v7037_v29 = vld [vmem:[#allocation2 + $0x301] sm:$0xff] }
 0x4ca   : > { %15847 = vst [vmem:[#allocation29_spill] sm:$0xff] %v14485_v38  ;;  %v14488_v33 = vadd.f32 %v6681_v35, %v5997_v30  ;;  %v6000_v31 = vadd.f32 %v11250_v7, %v15850_v44  ;;  %v11397_v28 = vpop.f32.mrf.mxu0  ;;  %11652 = vmatmul.mubr.bf16.gmra.mxu0 %v8057_v5  ;;  %v7036_v35 = vld [vmem:[#allocation2 + $0x2f9] sm:$0xff] }
 0x4cb   : > { %v5753_v51 = vpop.f32.mrf.mxu1  ;;  %11655 = vmatprep.mubr.bf16.mxu0 %v8058_v58  ;;  %v7966_v30 = vld [vmem:[#allocation2 + $0x2fa] sm:$0xff] }
 0x4cc   : > { %15849 = vst [vmem:[#allocation31_spill] sm:$0xff] %v14488_v33  ;;  %v14491_v15 = vadd.f32 %v11394_v54, %v6000_v31  ;;  %v5998_v6 = vadd.f32 %v5753_v51, %v15852_v42  ;;  %v6697_v32 = vpop.f32.mrf.mxu0  ;;  %v7967_v42 = vld [vmem:[#allocation2 + $0x302] sm:$0xff]  ;;  %v15856_v54 = vld [vmem:[#allocation41_spill] sm:$0xff]  ;;  %v7130_v51 = vpack.c.bf16 %v7037_v29, %v7036_v35 }
 0x4cd   : > { %v11253_v25 = vpop.f32.mrf.mxu1  ;;  %11508 = vmatmul.mubr.bf16.gmra.mxu1 %v7127_v22  ;;  %v15860_v33 = vld [vmem:[#allocation42_spill] sm:$0xff]  ;;  %v7969_v35 = vld [vmem:[#allocation2 + $0x312] sm:$0xff] }
 0x4ce   : > { %15851 = vst [vmem:[#allocation30_spill] sm:$0xff] %v14491_v15  ;;  %v14494_v16 = vadd.f32 %v6684_v14, %v5998_v6  ;;  %v6003_v8 = vadd.f32 %v11253_v25, %v15854_v63  ;;  %11511 = vmatprep.mubr.bf16.mxu1 %v7128_v37  ;;  %v11398_v44 = vpop.f32.mrf.mxu0  ;;  %v7129_v6 = vpack.c.bf16 %v7035_v36, %v7034_v49  ;;  %v15858_v37 = vld [vmem:[#allocation40_spill] sm:$0xff]  ;;  %v15862_v36 = vld [vmem:[#allocation43_spill] sm:$0xff] }
 0x4cf   : > { %v5766_v61 = vpop.f32.mrf.mxu1  ;;  %v8059_v14 = vpack.c.bf16 %v7965_v46, %v7964_v12  ;;  %v8060_v25 = vpack.c.bf16 %v7967_v42, %v7966_v30  ;;  %v7968_v46 = vld [vmem:[#allocation2 + $0x30a] sm:$0xff] }
 0x4d0   : > { %15853 = vst [vmem:[#allocation33_spill] sm:$0xff] %v14494_v16  ;;  %v14497_v7 = vadd.f32 %v11397_v28, %v6003_v8  ;;  %v6001_v22 = vadd.f32 %v5766_v61, %v15856_v54  ;;  %v6700_v16 = vpop.f32.mrf.mxu0  ;;  %v7038_v61 = vld [vmem:[#allocation2 + $0x309] sm:$0xff]  ;;  %v7039_v54 = vld [vmem:[#allocation2 + $0x311] sm:$0xff] }
 0x4d1   : > { %v11254_v5 = vpop.f32.mrf.mxu1  ;;  %v7041_v42 = vld [vmem:[#allocation2 + $0x329] sm:$0xff] }
 0x4d2   : > { %15855 = vst [vmem:[#allocation32_spill] sm:$0xff] %v14497_v7  ;;  %v14500_v31 = vadd.f32 %v6697_v32, %v6001_v22  ;;  %v6004_v58 = vadd.f32 %v11254_v5, %v15858_v37  ;;  %v11401_v8 = vpop.f32.mrf.mxu0  ;;  %11656 = vmatmul.mubr.bf16.gmra.mxu0 %v8059_v14  ;;  %v7040_v32 = vld [vmem:[#allocation2 + $0x321] sm:$0xff] }
 0x4d3   : > { %v5769_v63 = vpop.f32.mrf.mxu1  ;;  %11659 = vmatprep.mubr.bf16.mxu0 %v8060_v25  ;;  %v7970_v22 = vld [vmem:[#allocation2 + $0x322] sm:$0xff] }
 0x4d4   : > { %15857 = vst [vmem:[#allocation34_spill] sm:$0xff] %v14500_v31  ;;  %v14503_v15 = vadd.f32 %v11398_v44, %v6004_v58  ;;  %v6002_v38 = vadd.f32 %v5769_v63, %v15860_v33  ;;  %v6713_v30 = vpop.f32.mrf.mxu0  ;;  %v7971_v33 = vld [vmem:[#allocation2 + $0x32a] sm:$0xff]  ;;  %v7132_v63 = vpack.c.bf16 %v7041_v42, %v7040_v32  ;;  %v15868_v31 = vld [vmem:[#allocation46_spill] sm:$0xff] }
 0x4d5   : > { %v11257_v28 = vpop.f32.mrf.mxu1  ;;  %11512 = vmatmul.mubr.bf16.gmra.mxu1 %v7129_v6  ;;  %v15864_v44 = vld [vmem:[#allocation44_spill] sm:$0xff]  ;;  %v7973_v32 = vld [vmem:[#allocation2 + $0x33a] sm:$0xff] }
 0x4d6   : > { %15859 = vst [vmem:[#allocation35_spill] sm:$0xff] %v14503_v15  ;;  %v14506_v49 = vadd.f32 %v6700_v16, %v6002_v38  ;;  %v6007_v12 = vadd.f32 %v11257_v28, %v15862_v36  ;;  %11515 = vmatprep.mubr.bf16.mxu1 %v7130_v51  ;;  %v11402_v37 = vpop.f32.mrf.mxu0  ;;  %v7131_v38 = vpack.c.bf16 %v7039_v54, %v7038_v61  ;;  %v15866_v51 = vld [vmem:[#allocation45_spill] sm:$0xff]  ;;  %v15870_v54 = vld [vmem:[#allocation47_spill] sm:$0xff] }
 0x4d7   : > { %v5782_v29 = vpop.f32.mrf.mxu1  ;;  %v8061_v16 = vpack.c.bf16 %v7969_v35, %v7968_v46  ;;  %v8062_v28 = vpack.c.bf16 %v7971_v33, %v7970_v22  ;;  %v7972_v35 = vld [vmem:[#allocation2 + $0x332] sm:$0xff] }
 0x4d8   : > { %15861 = vst [vmem:[#allocation36_spill] sm:$0xff] %v14506_v49  ;;  %v14509_v5 = vadd.f32 %v11401_v8, %v6007_v12  ;;  %v6005_v6 = vadd.f32 %v5782_v29, %v15864_v44  ;;  %v6716_v49 = vpop.f32.mrf.mxu0  ;;  %v7042_v29 = vld [vmem:[#allocation2 + $0x331] sm:$0xff]  ;;  %v7043_v44 = vld [vmem:[#allocation2 + $0x339] sm:$0xff] }
 0x4d9   : > { %v11258_v14 = vpop.f32.mrf.mxu1  ;;  %v7045_v33 = vld [vmem:[#allocation2 + $0x351] sm:$0xff] }
 0x4da   : > { %15863 = vst [vmem:[#allocation37_spill] sm:$0xff] %v14509_v5  ;;  %v14512_v58 = vadd.f32 %v6713_v30, %v6005_v6  ;;  %v6008_v25 = vadd.f32 %v11258_v14, %v15866_v51  ;;  %v11405_v12 = vpop.f32.mrf.mxu0  ;;  %11660 = vmatmul.mubr.bf16.gmra.mxu0 %v8061_v16  ;;  %v7044_v30 = vld [vmem:[#allocation2 + $0x349] sm:$0xff] }
 0x4db   : > { %v5785_v36 = vpop.f32.mrf.mxu1  ;;  %11663 = vmatprep.mubr.bf16.mxu0 %v8062_v28  ;;  %v7974_v6 = vld [vmem:[#allocation2 + $0x34a] sm:$0xff] }
 0x4dc   : > { %15865 = vst [vmem:[#allocation39_spill] sm:$0xff] %v14512_v58  ;;  %v14515_v15 = vadd.f32 %v11402_v37, %v6008_v25  ;;  %v6006_v7 = vadd.f32 %v5785_v36, %v15868_v31  ;;  %v6729_v22 = vpop.f32.mrf.mxu0  ;;  %v7975_v31 = vld [vmem:[#allocation2 + $0x352] sm:$0xff]  ;;  %v7134_v36 = vpack.c.bf16 %v7045_v33, %v7044_v30  ;;  %v15876_v58 = vld [vmem:[#allocation114_spill] sm:$0xff] }
 0x4dd   : > { %v11261_v8 = vpop.f32.mrf.mxu1  ;;  %11516 = vmatmul.mubr.bf16.gmra.mxu1 %v7131_v38  ;;  %v15872_v37 = vld [vmem:[#allocation48_spill] sm:$0xff]  ;;  %v7977_v30 = vld [vmem:[#allocation2 + $0x362] sm:$0xff] }
 0x4de   : > { %15867 = vst [vmem:[#allocation38_spill] sm:$0xff] %v14515_v15  ;;  %v14518_v61 = vadd.f32 %v6716_v49, %v6006_v7  ;;  %v6011_v46 = vadd.f32 %v11261_v8, %v15870_v54  ;;  %11519 = vmatprep.mubr.bf16.mxu1 %v7132_v63  ;;  %v11406_v51 = vpop.f32.mrf.mxu0  ;;  %v7133_v7 = vpack.c.bf16 %v7043_v44, %v7042_v29  ;;  %v15874_v63 = vld [vmem:[#allocation49_spill] sm:$0xff]  ;;  %v15878_v44 = vld [vmem:[#allocation115_spill] sm:$0xff] }
 0x4df   : > { %v5798_v42 = vpop.f32.mrf.mxu1  ;;  %v8063_v49 = vpack.c.bf16 %v7973_v32, %v7972_v35  ;;  %v8064_v8 = vpack.c.bf16 %v7975_v31, %v7974_v6  ;;  %v7976_v32 = vld [vmem:[#allocation2 + $0x35a] sm:$0xff] }
 0x4e0   : > { %15869 = vst [vmem:[#allocation41_spill] sm:$0xff] %v14518_v61  ;;  %v14521_v14 = vadd.f32 %v11405_v12, %v6011_v46  ;;  %v6009_v38 = vadd.f32 %v5798_v42, %v15872_v37  ;;  %v6732_v61 = vpop.f32.mrf.mxu0  ;;  %v7046_v42 = vld [vmem:[#allocation2 + $0x359] sm:$0xff]  ;;  %v7047_v37 = vld [vmem:[#allocation2 + $0x361] sm:$0xff] }
 0x4e1   : > { %v11262_v16 = vpop.f32.mrf.mxu1  ;;  %v7049_v31 = vld [vmem:[#allocation2 + $0x379] sm:$0xff] }
 0x4e2   : > { %15871 = vst [vmem:[#allocation40_spill] sm:$0xff] %v14521_v14  ;;  %v14524_v25 = vadd.f32 %v6729_v22, %v6009_v38  ;;  %v6012_v28 = vadd.f32 %v11262_v16, %v15874_v63  ;;  %v11409_v46 = vpop.f32.mrf.mxu0  ;;  %11664 = vmatmul.mubr.bf16.gmra.mxu0 %v8063_v49  ;;  %v7048_v22 = vld [vmem:[#allocation2 + $0x371] sm:$0xff] }
 0x4e3   : > { %v5801_v54 = vpop.f32.mrf.mxu1  ;;  %11667 = vmatprep.mubr.bf16.mxu0 %v8064_v8  ;;  %v7978_v38 = vld [vmem:[#allocation2 + $0x372] sm:$0xff] }
 0x4e4   : > { %15873 = vst [vmem:[#allocation42_spill] sm:$0xff] %v14524_v25  ;;  %v14527_v15 = vadd.f32 %v11406_v51, %v6012_v28  ;;  %v6010_v5 = vadd.f32 %v5801_v54, %v15876_v58  ;;  %v6745_v6 = vpop.f32.mrf.mxu0  ;;  %v7979_v58 = vld [vmem:[#allocation2 + $0x37a] sm:$0xff]  ;;  %v15880_v51 = vld [vmem:[#allocation52_spill] sm:$0xff]  ;;  %v7136_v54 = vpack.c.bf16 %v7049_v31, %v7048_v22  ;;  %v15884_v25 = vld [vmem:[#allocation55_spill] sm:$0xff] }
 0x4e5   : > { %v11265_v12 = vpop.f32.mrf.mxu1  ;;  %11520 = vmatmul.mubr.bf16.gmra.mxu1 %v7133_v7  ;;  %v7981_v22 = vld [vmem:[#allocation2 + $0x38a] sm:$0xff] }
 0x4e6   : > { %15875 = vst [vmem:[#allocation43_spill] sm:$0xff] %v14527_v15  ;;  %v14530_v29 = vadd.f32 %v6732_v61, %v6010_v5  ;;  %v6015_v35 = vadd.f32 %v11265_v12, %v15878_v44  ;;  %11523 = vmatprep.mubr.bf16.mxu1 %v7134_v36  ;;  %v11410_v63 = vpop.f32.mrf.mxu0  ;;  %v7135_v5 = vpack.c.bf16 %v7047_v37, %v7046_v42  ;;  %v15882_v36 = vld [vmem:[#allocation53_spill] sm:$0xff] }
 0x4e7   : > { %v5814_v33 = vpop.f32.mrf.mxu1  ;;  %v8065_v61 = vpack.c.bf16 %v7977_v30, %v7976_v32  ;;  %v8066_v12 = vpack.c.bf16 %v7979_v58, %v7978_v38  ;;  %v15886_v37 = vld [vmem:[#allocation57_spill] sm:$0xff]  ;;  %v7980_v30 = vld [vmem:[#allocation2 + $0x382] sm:$0xff] }
 0x4e8   : > { %15877 = vst [vmem:[#allocation44_spill] sm:$0xff] %v14530_v29  ;;  %v14533_v16 = vadd.f32 %v11409_v46, %v6015_v35  ;;  %v6013_v7 = vadd.f32 %v5814_v33, %v15880_v51  ;;  %v6748_v29 = vpop.f32.mrf.mxu0  ;;  %v7050_v33 = vld [vmem:[#allocation2 + $0x381] sm:$0xff]  ;;  %v7051_v51 = vld [vmem:[#allocation2 + $0x389] sm:$0xff] }
 0x4e9   : > { %v11266_v49 = vpop.f32.mrf.mxu1  ;;  %v7053_v58 = vld [vmem:[#allocation2 + $0x3a1] sm:$0xff] }
 0x4ea   : > { %15879 = vst [vmem:[#allocation45_spill] sm:$0xff] %v14533_v16  ;;  %v14536_v28 = vadd.f32 %v6745_v6, %v6013_v7  ;;  %v6016_v8 = vadd.f32 %v11266_v49, %v15882_v36  ;;  %v11413_v35 = vpop.f32.mrf.mxu0  ;;  %11668 = vmatmul.mubr.bf16.gmra.mxu0 %v8065_v61  ;;  %v7052_v6 = vld [vmem:[#allocation2 + $0x399] sm:$0xff] }
 0x4eb   : > { %v5817_v44 = vpop.f32.mrf.mxu1  ;;  %11671 = vmatprep.mubr.bf16.mxu0 %v8066_v12  ;;  %v7982_v7 = vld [vmem:[#allocation2 + $0x39a] sm:$0xff] }
 0x4ec   : > { %15881 = vst [vmem:[#allocation46_spill] sm:$0xff] %v14536_v28  ;;  %v14539_v15 = vadd.f32 %v11410_v63, %v6016_v8  ;;  %v6014_v14 = vadd.f32 %v5817_v44, %v15884_v25  ;;  %v6761_v38 = vpop.f32.mrf.mxu0  ;;  %v7983_v25 = vld [vmem:[#allocation2 + $0x3a2] sm:$0xff]  ;;  %v7138_v44 = vpack.c.bf16 %v7053_v58, %v7052_v6  ;;  %v7985_v6 = vld [vmem:[#allocation2 + $0x3b2] sm:$0xff] }
 0x4ed   : > { %v11269_v46 = vpop.f32.mrf.mxu1  ;;  %11524 = vmatmul.mubr.bf16.gmra.mxu1 %v7135_v5  ;;  %v15888_v63 = vld [vmem:[#allocation59_spill] sm:$0xff] }
 0x4ee   : > { %15883 = vst [vmem:[#allocation47_spill] sm:$0xff] %v14539_v15  ;;  %v14542_v42 = vadd.f32 %v6748_v29, %v6014_v14  ;;  %v6019_v32 = vadd.f32 %v11269_v46, %v15886_v37  ;;  %11527 = vmatprep.mubr.bf16.mxu1 %v7136_v54  ;;  %v11414_v36 = vpop.f32.mrf.mxu0  ;;  %v7137_v14 = vpack.c.bf16 %v7051_v51, %v7050_v33  ;;  %v15890_v54 = vld [vmem:[#allocation61_spill] sm:$0xff]  ;;  %v15892_v28 = vld [vmem:[#allocation63_spill] sm:$0xff] }
 0x4ef   : > { %v5830_v31 = vpop.f32.mrf.mxu1  ;;  %v8067_v29 = vpack.c.bf16 %v7981_v22, %v7980_v30  ;;  %v8068_v46 = vpack.c.bf16 %v7983_v25, %v7982_v7  ;;  %v15894_v51 = vld [vmem:[#allocation65_spill] sm:$0xff]  ;;  %v7984_v22 = vld [vmem:[#allocation2 + $0x3aa] sm:$0xff] }
 0x4f0   : > { %15885 = vst [vmem:[#allocation48_spill] sm:$0xff] %v14542_v42  ;;  %v14545_v49 = vadd.f32 %v11413_v35, %v6019_v32  ;;  %v6017_v5 = vadd.f32 %v5830_v31, %v15888_v63  ;;  %v6764_v42 = vpop.f32.mrf.mxu0  ;;  %v7054_v31 = vld [vmem:[#allocation2 + $0x3a9] sm:$0xff]  ;;  %v7055_v63 = vld [vmem:[#allocation2 + $0x3b1] sm:$0xff] }
 0x4f1   : > { %v11270_v61 = vpop.f32.mrf.mxu1  ;;  %v7057_v25 = vld [vmem:[#allocation2 + $0x3c9] sm:$0xff] }
 0x4f2   : > { %15887 = vst [vmem:[#allocation49_spill] sm:$0xff] %v14545_v49  ;;  %v14548_v8 = vadd.f32 %v6761_v38, %v6017_v5  ;;  %v6020_v12 = vadd.f32 %v11270_v61, %v15890_v54  ;;  %v11417_v32 = vpop.f32.mrf.mxu0  ;;  %11672 = vmatmul.mubr.bf16.gmra.mxu0 %v8067_v29  ;;  %v7056_v38 = vld [vmem:[#allocation2 + $0x3c1] sm:$0xff] }
 0x4f3   : > { %v5833_v37 = vpop.f32.mrf.mxu1  ;;  %11675 = vmatprep.mubr.bf16.mxu0 %v8068_v46  ;;  %v7986_v5 = vld [vmem:[#allocation2 + $0x3c2] sm:$0xff] }
 0x4f4   : > { %15889 = vst [vmem:[#allocation114_spill] sm:$0xff] %v14548_v8  ;;  %v14551_v15 = vadd.f32 %v11414_v36, %v6020_v12  ;;  %v6018_v16 = vadd.f32 %v5833_v37, %v15892_v28  ;;  %v6777_v7 = vpop.f32.mrf.mxu0  ;;  %v7987_v28 = vld [vmem:[#allocation2 + $0x3ca] sm:$0xff]  ;;  %v7140_v37 = vpack.c.bf16 %v7057_v25, %v7056_v38  ;;  %v7989_v38 = vld [vmem:[#allocation2 + $0x3da] sm:$0xff] }
 0x4f5   : > { %v11273_v35 = vpop.f32.mrf.mxu1  ;;  %11528 = vmatmul.mubr.bf16.gmra.mxu1 %v7137_v14  ;;  %v15896_v36 = vld [vmem:[#allocation67_spill] sm:$0xff] }
 0x4f6   : > { %15891 = vst [vmem:[#allocation115_spill] sm:$0xff] %v14551_v15  ;;  %v14554_v33 = vadd.f32 %v6764_v42, %v6018_v16  ;;  %v6023_v30 = vadd.f32 %v11273_v35, %v15894_v51  ;;  %11531 = vmatprep.mubr.bf16.mxu1 %v7138_v44  ;;  %v11418_v54 = vpop.f32.mrf.mxu0  ;;  %v7139_v16 = vpack.c.bf16 %v7055_v63, %v7054_v31  ;;  %v15898_v44 = vld [vmem:[#allocation69_spill] sm:$0xff]  ;;  %v15900_v8 = vld [vmem:[#allocation71_spill] sm:$0xff] }
 0x4f7   : > { %v5846_v58 = vpop.f32.mrf.mxu1  ;;  %v8069_v42 = vpack.c.bf16 %v7985_v6, %v7984_v22  ;;  %v8070_v35 = vpack.c.bf16 %v7987_v28, %v7986_v5  ;;  %v15902_v63 = vld [vmem:[#allocation73_spill] sm:$0xff] }
 0x4f8   : > { %15893 = vst [vmem:[#allocation52_spill] sm:$0xff] %v14554_v33  ;;  %v14557_v61 = vadd.f32 %v11417_v32, %v6023_v30  ;;  %v6021_v14 = vadd.f32 %v5846_v58, %v15896_v36  ;;  %v6780_v33 = vpop.f32.mrf.mxu0  ;;  %v7058_v58 = vld [vmem:[#allocation2 + $0x3d1] sm:$0xff]  ;;  %v7059_v36 = vld [vmem:[#allocation2 + $0x3d9] sm:$0xff] }
 0x4f9   : > { %v11274_v29 = vpop.f32.mrf.mxu1  ;;  %v7988_v6 = vld [vmem:[#allocation2 + $0x3d2] sm:$0xff] }
 0x4fa   : > { %15895 = vst [vmem:[#allocation53_spill] sm:$0xff] %v14557_v61  ;;  %v14560_v12 = vadd.f32 %v6777_v7, %v6021_v14  ;;  %v6024_v46 = vadd.f32 %v11274_v29, %v15898_v44  ;;  %v11421_v30 = vpop.f32.mrf.mxu0  ;;  %11676 = vmatmul.mubr.bf16.gmra.mxu0 %v8069_v42  ;;  %v7060_v7 = vld [vmem:[#allocation2 + $0x3e9] sm:$0xff]  ;;  %v7061_v28 = vld [vmem:[#allocation2 + $0x3f1] sm:$0xff] }
 0x4fb   : > { %v5849_v51 = vpop.f32.mrf.mxu1  ;;  %11679 = vmatprep.mubr.bf16.mxu0 %v8070_v35  ;;  %v7990_v14 = vld [vmem:[#allocation2 + $0x3ea] sm:$0xff] }
 0x4fc   : > { %15897 = vst [vmem:[#allocation55_spill] sm:$0xff] %v14560_v12  ;;  %v14563_v15 = vadd.f32 %v11418_v54, %v6024_v46  ;;  %v6022_v49 = vadd.f32 %v5849_v51, %v15900_v8  ;;  %v6793_v5 = vpop.f32.mrf.mxu0  ;;  %v7991_v8 = vld [vmem:[#allocation2 + $0x3f2] sm:$0xff]  ;;  %v15903_v54 = vld [vmem:[#allocation75_spill] sm:$0xff]  ;;  %v7142_v51 = vpack.c.bf16 %v7061_v28, %v7060_v7 }
 0x4fd   : > { %v11277_v32 = vpop.f32.mrf.mxu1  ;;  %11532 = vmatmul.mubr.bf16.gmra.mxu1 %v7139_v16  ;;  %v15905_v12 = vld [vmem:[#allocation79_spill] sm:$0xff]  ;;  %v7064_v7 = vld [vmem:[#allocation2 + $0x411] sm:$0xff] }
 0x4fe   : > { %15899 = vst [vmem:[#allocation57_spill] sm:$0xff] %v14563_v15  ;;  %v14566_v31 = vadd.f32 %v6780_v33, %v6022_v49  ;;  %v6027_v22 = vadd.f32 %v11277_v32, %v15902_v63  ;;  %11535 = vmatprep.mubr.bf16.mxu1 %v7140_v37  ;;  %v11422_v44 = vpop.f32.mrf.mxu0  ;;  %v7141_v49 = vpack.c.bf16 %v7059_v36, %v7058_v58  ;;  %v15904_v37 = vld [vmem:[#allocation77_spill] sm:$0xff] }
 0x4ff   : > { %v5862_v25 = vpop.f32.mrf.mxu1  ;;  %v8071_v33 = vpack.c.bf16 %v7989_v38, %v7988_v6  ;;  %v8072_v32 = vpack.c.bf16 %v7991_v8, %v7990_v14  ;;  %v7992_v6 = vld [vmem:[#allocation2 + $0x3fa] sm:$0xff]  ;;  %v7993_v38 = vld [vmem:[#allocation2 + $0x402] sm:$0xff]  ;;  %v7994_v8 = vld [vmem:[#allocation2 + $0x412] sm:$0xff] }
 0x500   : > { %15901 = vst [vmem:[#allocation59_spill] sm:$0xff] %v14566_v31  ;;  %v14569_v29 = vadd.f32 %v11421_v30, %v6027_v22  ;;  %v6025_v16 = vadd.f32 %v5862_v25, %v15903_v54  ;;  %v6796_v31 = vpop.f32.mrf.mxu0  ;;  %v7062_v25 = vld [vmem:[#allocation2 + $0x3f9] sm:$0xff]  ;;  %v7063_v54 = vld [vmem:[#allocation2 + $0x401] sm:$0xff] }
 0x501   : > { %v11278_v42 = vpop.f32.mrf.mxu1  ;;  %v7065_v14 = vld [vmem:[#allocation2 + $0x419] sm:$0xff] }
 0x502   : > { %v14572_v46 = vadd.f32 %v6793_v5, %v6025_v16  ;;  %v6028_v35 = vadd.f32 %v11278_v42, %v15904_v37  ;;  %v11425_v22 = vpop.f32.mrf.mxu0  ;;  %11680 = vmatmul.mubr.bf16.gmra.mxu0 %v8071_v33  ;;  %v7144_v37 = vpack.c.bf16 %v7065_v14, %v7064_v7  ;;  %v7069_v14 = vld [vmem:[#allocation2 + $0x441] sm:$0xff] }
 0x503   : > { %v5865_v63 = vpop.f32.mrf.mxu1  ;;  %11683 = vmatprep.mubr.bf16.mxu0 %v8072_v32 }
 0x504   : > { %v14575_v15 = vadd.f32 %v11422_v44, %v6028_v35  ;;  %v6026_v61 = vadd.f32 %v5865_v63, %v15905_v12  ;;  %v6809_v28 = vpop.f32.mrf.mxu0  ;;  %v7995_v12 = vld [vmem:[#allocation2 + $0x41a] sm:$0xff] }
 0x505   : > { %v11281_v30 = vpop.f32.mrf.mxu1  ;;  %11536 = vmatmul.mubr.bf16.gmra.mxu1 %v7141_v49  ;;  %v8074_v35 = vpack.c.bf16 %v7995_v12, %v7994_v8  ;;  %v7998_v8 = vld [vmem:[#allocation2 + $0x43a] sm:$0xff] }
 0x506   : > { %v14578_v58 = vadd.f32 %v6796_v31, %v6026_v61  ;;  %v6031_v36 = vadd.f32 %v11281_v30, %v14197_v59  ;;  %11539 = vmatprep.mubr.bf16.mxu1 %v7142_v51  ;;  %v11426_v49 = vpop.f32.mrf.mxu0  ;;  %v7143_v61 = vpack.c.bf16 %v7063_v54, %v7062_v25  ;;  %v8073_v31 = vpack.c.bf16 %v7993_v38, %v7992_v6  ;;  %v7997_v6 = vld [vmem:[#allocation2 + $0x42a] sm:$0xff]  ;;  %v7068_v38 = vld [vmem:[#allocation2 + $0x439] sm:$0xff] }
 0x507   : > { %v5878_v5 = vpop.f32.mrf.mxu1 }
 0x508   : > { %v14581_v16 = vadd.f32 %v11425_v22, %v6031_v36  ;;  %v6029_v42 = vadd.f32 %v5878_v5, %v14200_v48  ;;  %v6812_v32 = vpop.f32.mrf.mxu0  ;;  %v7066_v48 = vld [vmem:[#allocation2 + $0x421] sm:$0xff]  ;;  %v7067_v5 = vld [vmem:[#allocation2 + $0x429] sm:$0xff] }
 0x509   : > { %v11282_v44 = vpop.f32.mrf.mxu1 }
 0x50a   : > { %v14584_v33 = vadd.f32 %v6809_v28, %v6029_v42  ;;  %v6032_v59 = vadd.f32 %v11282_v44, %v14203_v34  ;;  %v11429_v36 = vpop.f32.mrf.mxu0  ;;  %11684 = vmatmul.mubr.bf16.gmra.mxu0 %v8073_v31  ;;  %v7996_v34 = vld [vmem:[#allocation2 + $0x422] sm:$0xff] }
 0x50b   : > { %v5881_v51 = vpop.f32.mrf.mxu1  ;;  %11687 = vmatprep.mubr.bf16.mxu0 %v8074_v35  ;;  %v8075_v31 = vpack.c.bf16 %v7997_v6, %v7996_v34  ;;  %v8001_v34 = vld [vmem:[#allocation2 + $0x452] sm:$0xff]  ;;  %v14605_v6 = vld [vmem:[#allocation8] ss:$0 sm:$0xff] }
 0x50c   : > { %v14587_v63 = vadd.f32 %v11426_v49, %v6032_v59  ;;  %v6030_v30 = vadd.f32 %v5881_v51, %v14206_v4  ;;  %v6825_v28 = vpop.f32.mrf.mxu0  ;;  %v7999_v4 = vld [vmem:[#allocation2 + $0x442] sm:$0xff] }
 0x50d   : > { %v11285_v22 = vpop.f32.mrf.mxu1  ;;  %11540 = vmatmul.mubr.bf16.gmra.mxu1 %v7143_v61  ;;  %v7145_v61 = vpack.c.bf16 %v7067_v5, %v7066_v48  ;;  %v8076_v35 = vpack.c.bf16 %v7999_v4, %v7998_v8  ;;  %v8000_v5 = vld [vmem:[#allocation2 + $0x44a] sm:$0xff] }
 0x50e   : > { %v14590_v25 = vadd.f32 %v6812_v32, %v6030_v30  ;;  %v6035_v54 = vadd.f32 %v11285_v22, %v14209_v27  ;;  %11543 = vmatprep.mubr.bf16.mxu1 %v7144_v37  ;;  %v11430_v49 = vpop.f32.mrf.mxu0  ;;  %v7146_v37 = vpack.c.bf16 %v7069_v14, %v7068_v38  ;;  %v7072_v14 = vld [vmem:[#allocation2 + $0x461] sm:$0xff] }
 0x50f   : > { %v5894_v7 = vpop.f32.mrf.mxu1 }
 0x510   : > { %v14593_v12 = vadd.f32 %v11429_v36, %v6035_v54  ;;  %v6033_v42 = vadd.f32 %v5894_v7, %v14212_v62  ;;  %v6828_v32 = vpop.f32.mrf.mxu0  ;;  %v7070_v62 = vld [vmem:[#allocation2 + $0x449] sm:$0xff] }
 0x511   : > { %v11286_v44 = vpop.f32.mrf.mxu1 }
 0x512   : > { %v14596_v59 = vadd.f32 %v6825_v28, %v6033_v42  ;;  %v6036_v27 = vadd.f32 %v11286_v44, %v14215_v9  ;;  %v11593_v54 = vpop.f32.mrf.mxu0  ;;  %11688 = vmatmul.mubr.bf16.gmra.mxu0 %v8075_v31  ;;  %v7071_v9 = vld [vmem:[#allocation2 + $0x451] sm:$0xff]  ;;  %v8002_v42 = vld [vmem:[#allocation2 + $0x462] sm:$0xff]  ;;  %v8077_v31 = vpack.c.bf16 %v8001_v34, %v8000_v5  ;;  %v7075_v5 = vld [vmem:[#allocation2 + $0x479] sm:$0xff] }
 0x513   : > { %v5897_v51 = vpop.f32.mrf.mxu1  ;;  %11691 = vmatprep.mubr.bf16.mxu0 %v8076_v35  ;;  %v8003_v44 = vld [vmem:[#allocation2 + $0x46a] sm:$0xff]  ;;  %v8004_v34 = vld [vmem:[#allocation2 + $0x472] sm:$0xff] }
 0x514   : > { %v14599_v30 = vadd.f32 %v11430_v49, %v6036_v27  ;;  %v6034_v22 = vadd.f32 %v5897_v51, %v14218_v40  ;;  %v8189_v28 = vpop.f32.mrf.mxu0  ;;  %v7073_v40 = vld [vmem:[#allocation2 + $0x469] sm:$0xff] }
 0x515   : > { %v11449_v36 = vpop.f32.mrf.mxu1  ;;  %11544 = vmatmul.mubr.bf16.gmra.mxu1 %v7145_v61  ;;  %v7148_v51 = vpack.c.bf16 %v7073_v40, %v7072_v14  ;;  %v8005_v40 = vld [vmem:[#allocation2 + $0x47a] sm:$0xff] }
 0x516   : > { %15906 = vst [vmem:[#allocation61_spill] sm:$0xff] %v14599_v30  ;;  %v14602_v7 = vadd.f32 %v6828_v32, %v6034_v22  ;;  %v7772_v48 = vadd.f32 %v11449_v36, %v14221_v0  ;;  %11547 = vmatprep.mubr.bf16.mxu1 %v7146_v37  ;;  %v11594_v61 = vpop.f32.mrf.mxu0  ;;  %v7147_v0 = vpack.c.bf16 %v7071_v9, %v7070_v62 }
 0x517   : > { %v7259_v38 = vpop.f32.mrf.mxu1  ;;  %v8078_v36 = vpack.c.bf16 %v8003_v44, %v8002_v42 }
 0x518   : > { %15907 = vst [vmem:[#allocation63_spill] sm:$0xff] %v14602_v7  ;;  %v8702_v8 = vadd.f32 %v11593_v54, %v7772_v48  ;;  %v7770_v4 = vadd.f32 %v7259_v38, %v14224_v10  ;;  %v8192_v22 = vpop.f32.mrf.mxu0 }
 0x519   : > { %v11450_v49 = vpop.f32.mrf.mxu1 }
 0x51a   : > { %v8837_v27 = vadd.f32 %v14605_v6, %v8702_v8  ;;  %v8700_v37 = vadd.f32 %v8189_v28, %v7770_v4  ;;  %v7773_v35 = vadd.f32 %v11450_v49, %v14227_v57  ;;  %v11597_v9 = vpop.f32.mrf.mxu0  ;;  %11692 = vmatmul.mubr.bf16.gmra.mxu0 %v8077_v31  ;;  %v7074_v57 = vld [vmem:[#allocation2 + $0x471] sm:$0xff]  ;;  %v7076_v8 = vld [vmem:[#allocation2 + $0x489] sm:$0xff] }
 0x51b   : > { %v7262_v32 = vpop.f32.mrf.mxu1  ;;  %v7077_v4 = vld [vmem:[#allocation2 + $0x491] sm:$0xff]  ;;  %11695 = vmatprep.mubr.bf16.mxu0 %v8078_v36 }
 0x51c   : > { %8965 = vst [vmem:[%s14612_s24 + $0x10] sm:$0xff] %v8837_v27  ;;  %v8835_v10 = vadd.f32 %v14605_v6, %v8700_v37  ;;  %v8703_v54 = vadd.f32 %v11594_v61, %v7773_v35  ;;  %v7771_v62 = vadd.f32 %v7262_v32, %v14230_v20  ;;  %v8205_v42 = vpop.f32.mrf.mxu0  ;;  %v8007_v31 = vld [vmem:[#allocation2 + $0x492] sm:$0xff] }
 0x51d   : > { %v11453_v48 = vpop.f32.mrf.mxu1  ;;  %11548 = vmatmul.mubr.bf16.gmra.mxu1 %v7147_v0  ;;  %v8006_v0 = vld [vmem:[#allocation2 + $0x48a] sm:$0xff] }
 0x51e   : > { %8963 = vst [vmem:[%s14612_s24] sm:$0xff] %v8835_v10  ;;  %v8838_v38 = vadd.f32 %v14605_v6, %v8703_v54  ;;  %v8701_v28 = vadd.f32 %v8192_v22, %v7771_v62  ;;  %v7776_v14 = vadd.f32 %v11453_v48, %v14233_v24  ;;  %11551 = vmatprep.mubr.bf16.mxu1 %v7148_v51  ;;  %v11598_v32 = vpop.f32.mrf.mxu0 }
 0x51f   : > { %v7275_v20 = vpop.f32.mrf.mxu1  ;;  %v9225_v37 = vmul.f32 %v8835_v10, %v8835_v10  ;;  %v7149_v24 = vpack.c.bf16 %v7075_v5, %v7074_v57  ;;  %v8079_v51 = vpack.c.bf16 %v8005_v40, %v8004_v34  ;;  %v7150_v22 = vpack.c.bf16 %v7077_v4, %v7076_v8  ;;  %v7078_v8 = vld [vmem:[#allocation2 + $0x499] sm:$0xff] }
 0x520   : > { %8966 = vst [vmem:[%s14612_s24 + $0x18] sm:$0xff] %v8838_v38  ;;  %v8836_v44 = vadd.f32 %v14605_v6, %v8701_v28  ;;  %v8706_v49 = vadd.f32 %v11597_v9, %v7776_v14  ;;  %v7774_v61 = vadd.f32 %v7275_v20, %v14236_v3  ;;  %v8208_v3 = vpop.f32.mrf.mxu0  ;;  %v8080_v14 = vpack.c.bf16 %v8007_v31, %v8006_v0  ;;  %v8008_v4 = vld [vmem:[#allocation2 + $0x49a] sm:$0xff]  ;;  %v7080_v0 = vld [vmem:[#allocation2 + $0x4b1] sm:$0xff] }
 0x521   : > { %v11454_v35 = vpop.f32.mrf.mxu1  ;;  %v9227_v20 = vmul.f32 %v8837_v27, %v8837_v27  ;;  %v7081_v31 = vld [vmem:[#allocation2 + $0x4b9] sm:$0xff] }
 0x522   : > { %8964 = vst [vmem:[%s14612_s24 + $0x8] sm:$0xff] %v8836_v44  ;;  %v9091_v54 = vadd.f32 %v8836_v44, %v8835_v10  ;;  %v9226_v62 = vmul.f32 %v8836_v44, %v8836_v44  ;;  %v14625_v36 = vadd.f32 %v14605_v6, %v8706_v49  ;;  %v8704_v48 = vadd.f32 %v8205_v42, %v7774_v61  ;;  %v11601_v40 = vpop.f32.mrf.mxu0  ;;  %v8009_v61 = vld [vmem:[#allocation2 + $0x4a2] sm:$0xff] }
 0x523   : > { %v7777_v9 = vadd.f32 %v11454_v35, %v14239_v11  ;;  %v7278_v28 = vpop.f32.mrf.mxu1  ;;  %11696 = vmatmul.mubr.bf16.gmra.mxu0 %v8079_v51  ;;  %v7079_v11 = vld [vmem:[#allocation2 + $0x4a1] sm:$0xff]  ;;  %v9228_v42 = vmul.f32 %v8838_v38, %v8838_v38 }
 0x524   : > { %v9092_v7 = vadd.f32 %v9091_v54, %v8837_v27  ;;  %v9353_v30 = vadd.f32 %v9226_v62, %v9225_v37  ;;  %8969 = vst [vmem:[%s14612_s24 + $0x30] sm:$0xff] %v14625_v36  ;;  %v8839_v57 = vadd.f32 %v14605_v6, %v8704_v48  ;;  %v7775_v10 = vadd.f32 %v7278_v28, %v14242_v39 }
 0x525   : > { %v8707_v5 = vadd.f32 %v11598_v32, %v7777_v9  ;;  %v11457_v34 = vpop.f32.mrf.mxu1  ;;  %11552 = vmatmul.mubr.bf16.gmra.mxu1 %v7149_v24  ;;  %v8221_v24 = vpop.f32.mrf.mxu0  ;;  %11699 = vmatprep.mubr.bf16.mxu0 %v8080_v14  ;;  %v7151_v9 = vpack.c.bf16 %v7079_v11, %v7078_v8  ;;  %v8081_v28 = vpack.c.bf16 %v8009_v61, %v8008_v4 }
 0x526   : > { %v9093_v44 = vadd.f32 %v9092_v7, %v8838_v38  ;;  %v9354_v49 = vadd.f32 %v9353_v30, %v9227_v20  ;;  %8967 = vst [vmem:[%s14612_s24 + $0x20] sm:$0xff] %v8839_v57  ;;  %v7780_v27 = vadd.f32 %v11457_v34, %v14245_v53  ;;  %11555 = vmatprep.mubr.bf16.mxu1 %v7150_v22  ;;  %v8010_v38 = vld [vmem:[#allocation2 + $0x4b2] sm:$0xff]  ;;  %v8011_v53 = vld [vmem:[#allocation2 + $0x4ba] sm:$0xff] }
 0x527   : > { %v9229_v37 = vmul.f32 %v8839_v57, %v8839_v57  ;;  %v8842_v39 = vadd.f32 %v14605_v6, %v8707_v5  ;;  %v8705_v35 = vadd.f32 %v8208_v3, %v7775_v10  ;;  %v7291_v32 = vpop.f32.mrf.mxu1  ;;  %v11602_v48 = vpop.f32.mrf.mxu0  ;;  %v7152_v3 = vpack.c.bf16 %v7081_v31, %v7080_v0 }
 0x528   : > { %v9355_v51 = vadd.f32 %v9354_v49, %v9228_v42  ;;  %v9094_v54 = vadd.f32 %v9093_v44, %v8839_v57  ;;  %v8710_v7 = vadd.f32 %v11601_v40, %v7780_v27  ;;  %v7778_v30 = vadd.f32 %v7291_v32, %v14248_v55  ;;  %v7082_v44 = vld [vmem:[#allocation2 + $0x4c1] sm:$0xff]  ;;  %v7083_v49 = vld [vmem:[#allocation2 + $0x4c9] sm:$0xff] }
 0x529   : > { %8970 = vst [vmem:[%s14612_s24 + $0x38] sm:$0xff] %v8842_v39  ;;  %v8840_v22 = vadd.f32 %v14605_v6, %v8705_v35  ;;  %v11458_v62 = vpop.f32.mrf.mxu1  ;;  %v8224_v40 = vpop.f32.mrf.mxu0  ;;  %v8082_v42 = vpack.c.bf16 %v8011_v53, %v8010_v38  ;;  %v9231_v27 = vmul.f32 %v14625_v36, %v14625_v36  ;;  %v8013_v35 = vld [vmem:[#allocation2 + $0x4ca] sm:$0xff] }
 0x52a   : > { %v9356_v20 = vadd.f32 %v9355_v51, %v9229_v37  ;;  %v14639_v14 = vadd.f32 %v14605_v6, %v8710_v7  ;;  %v8708_v57 = vadd.f32 %v8221_v24, %v7778_v30  ;;  %v7781_v5 = vadd.f32 %v11458_v62, %v14251_v18  ;;  %v8012_v37 = vld [vmem:[#allocation2 + $0x4c2] sm:$0xff]  ;;  %v7084_v51 = vld [vmem:[#allocation2 + $0x4d9] sm:$0xff] }
 0x52b   : > { %8968 = vst [vmem:[%s14612_s24 + $0x28] sm:$0xff] %v8840_v22  ;;  %v9095_v55 = vadd.f32 %v9094_v54, %v8840_v22  ;;  %v9230_v10 = vmul.f32 %v8840_v22, %v8840_v22  ;;  %v7294_v34 = vpop.f32.mrf.mxu1  ;;  %v11605_v31 = vpop.f32.mrf.mxu0  ;;  %11700 = vmatmul.mubr.bf16.gmra.mxu0 %v8081_v28  ;;  %v7085_v54 = vld [vmem:[#allocation2 + $0x4e1] sm:$0xff]  ;;  %v9232_v7 = vmul.f32 %v8842_v39, %v8842_v39 }
 0x52c   : > { %8973 = vst [vmem:[%s14612_s24 + $0x50] sm:$0xff] %v14639_v14  ;;  %v8843_v8 = vadd.f32 %v14605_v6, %v8708_v57  ;;  %v8711_v11 = vadd.f32 %v11602_v48, %v7781_v5  ;;  %v7779_v4 = vadd.f32 %v7294_v34, %v14254_v21  ;;  %11703 = vmatprep.mubr.bf16.mxu0 %v8082_v42 }
 0x52d   : > { %v9096_v18 = vadd.f32 %v9095_v55, %v14625_v36  ;;  %v9357_v61 = vadd.f32 %v9356_v20, %v9230_v10  ;;  %v11461_v0 = vpop.f32.mrf.mxu1  ;;  %11556 = vmatmul.mubr.bf16.gmra.mxu1 %v7151_v9  ;;  %v8237_v53 = vpop.f32.mrf.mxu0  ;;  %v7153_v22 = vpack.c.bf16 %v7083_v49, %v7082_v44  ;;  %v8083_v28 = vpack.c.bf16 %v8013_v35, %v8012_v37  ;;  %v8014_v20 = vld [vmem:[#allocation2 + $0x4da] sm:$0xff] }
 0x52e   : > { %8971 = vst [vmem:[%s14612_s24 + $0x40] sm:$0xff] %v8843_v8  ;;  %v8846_v32 = vadd.f32 %v14605_v6, %v8711_v11  ;;  %v8709_v24 = vadd.f32 %v8224_v40, %v7779_v4  ;;  %v7784_v21 = vadd.f32 %v11461_v0, %v14257_v45  ;;  %11559 = vmatprep.mubr.bf16.mxu1 %v7152_v3  ;;  %v8015_v45 = vld [vmem:[#allocation2 + $0x4e2] sm:$0xff] }
 0x52f   : > { %v9097_v30 = vadd.f32 %v9096_v18, %v8842_v39  ;;  %v9358_v36 = vadd.f32 %v9357_v61, %v9231_v27  ;;  %v7307_v38 = vpop.f32.mrf.mxu1  ;;  %v9233_v5 = vmul.f32 %v8843_v8, %v8843_v8  ;;  %v11606_v55 = vpop.f32.mrf.mxu0  ;;  %v7154_v10 = vpack.c.bf16 %v7085_v54, %v7084_v51  ;;  %v7086_v0 = vld [vmem:[#allocation2 + $0x4e9] sm:$0xff]  ;;  %v8017_v54 = vld [vmem:[#allocation2 + $0x4f2] sm:$0xff] }
 0x530   : > { %8974 = vst [vmem:[%s14612_s24 + $0x58] sm:$0xff] %v8846_v32  ;;  %v8844_v62 = vadd.f32 %v14605_v6, %v8709_v24  ;;  %v8714_v48 = vadd.f32 %v11605_v31, %v7784_v21  ;;  %v7782_v9 = vadd.f32 %v7307_v38, %v14260_v17  ;;  %v8084_v27 = vpack.c.bf16 %v8015_v45, %v8014_v20  ;;  %v7087_v31 = vld [vmem:[#allocation2 + $0x4f1] sm:$0xff]  ;;  %v7089_v38 = vld [vmem:[#allocation2 + $0x509] sm:$0xff] }
 0x531   : > { %v9359_v3 = vadd.f32 %v9358_v36, %v9232_v7  ;;  %v9098_v57 = vadd.f32 %v9097_v30, %v8843_v8  ;;  %v11462_v39 = vpop.f32.mrf.mxu1  ;;  %v8240_v49 = vpop.f32.mrf.mxu0  ;;  %v9235_v37 = vmul.f32 %v14639_v14, %v14639_v14  ;;  %v8016_v51 = vld [vmem:[#allocation2 + $0x4ea] sm:$0xff]  ;;  %v7088_v36 = vld [vmem:[#allocation2 + $0x501] sm:$0xff] }
 0x532   : > { %8972 = vst [vmem:[%s14612_s24 + $0x48] sm:$0xff] %v8844_v62  ;;  %v9234_v34 = vmul.f32 %v8844_v62, %v8844_v62  ;;  %v14658_v40 = vadd.f32 %v14605_v6, %v8714_v48  ;;  %v8712_v42 = vadd.f32 %v8237_v53, %v7782_v9  ;;  %v7785_v11 = vadd.f32 %v11462_v39, %v14263_v60 }
 0x533   : > { %v9360_v4 = vadd.f32 %v9359_v3, %v9233_v5  ;;  %v9099_v17 = vadd.f32 %v9098_v57, %v8844_v62  ;;  %v7310_v44 = vpop.f32.mrf.mxu1  ;;  %v11609_v21 = vpop.f32.mrf.mxu0  ;;  %11704 = vmatmul.mubr.bf16.gmra.mxu0 %v8083_v28  ;;  %v9236_v53 = vmul.f32 %v8846_v32, %v8846_v32  ;;  %v8085_v3 = vpack.c.bf16 %v8017_v54, %v8016_v51  ;;  %v8018_v57 = vld [vmem:[#allocation2 + $0x502] sm:$0xff]  ;;  %v8020_v51 = vld [vmem:[#allocation2 + $0x512] sm:$0xff]  ;;  %v8021_v54 = vld [vmem:[#allocation2 + $0x51a] sm:$0xff] }
 0x534   : > { %8977 = vst [vmem:[%s14612_s24 + $0x70] sm:$0xff] %v14658_v40  ;;  %v8847_v8 = vadd.f32 %v14605_v6, %v8712_v42  ;;  %v8715_v18 = vadd.f32 %v11606_v55, %v7785_v11  ;;  %v7783_v61 = vadd.f32 %v7310_v44, %v14266_v1  ;;  %11707 = vmatprep.mubr.bf16.mxu0 %v8084_v27 }
 0x535   : > { %v9100_v60 = vadd.f32 %v9099_v17, %v14639_v14  ;;  %v9361_v35 = vadd.f32 %v9360_v4, %v9234_v34  ;;  %v11465_v24 = vpop.f32.mrf.mxu1  ;;  %11560 = vmatmul.mubr.bf16.gmra.mxu1 %v7153_v22  ;;  %v8253_v9 = vpop.f32.mrf.mxu0  ;;  %v7155_v22 = vpack.c.bf16 %v7087_v31, %v7086_v0  ;;  %v7156_v34 = vpack.c.bf16 %v7089_v38, %v7088_v36  ;;  %v7090_v31 = vld [vmem:[#allocation2 + $0x511] sm:$0xff]  ;;  %v7092_v36 = vld [vmem:[#allocation2 + $0x529] sm:$0xff] }
 0x536   : > { %8975 = vst [vmem:[%s14612_s24 + $0x60] sm:$0xff] %v8847_v8  ;;  %v8850_v7 = vadd.f32 %v14605_v6, %v8715_v18  ;;  %v8713_v30 = vadd.f32 %v8240_v49, %v7783_v61  ;;  %v7788_v1 = vadd.f32 %v11465_v24, %v14269_v23  ;;  %11563 = vmatprep.mubr.bf16.mxu1 %v7154_v10  ;;  %v8019_v23 = vld [vmem:[#allocation2 + $0x50a] sm:$0xff] }
 0x537   : > { %v9101_v62 = vadd.f32 %v9100_v60, %v8846_v32  ;;  %v9362_v14 = vadd.f32 %v9361_v35, %v9235_v37  ;;  %v7323_v48 = vpop.f32.mrf.mxu1  ;;  %v9237_v55 = vmul.f32 %v8847_v8, %v8847_v8  ;;  %v11610_v10 = vpop.f32.mrf.mxu0  ;;  %v8086_v18 = vpack.c.bf16 %v8019_v23, %v8018_v57  ;;  %v7091_v37 = vld [vmem:[#allocation2 + $0x519] sm:$0xff]  ;;  %v7093_v38 = vld [vmem:[#allocation2 + $0x531] sm:$0xff] }
 0x538   : > { %8978 = vst [vmem:[%s14612_s24 + $0x78] sm:$0xff] %v8850_v7  ;;  %v8848_v28 = vadd.f32 %v14605_v6, %v8713_v30  ;;  %v8718_v20 = vadd.f32 %v11609_v21, %v7788_v1  ;;  %v7786_v45 = vadd.f32 %v7323_v48, %v14272_v13  ;;  %v9239_v60 = vmul.f32 %v14658_v40, %v14658_v40 }
 0x539   : > { %v9363_v5 = vadd.f32 %v9362_v14, %v9236_v53  ;;  %v9102_v39 = vadd.f32 %v9101_v62, %v8847_v8  ;;  %v11466_v32 = vpop.f32.mrf.mxu1  ;;  %v8256_v27 = vpop.f32.mrf.mxu0  ;;  %v9240_v53 = vmul.f32 %v8850_v7, %v8850_v7 }
 0x53a   : > { %8976 = vst [vmem:[%s14612_s24 + $0x68] sm:$0xff] %v8848_v28  ;;  %v9238_v42 = vmul.f32 %v8848_v28, %v8848_v28  ;;  %v14676_v11 = vadd.f32 %v14605_v6, %v8718_v20  ;;  %v8716_v4 = vadd.f32 %v8253_v9, %v7786_v45  ;;  %v7789_v17 = vadd.f32 %v11466_v32, %v14275_v26 }
 0x53b   : > { %v9364_v44 = vadd.f32 %v9363_v5, %v9237_v55  ;;  %v9103_v13 = vadd.f32 %v9102_v39, %v8848_v28  ;;  %v7326_v49 = vpop.f32.mrf.mxu1  ;;  %v11613_v21 = vpop.f32.mrf.mxu0  ;;  %11708 = vmatmul.mubr.bf16.gmra.mxu0 %v8085_v3  ;;  %v7157_v9 = vpack.c.bf16 %v7091_v37, %v7090_v31  ;;  %v8087_v45 = vpack.c.bf16 %v8021_v54, %v8020_v51  ;;  %v8022_v3 = vld [vmem:[#allocation2 + $0x52a] sm:$0xff]  ;;  %v7094_v37 = vld [vmem:[#allocation2 + $0x539] sm:$0xff] }
 0x53c   : > { %8981 = vst [vmem:[%s14612_s24 + $0x90] sm:$0xff] %v14676_v11  ;;  %v8851_v8 = vadd.f32 %v14605_v6, %v8716_v4  ;;  %v8719_v61 = vadd.f32 %v11610_v10, %v7789_v17  ;;  %v7787_v0 = vadd.f32 %v7326_v49, %v14278_v47  ;;  %11711 = vmatprep.mubr.bf16.mxu0 %v8086_v18 }
 0x53d   : > { %v9104_v26 = vadd.f32 %v9103_v13, %v14658_v40  ;;  %v9365_v35 = vadd.f32 %v9364_v44, %v9238_v42  ;;  %v11469_v24 = vpop.f32.mrf.mxu1  ;;  %11564 = vmatmul.mubr.bf16.gmra.mxu1 %v7155_v22  ;;  %v8269_v48 = vpop.f32.mrf.mxu0  ;;  %v7158_v55 = vpack.c.bf16 %v7093_v38, %v7092_v36 }
 0x53e   : > { %8979 = vst [vmem:[%s14612_s24 + $0x80] sm:$0xff] %v8851_v8  ;;  %v8854_v30 = vadd.f32 %v14605_v6, %v8719_v61  ;;  %v8717_v1 = vadd.f32 %v8256_v27, %v7787_v0  ;;  %v7792_v47 = vadd.f32 %v11469_v24, %v14281_v19  ;;  %11567 = vmatprep.mubr.bf16.mxu1 %v7156_v34  ;;  %v8023_v19 = vld [vmem:[#allocation2 + $0x532] sm:$0xff] }
 0x53f   : > { %v9105_v62 = vadd.f32 %v9104_v26, %v8850_v7  ;;  %v9366_v40 = vadd.f32 %v9365_v35, %v9239_v60  ;;  %v7339_v14 = vpop.f32.mrf.mxu1  ;;  %v9241_v5 = vmul.f32 %v8851_v8, %v8851_v8  ;;  %v11614_v39 = vpop.f32.mrf.mxu0  ;;  %v8088_v13 = vpack.c.bf16 %v8023_v19, %v8022_v3  ;;  %v7095_v60 = vld [vmem:[#allocation2 + $0x541] sm:$0xff] }
 0x540   : > { %8982 = vst [vmem:[%s14612_s24 + $0x98] sm:$0xff] %v8854_v30  ;;  %v8852_v22 = vadd.f32 %v14605_v6, %v8717_v1  ;;  %v8722_v28 = vadd.f32 %v11613_v21, %v7792_v47  ;;  %v7790_v20 = vadd.f32 %v7339_v14, %v14284_v41  ;;  %v8025_v21 = vld [vmem:[#allocation2 + $0x542] sm:$0xff]  ;;  %v9244_v51 = vmul.f32 %v8854_v30, %v8854_v30 }
 0x541   : > { %v9367_v57 = vadd.f32 %v9366_v40, %v9240_v53  ;;  %v9106_v23 = vadd.f32 %v9105_v62, %v8851_v8  ;;  %v11470_v7 = vpop.f32.mrf.mxu1  ;;  %v8272_v44 = vpop.f32.mrf.mxu0  ;;  %v9243_v8 = vmul.f32 %v14676_v11, %v14676_v11  ;;  %v7159_v62 = vpack.c.bf16 %v7095_v60, %v7094_v37 }
 0x542   : > { %8980 = vst [vmem:[%s14612_s24 + $0x88] sm:$0xff] %v8852_v22  ;;  %v9242_v32 = vmul.f32 %v8852_v22, %v8852_v22  ;;  %v8857_v10 = vadd.f32 %v14605_v6, %v8722_v28  ;;  %v8720_v34 = vadd.f32 %v8269_v48, %v7790_v20  ;;  %v7793_v42 = vadd.f32 %v11470_v7, %v14287_v43 }
 0x543   : > { %v9368_v4 = vadd.f32 %v9367_v57, %v9241_v5  ;;  %v9107_v17 = vadd.f32 %v9106_v23, %v8852_v22  ;;  %v7342_v41 = vpop.f32.mrf.mxu1  ;;  %v11617_v43 = vpop.f32.mrf.mxu0  ;;  %11712 = vmatmul.mubr.bf16.gmra.mxu0 %v8087_v45  ;;  %v15908_v45 = vld [vmem:[#allocation81_spill] sm:$0xff] }
 0x544   : > { %8985 = vst [vmem:[%s14612_s24 + $0xb0] sm:$0xff] %v8857_v10  ;;  %v8855_v49 = vadd.f32 %v14605_v6, %v8720_v34  ;;  %v8723_v27 = vadd.f32 %v11614_v39, %v7793_v42  ;;  %v7791_v18 = vadd.f32 %v7342_v41, %v14290_v56  ;;  %v8024_v56 = vld [vmem:[#allocation2 + $0x53a] sm:$0xff]  ;;  %11715 = vmatprep.mubr.bf16.mxu0 %v8088_v13  ;;  %v15909_v39 = vld [vmem:[#allocation83_spill] sm:$0xff] }
 0x545   : > { %v9108_v61 = vadd.f32 %v9107_v17, %v14676_v11  ;;  %v9369_v0 = vadd.f32 %v9368_v4, %v9242_v32  ;;  %v11473_v31 = vpop.f32.mrf.mxu1  ;;  %11568 = vmatmul.mubr.bf16.gmra.mxu1 %v7157_v9  ;;  %v8285_v47 = vpop.f32.mrf.mxu0  ;;  %v8089_v22 = vpack.c.bf16 %v8025_v21, %v8024_v56  ;;  %v9247_v32 = vmul.f32 %v8857_v10, %v8857_v10  ;;  %v15910_v13 = vld [vmem:[#allocation85_spill] sm:$0xff] }
 0x546   : > { %8983 = vst [vmem:[%s14612_s24 + $0xa0] sm:$0xff] %v8855_v49  ;;  %v8858_v26 = vadd.f32 %v14605_v6, %v8723_v27  ;;  %v8721_v35 = vadd.f32 %v8272_v44, %v7791_v18  ;;  %v7796_v24 = vadd.f32 %v11473_v31, %v14293_v52  ;;  %11571 = vmatprep.mubr.bf16.mxu1 %v7158_v55 }
 0x547   : > { %v9109_v54 = vadd.f32 %v9108_v61, %v8854_v30  ;;  %v9370_v11 = vadd.f32 %v9369_v0, %v9243_v8  ;;  %v7355_v1 = vpop.f32.mrf.mxu1  ;;  %v9245_v14 = vmul.f32 %v8855_v49, %v8855_v49  ;;  %v11618_v9 = vpop.f32.mrf.mxu0 }
 0x548   : > { %8986 = vst [vmem:[%s14612_s24 + $0xb8] sm:$0xff] %v8858_v26  ;;  %v8856_v36 = vadd.f32 %v14605_v6, %v8721_v35  ;;  %v8726_v38 = vadd.f32 %v11617_v43, %v7796_v24  ;;  %v7794_v53 = vadd.f32 %v7355_v1, %v14296_v2  ;;  %v9248_v27 = vmul.f32 %v8858_v26, %v8858_v26  ;;  %v15911_v43 = vld [vmem:[#allocation87_spill] sm:$0xff] }
 0x549   : > { %v9371_v40 = vadd.f32 %v9370_v11, %v9244_v51  ;;  %v9110_v52 = vadd.f32 %v9109_v54, %v8855_v49  ;;  %v11474_v48 = vpop.f32.mrf.mxu1  ;;  %v8288_v2 = vpop.f32.mrf.mxu0  ;;  %v15912_v11 = vld [vmem:[#allocation89_spill] sm:$0xff] }
 0x54a   : > { %8984 = vst [vmem:[%s14612_s24 + $0xa8] sm:$0xff] %v8856_v36  ;;  %v9246_v30 = vmul.f32 %v8856_v36, %v8856_v36  ;;  %v8861_v28 = vadd.f32 %v14605_v6, %v8726_v38  ;;  %v8724_v20 = vadd.f32 %v8285_v47, %v7794_v53  ;;  %v7797_v3 = vadd.f32 %v11474_v48, %v15908_v45 }
 0x54b   : > { %v9372_v19 = vadd.f32 %v9371_v40, %v9245_v14  ;;  %v9111_v57 = vadd.f32 %v9110_v52, %v8856_v36  ;;  %v7358_v23 = vpop.f32.mrf.mxu1  ;;  %v11621_v17 = vpop.f32.mrf.mxu0  ;;  %11716 = vmatmul.mubr.bf16.gmra.mxu0 %v8089_v22  ;;  %v15913_v52 = vld [vmem:[#allocation91_spill] sm:$0xff] }
 0x54c   : > { %8989 = vst [vmem:[%s14612_s24 + $0xd0] sm:$0xff] %v8861_v28  ;;  %v8859_v5 = vadd.f32 %v14605_v6, %v8724_v20  ;;  %v8727_v7 = vadd.f32 %v11618_v9, %v7797_v3  ;;  %v7795_v55 = vadd.f32 %v7358_v23, %v15909_v39  ;;  %v9251_v48 = vmul.f32 %v8861_v28, %v8861_v28 }
 0x54d   : > { %v9112_v34 = vadd.f32 %v9111_v57, %v8857_v10  ;;  %v9373_v42 = vadd.f32 %v9372_v19, %v9246_v30  ;;  %v11477_v4 = vpop.f32.mrf.mxu1  ;;  %11572 = vmatmul.mubr.bf16.gmra.mxu1 %v7159_v62  ;;  %v8301_v0 = vpop.f32.mrf.mxu0 }
 0x54e   : > { %8987 = vst [vmem:[%s14612_s24 + $0xc0] sm:$0xff] %v8859_v5  ;;  %v8862_v41 = vadd.f32 %v14605_v6, %v8727_v7  ;;  %v8725_v44 = vadd.f32 %v8288_v2, %v7795_v55  ;;  %v7800_v49 = vadd.f32 %v11477_v4, %v15910_v13  ;;  %v9249_v24 = vmul.f32 %v8859_v5, %v8859_v5 }
 0x54f   : > { %v9113_v18 = vadd.f32 %v9112_v34, %v8858_v26  ;;  %v9374_v8 = vadd.f32 %v9373_v42, %v9247_v32  ;;  %v7371_v61 = vpop.f32.mrf.mxu1  ;;  %v11622_v21 = vpop.f32.mrf.mxu0 }
 0x550   : > { %8990 = vst [vmem:[%s14612_s24 + $0xd8] sm:$0xff] %v8862_v41  ;;  %v8860_v10 = vadd.f32 %v14605_v6, %v8725_v44  ;;  %v8730_v31 = vadd.f32 %v11621_v17, %v7800_v49  ;;  %v7798_v37 = vadd.f32 %v7371_v61, %v15911_v43  ;;  %v9252_v57 = vmul.f32 %v8862_v41, %v8862_v41  ;;  %v15915_v49 = vld [vmem:[#allocation95_spill] sm:$0xff]  ;;  %v15916_v43 = vld [vmem:[#allocation97_spill] sm:$0xff] }
 0x551   : > { %v9375_v60 = vadd.f32 %v9374_v8, %v9248_v27  ;;  %v9114_v35 = vadd.f32 %v9113_v18, %v8859_v5  ;;  %v11478_v56 = vpop.f32.mrf.mxu1  ;;  %v8304_v53 = vpop.f32.mrf.mxu0 }
 0x552   : > { %8988 = vst [vmem:[%s14612_s24 + $0xc8] sm:$0xff] %v8860_v10  ;;  %v9250_v51 = vmul.f32 %v8860_v10, %v8860_v10  ;;  %v8865_v54 = vadd.f32 %v14605_v6, %v8730_v31  ;;  %v8728_v26 = vadd.f32 %v8301_v0, %v7798_v37  ;;  %v7801_v1 = vadd.f32 %v11478_v56, %v15912_v11  ;;  %v15917_v11 = vld [vmem:[#allocation99_spill] sm:$0xff] }
 0x553   : > { %v9376_v47 = vadd.f32 %v9375_v60, %v9249_v24  ;;  %v9115_v36 = vadd.f32 %v9114_v35, %v8860_v10  ;;  %v7374_v38 = vpop.f32.mrf.mxu1  ;;  %v11625_v20 = vpop.f32.mrf.mxu0 }
 0x554   : > { %8993 = vst [vmem:[%s14612_s24 + $0xf0] sm:$0xff] %v8865_v54  ;;  %v8863_v62 = vadd.f32 %v14605_v6, %v8728_v26  ;;  %v8731_v40 = vadd.f32 %v11622_v21, %v7801_v1  ;;  %v7799_v14 = vadd.f32 %v7374_v38, %v15913_v52  ;;  %v9255_v60 = vmul.f32 %v8865_v54, %v8865_v54 }
 0x555   : > { %v9116_v9 = vadd.f32 %v9115_v36, %v8861_v28  ;;  %v9377_v22 = vadd.f32 %v9376_v47, %v9250_v51  ;;  %v11481_v30 = vpop.f32.mrf.mxu1  ;;  %v8317_v7 = vpop.f32.mrf.mxu0  ;;  %v15914_v28 = vld [vmem:[#allocation93_spill] sm:$0xff] }
 0x556   : > { %8991 = vst [vmem:[%s14612_s24 + $0xe0] sm:$0xff] %v8863_v62  ;;  %v8866_v45 = vadd.f32 %v14605_v6, %v8731_v40  ;;  %v8729_v3 = vadd.f32 %v8304_v53, %v7799_v14  ;;  %v7804_v19 = vadd.f32 %v11481_v30, %v14317_v50  ;;  %v9253_v4 = vmul.f32 %v8863_v62, %v8863_v62 }
 0x557   : > { %v9117_v23 = vadd.f32 %v9116_v9, %v8862_v41  ;;  %v9378_v2 = vadd.f32 %v9377_v22, %v9251_v48  ;;  %v7387_v5 = vpop.f32.mrf.mxu1  ;;  %v11626_v44 = vpop.f32.mrf.mxu0 }
 0x558   : > { %8994 = vst [vmem:[%s14612_s24 + $0xf8] sm:$0xff] %v8866_v45  ;;  %v8864_v39 = vadd.f32 %v14605_v6, %v8729_v3  ;;  %v8734_v55 = vadd.f32 %v11625_v20, %v7804_v19  ;;  %v7802_v32 = vadd.f32 %v7387_v5, %v15914_v28  ;;  %v9256_v47 = vmul.f32 %v8866_v45, %v8866_v45 }
 0x559   : > { %v9379_v34 = vadd.f32 %v9378_v2, %v9252_v57  ;;  %v9118_v42 = vadd.f32 %v9117_v23, %v8863_v62  ;;  %v11482_v17 = vpop.f32.mrf.mxu1  ;;  %v8320_v0 = vpop.f32.mrf.mxu0  ;;  %v15919_v57 = vld [vmem:[#allocation103_spill] sm:$0xff] }
 0x55a   : > { %8992 = vst [vmem:[%s14612_s24 + $0xe8] sm:$0xff] %v8864_v39  ;;  %v9254_v13 = vmul.f32 %v8864_v39, %v8864_v39  ;;  %v8869_v50 = vadd.f32 %v14605_v6, %v8734_v55  ;;  %v8732_v41 = vadd.f32 %v8317_v7, %v7802_v32  ;;  %v7805_v27 = vadd.f32 %v11482_v17, %v15915_v49  ;;  %v15920_v32 = vld [vmem:[#allocation105_spill] sm:$0xff] }
 0x55b   : > { %v9380_v18 = vadd.f32 %v9379_v34, %v9253_v4  ;;  %v9119_v8 = vadd.f32 %v9118_v42, %v8864_v39  ;;  %v7390_v61 = vpop.f32.mrf.mxu1  ;;  %v11629_v21 = vpop.f32.mrf.mxu0 }
 0x55c   : > { %8997 = vst [vmem:[%s14612_s24 + $0x110] sm:$0xff] %v8869_v50  ;;  %v8867_v10 = vadd.f32 %v14605_v6, %v8732_v41  ;;  %v8735_v31 = vadd.f32 %v11626_v44, %v7805_v27  ;;  %v7803_v37 = vadd.f32 %v7390_v61, %v15916_v43  ;;  %v9259_v42 = vmul.f32 %v8869_v50, %v8869_v50  ;;  %v15921_v27 = vld [vmem:[#allocation107_spill] sm:$0xff] }
 0x55d   : > { %v9120_v35 = vadd.f32 %v9119_v8, %v8865_v54  ;;  %v9381_v24 = vadd.f32 %v9380_v18, %v9254_v13  ;;  %v11485_v56 = vpop.f32.mrf.mxu1  ;;  %v8333_v62 = vpop.f32.mrf.mxu0  ;;  %v15918_v54 = vld [vmem:[#allocation101_spill] sm:$0xff] }
 0x55e   : > { %8995 = vst [vmem:[%s14612_s24 + $0x100] sm:$0xff] %v8867_v10  ;;  %v8870_v51 = vadd.f32 %v14605_v6, %v8735_v31  ;;  %v8733_v26 = vadd.f32 %v8320_v0, %v7803_v37  ;;  %v7808_v1 = vadd.f32 %v11485_v56, %v15917_v11  ;;  %v9257_v22 = vmul.f32 %v8867_v10, %v8867_v10 }
 0x55f   : > { %v9121_v36 = vadd.f32 %v9120_v35, %v8866_v45  ;;  %v9382_v38 = vadd.f32 %v9381_v24, %v9255_v60  ;;  %v7403_v53 = vpop.f32.mrf.mxu1  ;;  %v11630_v20 = vpop.f32.mrf.mxu0 }
 0x560   : > { %8998 = vst [vmem:[%s14612_s24 + $0x118] sm:$0xff] %v8870_v51  ;;  %v8868_v40 = vadd.f32 %v14605_v6, %v8733_v26  ;;  %v8738_v52 = vadd.f32 %v11629_v21, %v7808_v1  ;;  %v7806_v14 = vadd.f32 %v7403_v53, %v15918_v54  ;;  %v9260_v8 = vmul.f32 %v8870_v51, %v8870_v51 }
 0x561   : > { %v9383_v48 = vadd.f32 %v9382_v38, %v9256_v47  ;;  %v9122_v9 = vadd.f32 %v9121_v36, %v8867_v10  ;;  %v11486_v30 = vpop.f32.mrf.mxu1  ;;  %v8336_v39 = vpop.f32.mrf.mxu0  ;;  %v15923_v47 = vld [vmem:[#allocation109_spill] sm:$0xff] }
 0x562   : > { %8996 = vst [vmem:[%s14612_s24 + $0x108] sm:$0xff] %v8868_v40  ;;  %v9258_v3 = vmul.f32 %v8868_v40, %v8868_v40  ;;  %v8873_v19 = vadd.f32 %v14605_v6, %v8738_v52  ;;  %v8736_v45 = vadd.f32 %v8333_v62, %v7806_v14  ;;  %v7809_v23 = vadd.f32 %v11486_v30, %v15919_v57  ;;  %v15924_v14 = vld [vmem:[#allocation50_spill] sm:$0xff] }
 0x563   : > { %v9384_v2 = vadd.f32 %v9383_v48, %v9257_v22  ;;  %v9123_v5 = vadd.f32 %v9122_v9, %v8868_v40  ;;  %v7406_v7 = vpop.f32.mrf.mxu1  ;;  %v11633_v13 = vpop.f32.mrf.mxu0 }
 0x564   : > { %9001 = vst [vmem:[%s14612_s24 + $0x130] sm:$0xff] %v8873_v19  ;;  %v8871_v55 = vadd.f32 %v14605_v6, %v8736_v45  ;;  %v8739_v28 = vadd.f32 %v11630_v20, %v7809_v23  ;;  %v7807_v34 = vadd.f32 %v7406_v7, %v15920_v32  ;;  %v9263_v9 = vmul.f32 %v8873_v19, %v8873_v19  ;;  %v15925_v23 = vld [vmem:[#allocation51_spill] sm:$0xff] }
 0x565   : > { %v9124_v4 = vadd.f32 %v9123_v5, %v8869_v50  ;;  %v9385_v17 = vadd.f32 %v9384_v2, %v9258_v3  ;;  %v11489_v44 = vpop.f32.mrf.mxu1  ;;  %v8349_v31 = vpop.f32.mrf.mxu0  ;;  %v15922_v50 = vld [vmem:[#allocation108_spill] sm:$0xff] }
 0x566   : > { %8999 = vst [vmem:[%s14612_s24 + $0x120] sm:$0xff] %v8871_v55  ;;  %v8874_v41 = vadd.f32 %v14605_v6, %v8739_v28  ;;  %v8737_v49 = vadd.f32 %v8336_v39, %v7807_v34  ;;  %v7812_v18 = vadd.f32 %v11489_v44, %v15921_v27  ;;  %v9261_v56 = vmul.f32 %v8871_v55, %v8871_v55 }
 0x567   : > { %v9125_v61 = vadd.f32 %v9124_v4, %v8870_v51  ;;  %v9386_v0 = vadd.f32 %v9385_v17, %v9259_v42  ;;  %v7419_v10 = vpop.f32.mrf.mxu1  ;;  %v11634_v26 = vpop.f32.mrf.mxu0 }
 0x568   : > { %9002 = vst [vmem:[%s14612_s24 + $0x138] sm:$0xff] %v8874_v41  ;;  %v8872_v43 = vadd.f32 %v14605_v6, %v8737_v49  ;;  %v8742_v37 = vadd.f32 %v11633_v13, %v7812_v18  ;;  %v7810_v60 = vadd.f32 %v7419_v10, %v15922_v50  ;;  %v9264_v5 = vmul.f32 %v8874_v41, %v8874_v41 }
 0x569   : > { %v9387_v35 = vadd.f32 %v9386_v0, %v9260_v8  ;;  %v9126_v24 = vadd.f32 %v9125_v61, %v8871_v55  ;;  %v11490_v21 = vpop.f32.mrf.mxu1  ;;  %v8352_v40 = vpop.f32.mrf.mxu0  ;;  %v15927_v8 = vld [vmem:[#allocation111_spill] sm:$0xff] }
 0x56a   : > { %9000 = vst [vmem:[%s14612_s24 + $0x128] sm:$0xff] %v8872_v43  ;;  %v9262_v11 = vmul.f32 %v8872_v43, %v8872_v43  ;;  %v8877_v1 = vadd.f32 %v14605_v6, %v8742_v37  ;;  %v8740_v51 = vadd.f32 %v8349_v31, %v7810_v60  ;;  %v7813_v36 = vadd.f32 %v11490_v21, %v15923_v47  ;;  %v15928_v60 = vld [vmem:[#allocation112_spill] sm:$0xff] }
 0x56b   : > { %v9388_v38 = vadd.f32 %v9387_v35, %v9261_v56  ;;  %v9127_v53 = vadd.f32 %v9126_v24, %v8872_v43  ;;  %v7422_v62 = vpop.f32.mrf.mxu1  ;;  %v11637_v3 = vpop.f32.mrf.mxu0 }
 0x56c   : > { %9005 = vst [vmem:[%s14612_s24 + $0x150] sm:$0xff] %v8877_v1  ;;  %v8875_v52 = vadd.f32 %v14605_v6, %v8740_v51  ;;  %v8743_v54 = vadd.f32 %v11634_v26, %v7813_v36  ;;  %v7811_v48 = vadd.f32 %v7422_v62, %v15924_v14  ;;  %v9267_v24 = vmul.f32 %v8877_v1, %v8877_v1  ;;  %v15929_v36 = vld [vmem:[#allocation113_spill] sm:$0xff]  ;;  %v14777_v14 = vld [vmem:[#allocation8] ss:$0 sm:$0xff] }
 0x56d   : > { %v9128_v22 = vadd.f32 %v9127_v53, %v8873_v19  ;;  %v9389_v30 = vadd.f32 %v9388_v38, %v9262_v11  ;;  %v11493_v20 = vpop.f32.mrf.mxu1  ;;  %v8365_v28 = vpop.f32.mrf.mxu0  ;;  %v15926_v19 = vld [vmem:[#allocation110_spill] sm:$0xff] }
 0x56e   : > { %9003 = vst [vmem:[%s14612_s24 + $0x140] sm:$0xff] %v8875_v52  ;;  %v8878_v45 = vadd.f32 %v14605_v6, %v8743_v54  ;;  %v8741_v57 = vadd.f32 %v8352_v40, %v7811_v48  ;;  %v7816_v2 = vadd.f32 %v11493_v20, %v15925_v23  ;;  %v9265_v44 = vmul.f32 %v8875_v52, %v8875_v52 }
 0x56f   : > { %v9129_v7 = vadd.f32 %v9128_v22, %v8874_v41  ;;  %v9390_v39 = vadd.f32 %v9389_v30, %v9263_v9  ;;  %v7435_v55 = vpop.f32.mrf.mxu1  ;;  %v11638_v49 = vpop.f32.mrf.mxu0  ;;  %v15930_v9 = vld [vmem:[#allocation54_spill] sm:$0xff] }
 0x570   : > { %9006 = vst [vmem:[%s14612_s24 + $0x158] sm:$0xff] %v8878_v45  ;;  %v8876_v32 = vadd.f32 %v14605_v6, %v8741_v57  ;;  %v8746_v34 = vadd.f32 %v11637_v3, %v7816_v2  ;;  %v7814_v42 = vadd.f32 %v7435_v55, %v15926_v19  ;;  %v9268_v53 = vmul.f32 %v8878_v45, %v8878_v45 }
 0x571   : > { %v9391_v4 = vadd.f32 %v9390_v39, %v9264_v5  ;;  %v9130_v17 = vadd.f32 %v9129_v7, %v8875_v52  ;;  %v11494_v13 = vpop.f32.mrf.mxu1  ;;  %v8368_v43 = vpop.f32.mrf.mxu0  ;;  %v15931_v5 = vld [vmem:[#allocation56_spill] sm:$0xff] }
 0x572   : > { %9004 = vst [vmem:[%s14612_s24 + $0x148] sm:$0xff] %v8876_v32  ;;  %v9266_v27 = vmul.f32 %v8876_v32, %v8876_v32  ;;  %v8881_v18 = vadd.f32 %v14605_v6, %v8746_v34  ;;  %v8744_v41 = vadd.f32 %v8365_v28, %v7814_v42  ;;  %v7817_v61 = vadd.f32 %v11494_v13, %v15927_v8  ;;  %v15932_v42 = vld [vmem:[#allocation58_spill] sm:$0xff] }
 0x573   : > { %v9392_v0 = vadd.f32 %v9391_v4, %v9265_v44  ;;  %v9131_v10 = vadd.f32 %v9130_v17, %v8876_v32  ;;  %v7438_v31 = vpop.f32.mrf.mxu1  ;;  %v11641_v11 = vpop.f32.mrf.mxu0 }
 0x574   : > { %9009 = vst [vmem:[%s14612_s24 + $0x170] sm:$0xff] %v8881_v18  ;;  %v8879_v37 = vadd.f32 %v14605_v6, %v8744_v41  ;;  %v8747_v50 = vadd.f32 %v11638_v49, %v7817_v61  ;;  %v7815_v35 = vadd.f32 %v7438_v31, %v15928_v60  ;;  %v9271_v17 = vmul.f32 %v8881_v18, %v8881_v18  ;;  %v15933_v61 = vld [vmem:[#allocation60_spill] sm:$0xff] }
 0x575   : > { %v9132_v56 = vadd.f32 %v9131_v10, %v8877_v1  ;;  %v9393_v21 = vadd.f32 %v9392_v0, %v9266_v27  ;;  %v11497_v26 = vpop.f32.mrf.mxu1  ;;  %v8381_v54 = vpop.f32.mrf.mxu0 }
 0x576   : > { %9007 = vst [vmem:[%s14612_s24 + $0x160] sm:$0xff] %v8879_v37  ;;  %v8882_v51 = vadd.f32 %v14605_v6, %v8747_v50  ;;  %v8745_v47 = vadd.f32 %v8368_v43, %v7815_v35  ;;  %v7820_v38 = vadd.f32 %v11497_v26, %v15929_v36  ;;  %v9269_v20 = vmul.f32 %v8879_v37, %v8879_v37 }
 0x577   : > { %v9133_v62 = vadd.f32 %v9132_v56, %v8878_v45  ;;  %v9394_v40 = vadd.f32 %v9393_v21, %v9267_v24  ;;  %v7451_v52 = vpop.f32.mrf.mxu1  ;;  %v11642_v57 = vpop.f32.mrf.mxu0 }
 0x578   : > { %9010 = vst [vmem:[%s14612_s24 + $0x178] sm:$0xff] %v8882_v51  ;;  %v8880_v1 = vadd.f32 %v14777_v14, %v8745_v47  ;;  %v8750_v48 = vadd.f32 %v11641_v11, %v7820_v38  ;;  %v7818_v22 = vadd.f32 %v7451_v52, %v15930_v9  ;;  %v9272_v10 = vmul.f32 %v8882_v51, %v8882_v51 }
 0x579   : > { %v9395_v30 = vadd.f32 %v9394_v40, %v9268_v53  ;;  %v9134_v6 = vadd.f32 %v9133_v62, %v8879_v37  ;;  %v11498_v3 = vpop.f32.mrf.mxu1  ;;  %v8384_v32 = vpop.f32.mrf.mxu0  ;;  %v15935_v53 = vld [vmem:[#allocation64_spill] sm:$0xff] }
 0x57a   : > { %9008 = vst [vmem:[%s14612_s24 + $0x168] sm:$0xff] %v8880_v1  ;;  %v9270_v23 = vmul.f32 %v8880_v1, %v8880_v1  ;;  %v8885_v45 = vadd.f32 %v14777_v14, %v8750_v48  ;;  %v8748_v2 = vadd.f32 %v8381_v54, %v7818_v22  ;;  %v7821_v7 = vadd.f32 %v11498_v3, %v15931_v5  ;;  %v15936_v22 = vld [vmem:[#allocation66_spill] sm:$0xff] }
 0x57b   : > { %v9396_v39 = vadd.f32 %v9395_v30, %v9269_v20  ;;  %v9135_v55 = vadd.f32 %v9134_v6, %v8880_v1  ;;  %v7454_v28 = vpop.f32.mrf.mxu1  ;;  %v11645_v27 = vpop.f32.mrf.mxu0 }
 0x57c   : > { %9013 = vst [vmem:[%s14612_s24 + $0x190] sm:$0xff] %v8885_v45  ;;  %v8883_v34 = vadd.f32 %v14777_v14, %v8748_v2  ;;  %v8751_v19 = vadd.f32 %v11642_v57, %v7821_v7  ;;  %v7819_v4 = vadd.f32 %v7454_v28, %v15932_v42  ;;  %v9275_v6 = vmul.f32 %v8885_v45, %v8885_v45  ;;  %v15937_v7 = vld [vmem:[#allocation68_spill] sm:$0xff] }
 0x57d   : > { %v9136_v44 = vadd.f32 %v9135_v55, %v8881_v18  ;;  %v9397_v13 = vadd.f32 %v9396_v39, %v9270_v23  ;;  %v11501_v49 = vpop.f32.mrf.mxu1  ;;  %v8397_v50 = vpop.f32.mrf.mxu0  ;;  %v15934_v18 = vld [vmem:[#allocation62_spill] sm:$0xff] }
 0x57e   : > { %9011 = vst [vmem:[%s14612_s24 + $0x180] sm:$0xff] %v8883_v34  ;;  %v8886_v41 = vadd.f32 %v14777_v14, %v8751_v19  ;;  %v8749_v8 = vadd.f32 %v8384_v32, %v7819_v4  ;;  %v7824_v0 = vadd.f32 %v11501_v49, %v15933_v61  ;;  %v9273_v26 = vmul.f32 %v8883_v34, %v8883_v34 }
 0x57f   : > { %v9137_v31 = vadd.f32 %v9136_v44, %v8882_v51  ;;  %v9398_v43 = vadd.f32 %v9397_v13, %v9271_v17  ;;  %v7467_v37 = vpop.f32.mrf.mxu1  ;;  %v11646_v47 = vpop.f32.mrf.mxu0 }
 0x580   : > { %9014 = vst [vmem:[%s14612_s24 + $0x198] sm:$0xff] %v8886_v41  ;;  %v8884_v60 = vadd.f32 %v14777_v14, %v8749_v8  ;;  %v8754_v35 = vadd.f32 %v11645_v27, %v7824_v0  ;;  %v7822_v24 = vadd.f32 %v7467_v37, %v15934_v18  ;;  %v9276_v55 = vmul.f32 %v8886_v41, %v8886_v41 }
 0x581   : > { %v9399_v56 = vadd.f32 %v9398_v43, %v9272_v10  ;;  %v9138_v21 = vadd.f32 %v9137_v31, %v8883_v34  ;;  %v11502_v11 = vpop.f32.mrf.mxu1  ;;  %v8400_v1 = vpop.f32.mrf.mxu0  ;;  %v15939_v10 = vld [vmem:[#allocation72_spill] sm:$0xff] }
 0x582   : > { %9012 = vst [vmem:[%s14612_s24 + $0x188] sm:$0xff] %v8884_v60  ;;  %v9274_v36 = vmul.f32 %v8884_v60, %v8884_v60  ;;  %v8889_v38 = vadd.f32 %v14777_v14, %v8754_v35  ;;  %v8752_v51 = vadd.f32 %v8397_v50, %v7822_v24  ;;  %v7825_v62 = vadd.f32 %v11502_v11, %v15935_v53  ;;  %v15940_v24 = vld [vmem:[#allocation74_spill] sm:$0xff] }
 0x583   : > { %v9400_v40 = vadd.f32 %v9399_v56, %v9273_v26  ;;  %v9139_v52 = vadd.f32 %v9138_v21, %v8884_v60  ;;  %v7470_v54 = vpop.f32.mrf.mxu1  ;;  %v11649_v23 = vpop.f32.mrf.mxu0 }
 0x584   : > { %9017 = vst [vmem:[%s14612_s24 + $0x1b0] sm:$0xff] %v8889_v38  ;;  %v8887_v48 = vadd.f32 %v14777_v14, %v8752_v51  ;;  %v8755_v9 = vadd.f32 %v11646_v47, %v7825_v62  ;;  %v7823_v30 = vadd.f32 %v7470_v54, %v15936_v22  ;;  %v9279_v21 = vmul.f32 %v8889_v38, %v8889_v38  ;;  %v15941_v62 = vld [vmem:[#allocation76_spill] sm:$0xff] }
 0x585   : > { %v9140_v20 = vadd.f32 %v9139_v52, %v8885_v45  ;;  %v9401_v3 = vadd.f32 %v9400_v40, %v9274_v36  ;;  %v11505_v57 = vpop.f32.mrf.mxu1  ;;  %v8413_v19 = vpop.f32.mrf.mxu0  ;;  %v15938_v45 = vld [vmem:[#allocation70_spill] sm:$0xff] }
 0x586   : > { %9015 = vst [vmem:[%s14612_s24 + $0x1a0] sm:$0xff] %v8887_v48  ;;  %v8890_v2 = vadd.f32 %v14777_v14, %v8755_v9  ;;  %v8753_v5 = vadd.f32 %v8400_v1, %v7823_v30  ;;  %v7828_v39 = vadd.f32 %v11505_v57, %v15937_v7  ;;  %v9277_v49 = vmul.f32 %v8887_v48, %v8887_v48 }
 0x587   : > { %v9141_v28 = vadd.f32 %v9140_v20, %v8886_v41  ;;  %v9402_v32 = vadd.f32 %v9401_v3, %v9275_v6  ;;  %v7483_v34 = vpop.f32.mrf.mxu1  ;;  %v11650_v8 = vpop.f32.mrf.mxu0 }
 0x588   : > { %9018 = vst [vmem:[%s14612_s24 + $0x1b8] sm:$0xff] %v8890_v2  ;;  %v8888_v42 = vadd.f32 %v14777_v14, %v8753_v5  ;;  %v8758_v4 = vadd.f32 %v11649_v23, %v7828_v39  ;;  %v7826_v17 = vadd.f32 %v7483_v34, %v15938_v45  ;;  %v9280_v52 = vmul.f32 %v8890_v2, %v8890_v2 }
 0x589   : > { %v9403_v44 = vadd.f32 %v9402_v32, %v9276_v55  ;;  %v9142_v13 = vadd.f32 %v9141_v28, %v8887_v48  ;;  %v11506_v27 = vpop.f32.mrf.mxu1  ;;  %v8416_v60 = vpop.f32.mrf.mxu0  ;;  %v15943_v55 = vld [vmem:[#allocation80_spill] sm:$0xff] }
 0x58a   : > { %9016 = vst [vmem:[%s14612_s24 + $0x1a8] sm:$0xff] %v8888_v42  ;;  %v9278_v61 = vmul.f32 %v8888_v42, %v8888_v42  ;;  %v8893_v0 = vadd.f32 %v14777_v14, %v8758_v4  ;;  %v8756_v41 = vadd.f32 %v8413_v19, %v7826_v17  ;;  %v7829_v31 = vadd.f32 %v11506_v27, %v15939_v10  ;;  %v15944_v17 = vld [vmem:[#allocation82_spill] sm:$0xff] }
 0x58b   : > { %v9404_v43 = vadd.f32 %v9403_v44, %v9277_v49  ;;  %v9143_v37 = vadd.f32 %v9142_v13, %v8888_v42  ;;  %v7486_v50 = vpop.f32.mrf.mxu1  ;;  %v11653_v36 = vpop.f32.mrf.mxu0 }
 0x58c   : > { %9021 = vst [vmem:[%s14612_s24 + $0x1d0] sm:$0xff] %v8893_v0  ;;  %v8891_v35 = vadd.f32 %v14777_v14, %v8756_v41  ;;  %v8759_v18 = vadd.f32 %v11650_v8, %v7829_v31  ;;  %v7827_v56 = vadd.f32 %v7486_v50, %v15940_v24  ;;  %v9283_v13 = vmul.f32 %v8893_v0, %v8893_v0  ;;  %v15945_v31 = vld [vmem:[#allocation84_spill] sm:$0xff] }
 0x58d   : > { %v9144_v26 = vadd.f32 %v9143_v37, %v8889_v38  ;;  %v9405_v11 = vadd.f32 %v9404_v43, %v9278_v61  ;;  %v11509_v47 = vpop.f32.mrf.mxu1  ;;  %v8429_v9 = vpop.f32.mrf.mxu0  ;;  %v15942_v38 = vld [vmem:[#allocation78_spill] sm:$0xff] }
 0x58e   : > { %9019 = vst [vmem:[%s14612_s24 + $0x1c0] sm:$0xff] %v8891_v35  ;;  %v8894_v51 = vadd.f32 %v14777_v14, %v8759_v18  ;;  %v8757_v53 = vadd.f32 %v8416_v60, %v7827_v56  ;;  %v7832_v40 = vadd.f32 %v11509_v47, %v15941_v62  ;;  %v9281_v57 = vmul.f32 %v8891_v35, %v8891_v35 }
 0x58f   : > { %v9145_v54 = vadd.f32 %v9144_v26, %v8890_v2  ;;  %v9406_v1 = vadd.f32 %v9405_v11, %v9279_v21  ;;  %v7499_v48 = vpop.f32.mrf.mxu1  ;;  %v11654_v5 = vpop.f32.mrf.mxu0 }
 0x590   : > { %9022 = vst [vmem:[%s14612_s24 + $0x1d8] sm:$0xff] %v8894_v51  ;;  %v8892_v22 = vadd.f32 %v14777_v14, %v8757_v53  ;;  %v8762_v30 = vadd.f32 %v11653_v36, %v7832_v40  ;;  %v7830_v6 = vadd.f32 %v7499_v48, %v15942_v38  ;;  %v9284_v37 = vmul.f32 %v8894_v51, %v8894_v51 }
 0x591   : > { %v9407_v20 = vadd.f32 %v9406_v1, %v9280_v52  ;;  %v9146_v3 = vadd.f32 %v9145_v54, %v8891_v35  ;;  %v11510_v23 = vpop.f32.mrf.mxu1  ;;  %v8432_v42 = vpop.f32.mrf.mxu0  ;;  %v15947_v52 = vld [vmem:[#allocation88_spill] sm:$0xff] }
 0x592   : > { %9020 = vst [vmem:[%s14612_s24 + $0x1c8] sm:$0xff] %v8892_v22  ;;  %v9282_v7 = vmul.f32 %v8892_v22, %v8892_v22  ;;  %v8897_v39 = vadd.f32 %v14777_v14, %v8762_v30  ;;  %v8760_v2 = vadd.f32 %v8429_v9, %v7830_v6  ;;  %v7833_v28 = vadd.f32 %v11510_v23, %v15943_v55  ;;  %v15948_v6 = vld [vmem:[#allocation90_spill] sm:$0xff] }
 0x593   : > { %v9408_v32 = vadd.f32 %v9407_v20, %v9281_v57  ;;  %v9147_v34 = vadd.f32 %v9146_v3, %v8892_v22  ;;  %v7502_v19 = vpop.f32.mrf.mxu1  ;;  %v11657_v61 = vpop.f32.mrf.mxu0 }
 0x594   : > { %9025 = vst [vmem:[%s14612_s24 + $0x1f0] sm:$0xff] %v8897_v39  ;;  %v8895_v4 = vadd.f32 %v14777_v14, %v8760_v2  ;;  %v8763_v45 = vadd.f32 %v11654_v5, %v7833_v28  ;;  %v7831_v44 = vadd.f32 %v7502_v19, %v15944_v17  ;;  %v9287_v3 = vmul.f32 %v8897_v39, %v8897_v39  ;;  %v15949_v28 = vld [vmem:[#allocation92_spill] sm:$0xff] }
 0x595   : > { %v9148_v49 = vadd.f32 %v9147_v34, %v8893_v0  ;;  %v9409_v27 = vadd.f32 %v9408_v32, %v9282_v7  ;;  %v11513_v8 = vpop.f32.mrf.mxu1  ;;  %v8445_v18 = vpop.f32.mrf.mxu0  ;;  %v15946_v0 = vld [vmem:[#allocation86_spill] sm:$0xff] }
 0x596   : > { %9023 = vst [vmem:[%s14612_s24 + $0x1e0] sm:$0xff] %v8895_v4  ;;  %v8898_v41 = vadd.f32 %v14777_v14, %v8763_v45  ;;  %v8761_v10 = vadd.f32 %v8432_v42, %v7831_v44  ;;  %v7836_v43 = vadd.f32 %v11513_v8, %v15945_v31  ;;  %v9285_v47 = vmul.f32 %v8895_v4, %v8895_v4 }
 0x597   : > { %v9149_v50 = vadd.f32 %v9148_v49, %v8894_v51  ;;  %v9410_v60 = vadd.f32 %v9409_v27, %v9283_v13  ;;  %v7515_v35 = vpop.f32.mrf.mxu1  ;;  %v11658_v53 = vpop.f32.mrf.mxu0 }
 0x598   : > { %9026 = vst [vmem:[%s14612_s24 + $0x1f8] sm:$0xff] %v8898_v41  ;;  %v8896_v24 = vadd.f32 %v14777_v14, %v8761_v10  ;;  %v8766_v56 = vadd.f32 %v11657_v61, %v7836_v43  ;;  %v7834_v21 = vadd.f32 %v7515_v35, %v15946_v0  ;;  %v9288_v34 = vmul.f32 %v8898_v41, %v8898_v41 }
 0x599   : > { %v9411_v26 = vadd.f32 %v9410_v60, %v9284_v37  ;;  %v9150_v11 = vadd.f32 %v9149_v50, %v8895_v4  ;;  %v11514_v36 = vpop.f32.mrf.mxu1  ;;  %v8448_v22 = vpop.f32.mrf.mxu0  ;;  %v15951_v37 = vld [vmem:[#allocation96_spill] sm:$0xff] }
 0x59a   : > { %9024 = vst [vmem:[%s14612_s24 + $0x1e8] sm:$0xff] %v8896_v24  ;;  %v9286_v62 = vmul.f32 %v8896_v24, %v8896_v24  ;;  %v8901_v40 = vadd.f32 %v14777_v14, %v8766_v56  ;;  %v8764_v51 = vadd.f32 %v8445_v18, %v7834_v21  ;;  %v7837_v54 = vadd.f32 %v11514_v36, %v15947_v52  ;;  %v15952_v21 = vld [vmem:[#allocation98_spill] sm:$0xff] }
 0x59b   : > { %v9412_v1 = vadd.f32 %v9411_v26, %v9285_v47  ;;  %v9151_v48 = vadd.f32 %v9150_v11, %v8896_v24  ;;  %v7518_v9 = vpop.f32.mrf.mxu1  ;;  %v11661_v7 = vpop.f32.mrf.mxu0 }
 0x59c   : > { %9029 = vst [vmem:[%s14612_s24 + $0x210] sm:$0xff] %v8901_v40  ;;  %v8899_v30 = vadd.f32 %v14777_v14, %v8764_v51  ;;  %v8767_v38 = vadd.f32 %v11658_v53, %v7837_v54  ;;  %v7835_v20 = vadd.f32 %v7518_v9, %v15948_v6  ;;  %v9291_v11 = vmul.f32 %v8901_v40, %v8901_v40  ;;  %v15953_v54 = vld [vmem:[#allocation100_spill] sm:$0xff] }
 0x59d   : > { %v9152_v57 = vadd.f32 %v9151_v48, %v8897_v39  ;;  %v9413_v23 = vadd.f32 %v9412_v1, %v9286_v62  ;;  %v11517_v5 = vpop.f32.mrf.mxu1  ;;  %v8461_v45 = vpop.f32.mrf.mxu0  ;;  %v15950_v39 = vld [vmem:[#allocation94_spill] sm:$0xff] }
 0x59e   : > { %9027 = vst [vmem:[%s14612_s24 + $0x200] sm:$0xff] %v8899_v30  ;;  %v8902_v2 = vadd.f32 %v14777_v14, %v8767_v38  ;;  %v8765_v55 = vadd.f32 %v8448_v22, %v7835_v20  ;;  %v7840_v32 = vadd.f32 %v11517_v5, %v15949_v28  ;;  %v9289_v8 = vmul.f32 %v8899_v30, %v8899_v30 }
 0x59f   : > { %v9153_v19 = vadd.f32 %v9152_v57, %v8898_v41  ;;  %v9414_v42 = vadd.f32 %v9413_v23, %v9287_v3  ;;  %v7531_v4 = vpop.f32.mrf.mxu1  ;;  %v11662_v10 = vpop.f32.mrf.mxu0 }
 0x5a0   : > { %9030 = vst [vmem:[%s14612_s24 + $0x218] sm:$0xff] %v8902_v2  ;;  %v8900_v17 = vadd.f32 %v14777_v14, %v8765_v55  ;;  %v8770_v44 = vadd.f32 %v11661_v7, %v7840_v32  ;;  %v7838_v13 = vadd.f32 %v7531_v4, %v15950_v39  ;;  %v9292_v48 = vmul.f32 %v8902_v2, %v8902_v2 }
 0x5a1   : > { %v9415_v49 = vadd.f32 %v9414_v42, %v9288_v34  ;;  %v9154_v27 = vadd.f32 %v9153_v19, %v8899_v30  ;;  %v11518_v61 = vpop.f32.mrf.mxu1  ;;  %v8464_v24 = vpop.f32.mrf.mxu0  ;;  %v15955_v34 = vld [vmem:[#allocation104_spill] sm:$0xff] }
 0x5a2   : > { %9028 = vst [vmem:[%s14612_s24 + $0x208] sm:$0xff] %v8900_v17  ;;  %v9290_v31 = vmul.f32 %v8900_v17, %v8900_v17  ;;  %v8905_v43 = vadd.f32 %v14777_v14, %v8770_v44  ;;  %v8768_v41 = vadd.f32 %v8461_v45, %v7838_v13  ;;  %v7841_v50 = vadd.f32 %v11518_v61, %v15951_v37  ;;  %v15956_v13 = vld [vmem:[#allocation106_spill] sm:$0xff] }
 0x5a3   : > { %v9416_v60 = vadd.f32 %v9415_v49, %v9289_v8  ;;  %v9155_v35 = vadd.f32 %v9154_v27, %v8900_v17  ;;  %v7534_v18 = vpop.f32.mrf.mxu1  ;;  %v11665_v62 = vpop.f32.mrf.mxu0 }
 0x5a4   : > { %9033 = vst [vmem:[%s14612_s24 + $0x230] sm:$0xff] %v8905_v43  ;;  %v8903_v56 = vadd.f32 %v14777_v14, %v8768_v41  ;;  %v8771_v0 = vadd.f32 %v11662_v10, %v7841_v50  ;;  %v7839_v26 = vadd.f32 %v7534_v18, %v15952_v21  ;;  %v9295_v27 = vmul.f32 %v8905_v43, %v8905_v43  ;;  %v15957_v50 = vld [vmem:[#allocation17_spill] sm:$0xff] }
 0x5a5   : > { %v9156_v47 = vadd.f32 %v9155_v35, %v8901_v40  ;;  %v9417_v36 = vadd.f32 %v9416_v60, %v9290_v31  ;;  %v11521_v53 = vpop.f32.mrf.mxu1  ;;  %v8477_v38 = vpop.f32.mrf.mxu0  ;;  %v15954_v40 = vld [vmem:[#allocation102_spill] sm:$0xff] }
 0x5a6   : > { %9031 = vst [vmem:[%s14612_s24 + $0x220] sm:$0xff] %v8903_v56  ;;  %v8906_v51 = vadd.f32 %v14777_v14, %v8771_v0  ;;  %v8769_v52 = vadd.f32 %v8464_v24, %v7839_v26  ;;  %v7844_v1 = vadd.f32 %v11521_v53, %v15953_v54  ;;  %v9293_v23 = vmul.f32 %v8903_v56, %v8903_v56 }
 0x5a7   : > { %v9418_v9 = vadd.f32 %v9417_v36, %v9291_v11  ;;  %v9157_v22 = vadd.f32 %v9156_v47, %v8902_v2  ;;  %v7547_v30 = vpop.f32.mrf.mxu1  ;;  %v11666_v55 = vpop.f32.mrf.mxu0 }
 0x5a8   : > { %9034 = vst [vmem:[%s14612_s24 + $0x238] sm:$0xff] %v8906_v51  ;;  %v8904_v6 = vadd.f32 %v14777_v14, %v8769_v52  ;;  %v8774_v20 = vadd.f32 %v11665_v62, %v7844_v1  ;;  %v7842_v3 = vadd.f32 %v7547_v30, %v15954_v40  ;;  %v9296_v35 = vmul.f32 %v8906_v51, %v8906_v51 }
 0x5a9   : > { %v9158_v57 = vadd.f32 %v9157_v22, %v8903_v56  ;;  %v9419_v5 = vadd.f32 %v9418_v9, %v9292_v48  ;;  %v11522_v7 = vpop.f32.mrf.mxu1  ;;  %v8480_v17 = vpop.f32.mrf.mxu0  ;;  %v15959_v48 = vld [vmem:[#allocation19_spill] sm:$0xff] }
 0x5aa   : > { %9032 = vst [vmem:[%s14612_s24 + $0x228] sm:$0xff] %v8904_v6  ;;  %v9294_v28 = vmul.f32 %v8904_v6, %v8904_v6  ;;  %v8909_v32 = vadd.f32 %v14777_v14, %v8774_v20  ;;  %v8772_v2 = vadd.f32 %v8477_v38, %v7842_v3  ;;  %v7845_v19 = vadd.f32 %v11522_v7, %v15955_v34  ;;  %v15960_v3 = vld [vmem:[#allocation20_spill] sm:$0xff] }
 0x5ab   : > { %v9420_v42 = vadd.f32 %v9419_v5, %v9293_v23  ;;  %v9159_v4 = vadd.f32 %v9158_v57, %v8904_v6  ;;  %v7550_v45 = vpop.f32.mrf.mxu1  ;;  %v11669_v31 = vpop.f32.mrf.mxu0 }
 0x5ac   : > { %9037 = vst [vmem:[%s14612_s24 + $0x250] sm:$0xff] %v8909_v32  ;;  %v8907_v44 = vadd.f32 %v14777_v14, %v8772_v2  ;;  %v8775_v39 = vadd.f32 %v11666_v55, %v7845_v19  ;;  %v7843_v49 = vadd.f32 %v7550_v45, %v15956_v13  ;;  %v9299_v23 = vmul.f32 %v8909_v32, %v8909_v32  ;;  %v15961_v19 = vld [vmem:[#allocation21_spill] sm:$0xff] }
 0x5ad   : > { %v9160_v8 = vadd.f32 %v9159_v4, %v8905_v43  ;;  %v9421_v61 = vadd.f32 %v9420_v42, %v9294_v28  ;;  %v11525_v10 = vpop.f32.mrf.mxu1  ;;  %v8493_v0 = vpop.f32.mrf.mxu0  ;;  %v15958_v43 = vld [vmem:[#allocation18_spill] sm:$0xff] }
 0x5ae   : > { %9035 = vst [vmem:[%s14612_s24 + $0x240] sm:$0xff] %v8907_v44  ;;  %v8910_v41 = vadd.f32 %v14777_v14, %v8775_v39  ;;  %v8773_v37 = vadd.f32 %v8480_v17, %v7843_v49  ;;  %v7848_v60 = vadd.f32 %v11525_v10, %v15957_v50  ;;  %v9297_v36 = vmul.f32 %v8907_v44, %v8907_v44 }
 0x5af   : > { %v9422_v18 = vadd.f32 %v9421_v61, %v9295_v27  ;;  %v9161_v24 = vadd.f32 %v9160_v8, %v8906_v51  ;;  %v7563_v56 = vpop.f32.mrf.mxu1  ;;  %v11670_v52 = vpop.f32.mrf.mxu0 }
 0x5b0   : > { %9038 = vst [vmem:[%s14612_s24 + $0x258] sm:$0xff] %v8910_v41  ;;  %v8908_v21 = vadd.f32 %v14777_v14, %v8773_v37  ;;  %v8778_v26 = vadd.f32 %v11669_v31, %v7848_v60  ;;  %v7846_v11 = vadd.f32 %v7563_v56, %v15958_v43  ;;  %v9300_v4 = vmul.f32 %v8910_v41, %v8910_v41 }
 0x5b1   : > { %v9162_v47 = vadd.f32 %v9161_v24, %v8907_v44  ;;  %v9423_v53 = vadd.f32 %v9422_v18, %v9296_v35  ;;  %v11526_v62 = vpop.f32.mrf.mxu1  ;;  %v8496_v6 = vpop.f32.mrf.mxu0  ;;  %v15963_v35 = vld [vmem:[#allocation23_spill] sm:$0xff] }
 0x5b2   : > { %9036 = vst [vmem:[%s14612_s24 + $0x248] sm:$0xff] %v8908_v21  ;;  %v9298_v54 = vmul.f32 %v8908_v21, %v8908_v21  ;;  %v8913_v1 = vadd.f32 %v14777_v14, %v8778_v26  ;;  %v8776_v51 = vadd.f32 %v8493_v0, %v7846_v11  ;;  %v7849_v9 = vadd.f32 %v11526_v62, %v15959_v48  ;;  %v15964_v11 = vld [vmem:[#allocation24_spill] sm:$0xff] }
 0x5b3   : > { %v9424_v22 = vadd.f32 %v9423_v53, %v9297_v36  ;;  %v9163_v30 = vadd.f32 %v9162_v47, %v8908_v21  ;;  %v7566_v38 = vpop.f32.mrf.mxu1  ;;  %v11673_v28 = vpop.f32.mrf.mxu0 }
 0x5b4   : > { %9041 = vst [vmem:[%s14612_s24 + $0x270] sm:$0xff] %v8913_v1  ;;  %v8911_v20 = vadd.f32 %v14777_v14, %v8776_v51  ;;  %v8779_v40 = vadd.f32 %v11670_v52, %v7849_v9  ;;  %v7847_v57 = vadd.f32 %v7566_v38, %v15960_v3  ;;  %v9303_v36 = vmul.f32 %v8913_v1, %v8913_v1  ;;  %v15965_v9 = vld [vmem:[#allocation25_spill] sm:$0xff] }
 0x5b5   : > { %v9164_v5 = vadd.f32 %v9163_v30, %v8909_v32  ;;  %v9425_v7 = vadd.f32 %v9424_v22, %v9298_v54  ;;  %v11529_v55 = vpop.f32.mrf.mxu1  ;;  %v8509_v39 = vpop.f32.mrf.mxu0  ;;  %v15962_v32 = vld [vmem:[#allocation22_spill] sm:$0xff] }
 0x5b6   : > { %9039 = vst [vmem:[%s14612_s24 + $0x260] sm:$0xff] %v8911_v20  ;;  %v8914_v2 = vadd.f32 %v14777_v14, %v8779_v40  ;;  %v8777_v34 = vadd.f32 %v8496_v6, %v7847_v57  ;;  %v7852_v42 = vadd.f32 %v11529_v55, %v15961_v19  ;;  %v9301_v61 = vmul.f32 %v8911_v20, %v8911_v20 }
 0x5b7   : > { %v9426_v45 = vadd.f32 %v9425_v7, %v9299_v23  ;;  %v9165_v17 = vadd.f32 %v9164_v5, %v8910_v41  ;;  %v7579_v44 = vpop.f32.mrf.mxu1  ;;  %v11674_v37 = vpop.f32.mrf.mxu0 }
 0x5b8   : > { %9042 = vst [vmem:[%s14612_s24 + $0x278] sm:$0xff] %v8914_v2  ;;  %v8912_v13 = vadd.f32 %v14777_v14, %v8777_v34  ;;  %v8782_v49 = vadd.f32 %v11673_v28, %v7852_v42  ;;  %v7850_v27 = vadd.f32 %v7579_v44, %v15962_v32  ;;  %v9304_v30 = vmul.f32 %v8914_v2, %v8914_v2 }
 0x5b9   : > { %v9166_v8 = vadd.f32 %v9165_v17, %v8911_v20  ;;  %v9427_v10 = vadd.f32 %v9426_v45, %v9300_v4  ;;  %v11530_v31 = vpop.f32.mrf.mxu1  ;;  %v8512_v21 = vpop.f32.mrf.mxu0  ;;  %v15967_v4 = vld [vmem:[#allocation28_spill] sm:$0xff] }
 0x5ba   : > { %9040 = vst [vmem:[%s14612_s24 + $0x268] sm:$0xff] %v8912_v13  ;;  %v9302_v50 = vmul.f32 %v8912_v13, %v8912_v13  ;;  %v8917_v60 = vadd.f32 %v14777_v14, %v8782_v49  ;;  %v8780_v41 = vadd.f32 %v8509_v39, %v7850_v27  ;;  %v7853_v18 = vadd.f32 %v11530_v31, %v15963_v35  ;;  %v15968_v27 = vld [vmem:[#allocation27_spill] sm:$0xff] }
 0x5bb   : > { %v9428_v24 = vadd.f32 %v9427_v10, %v9301_v61  ;;  %v9167_v56 = vadd.f32 %v9166_v8, %v8912_v13  ;;  %v7582_v0 = vpop.f32.mrf.mxu1  ;;  %v11677_v54 = vpop.f32.mrf.mxu0 }
 0x5bc   : > { %9045 = vst [vmem:[%s14612_s24 + $0x290] sm:$0xff] %v8917_v60  ;;  %v8915_v26 = vadd.f32 %v14777_v14, %v8780_v41  ;;  %v8783_v43 = vadd.f32 %v11674_v37, %v7853_v18  ;;  %v7851_v47 = vadd.f32 %v7582_v0, %v15964_v11  ;;  %v9307_v61 = vmul.f32 %v8917_v60, %v8917_v60  ;;  %v15969_v18 = vld [vmem:[#allocation29_spill] sm:$0xff] }
 0x5bd   : > { %v9168_v53 = vadd.f32 %v9167_v56, %v8913_v1  ;;  %v9429_v62 = vadd.f32 %v9428_v24, %v9302_v50  ;;  %v11533_v52 = vpop.f32.mrf.mxu1  ;;  %v8525_v40 = vpop.f32.mrf.mxu0  ;;  %v15966_v1 = vld [vmem:[#allocation26_spill] sm:$0xff] }
 0x5be   : > { %9043 = vst [vmem:[%s14612_s24 + $0x280] sm:$0xff] %v8915_v26  ;;  %v8918_v51 = vadd.f32 %v14777_v14, %v8783_v43  ;;  %v8781_v48 = vadd.f32 %v8512_v21, %v7851_v47  ;;  %v7856_v22 = vadd.f32 %v11533_v52, %v15965_v9  ;;  %v9305_v7 = vmul.f32 %v8915_v26, %v8915_v26 }
 0x5bf   : > { %v9430_v38 = vadd.f32 %v9429_v62, %v9303_v36  ;;  %v9169_v6 = vadd.f32 %v9168_v53, %v8914_v2  ;;  %v7595_v20 = vpop.f32.mrf.mxu1  ;;  %v11678_v34 = vpop.f32.mrf.mxu0 }
 0x5c0   : > { %9046 = vst [vmem:[%s14612_s24 + $0x298] sm:$0xff] %v8918_v51  ;;  %v8916_v3 = vadd.f32 %v14777_v14, %v8781_v48  ;;  %v8786_v57 = vadd.f32 %v11677_v54, %v7856_v22  ;;  %v7854_v23 = vadd.f32 %v7595_v20, %v15966_v1  ;;  %v9308_v56 = vmul.f32 %v8918_v51, %v8918_v51 }
 0x5c1   : > { %v9170_v5 = vadd.f32 %v9169_v6, %v8915_v26  ;;  %v9431_v55 = vadd.f32 %v9430_v38, %v9304_v30  ;;  %v11534_v28 = vpop.f32.mrf.mxu1  ;;  %v8528_v13 = vpop.f32.mrf.mxu0  ;;  %v15971_v30 = vld [vmem:[#allocation30_spill] sm:$0xff] }
 0x5c2   : > { %9044 = vst [vmem:[%s14612_s24 + $0x288] sm:$0xff] %v8916_v3  ;;  %v9306_v19 = vmul.f32 %v8916_v3, %v8916_v3  ;;  %v8921_v42 = vadd.f32 %v14777_v14, %v8786_v57  ;;  %v8784_v2 = vadd.f32 %v8525_v40, %v7854_v23  ;;  %v7857_v45 = vadd.f32 %v11534_v28, %v15967_v4  ;;  %v15972_v23 = vld [vmem:[#allocation33_spill] sm:$0xff] }
 0x5c3   : > { %v9432_v17 = vadd.f32 %v9431_v55, %v9305_v7  ;;  %v9171_v44 = vadd.f32 %v9170_v5, %v8916_v3  ;;  %v7598_v39 = vpop.f32.mrf.mxu1  ;;  %v11681_v50 = vpop.f32.mrf.mxu0 }
 0x5c4   : > { %9049 = vst [vmem:[%s14612_s24 + $0x2b0] sm:$0xff] %v8921_v42  ;;  %v8919_v49 = vadd.f32 %v14777_v14, %v8784_v2  ;;  %v8787_v32 = vadd.f32 %v11678_v34, %v7857_v45  ;;  %v7855_v8 = vadd.f32 %v7598_v39, %v15968_v27  ;;  %v9311_v7 = vmul.f32 %v8921_v42, %v8921_v42  ;;  %v15973_v45 = vld [vmem:[#allocation32_spill] sm:$0xff] }
 0x5c5   : > { %v9172_v10 = vadd.f32 %v9171_v44, %v8917_v60  ;;  %v9433_v31 = vadd.f32 %v9432_v17, %v9306_v19  ;;  %v11537_v37 = vpop.f32.mrf.mxu1  ;;  %v8541_v43 = vpop.f32.mrf.mxu0  ;;  %v15970_v60 = vld [vmem:[#allocation31_spill] sm:$0xff] }
 0x5c6   : > { %9047 = vst [vmem:[%s14612_s24 + $0x2a0] sm:$0xff] %v8919_v49  ;;  %v8922_v41 = vadd.f32 %v14777_v14, %v8787_v32  ;;  %v8785_v35 = vadd.f32 %v8528_v13, %v7855_v8  ;;  %v7860_v24 = vadd.f32 %v11537_v37, %v15969_v18  ;;  %v9309_v62 = vmul.f32 %v8919_v49, %v8919_v49 }
 0x5c7   : > { %v9434_v0 = vadd.f32 %v9433_v31, %v9307_v61  ;;  %v9173_v21 = vadd.f32 %v9172_v10, %v8918_v51  ;;  %v7611_v26 = vpop.f32.mrf.mxu1  ;;  %v11682_v48 = vpop.f32.mrf.mxu0 }
 0x5c8   : > { %9050 = vst [vmem:[%s14612_s24 + $0x2b8] sm:$0xff] %v8922_v41  ;;  %v8920_v11 = vadd.f32 %v14777_v14, %v8785_v35  ;;  %v8790_v47 = vadd.f32 %v11681_v50, %v7860_v24  ;;  %v7858_v36 = vadd.f32 %v7611_v26, %v15970_v60  ;;  %v9312_v44 = vmul.f32 %v8922_v41, %v8922_v41 }
 0x5c9   : > { %v9174_v53 = vadd.f32 %v9173_v21, %v8919_v49  ;;  %v9435_v52 = vadd.f32 %v9434_v0, %v9308_v56  ;;  %v11538_v54 = vpop.f32.mrf.mxu1  ;;  %v8544_v3 = vpop.f32.mrf.mxu0  ;;  %v15975_v56 = vld [vmem:[#allocation35_spill] sm:$0xff] }
 0x5ca   : > { %9048 = vst [vmem:[%s14612_s24 + $0x2a8] sm:$0xff] %v8920_v11  ;;  %v9310_v9 = vmul.f32 %v8920_v11, %v8920_v11  ;;  %v8925_v22 = vadd.f32 %v14777_v14, %v8790_v47  ;;  %v8788_v51 = vadd.f32 %v8541_v43, %v7858_v36  ;;  %v7861_v38 = vadd.f32 %v11538_v54, %v15971_v30  ;;  %v15976_v36 = vld [vmem:[#allocation36_spill] sm:$0xff] }
 0x5cb   : > { %v9436_v6 = vadd.f32 %v9435_v52, %v9309_v62  ;;  %v9175_v20 = vadd.f32 %v9174_v53, %v8920_v11  ;;  %v7614_v40 = vpop.f32.mrf.mxu1  ;;  %v11685_v19 = vpop.f32.mrf.mxu0 }
 0x5cc   : > { %9053 = vst [vmem:[%s14612_s24 + $0x2d0] sm:$0xff] %v8925_v22  ;;  %v8923_v57 = vadd.f32 %v14777_v14, %v8788_v51  ;;  %v8791_v1 = vadd.f32 %v11682_v48, %v7861_v38  ;;  %v7859_v5 = vadd.f32 %v7614_v40, %v15972_v23  ;;  %v9315_v62 = vmul.f32 %v8925_v22, %v8925_v22  ;;  %v15977_v38 = vld [vmem:[#allocation37_spill] sm:$0xff] }
 0x5cd   : > { %v9176_v55 = vadd.f32 %v9175_v20, %v8921_v42  ;;  %v9437_v28 = vadd.f32 %v9436_v6, %v9310_v9  ;;  %v11541_v34 = vpop.f32.mrf.mxu1  ;;  %v8557_v32 = vpop.f32.mrf.mxu0  ;;  %v15974_v42 = vld [vmem:[#allocation34_spill] sm:$0xff] }
 0x5ce   : > { %9051 = vst [vmem:[%s14612_s24 + $0x2c0] sm:$0xff] %v8923_v57  ;;  %v8926_v2 = vadd.f32 %v14777_v14, %v8791_v1  ;;  %v8789_v4 = vadd.f32 %v8544_v3, %v7859_v5  ;;  %v7864_v17 = vadd.f32 %v11541_v34, %v15973_v45  ;;  %v9313_v31 = vmul.f32 %v8923_v57, %v8923_v57 }
 0x5cf   : > { %v9438_v39 = vadd.f32 %v9437_v28, %v9311_v7  ;;  %v9177_v13 = vadd.f32 %v9176_v55, %v8922_v41  ;;  %v7627_v49 = vpop.f32.mrf.mxu1  ;;  %v11686_v35 = vpop.f32.mrf.mxu0 }
 0x5d0   : > { %9054 = vst [vmem:[%s14612_s24 + $0x2d8] sm:$0xff] %v8926_v2  ;;  %v8924_v27 = vadd.f32 %v14777_v14, %v8789_v4  ;;  %v8794_v8 = vadd.f32 %v11685_v19, %v7864_v17  ;;  %v7862_v61 = vadd.f32 %v7627_v49, %v15974_v42  ;;  %v9316_v20 = vmul.f32 %v8926_v2, %v8926_v2 }
 0x5d1   : > { %v9178_v10 = vadd.f32 %v9177_v13, %v8923_v57  ;;  %v9439_v37 = vadd.f32 %v9438_v39, %v9312_v44  ;;  %v11542_v50 = vpop.f32.mrf.mxu1  ;;  %v8560_v11 = vpop.f32.mrf.mxu0  ;;  %v15979_v44 = vld [vmem:[#allocation38_spill] sm:$0xff] }
 0x5d2   : > { %9052 = vst [vmem:[%s14612_s24 + $0x2c8] sm:$0xff] %v8924_v27  ;;  %v9314_v18 = vmul.f32 %v8924_v27, %v8924_v27  ;;  %v8929_v24 = vadd.f32 %v14777_v14, %v8794_v8  ;;  %v8792_v41 = vadd.f32 %v8557_v32, %v7862_v61  ;;  %v7865_v0 = vadd.f32 %v11542_v50, %v15975_v56  ;;  %v15980_v61 = vld [vmem:[#allocation41_spill] sm:$0xff] }
 0x5d3   : > { %v9440_v21 = vadd.f32 %v9439_v37, %v9313_v31  ;;  %v9179_v26 = vadd.f32 %v9178_v10, %v8924_v27  ;;  %v7630_v43 = vpop.f32.mrf.mxu1  ;;  %v11689_v9 = vpop.f32.mrf.mxu0 }
 0x5d4   : > { %9057 = vst [vmem:[%s14612_s24 + $0x2f0] sm:$0xff] %v8929_v24  ;;  %v8927_v47 = vadd.f32 %v14777_v14, %v8792_v41  ;;  %v8795_v60 = vadd.f32 %v11686_v35, %v7865_v0  ;;  %v7863_v53 = vadd.f32 %v7630_v43, %v15976_v36  ;;  %v9319_v31 = vmul.f32 %v8929_v24, %v8929_v24  ;;  %v15981_v0 = vld [vmem:[#allocation40_spill] sm:$0xff] }
 0x5d5   : > { %v9180_v52 = vadd.f32 %v9179_v26, %v8925_v22  ;;  %v9441_v54 = vadd.f32 %v9440_v21, %v9314_v18  ;;  %v11545_v48 = vpop.f32.mrf.mxu1  ;;  %v8573_v1 = vpop.f32.mrf.mxu0  ;;  %v15978_v22 = vld [vmem:[#allocation39_spill] sm:$0xff] }
 0x5d6   : > { %9055 = vst [vmem:[%s14612_s24 + $0x2e0] sm:$0xff] %v8927_v47  ;;  %v8930_v51 = vadd.f32 %v14777_v14, %v8795_v60  ;;  %v8793_v30 = vadd.f32 %v8560_v11, %v7863_v53  ;;  %v7868_v6 = vadd.f32 %v11545_v48, %v15977_v38  ;;  %v9317_v28 = vmul.f32 %v8927_v47, %v8927_v47 }
 0x5d7   : > { %v9442_v40 = vadd.f32 %v9441_v54, %v9315_v62  ;;  %v9181_v3 = vadd.f32 %v9180_v52, %v8926_v2  ;;  %v7643_v57 = vpop.f32.mrf.mxu1  ;;  %v11690_v4 = vpop.f32.mrf.mxu0 }
 0x5d8   : > { %9058 = vst [vmem:[%s14612_s24 + $0x2f8] sm:$0xff] %v8930_v51  ;;  %v8928_v23 = vadd.f32 %v14777_v14, %v8793_v30  ;;  %v8798_v5 = vadd.f32 %v11689_v9, %v7868_v6  ;;  %v7866_v7 = vadd.f32 %v7643_v57, %v15978_v22  ;;  %v9320_v26 = vmul.f32 %v8930_v51, %v8930_v51 }
 0x5d9   : > { %v9182_v55 = vadd.f32 %v9181_v3, %v8927_v47  ;;  %v9443_v34 = vadd.f32 %v9442_v40, %v9316_v20  ;;  %v11546_v19 = vpop.f32.mrf.mxu1  ;;  %v8576_v27 = vpop.f32.mrf.mxu0  ;;  %v15983_v20 = vld [vmem:[#allocation43_spill] sm:$0xff] }
 0x5da   : > { %9056 = vst [vmem:[%s14612_s24 + $0x2e8] sm:$0xff] %v8928_v23  ;;  %v9318_v45 = vmul.f32 %v8928_v23, %v8928_v23  ;;  %v8933_v17 = vadd.f32 %v14777_v14, %v8798_v5  ;;  %v8796_v2 = vadd.f32 %v8573_v1, %v7866_v7  ;;  %v7869_v39 = vadd.f32 %v11546_v19, %v15979_v44  ;;  %v15984_v7 = vld [vmem:[#allocation44_spill] sm:$0xff] }
 0x5db   : > { %v9444_v13 = vadd.f32 %v9443_v34, %v9317_v28  ;;  %v9183_v49 = vadd.f32 %v9182_v55, %v8928_v23  ;;  %v7646_v32 = vpop.f32.mrf.mxu1  ;;  %v11693_v18 = vpop.f32.mrf.mxu0 }
 0x5dc   : > { %9061 = vst [vmem:[%s14612_s24 + $0x310] sm:$0xff] %v8933_v17  ;;  %v8931_v8 = vadd.f32 %v14777_v14, %v8796_v2  ;;  %v8799_v42 = vadd.f32 %v11690_v4, %v7869_v39  ;;  %v7867_v10 = vadd.f32 %v7646_v32, %v15980_v61  ;;  %v9323_v28 = vmul.f32 %v8933_v17, %v8933_v17  ;;  %v15985_v39 = vld [vmem:[#allocation45_spill] sm:$0xff] }
 0x5dd   : > { %v9184_v37 = vadd.f32 %v9183_v49, %v8929_v24  ;;  %v9445_v50 = vadd.f32 %v9444_v13, %v9318_v45  ;;  %v11549_v35 = vpop.f32.mrf.mxu1  ;;  %v8589_v60 = vpop.f32.mrf.mxu0  ;;  %v15982_v24 = vld [vmem:[#allocation42_spill] sm:$0xff] }
 0x5de   : > { %9059 = vst [vmem:[%s14612_s24 + $0x300] sm:$0xff] %v8931_v8  ;;  %v8934_v41 = vadd.f32 %v14777_v14, %v8799_v42  ;;  %v8797_v56 = vadd.f32 %v8576_v27, %v7867_v10  ;;  %v7872_v21 = vadd.f32 %v11549_v35, %v15981_v0  ;;  %v9321_v54 = vmul.f32 %v8931_v8, %v8931_v8 }
 0x5df   : > { %v9446_v43 = vadd.f32 %v9445_v50, %v9319_v31  ;;  %v9185_v11 = vadd.f32 %v9184_v37, %v8930_v51  ;;  %v7659_v47 = vpop.f32.mrf.mxu1  ;;  %v11694_v30 = vpop.f32.mrf.mxu0 }
 0x5e0   : > { %9062 = vst [vmem:[%s14612_s24 + $0x318] sm:$0xff] %v8934_v41  ;;  %v8932_v36 = vadd.f32 %v14777_v14, %v8797_v56  ;;  %v8802_v53 = vadd.f32 %v11693_v18, %v7872_v21  ;;  %v7870_v62 = vadd.f32 %v7659_v47, %v15982_v24  ;;  %v9324_v49 = vmul.f32 %v8934_v41, %v8934_v41  ;;  %v14950_v21 = vld [vmem:[#allocation8] ss:$0 sm:$0xff] }
 0x5e1   : > { %v9186_v52 = vadd.f32 %v9185_v11, %v8931_v8  ;;  %v9447_v48 = vadd.f32 %v9446_v43, %v9320_v26  ;;  %v11550_v9 = vpop.f32.mrf.mxu1  ;;  %v8592_v23 = vpop.f32.mrf.mxu0  ;;  %v15987_v43 = vld [vmem:[#allocation47_spill] sm:$0xff] }
 0x5e2   : > { %9060 = vst [vmem:[%s14612_s24 + $0x308] sm:$0xff] %v8932_v36  ;;  %v9322_v38 = vmul.f32 %v8932_v36, %v8932_v36  ;;  %v8937_v6 = vadd.f32 %v14777_v14, %v8802_v53  ;;  %v8800_v51 = vadd.f32 %v8589_v60, %v7870_v62  ;;  %v7873_v40 = vadd.f32 %v11550_v9, %v15983_v20  ;;  %v15988_v62 = vld [vmem:[#allocation48_spill] sm:$0xff] }
 0x5e3   : > { %v9448_v3 = vadd.f32 %v9447_v48, %v9321_v54  ;;  %v9187_v57 = vadd.f32 %v9186_v52, %v8932_v36  ;;  %v7662_v1 = vpop.f32.mrf.mxu1  ;;  %v11697_v45 = vpop.f32.mrf.mxu0 }
 0x5e4   : > { %9065 = vst [vmem:[%s14612_s24 + $0x330] sm:$0xff] %v8937_v6  ;;  %v8935_v5 = vadd.f32 %v14777_v14, %v8800_v51  ;;  %v8803_v22 = vadd.f32 %v11694_v30, %v7873_v40  ;;  %v7871_v55 = vadd.f32 %v7662_v1, %v15984_v7  ;;  %v9327_v54 = vmul.f32 %v8937_v6, %v8937_v6  ;;  %v15989_v40 = vld [vmem:[#allocation49_spill] sm:$0xff] }
 0x5e5   : > { %v9188_v34 = vadd.f32 %v9187_v57, %v8933_v17  ;;  %v9449_v19 = vadd.f32 %v9448_v3, %v9322_v38  ;;  %v11553_v4 = vpop.f32.mrf.mxu1  ;;  %v8605_v42 = vpop.f32.mrf.mxu0  ;;  %v15986_v17 = vld [vmem:[#allocation46_spill] sm:$0xff] }
 0x5e6   : > { %9063 = vst [vmem:[%s14612_s24 + $0x320] sm:$0xff] %v8935_v5  ;;  %v8938_v2 = vadd.f32 %v14777_v14, %v8803_v22  ;;  %v8801_v44 = vadd.f32 %v8592_v23, %v7871_v55  ;;  %v7876_v13 = vadd.f32 %v11553_v4, %v15985_v39  ;;  %v9325_v50 = vmul.f32 %v8935_v5, %v8935_v5 }
 0x5e7   : > { %v9450_v32 = vadd.f32 %v9449_v19, %v9323_v28  ;;  %v9189_v27 = vadd.f32 %v9188_v34, %v8934_v41  ;;  %v7675_v8 = vpop.f32.mrf.mxu1  ;;  %v11698_v56 = vpop.f32.mrf.mxu0 }
 0x5e8   : > { %9066 = vst [vmem:[%s14612_s24 + $0x338] sm:$0xff] %v8938_v2  ;;  %v8936_v61 = vadd.f32 %v14777_v14, %v8801_v44  ;;  %v8806_v10 = vadd.f32 %v11697_v45, %v7876_v13  ;;  %v7874_v31 = vadd.f32 %v7675_v8, %v15986_v17  ;;  %v9328_v57 = vmul.f32 %v8938_v2, %v8938_v2 }
 0x5e9   : > { %v9190_v37 = vadd.f32 %v9189_v27, %v8935_v5  ;;  %v9451_v35 = vadd.f32 %v9450_v32, %v9324_v49  ;;  %v11554_v18 = vpop.f32.mrf.mxu1  ;;  %v8608_v36 = vpop.f32.mrf.mxu0  ;;  %v15991_v49 = vld [vmem:[#allocation115_spill] sm:$0xff] }
 0x5ea   : > { %9064 = vst [vmem:[%s14612_s24 + $0x328] sm:$0xff] %v8936_v61  ;;  %v9326_v0 = vmul.f32 %v8936_v61, %v8936_v61  ;;  %v8941_v41 = vadd.f32 %v14950_v21, %v8806_v10  ;;  %v8804_v26 = vadd.f32 %v8605_v42, %v7874_v31  ;;  %v7877_v11 = vadd.f32 %v11554_v18, %v15987_v43  ;;  %v15992_v31 = vld [vmem:[#allocation52_spill] sm:$0xff] }
 0x5eb   : > { %v9452_v14 = vadd.f32 %v9451_v35, %v9325_v50  ;;  %v9191_v47 = vadd.f32 %v9190_v37, %v8936_v61  ;;  %v7678_v60 = vpop.f32.mrf.mxu1  ;;  %v11701_v38 = vpop.f32.mrf.mxu0 }
 0x5ec   : > { %9069 = vst [vmem:[%s14612_s24 + $0x350] sm:$0xff] %v8941_v41  ;;  %v8939_v53 = vadd.f32 %v14950_v21, %v8804_v26  ;;  %v8807_v24 = vadd.f32 %v11698_v56, %v7877_v11  ;;  %v7875_v52 = vadd.f32 %v7678_v60, %v15988_v62  ;;  %v9331_v50 = vmul.f32 %v8941_v41, %v8941_v41  ;;  %v15993_v11 = vld [vmem:[#allocation53_spill] sm:$0xff] }
 0x5ed   : > { %v9192_v48 = vadd.f32 %v9191_v47, %v8937_v6  ;;  %v9453_v9 = vadd.f32 %v9452_v14, %v9326_v0  ;;  %v11557_v30 = vpop.f32.mrf.mxu1  ;;  %v8621_v22 = vpop.f32.mrf.mxu0  ;;  %v15990_v6 = vld [vmem:[#allocation114_spill] sm:$0xff] }
 0x5ee   : > { %9067 = vst [vmem:[%s14612_s24 + $0x340] sm:$0xff] %v8939_v53  ;;  %v8942_v51 = vadd.f32 %v14950_v21, %v8807_v24  ;;  %v8805_v20 = vadd.f32 %v8608_v36, %v7875_v52  ;;  %v7880_v3 = vadd.f32 %v11557_v30, %v15989_v40  ;;  %v9329_v19 = vmul.f32 %v8939_v53, %v8939_v53 }
 0x5ef   : > { %v9454_v1 = vadd.f32 %v9453_v9, %v9327_v54  ;;  %v9193_v23 = vadd.f32 %v9192_v48, %v8938_v2  ;;  %v7691_v5 = vpop.f32.mrf.mxu1  ;;  %v11702_v44 = vpop.f32.mrf.mxu0 }
 0x5f0   : > { %9070 = vst [vmem:[%s14612_s24 + $0x358] sm:$0xff] %v8942_v51  ;;  %v8940_v7 = vadd.f32 %v14950_v21, %v8805_v20  ;;  %v8810_v55 = vadd.f32 %v11701_v38, %v7880_v3  ;;  %v7878_v28 = vadd.f32 %v7691_v5, %v15990_v6  ;;  %v9332_v47 = vmul.f32 %v8942_v51, %v8942_v51 }
 0x5f1   : > { %v9194_v34 = vadd.f32 %v9193_v23, %v8939_v53  ;;  %v9455_v4 = vadd.f32 %v9454_v1, %v9328_v57  ;;  %v11558_v45 = vpop.f32.mrf.mxu1  ;;  %v8624_v61 = vpop.f32.mrf.mxu0  ;;  %v15995_v57 = vld [vmem:[#allocation57_spill] sm:$0xff] }
 0x5f2   : > { %9068 = vst [vmem:[%s14612_s24 + $0x348] sm:$0xff] %v8940_v7  ;;  %v9330_v39 = vmul.f32 %v8940_v7, %v8940_v7  ;;  %v8945_v13 = vadd.f32 %v14950_v21, %v8810_v55  ;;  %v8808_v2 = vadd.f32 %v8621_v22, %v7878_v28  ;;  %v7881_v32 = vadd.f32 %v11558_v45, %v15991_v49  ;;  %v15996_v28 = vld [vmem:[#allocation59_spill] sm:$0xff] }
 0x5f3   : > { %v9456_v27 = vadd.f32 %v9455_v4, %v9329_v19  ;;  %v9195_v8 = vadd.f32 %v9194_v34, %v8940_v7  ;;  %v7694_v42 = vpop.f32.mrf.mxu1  ;;  %v11705_v0 = vpop.f32.mrf.mxu0 }
 0x5f4   : > { %9073 = vst [vmem:[%s14612_s24 + $0x370] sm:$0xff] %v8945_v13  ;;  %v8943_v10 = vadd.f32 %v14950_v21, %v8808_v2  ;;  %v8811_v17 = vadd.f32 %v11702_v44, %v7881_v32  ;;  %v7879_v37 = vadd.f32 %v7694_v42, %v15992_v31  ;;  %v9335_v19 = vmul.f32 %v8945_v13, %v8945_v13 }
 0x5f5   : > { %v9196_v35 = vadd.f32 %v9195_v8, %v8941_v41  ;;  %v9457_v18 = vadd.f32 %v9456_v27, %v9330_v39  ;;  %v11561_v56 = vpop.f32.mrf.mxu1  ;;  %v8637_v24 = vpop.f32.mrf.mxu0  ;;  %v15994_v41 = vld [vmem:[#allocation55_spill] sm:$0xff] }
 0x5f6   : > { %9071 = vst [vmem:[%s14612_s24 + $0x360] sm:$0xff] %v8943_v10  ;;  %v8946_v26 = vadd.f32 %v14950_v21, %v8811_v17  ;;  %v8809_v43 = vadd.f32 %v8624_v61, %v7879_v37  ;;  %v7884_v14 = vadd.f32 %v11561_v56, %v15993_v11  ;;  %v9333_v9 = vmul.f32 %v8943_v10, %v8943_v10 }
 0x5f7   : > { %v9458_v60 = vadd.f32 %v9457_v18, %v9331_v50  ;;  %v9197_v36 = vadd.f32 %v9196_v35, %v8942_v51  ;;  %v7707_v53 = vpop.f32.mrf.mxu1  ;;  %v11706_v20 = vpop.f32.mrf.mxu0 }
 0x5f8   : > { %9074 = vst [vmem:[%s14612_s24 + $0x378] sm:$0xff] %v8946_v26  ;;  %v8944_v62 = vadd.f32 %v14950_v21, %v8809_v43  ;;  %v8814_v52 = vadd.f32 %v11705_v0, %v7884_v14  ;;  %v7882_v54 = vadd.f32 %v7707_v53, %v15994_v41  ;;  %v9336_v27 = vmul.f32 %v8946_v26, %v8946_v26 }
 0x5f9   : > { %v9198_v48 = vadd.f32 %v9197_v36, %v8943_v10  ;;  %v9459_v30 = vadd.f32 %v9458_v60, %v9332_v47  ;;  %v11562_v38 = vpop.f32.mrf.mxu1  ;;  %v8640_v7 = vpop.f32.mrf.mxu0 }
 0x5fa   : > { %9072 = vst [vmem:[%s14612_s24 + $0x368] sm:$0xff] %v8944_v62  ;;  %v9334_v40 = vmul.f32 %v8944_v62, %v8944_v62  ;;  %v8949_v3 = vadd.f32 %v14950_v21, %v8814_v52  ;;  %v8812_v51 = vadd.f32 %v8637_v24, %v7882_v54  ;;  %v7885_v1 = vadd.f32 %v11562_v38, %v15995_v57 }
 0x5fb   : > { %v9460_v23 = vadd.f32 %v9459_v30, %v9333_v9  ;;  %v9199_v5 = vadd.f32 %v9198_v48, %v8944_v62  ;;  %v7710_v22 = vpop.f32.mrf.mxu1  ;;  %v11709_v39 = vpop.f32.mrf.mxu0 }
 0x5fc   : > { %9077 = vst [vmem:[%s14612_s24 + $0x390] sm:$0xff] %v8949_v3  ;;  %v8947_v55 = vadd.f32 %v14950_v21, %v8812_v51  ;;  %v8815_v6 = vadd.f32 %v11706_v20, %v7885_v1  ;;  %v7883_v34 = vadd.f32 %v7710_v22, %v15996_v28  ;;  %v9339_v24 = vmul.f32 %v8949_v3, %v8949_v3 }
 0x5fd   : > { %v9200_v4 = vadd.f32 %v9199_v5, %v8945_v13  ;;  %v9461_v45 = vadd.f32 %v9460_v23, %v9334_v40  ;;  %v11565_v44 = vpop.f32.mrf.mxu1  ;;  %v8653_v10 = vpop.f32.mrf.mxu0 }
 0x5fe   : > { %9075 = vst [vmem:[%s14612_s24 + $0x380] sm:$0xff] %v8947_v55  ;;  %v8950_v2 = vadd.f32 %v14950_v21, %v8815_v6  ;;  %v8813_v49 = vadd.f32 %v8640_v7, %v7883_v34  ;;  %v7888_v32 = vadd.f32 %v11565_v44, %v14569_v29  ;;  %v9337_v50 = vmul.f32 %v8947_v55, %v8947_v55 }
 0x5ff   : > { %v9462_v8 = vadd.f32 %v9461_v45, %v9335_v19  ;;  %v9201_v42 = vadd.f32 %v9200_v4, %v8946_v26  ;;  %v7723_v61 = vpop.f32.mrf.mxu1  ;;  %v11710_v56 = vpop.f32.mrf.mxu0 }
 0x600   : > { %9078 = vst [vmem:[%s14612_s24 + $0x398] sm:$0xff] %v8950_v2  ;;  %v8948_v17 = vadd.f32 %v14950_v21, %v8813_v49  ;;  %v8818_v31 = vadd.f32 %v11709_v39, %v7888_v32  ;;  %v7886_v13 = vadd.f32 %v7723_v61, %v14572_v46  ;;  %v9340_v30 = vmul.f32 %v8950_v2, %v8950_v2 }
 0x601   : > { %v9202_v37 = vadd.f32 %v9201_v42, %v8947_v55  ;;  %v9463_v35 = vadd.f32 %v9462_v8, %v9336_v27  ;;  %v11566_v18 = vpop.f32.mrf.mxu1  ;;  %v8656_v60 = vpop.f32.mrf.mxu0 }
 0x602   : > { %9076 = vst [vmem:[%s14612_s24 + $0x388] sm:$0xff] %v8948_v17  ;;  %v9338_v0 = vmul.f32 %v8948_v17, %v8948_v17  ;;  %v8953_v29 = vadd.f32 %v14950_v21, %v8818_v31  ;;  %v8816_v26 = vadd.f32 %v8653_v10, %v7886_v13  ;;  %v7889_v43 = vadd.f32 %v11566_v18, %v14575_v15 }
 0x603   : > { %v9464_v11 = vadd.f32 %v9463_v35, %v9337_v50  ;;  %v9203_v14 = vadd.f32 %v9202_v37, %v8948_v17  ;;  %v7726_v47 = vpop.f32.mrf.mxu1  ;;  %v11713_v54 = vpop.f32.mrf.mxu0 }
 0x604   : > { %9081 = vst [vmem:[%s14612_s24 + $0x3b0] sm:$0xff] %v8953_v29  ;;  %v8951_v46 = vadd.f32 %v14950_v21, %v8816_v26  ;;  %v8819_v36 = vadd.f32 %v11710_v56, %v7889_v43  ;;  %v7887_v53 = vadd.f32 %v7726_v47, %v14578_v58 }
 0x605   : > { %v9204_v62 = vadd.f32 %v9203_v14, %v8949_v3  ;;  %v9465_v52 = vadd.f32 %v9464_v11, %v9338_v0  ;;  %v11569_v41 = vpop.f32.mrf.mxu1  ;;  %v8669_v51 = vpop.f32.mrf.mxu0  ;;  %v15997_v14 = vld [vmem:[#allocation61_spill] sm:$0xff] }
 0x606   : > { %9079 = vst [vmem:[%s14612_s24 + $0x3a0] sm:$0xff] %v8951_v46  ;;  %v8954_v48 = vadd.f32 %v14950_v21, %v8819_v36  ;;  %v8817_v15 = vadd.f32 %v8656_v60, %v7887_v53  ;;  %v7892_v9 = vadd.f32 %v11569_v41, %v14581_v16  ;;  %v9341_v23 = vmul.f32 %v8951_v46, %v8951_v46 }
 0x607   : > { %v9466_v38 = vadd.f32 %v9465_v52, %v9339_v24  ;;  %v9205_v20 = vadd.f32 %v9204_v62, %v8950_v2  ;;  %v7739_v40 = vpop.f32.mrf.mxu1  ;;  %v11714_v7 = vpop.f32.mrf.mxu0  ;;  %v9343_v2 = vmul.f32 %v8953_v29, %v8953_v29  ;;  %v15998_v24 = vld [vmem:[#allocation63_spill] sm:$0xff] }
 0x608   : > { %9082 = vst [vmem:[%s14612_s24 + $0x3b8] sm:$0xff] %v8954_v48  ;;  %v8952_v58 = vadd.f32 %v14950_v21, %v8817_v15  ;;  %v8822_v57 = vadd.f32 %v11713_v54, %v7892_v9  ;;  %v7890_v3 = vadd.f32 %v7739_v40, %v14584_v33  ;;  %v9344_v10 = vmul.f32 %v8954_v48, %v8954_v48 }
 0x609   : > { %v9206_v1 = vadd.f32 %v9205_v20, %v8951_v46  ;;  %v9467_v5 = vadd.f32 %v9466_v38, %v9340_v30  ;;  %v11570_v22 = vpop.f32.mrf.mxu1  ;;  %v8672_v45 = vpop.f32.mrf.mxu0 }
 0x60a   : > { %9080 = vst [vmem:[%s14612_s24 + $0x3a8] sm:$0xff] %v8952_v58  ;;  %v9342_v55 = vmul.f32 %v8952_v58, %v8952_v58  ;;  %v8957_v16 = vadd.f32 %v14950_v21, %v8822_v57  ;;  %v8820_v6 = vadd.f32 %v8669_v51, %v7890_v3  ;;  %v7893_v28 = vadd.f32 %v11570_v22, %v14587_v63 }
 0x60b   : > { %v9468_v34 = vadd.f32 %v9467_v5, %v9341_v23  ;;  %v9207_v19 = vadd.f32 %v9206_v1, %v8952_v58  ;;  %v7742_v4 = vpop.f32.mrf.mxu1  ;;  %v11717_v8 = vpop.f32.mrf.mxu0 }
 0x60c   : > { %9085 = vst [vmem:[%s14612_s24 + $0x3d0] sm:$0xff] %v8957_v16  ;;  %v8955_v33 = vadd.f32 %v14950_v21, %v8820_v6  ;;  %v8823_v44 = vadd.f32 %v11714_v7, %v7893_v28  ;;  %v7891_v39 = vadd.f32 %v7742_v4, %v14590_v25  ;;  %v9347_v52 = vmul.f32 %v8957_v16, %v8957_v16 }
 0x60d   : > { %v9208_v49 = vadd.f32 %v9207_v19, %v8953_v29  ;;  %v9469_v32 = vadd.f32 %v9468_v34, %v9342_v55  ;;  %v11573_v27 = vpop.f32.mrf.mxu1  ;;  %v8685_v37 = vpop.f32.mrf.mxu0 }
 0x60e   : > { %9083 = vst [vmem:[%s14612_s24 + $0x3c0] sm:$0xff] %v8955_v33  ;;  %v8958_v42 = vadd.f32 %v14950_v21, %v8823_v44  ;;  %v8821_v63 = vadd.f32 %v8672_v45, %v7891_v39  ;;  %v7896_v61 = vadd.f32 %v11573_v27, %v14593_v12  ;;  %v9345_v56 = vmul.f32 %v8955_v33, %v8955_v33 }
 0x60f   : > { %v9470_v17 = vadd.f32 %v9469_v32, %v9343_v2  ;;  %v9209_v31 = vadd.f32 %v9208_v49, %v8954_v48  ;;  %v7755_v13 = vpop.f32.mrf.mxu1  ;;  %v11718_v26 = vpop.f32.mrf.mxu0 }
 0x610   : > { %9086 = vst [vmem:[%s14612_s24 + $0x3d8] sm:$0xff] %v8958_v42  ;;  %v8956_v25 = vadd.f32 %v14950_v21, %v8821_v63  ;;  %v8826_v50 = vadd.f32 %v11717_v8, %v7896_v61  ;;  %v7894_v35 = vadd.f32 %v7755_v13, %v14596_v59  ;;  %v9348_v30 = vmul.f32 %v8958_v42, %v8958_v42 }
 0x611   : > { %v9210_v18 = vadd.f32 %v9209_v31, %v8955_v33  ;;  %v9471_v0 = vadd.f32 %v9470_v17, %v9344_v10  ;;  %v11574_v29 = vpop.f32.mrf.mxu1  ;;  %v8688_v48 = vpop.f32.mrf.mxu0 }
 0x612   : > { %9084 = vst [vmem:[%s14612_s24 + $0x3c8] sm:$0xff] %v8956_v25  ;;  %v9346_v12 = vmul.f32 %v8956_v25, %v8956_v25  ;;  %v8961_v43 = vadd.f32 %v14950_v21, %v8826_v50  ;;  %v8824_v11 = vadd.f32 %v8685_v37, %v7894_v35  ;;  %v7897_v47 = vadd.f32 %v11574_v29, %v15997_v14 }
 0x613   : > { %v9472_v60 = vadd.f32 %v9471_v0, %v9345_v56  ;;  %v9211_v46 = vadd.f32 %v9210_v18, %v8956_v25  ;;  %v7758_v36 = vpop.f32.mrf.mxu1 }
 0x614   : > { %9089 = vst [vmem:[%s14612_s24 + $0x3f0] sm:$0xff] %v8961_v43  ;;  %v8959_v59 = vadd.f32 %v14950_v21, %v8824_v11  ;;  %v8827_v53 = vadd.f32 %v11718_v26, %v7897_v47  ;;  %v7895_v62 = vadd.f32 %v7758_v36, %v15998_v24 }
 0x615   : > { %v9212_v41 = vadd.f32 %v9211_v46, %v8957_v16  ;;  %v9473_v54 = vadd.f32 %v9472_v60, %v9346_v12 }
 0x616   : > { %9087 = vst [vmem:[%s14612_s24 + $0x3e0] sm:$0xff] %v8959_v59  ;;  %v8962_v15 = vadd.f32 %v14950_v21, %v8827_v53  ;;  %v8825_v9 = vadd.f32 %v8688_v48, %v7895_v62  ;;  %v9349_v58 = vmul.f32 %v8959_v59, %v8959_v59 }
 0x617   : > { %v9474_v38 = vadd.f32 %v9473_v54, %v9347_v52  ;;  %v9213_v20 = vadd.f32 %v9212_v41, %v8958_v42 }
 0x618   : > { %9090 = vst [vmem:[%s14612_s24 + $0x3f8] sm:$0xff] %v8962_v15  ;;  %v8960_v40 = vadd.f32 %v14950_v21, %v8825_v9 }
 0x619   : > { %v9214_v51 = vadd.f32 %v9213_v20, %v8959_v59  ;;  %v9475_v57 = vadd.f32 %v9474_v38, %v9348_v30 }
 0x61a   : > { %9088 = vst [vmem:[%s14612_s24 + $0x3e8] sm:$0xff] %v8960_v40  ;;  %v9350_v3 = vmul.f32 %v8960_v40, %v8960_v40 }
 0x61b   : > { %v9476_v1 = vadd.f32 %v9475_v57, %v9349_v58  ;;  %v9215_v23 = vadd.f32 %v9214_v51, %v8960_v40 }
 0x61c   : > { %11988 = shalt.err (!%p11985_p13)
}
 0x61d   : > { %s11989_s6 = scalar_lea.hbm %s15024_s14, 16384  ;;  %s11993_s24 = scalar_lea.hbm %s15142_s3, 65536 }
 0x61e   : > { %p11990_p3 = scmp.ne.s32.totalorder %s15024_s14, %s11989_s6  ;;  %p11994_p4 = scmp.lt.s32.totalorder %s15024_s14, %s15142_s3 }
 0x61f   : > { %p11995_p6 = scmp.lt.s32.totalorder %s11993_s24, %s11989_s6 }
 0x620   : > { %p11991_p5 = pnand %p11990_p3, %p15999_p10 }
 0x621   : > { %p11996_p8 = por %p11995_p6, %p11994_p4 }
 0x622   : > { %p11992_p0 = pneg %p11991_p5 }
 0x624   : > { %p11997_p9 = pnand %p11996_p8, %p11992_p0 }
 0x626   : > { %12000 = shalt.err (!%p11997_p9)
}
 0x627   : > { %s12110_s13 = smov 128   ;;  %s12111_s11 = smov 8   ;;  %v9351_v21 = vmul.f32 %v8961_v43, %v8961_v43  ;;  %v9216_v5 = vadd.f32 %v9215_v23, %v8961_v43  ;;  %v9477_v22 = vadd.f32 %v9476_v1, %v9350_v3  ;;  %v9352_v7 = vmul.f32 %v8962_v15, %v8962_v15 }
 0x628   : > { %11745 = dma.vmem_to_hbm [thread:$0]  (%p15999_p10), %s15026_s10, 16384, %s15024_s14, %s9488_s9, %s12110_s13, %s12110_s13, %s12111_s11  }
 0x629   : > { %v9217_v55 = vadd.f32 %v9216_v5, %v8962_v15  ;;  %v9478_v16 = vadd.f32 %v9477_v22, %v9351_v21  ;;  %s9492_s17 = sand.u32 1, %s12165_s22   ;;  %s9769_s10 = sshll.u32 %s12165_s22, 4 }
 0x62a   : > { %s279_s14 = scalar_lea.vmem [#allocation10], %s12272_s7  ;;  %s285_s15 = scalar_lea.vmem [#allocation12], %s12272_s7 }
 0x62b   : > { %v9218_v6 = vrot.slane %v9217_v55, 4  ;;  %v9479_v28 = vadd.f32 %v9478_v16, %v9352_v7  ;;  %s9525_s9 = sshll.u32 %s279_s14, 4  ;;  %s9538_s27 = sshll.u32 %s285_s15, 4  ;;  %s15065_s9 = int_to_ptr.vmem [resolvable:$true] %s9525_s9  ;;  %s15072_s27 = int_to_ptr.vmem [resolvable:$true] %s9538_s27 }
 0x62c   : > { %s15063_s30 = scalar_lea.hbm %s15143_s4, %s9769_s10  ;;  %s15070_s26 = scalar_lea.hbm %s15144_s5, %s9769_s10 }
 0x62d   : > { %v9219_v34 = vadd.f32 %v9218_v6, %v9217_v55  ;;  %v9480_v19 = vrot.slane %v9479_v28, 4  ;;  %s15074_s12 = scalar_lea.sflag [#allocation11], %s9492_s17  ;;  %s12001_s13 = scalar_lea.vmem %s15065_s9, 16 }
 0x62e   : > { %p12002_p1 = scmp.ne.s32.totalorder %s15065_s9, %s12001_s13  ;;  %s12112_s11 = smov [#allocation10]  }
 0x62f   : > { %v9481_v4 = vadd.f32 %v9480_v19, %v9479_v28  ;;  %v9220_v45 = vrot.slane %v9219_v34, 2  ;;  %s12005_s6 = sshll.u32 %s12112_s11, 4  ;;  %s12006_s6 = int_to_ptr.vmem [resolvable:$false] %s12005_s6 }
 0x630   : > { %p12003_p2 = pnand %p12002_p1, %p15999_p10  ;;  %s12007_s8 = scalar_lea.vmem %s12006_s6, 32 }
 0x631   : > { %v9221_v33 = vadd.f32 %v9220_v45, %v9219_v34  ;;  %v9482_v44 = vrot.slane %v9481_v4, 2  ;;  %p12008_p7 = scmp.lt.s32.totalorder %s15065_s9, %s12006_s6  ;;  %p12009_p12 = scmp.lt.s32.totalorder %s12007_s8, %s12001_s13 }
 0x632   : > { %p12004_p11 = pneg %p12003_p2 }
 0x633   : > { %v9222_v39 = vrot.slane %v9221_v33, 1  ;;  %v9483_v2 = vadd.f32 %v9482_v44, %v9481_v4  ;;  %p12010_p13 = por %p12009_p12, %p12008_p7 }
 0x635   : > { %v9223_v49 = vadd.f32 %v9222_v39, %v9221_v33  ;;  %v9484_v32 = vrot.slane %v9483_v2, 1  ;;  %p12011_p3 = pnand %p12010_p13, %p12004_p11 }
 0x637   : > { %9224 = vst [vmem:[%s279_s14] sm:$0x1] %v9223_v49  ;;  %v9485_v27 = vadd.f32 %v9484_v32, %v9483_v2 }
 0x638   : > { %12014 = shalt.err (!%p12011_p3)
}
 0x639   : > { %s12015_s17 = scalar_lea.hbm %s15063_s30, 16  ;;  %s12019_s22 = scalar_lea.hbm %s15143_s4, 64 }
 0x63a   : > { %p12016_p5 = scmp.ne.s32.totalorder %s15063_s30, %s12015_s17  ;;  %p12020_p6 = scmp.lt.s32.totalorder %s15063_s30, %s15143_s4 }
 0x63b   : > { %p12021_p8 = scmp.lt.s32.totalorder %s12019_s22, %s12015_s17 }
 0x63c   : > { %p12017_p0 = pnand %p12016_p5, %p15999_p10 }
 0x63d   : > { %p12022_p9 = por %p12021_p8, %p12020_p6 }
 0x63e   : > { %p12018_p4 = pneg %p12017_p0 }
 0x640   : > { %p12023_p1 = pnand %p12022_p9, %p12018_p4 }
 0x642   : > { %12026 = shalt.err (!%p12023_p1)
}
 0x643   : > { %11746 = dma.vmem_to_hbm [thread:$0]  (%p15999_p10), %s15065_s9, 16, %s15063_s30, %s15074_s12   ;;  %9486 = vst [vmem:[%s285_s15] sm:$0x1] %v9485_v27 }
 0x644   : > { %s12027_s13 = scalar_lea.vmem %s15072_s27, 16  ;;  %s12113_s6 = smov [#allocation12]  }
 0x645   : > { %p12028_p2 = scmp.ne.s32.totalorder %s15072_s27, %s12027_s13  ;;  %s12031_s8 = sshll.u32 %s12113_s6, 4  ;;  %s12032_s8 = int_to_ptr.vmem [resolvable:$false] %s12031_s8 }
 0x646   : > { %s12033_s17 = scalar_lea.vmem %s12032_s8, 32  ;;  %p12034_p12 = scmp.lt.s32.totalorder %s15072_s27, %s12032_s8 }
 0x647   : > { %p12029_p11 = pnand %p12028_p2, %p15999_p10  ;;  %p12035_p13 = scmp.lt.s32.totalorder %s12033_s17, %s12027_s13 }
 0x649   : > { %p12030_p7 = pneg %p12029_p11  ;;  %p12036_p3 = por %p12035_p13, %p12034_p12 }
 0x64b   : > { %p12037_p5 = pnand %p12036_p3, %p12030_p7 }
 0x64d   : > { %12040 = shalt.err (!%p12037_p5)
}
 0x64e   : > { %s12041_s7 = scalar_lea.hbm %s15070_s26, 16  ;;  %s12045_s30 = scalar_lea.hbm %s15144_s5, 64 }
 0x64f   : > { %p12042_p0 = scmp.ne.s32.totalorder %s15070_s26, %s12041_s7  ;;  %p12046_p8 = scmp.lt.s32.totalorder %s15070_s26, %s15144_s5 }
 0x650   : > { %p12047_p9 = scmp.lt.s32.totalorder %s12045_s30, %s12041_s7 }
 0x651   : > { %p12043_p4 = pnand %p12042_p0, %p15999_p10 }
 0x652   : > { %p12048_p1 = por %p12047_p9, %p12046_p8 }
 0x653   : > { %p12044_p6 = pneg %p12043_p4 }
 0x655   : > { %p12049_p2 = pnand %p12048_p1, %p12044_p6 }
 0x657   : > { %12052 = shalt.err (!%p12049_p2)
}
 0x658   : > { %11747 = dma.vmem_to_hbm [thread:$0]  (%p15999_p10), %s15072_s27, 16, %s15070_s26, %s15074_s12  }
 0x659 PF: > { %p11777_p11 = scmp.ge.s32.totalorder %s12099_s21, 2  ;;  %s9550_s22 = sand.u32 1, %s12087_s18  }
 0x65a   : > { %p16000_p7 = scmp.ne.s32.totalorder %s15180_s25, 0  ;;  %s9551_s24 = scalar_lea.sflag [#allocation5], %s9550_s22 }
 0x65c   : > { %p11763_p12 = pnand %p11777_p11, %p16000_p7 }
 0x65e   : > { %p11764_p13 = pneg %p11763_p12 }
 0x660   : > { %12078 = dma.done.wait (%p11764_p13), %s9551_s24, 16384  }
 0x661   : > { %12080 = vsyncadd (%p11764_p13), %s9551_s24, 4294950912  ;;  %s9559_s11 = sand.u32 1, %s9680_s23  }
 0x662   : > { %s9560_s28 = scalar_lea.sflag [#allocation11], %s9559_s11 }
 0x663   : > { %12082 = dma.done.wait (%p11764_p13), %s9560_s28, 32  }
 0x664   : > { %12084 = vsyncadd (%p11764_p13), %s9560_s28, 4294967264  ;;  %p23_p10 = scmp.ge.s32.totalorder %s12217_s16, 6   ;;  %s16001_s18 = smov %s12091_s19 }
 0x665   : > { %s16002_s19 = smov %s12095_s20  ;;  %s16003_s20 = smov %s12233_s29 }
 0x666   : > { %s16004_s21 = smov %s12217_s16  ;;  %25 = sbr.rel (!%p23_p10) target bundleno = 8 (0x8), region = 127 }
 0x66b   :  { %9572 = vsyncpa [#allocation4], 1 }
 0x66c   :  { %9574 = vsyncpa [#allocation4 + $0x1], 1 }
 0x66d   :  { %9575 = vsyncpa [#allocation7], 1 }
 0x66e   :  { %9576 = vsyncpa [#allocation5], 1 }
 0x66f   :  { %9578 = vsyncpa [#allocation5 + $0x1], 1 }
 0x670   :  { %9579 = vsyncpa [#allocation11], 1 }
 0x671   :  { %9581 = vsyncpa [#allocation11 + $0x1], 1 }

</bundles_post_ra>
